<compile_context>
chip_gen: v7x
topology: tpu7x:2x2x1
jax: 0.10.0
libtpu: 0.0.40
codegen_flags: <defaults>
</compile_context>

<pallas_src>
import functools

import numpy as np
import jax
import jax.numpy as jnp
from jax import lax
from jax.experimental import pallas as pl
from jax.experimental.pallas import tpu as pltpu


_GN_EPS = 1e-5  # PyTorch GroupNorm default


def _round_up(v, m):
    return ((v + m - 1) // m) * m


def _gelu_tanh(x):
    # tanh-approximate GELU (one EUP tanh instead of an erf polynomial);
    # |err| vs the exact erf-GELU reference is ~1e-3.
    c = 0.7978845608028654  # sqrt(2/pi)
    return 0.5 * x * (1.0 + jnp.tanh(c * (x + 0.044715 * x * x * x)))


def _const_spec(shape):
    """BlockSpec for a grid-invariant input: constant index map, and (when
    supported) a single pipeline buffer so it is not double-buffered."""
    zeros = (0,) * len(shape)
    try:
        return pl.BlockSpec(shape, lambda *_: zeros,
                            pipeline_mode=pl.Buffered(1))
    except Exception:  # older jax without pipeline_mode: fall back cleanly
        return pl.BlockSpec(shape, lambda *_: zeros)


# ---------------------------------------------------------------------------
# Fused DoubleAdjConv:
#   conv3x3x3 -> GroupNorm(1) -> ReLU -> conv3x3x3 -> GroupNorm(1)
#   [-> gelu(x + out)]  [-> + Linear(SiLU(t))]
# one pallas_call, grid over the batch.
# ---------------------------------------------------------------------------
def _double_adj_conv_kernel(*refs, dims, cin, cmid, cout, cin_p, cmid_p,
                            residual, add_emb):
    if add_emb:
        (x_ref, hw_ref, w1_ref, g1_ref, b1_ref, w2_ref, g2_ref, b2_ref,
         t_ref, lw_ref, lb_ref, o_ref, flat_ref) = refs
    else:
        (x_ref, hw_ref, w1_ref, g1_ref, b1_ref, w2_ref, g2_ref, b2_ref,
         o_ref, flat_ref) = refs

    D, H, W, pad = dims
    M = D * H * W
    hw_sz = H * W

    # Zero the whole staging buffer every step: provides the depth halo for
    # free, keeps the K-padded channel rows finite (0-weight x NaN garbage
    # would still poison the MXU accumulation), and is safe when the
    # "parallel" batch axis is split across TensorCores (per-core scratch).
    flat_ref[...] = jnp.zeros(flat_ref.shape, flat_ref.dtype)

    # 9 combined (kh, kw) boundary masks, computed ONCE and reused for all
    # three kd values and for both convs (review: hoist out of the kd loop).
    hh = hw_ref[pl.ds(0, 1), :]                      # (1, M) int32
    ww = hw_ref[pl.ds(1, 1), :]                      # (1, M) int32
    h_ok = {0: hh >= 1, 1: None, 2: hh <= H - 2}
    w_ok = {0: ww >= 1, 1: None, 2: ww <= W - 2}
    masks = {}
    for kh in range(3):
        for kw in range(3):
            mk = h_ok[kh]
            if w_ok[kw] is not None:
                mk = w_ok[kw] if mk is None else (mk & w_ok[kw])
            masks[(kh, kw)] = mk

    def conv_gn(stage_src, c_src, c_src_p, w_ref, g_ref, b_ref, c_dst, relu):
        """'same' conv3x3x3 as 27 accumulated MXU dots + fused GroupNorm(1)."""
        # Stage the bf16 source at the centre of the flat buffer; the zeroed
        # halo provides the depth (d) padding for free.
        flat_ref[pl.ds(0, c_src), pl.ds(pad, M)] = stage_src.astype(
            flat_ref.dtype)
        acc = None
        tap = 0
        for kd in range(3):
            for kh in range(3):
                for kw in range(3):
                    off = (kd - 1) * hw_sz + (kh - 1) * W + (kw - 1)
                    patch = flat_ref[pl.ds(0, c_src_p), pl.ds(pad + off, M)]
                    mk = masks[(kh, kw)]
                    if mk is not None:
                        patch = jnp.where(mk, patch, jnp.zeros_like(patch))
                    wt = w_ref[:, pl.ds(tap * c_src_p, c_src_p)]
                    d = jnp.dot(wt, patch,
                                preferred_element_type=jnp.float32)
                    acc = d if acc is None else acc + d
                    tap += 1
        y = acc                                           # (c_dst, M) f32
        # GroupNorm(num_groups=1): one sweep for sum / sum-of-squares over all
        # C*D*H*W elements, then a single fused scale/shift (+ReLU) pass.
        cnt = float(c_dst * M)
        s1 = jnp.sum(y)
        s2 = jnp.sum(y * y)
        mean = s1 / cnt
        var = s2 / cnt - mean * mean
        scale = g_ref[...] * lax.rsqrt(var + _GN_EPS)     # (c_dst, 1)
        shift = b_ref[...] - mean * scale
        y = y * scale + shift
        if relu:
            y = jnp.maximum(y, 0.0)
        return y

    out = conv_gn(x_ref[0], cin, cin_p, w1_ref, g1_ref, b1_ref, cmid,
                  relu=True)
    out = conv_gn(out.astype(jnp.bfloat16), cmid, cmid_p, w2_ref, g2_ref,
                  b2_ref, cout, relu=False)

    if residual:
        # Re-read the VMEM-resident input only here (no f32 copy kept live
        # across both convs).
        out = _gelu_tanh(x_ref[0].astype(jnp.float32) + out)
    if add_emb:
        # Fused emb = Linear(SiLU(t)), broadcast over the spatial axis.
        tv = t_ref[0].astype(jnp.float32)                 # (tdim, 1)
        sv = tv * jax.nn.sigmoid(tv)                      # SiLU
        emb = jnp.dot(lw_ref[...], sv,
                      preferred_element_type=jnp.float32) + lb_ref[...]
        out = out + emb                                   # (cout, 1) bcast
    o_ref[0] = out.astype(o_ref.dtype)


def double_adj_conv(xf, p, dhw, residual, out_dtype, time_inputs=None):
    """Fused DoubleAdjConv on a (N, Cin, D*H*W) channels-first activation.

    If `time_inputs=(t, lin_w, lin_b)` is given, `Linear(SiLU(t))` is
    computed in-kernel and added to the output (review: no separate tiny
    pallas_call / HBM round trip for emb).
    """
    n, cin, m = xf.shape
    D, H, W = dhw
    assert m == D * H * W
    cmid = p["w1"].shape[-1]
    cout = p["w2"].shape[-1]
    if residual:
        assert cin == cout, "residual path needs Cin == Cout"

    # Channel (K) padding to 16 for bf16 sublane packing; padded weight
    # columns are zero so padded flat rows contribute nothing.
    cin_p = _round_up(cin, 16)
    cmid_p = _round_up(cmid, 16)
    c_stage = max(cin_p, cmid_p)

    def pack_w(w3, cs, cs_p, cd):
        # w3: (3, 3, 3, cs, cd)  ->  (cd, 27*cs_p) bf16, row order (kd,kh,kw,ci)
        w = w3.reshape(27, cs, cd)
        w = jnp.pad(w, ((0, 0), (0, cs_p - cs), (0, 0)))
        return jnp.transpose(w, (2, 0, 1)).reshape(
            cd, 27 * cs_p).astype(jnp.bfloat16)

    w1_2d = pack_w(p["w1"], cin, cin_p, cmid)
    w2_2d = pack_w(p["w2"], cmid, cmid_p, cout)

    # h / w components of the flattened spatial index (boundary masks).
    m_idx = np.arange(m, dtype=np.int32)
    hw_idx = jnp.asarray(np.stack([(m_idx // W) % H, m_idx % W]))   # (2, M)

    pad = _round_up(H * W + W + 1, 128)   # lane-aligned halo width

    in_specs = [
        pl.BlockSpec((1, cin, m), lambda i: (i, 0, 0)),
        _const_spec((2, m)),
        _const_spec((cmid, 27 * cin_p)),
        _const_spec((cmid, 1)),
        _const_spec((cmid, 1)),
        _const_spec((cout, 27 * cmid_p)),
        _const_spec((cout, 1)),
        _const_spec((cout, 1)),
    ]
    args = [xf, hw_idx, w1_2d, p["g1"], p["b1"], w2_2d, p["g2"], p["b2"]]

    add_emb = time_inputs is not None
    if add_emb:
        t, lin_w, lin_b = time_inputs
        tdim = t.shape[-1]
        in_specs += [
            pl.BlockSpec((1, tdim, 1), lambda i: (i, 0, 0)),
            _const_spec((cout, tdim)),
            _const_spec((cout, 1)),
        ]
        args += [t.reshape(n, tdim, 1).astype(jnp.float32),
                 lin_w.T.astype(jnp.float32),            # (cout, tdim)
                 lin_b.reshape(cout, 1).astype(jnp.float32)]

    flops = int(2 * 27 * m * n * (cin_p * cmid + cmid_p * cout))
    transcendentals = int(n * m * cout + n * (time_inputs[0].shape[-1]
                                              if add_emb else 0))
    bytes_accessed = int(xf.size * xf.dtype.itemsize
                         + n * cout * m * jnp.dtype(out_dtype).itemsize
                         + w1_2d.size * 2 + w2_2d.size * 2 + hw_idx.size * 4)

    kernel = functools.partial(_double_adj_conv_kernel,
                               dims=(D, H, W, pad), cin=cin, cmid=cmid,
                               cout=cout, cin_p=cin_p, cmid_p=cmid_p,
                               residual=residual, add_emb=add_emb)
    return pl.pallas_call(
        kernel,
        out_shape=jax.ShapeDtypeStruct((n, cout, m), out_dtype),
        grid=(n,),
        in_specs=in_specs,
        out_specs=pl.BlockSpec((1, cout, m), lambda i: (i, 0, 0)),
        scratch_shapes=[pltpu.VMEM((c_stage, m + 2 * pad), jnp.bfloat16)],
        compiler_params=pltpu.CompilerParams(
            dimension_semantics=("parallel",),
            vmem_limit_bytes=64 * 1024 * 1024),
        cost_estimate=pl.CostEstimate(flops=flops,
                                      transcendentals=transcendentals,
                                      bytes_accessed=bytes_accessed),
    )(*args)


# ---------------------------------------------------------------------------
# DownsampleBlock composition (NCDHW in / NCDHW out)
# ---------------------------------------------------------------------------
def downsample_block(x_ncdhw, t, params):
    n, c, d, h, w = x_ncdhw.shape
    # TODO(synk): PyTorch MaxPool3d(2) floors odd dims; only even dims here.
    assert d % 2 == 0 and h % 2 == 0 and w % 2 == 0, "even spatial dims only"
    d2, h2, w2 = d // 2, h // 2, w // 2
    m = d2 * h2 * w2

    # MaxPool3d(2): one XLA reshape+max (lane-dense as emitted by XLA; a
    # standalone Pallas pool kernel is ~98% padded tiles + masked stores).
    # TODO(synk): at production volumes fold the pool into dc1's staging loop
    # so the un-pooled activation never round-trips HBM.
    xp = jnp.max(x_ncdhw.reshape(n, c, d2, 2, h2, 2, w2, 2), axis=(3, 5, 7))
    xf = xp.reshape(n, c, m).astype(jnp.bfloat16)       # bf16 inter-kernel act

    xf = double_adj_conv(xf, params["dc1"], (d2, h2, w2), residual=True,
                         out_dtype=jnp.bfloat16)
    out = double_adj_conv(xf, params["dc2"], (d2, h2, w2), residual=False,
                          out_dtype=jnp.float32,
                          time_inputs=(t, params["lin_w"], params["lin_b"]))
    cout = out.shape[1]
    return out.reshape(n, cout, d2, h2, w2)             # NCDHW output


def init_params(key, in_channels, out_channels, time_embed_dim):
    ks = jax.random.split(key, 6)

    def conv_w(k, cin, cout):
        # stored as (3, 3, 3, Cin, Cout) == PyTorch weight.permute(2,3,4,1,0)
        fan_in = cin * 27
        return jax.random.normal(k, (3, 3, 3, cin, cout),
                                 jnp.float32) / jnp.sqrt(fan_in)

    def gn(c):
        return jnp.ones((c, 1), jnp.float32), jnp.zeros((c, 1), jnp.float32)

    g1a, b1a = gn(in_channels)
    g2a, b2a = gn(in_channels)
    dc1 = dict(w1=conv_w(ks[0], in_channels, in_channels), g1=g1a, b1=b1a,
               w2=conv_w(ks[1], in_channels, in_channels), g2=g2a, b2=b2a)

    g1b, b1b = gn(out_channels)
    g2b, b2b = gn(out_channels)
    dc2 = dict(w1=conv_w(ks[2], in_channels, out_channels), g1=g1b, b1=b1b,
               w2=conv_w(ks[3], out_channels, out_channels), g2=g2b, b2=b2b)

    lin_w = (jax.random.normal(ks[4], (time_embed_dim, out_channels),
                               jnp.float32) / jnp.sqrt(time_embed_dim))
    lin_b = jax.random.normal(ks[5], (out_channels,), jnp.float32) * 0.01
    return dict(dc1=dc1, dc2=dc2, lin_w=lin_w, lin_b=lin_b)


if __name__ == "__main__":
    key = jax.random.PRNGKey(0)
    k_x, k_t, k_p = jax.random.split(key, 3)

    N, C_IN, C_OUT = 2, 4, 8
    D = H = W = 8
    T_DIM = 32

    x = jax.random.normal(k_x, (N, C_IN, D, H, W), jnp.float32)
    t = jax.random.normal(k_t, (N, T_DIM), jnp.float32)
    params = init_params(k_p, C_IN, C_OUT, T_DIM)

    out = jax.jit(downsample_block)(x, t, params)
    out = jax.block_until_ready(out)

    assert out.shape == (N, C_OUT, D // 2, H // 2, W // 2), out.shape
    assert bool(jnp.all(jnp.isfinite(out)))
    print("KERNEL_OK")
</pallas_src>

<mosaic_0001>
module attributes {stable_mosaic.version = 11 : i64} {
  func.func @_double_adj_conv_kernel(%arg0: i32, %arg1: memref<1x4x64xbf16, #tpu.memory_space<vmem>>, %arg2: memref<2x64xi32, #tpu.memory_space<vmem>>, %arg3: memref<4x432xbf16, #tpu.memory_space<vmem>>, %arg4: memref<4x1xf32, #tpu.memory_space<vmem>>, %arg5: memref<4x1xf32, #tpu.memory_space<vmem>>, %arg6: memref<4x432xbf16, #tpu.memory_space<vmem>>, %arg7: memref<4x1xf32, #tpu.memory_space<vmem>>, %arg8: memref<4x1xf32, #tpu.memory_space<vmem>>, %arg9: memref<1x4x64xbf16, #tpu.memory_space<vmem>>, %arg10: memref<16x320xbf16, #tpu.memory_space<vmem>>) attributes {dimension_semantics = [#tpu.dimension_semantics<parallel>], iteration_bounds = array<i64: 2>, scalar_prefetch = 0 : i64, scratch_operands = 1 : i64, tpu.core_type = #tpu.core_type<tc>, window_params = [{transform_indices = @transform_0, window_bounds = array<i64: 1, 4, 64>}, {pipeline_mode = #tpu.pipeline_mode<synchronous>, transform_indices = @transform_1, window_bounds = array<i64: 2, 64>}, {pipeline_mode = #tpu.pipeline_mode<synchronous>, transform_indices = @transform_2, window_bounds = array<i64: 4, 432>}, {pipeline_mode = #tpu.pipeline_mode<synchronous>, transform_indices = @transform_3, window_bounds = array<i64: 4, 1>}, {pipeline_mode = #tpu.pipeline_mode<synchronous>, transform_indices = @transform_4, window_bounds = array<i64: 4, 1>}, {pipeline_mode = #tpu.pipeline_mode<synchronous>, transform_indices = @transform_5, window_bounds = array<i64: 4, 432>}, {pipeline_mode = #tpu.pipeline_mode<synchronous>, transform_indices = @transform_6, window_bounds = array<i64: 4, 1>}, {pipeline_mode = #tpu.pipeline_mode<synchronous>, transform_indices = @transform_7, window_bounds = array<i64: 4, 1>}, {transform_indices = @transform_8, window_bounds = array<i64: 1, 4, 64>}]} {
    %cst = arith.constant 0.000000e+00 : bf16
    %0 = vector.broadcast %cst : bf16 to vector<16x320xbf16>
    %c0 = arith.constant 0 : index
    %c0_0 = arith.constant 0 : index
    %1 = vector.load %arg10[%c0, %c0_0] : memref<16x320xbf16, #tpu.memory_space<vmem>>, vector<16x320xbf16>
    tpu.vector_store %arg10[%c0, %c0_0], %0 {strides = array<i32>} : memref<16x320xbf16, #tpu.memory_space<vmem>>, vector<16x320xbf16>,
    %c0_1 = arith.constant 0 : index
    %c0_2 = arith.constant 0 : index
    %2 = vector.load %arg2[%c0_1, %c0_2] : memref<2x64xi32, #tpu.memory_space<vmem>>, vector<1x64xi32>
    %c1 = arith.constant 1 : index
    %c0_3 = arith.constant 0 : index
    %3 = vector.load %arg2[%c1, %c0_3] : memref<2x64xi32, #tpu.memory_space<vmem>>, vector<1x64xi32>
    %c1_i32 = arith.constant 1 : i32
    %4 = vector.broadcast %c1_i32 : i32 to vector<1x64xi32>
    %5 = arith.cmpi sge, %2, %4 : vector<1x64xi32>
    %c2_i32 = arith.constant 2 : i32
    %6 = vector.broadcast %c2_i32 : i32 to vector<1x64xi32>
    %7 = arith.cmpi sle, %2, %6 : vector<1x64xi32>
    %c1_i32_4 = arith.constant 1 : i32
    %8 = vector.broadcast %c1_i32_4 : i32 to vector<1x64xi32>
    %9 = arith.cmpi sge, %3, %8 : vector<1x64xi32>
    %c2_i32_5 = arith.constant 2 : i32
    %10 = vector.broadcast %c2_i32_5 : i32 to vector<1x64xi32>
    %11 = arith.cmpi sle, %3, %10 : vector<1x64xi32>
    %12 = arith.andi %5, %9 : vector<1x64xi1>
    %13 = arith.andi %5, %11 : vector<1x64xi1>
    %14 = arith.andi %7, %9 : vector<1x64xi1>
    %15 = arith.andi %7, %11 : vector<1x64xi1>
    %c0_6 = arith.constant 0 : index
    %c0_7 = arith.constant 0 : index
    %c0_8 = arith.constant 0 : index
    %16 = vector.load %arg1[%c0_6, %c0_7, %c0_8] : memref<1x4x64xbf16, #tpu.memory_space<vmem>>, vector<1x4x64xbf16>
    %17 = vector.shape_cast %16 : vector<1x4x64xbf16> to vector<4x64xbf16>
    %c0_9 = arith.constant 0 : index
    %c128 = arith.constant 128 : index
    %18 = vector.load %arg10[%c0_9, %c128] : memref<16x320xbf16, #tpu.memory_space<vmem>>, vector<4x64xbf16>
    tpu.vector_store %arg10[%c0_9, %c128], %17 {strides = array<i32>} : memref<16x320xbf16, #tpu.memory_space<vmem>>, vector<4x64xbf16>,
    %c0_10 = arith.constant 0 : index
    %c107 = arith.constant 107 : index
    %19 = vector.load %arg10[%c0_10, %c107] : memref<16x320xbf16, #tpu.memory_space<vmem>>, vector<16x64xbf16>
    %cst_11 = arith.constant 0.000000e+00 : bf16
    %20 = vector.broadcast %cst_11 : bf16 to vector<16x64xbf16>
    %21 = vector.shape_cast %12 : vector<1x64xi1> to vector<1x64xi1>
    %22 = vector.broadcast %21 : vector<1x64xi1> to vector<16x64xi1>
    %23 = arith.select %22, %19, %20 : vector<16x64xi1>, vector<16x64xbf16>
    %c0_12 = arith.constant 0 : index
    %c0_13 = arith.constant 0 : index
    %24 = vector.load %arg3[%c0_12, %c0_13] : memref<4x432xbf16, #tpu.memory_space<vmem>>, vector<4x16xbf16>
    %cst_14 = arith.constant dense<0.000000e+00> : vector<4x64xf32>
    %25 = tpu.matmul %24, %23, %cst_14 {dimension_numbers = #tpu.dot_dimension_numbers<[1], [0], [0], [1], [0, 0, 1, 1], [], []>} : vector<4x16xbf16>, vector<16x64xbf16>, vector<4x64xf32> -> vector<4x64xf32>
    %c0_15 = arith.constant 0 : index
    %c108 = arith.constant 108 : index
    %26 = vector.load %arg10[%c0_15, %c108] : memref<16x320xbf16, #tpu.memory_space<vmem>>, vector<16x64xbf16>
    %cst_16 = arith.constant 0.000000e+00 : bf16
    %27 = vector.broadcast %cst_16 : bf16 to vector<16x64xbf16>
    %28 = vector.shape_cast %5 : vector<1x64xi1> to vector<1x64xi1>
    %29 = vector.broadcast %28 : vector<1x64xi1> to vector<16x64xi1>
    %30 = arith.select %29, %26, %27 : vector<16x64xi1>, vector<16x64xbf16>
    %c0_17 = arith.constant 0 : index
    %c16 = arith.constant 16 : index
    %31 = vector.load %arg3[%c0_17, %c16] : memref<4x432xbf16, #tpu.memory_space<vmem>>, vector<4x16xbf16>
    %cst_18 = arith.constant dense<0.000000e+00> : vector<4x64xf32>
    %32 = tpu.matmul %31, %30, %cst_18 {dimension_numbers = #tpu.dot_dimension_numbers<[1], [0], [0], [1], [0, 0, 1, 1], [], []>} : vector<4x16xbf16>, vector<16x64xbf16>, vector<4x64xf32> -> vector<4x64xf32>
    %33 = arith.addf %25, %32 : vector<4x64xf32>
    %c0_19 = arith.constant 0 : index
    %c109 = arith.constant 109 : index
    %34 = vector.load %arg10[%c0_19, %c109] : memref<16x320xbf16, #tpu.memory_space<vmem>>, vector<16x64xbf16>
    %cst_20 = arith.constant 0.000000e+00 : bf16
    %35 = vector.broadcast %cst_20 : bf16 to vector<16x64xbf16>
    %36 = vector.shape_cast %13 : vector<1x64xi1> to vector<1x64xi1>
    %37 = vector.broadcast %36 : vector<1x64xi1> to vector<16x64xi1>
    %38 = arith.select %37, %34, %35 : vector<16x64xi1>, vector<16x64xbf16>
    %c0_21 = arith.constant 0 : index
    %c32 = arith.constant 32 : index
    %39 = vector.load %arg3[%c0_21, %c32] : memref<4x432xbf16, #tpu.memory_space<vmem>>, vector<4x16xbf16>
    %cst_22 = arith.constant dense<0.000000e+00> : vector<4x64xf32>
    %40 = tpu.matmul %39, %38, %cst_22 {dimension_numbers = #tpu.dot_dimension_numbers<[1], [0], [0], [1], [0, 0, 1, 1], [], []>} : vector<4x16xbf16>, vector<16x64xbf16>, vector<4x64xf32> -> vector<4x64xf32>
    %41 = arith.addf %33, %40 : vector<4x64xf32>
    %c0_23 = arith.constant 0 : index
    %c111 = arith.constant 111 : index
    %42 = vector.load %arg10[%c0_23, %c111] : memref<16x320xbf16, #tpu.memory_space<vmem>>, vector<16x64xbf16>
    %cst_24 = arith.constant 0.000000e+00 : bf16
    %43 = vector.broadcast %cst_24 : bf16 to vector<16x64xbf16>
    %44 = vector.shape_cast %9 : vector<1x64xi1> to vector<1x64xi1>
    %45 = vector.broadcast %44 : vector<1x64xi1> to vector<16x64xi1>
    %46 = arith.select %45, %42, %43 : vector<16x64xi1>, vector<16x64xbf16>
    %c0_25 = arith.constant 0 : index
    %c48 = arith.constant 48 : index
    %47 = vector.load %arg3[%c0_25, %c48] : memref<4x432xbf16, #tpu.memory_space<vmem>>, vector<4x16xbf16>
    %cst_26 = arith.constant dense<0.000000e+00> : vector<4x64xf32>
    %48 = tpu.matmul %47, %46, %cst_26 {dimension_numbers = #tpu.dot_dimension_numbers<[1], [0], [0], [1], [0, 0, 1, 1], [], []>} : vector<4x16xbf16>, vector<16x64xbf16>, vector<4x64xf32> -> vector<4x64xf32>
    %49 = arith.addf %41, %48 : vector<4x64xf32>
    %c0_27 = arith.constant 0 : index
    %c112 = arith.constant 112 : index
    %50 = vector.load %arg10[%c0_27, %c112] : memref<16x320xbf16, #tpu.memory_space<vmem>>, vector<16x64xbf16>
    %c0_28 = arith.constant 0 : index
    %c64 = arith.constant 64 : index
    %51 = vector.load %arg3[%c0_28, %c64] : memref<4x432xbf16, #tpu.memory_space<vmem>>, vector<4x16xbf16>
    %cst_29 = arith.constant dense<0.000000e+00> : vector<4x64xf32>
    %52 = tpu.matmul %51, %50, %cst_29 {dimension_numbers = #tpu.dot_dimension_numbers<[1], [0], [0], [1], [0, 0, 1, 1], [], []>} : vector<4x16xbf16>, vector<16x64xbf16>, vector<4x64xf32> -> vector<4x64xf32>
    %53 = arith.addf %49, %52 : vector<4x64xf32>
    %c0_30 = arith.constant 0 : index
    %c113 = arith.constant 113 : index
    %54 = vector.load %arg10[%c0_30, %c113] : memref<16x320xbf16, #tpu.memory_space<vmem>>, vector<16x64xbf16>
    %cst_31 = arith.constant 0.000000e+00 : bf16
    %55 = vector.broadcast %cst_31 : bf16 to vector<16x64xbf16>
    %56 = vector.shape_cast %11 : vector<1x64xi1> to vector<1x64xi1>
    %57 = vector.broadcast %56 : vector<1x64xi1> to vector<16x64xi1>
    %58 = arith.select %57, %54, %55 : vector<16x64xi1>, vector<16x64xbf16>
    %c0_32 = arith.constant 0 : index
    %c80 = arith.constant 80 : index
    %59 = vector.load %arg3[%c0_32, %c80] : memref<4x432xbf16, #tpu.memory_space<vmem>>, vector<4x16xbf16>
    %cst_33 = arith.constant dense<0.000000e+00> : vector<4x64xf32>
    %60 = tpu.matmul %59, %58, %cst_33 {dimension_numbers = #tpu.dot_dimension_numbers<[1], [0], [0], [1], [0, 0, 1, 1], [], []>} : vector<4x16xbf16>, vector<16x64xbf16>, vector<4x64xf32> -> vector<4x64xf32>
    %61 = arith.addf %53, %60 : vector<4x64xf32>
    %c0_34 = arith.constant 0 : index
    %c115 = arith.constant 115 : index
    %62 = vector.load %arg10[%c0_34, %c115] : memref<16x320xbf16, #tpu.memory_space<vmem>>, vector<16x64xbf16>
    %cst_35 = arith.constant 0.000000e+00 : bf16
    %63 = vector.broadcast %cst_35 : bf16 to vector<16x64xbf16>
    %64 = vector.shape_cast %14 : vector<1x64xi1> to vector<1x64xi1>
    %65 = vector.broadcast %64 : vector<1x64xi1> to vector<16x64xi1>
    %66 = arith.select %65, %62, %63 : vector<16x64xi1>, vector<16x64xbf16>
    %c0_36 = arith.constant 0 : index
    %c96 = arith.constant 96 : index
    %67 = vector.load %arg3[%c0_36, %c96] : memref<4x432xbf16, #tpu.memory_space<vmem>>, vector<4x16xbf16>
    %cst_37 = arith.constant dense<0.000000e+00> : vector<4x64xf32>
    %68 = tpu.matmul %67, %66, %cst_37 {dimension_numbers = #tpu.dot_dimension_numbers<[1], [0], [0], [1], [0, 0, 1, 1], [], []>} : vector<4x16xbf16>, vector<16x64xbf16>, vector<4x64xf32> -> vector<4x64xf32>
    %69 = arith.addf %61, %68 : vector<4x64xf32>
    %c0_38 = arith.constant 0 : index
    %c116 = arith.constant 116 : index
    %70 = vector.load %arg10[%c0_38, %c116] : memref<16x320xbf16, #tpu.memory_space<vmem>>, vector<16x64xbf16>
    %cst_39 = arith.constant 0.000000e+00 : bf16
    %71 = vector.broadcast %cst_39 : bf16 to vector<16x64xbf16>
    %72 = vector.shape_cast %7 : vector<1x64xi1> to vector<1x64xi1>
    %73 = vector.broadcast %72 : vector<1x64xi1> to vector<16x64xi1>
    %74 = arith.select %73, %70, %71 : vector<16x64xi1>, vector<16x64xbf16>
    %c0_40 = arith.constant 0 : index
    %c112_41 = arith.constant 112 : index
    %75 = vector.load %arg3[%c0_40, %c112_41] : memref<4x432xbf16, #tpu.memory_space<vmem>>, vector<4x16xbf16>
    %cst_42 = arith.constant dense<0.000000e+00> : vector<4x64xf32>
    %76 = tpu.matmul %75, %74, %cst_42 {dimension_numbers = #tpu.dot_dimension_numbers<[1], [0], [0], [1], [0, 0, 1, 1], [], []>} : vector<4x16xbf16>, vector<16x64xbf16>, vector<4x64xf32> -> vector<4x64xf32>
    %77 = arith.addf %69, %76 : vector<4x64xf32>
    %c0_43 = arith.constant 0 : index
    %c117 = arith.constant 117 : index
    %78 = vector.load %arg10[%c0_43, %c117] : memref<16x320xbf16, #tpu.memory_space<vmem>>, vector<16x64xbf16>
    %cst_44 = arith.constant 0.000000e+00 : bf16
    %79 = vector.broadcast %cst_44 : bf16 to vector<16x64xbf16>
    %80 = vector.shape_cast %15 : vector<1x64xi1> to vector<1x64xi1>
    %81 = vector.broadcast %80 : vector<1x64xi1> to vector<16x64xi1>
    %82 = arith.select %81, %78, %79 : vector<16x64xi1>, vector<16x64xbf16>
    %c0_45 = arith.constant 0 : index
    %c128_46 = arith.constant 128 : index
    %83 = vector.load %arg3[%c0_45, %c128_46] : memref<4x432xbf16, #tpu.memory_space<vmem>>, vector<4x16xbf16>
    %cst_47 = arith.constant dense<0.000000e+00> : vector<4x64xf32>
    %84 = tpu.matmul %83, %82, %cst_47 {dimension_numbers = #tpu.dot_dimension_numbers<[1], [0], [0], [1], [0, 0, 1, 1], [], []>} : vector<4x16xbf16>, vector<16x64xbf16>, vector<4x64xf32> -> vector<4x64xf32>
    %85 = arith.addf %77, %84 : vector<4x64xf32>
    %c0_48 = arith.constant 0 : index
    %c123 = arith.constant 123 : index
    %86 = vector.load %arg10[%c0_48, %c123] : memref<16x320xbf16, #tpu.memory_space<vmem>>, vector<16x64xbf16>
    %cst_49 = arith.constant 0.000000e+00 : bf16
    %87 = vector.broadcast %cst_49 : bf16 to vector<16x64xbf16>
    %88 = vector.shape_cast %12 : vector<1x64xi1> to vector<1x64xi1>
    %89 = vector.broadcast %88 : vector<1x64xi1> to vector<16x64xi1>
    %90 = arith.select %89, %86, %87 : vector<16x64xi1>, vector<16x64xbf16>
    %c0_50 = arith.constant 0 : index
    %c144 = arith.constant 144 : index
    %91 = vector.load %arg3[%c0_50, %c144] : memref<4x432xbf16, #tpu.memory_space<vmem>>, vector<4x16xbf16>
    %cst_51 = arith.constant dense<0.000000e+00> : vector<4x64xf32>
    %92 = tpu.matmul %91, %90, %cst_51 {dimension_numbers = #tpu.dot_dimension_numbers<[1], [0], [0], [1], [0, 0, 1, 1], [], []>} : vector<4x16xbf16>, vector<16x64xbf16>, vector<4x64xf32> -> vector<4x64xf32>
    %93 = arith.addf %85, %92 : vector<4x64xf32>
    %c0_52 = arith.constant 0 : index
    %c124 = arith.constant 124 : index
    %94 = vector.load %arg10[%c0_52, %c124] : memref<16x320xbf16, #tpu.memory_space<vmem>>, vector<16x64xbf16>
    %cst_53 = arith.constant 0.000000e+00 : bf16
    %95 = vector.broadcast %cst_53 : bf16 to vector<16x64xbf16>
    %96 = vector.shape_cast %5 : vector<1x64xi1> to vector<1x64xi1>
    %97 = vector.broadcast %96 : vector<1x64xi1> to vector<16x64xi1>
    %98 = arith.select %97, %94, %95 : vector<16x64xi1>, vector<16x64xbf16>
    %c0_54 = arith.constant 0 : index
    %c160 = arith.constant 160 : index
    %99 = vector.load %arg3[%c0_54, %c160] : memref<4x432xbf16, #tpu.memory_space<vmem>>, vector<4x16xbf16>
    %cst_55 = arith.constant dense<0.000000e+00> : vector<4x64xf32>
    %100 = tpu.matmul %99, %98, %cst_55 {dimension_numbers = #tpu.dot_dimension_numbers<[1], [0], [0], [1], [0, 0, 1, 1], [], []>} : vector<4x16xbf16>, vector<16x64xbf16>, vector<4x64xf32> -> vector<4x64xf32>
    %101 = arith.addf %93, %100 : vector<4x64xf32>
    %c0_56 = arith.constant 0 : index
    %c125 = arith.constant 125 : index
    %102 = vector.load %arg10[%c0_56, %c125] : memref<16x320xbf16, #tpu.memory_space<vmem>>, vector<16x64xbf16>
    %cst_57 = arith.constant 0.000000e+00 : bf16
    %103 = vector.broadcast %cst_57 : bf16 to vector<16x64xbf16>
    %104 = vector.shape_cast %13 : vector<1x64xi1> to vector<1x64xi1>
    %105 = vector.broadcast %104 : vector<1x64xi1> to vector<16x64xi1>
    %106 = arith.select %105, %102, %103 : vector<16x64xi1>, vector<16x64xbf16>
    %c0_58 = arith.constant 0 : index
    %c176 = arith.constant 176 : index
    %107 = vector.load %arg3[%c0_58, %c176] : memref<4x432xbf16, #tpu.memory_space<vmem>>, vector<4x16xbf16>
    %cst_59 = arith.constant dense<0.000000e+00> : vector<4x64xf32>
    %108 = tpu.matmul %107, %106, %cst_59 {dimension_numbers = #tpu.dot_dimension_numbers<[1], [0], [0], [1], [0, 0, 1, 1], [], []>} : vector<4x16xbf16>, vector<16x64xbf16>, vector<4x64xf32> -> vector<4x64xf32>
    %109 = arith.addf %101, %108 : vector<4x64xf32>
    %c0_60 = arith.constant 0 : index
    %c127 = arith.constant 127 : index
    %110 = vector.load %arg10[%c0_60, %c127] : memref<16x320xbf16, #tpu.memory_space<vmem>>, vector<16x64xbf16>
    %cst_61 = arith.constant 0.000000e+00 : bf16
    %111 = vector.broadcast %cst_61 : bf16 to vector<16x64xbf16>
    %112 = vector.shape_cast %9 : vector<1x64xi1> to vector<1x64xi1>
    %113 = vector.broadcast %112 : vector<1x64xi1> to vector<16x64xi1>
    %114 = arith.select %113, %110, %111 : vector<16x64xi1>, vector<16x64xbf16>
    %c0_62 = arith.constant 0 : index
    %c192 = arith.constant 192 : index
    %115 = vector.load %arg3[%c0_62, %c192] : memref<4x432xbf16, #tpu.memory_space<vmem>>, vector<4x16xbf16>
    %cst_63 = arith.constant dense<0.000000e+00> : vector<4x64xf32>
    %116 = tpu.matmul %115, %114, %cst_63 {dimension_numbers = #tpu.dot_dimension_numbers<[1], [0], [0], [1], [0, 0, 1, 1], [], []>} : vector<4x16xbf16>, vector<16x64xbf16>, vector<4x64xf32> -> vector<4x64xf32>
    %117 = arith.addf %109, %116 : vector<4x64xf32>
    %c0_64 = arith.constant 0 : index
    %c128_65 = arith.constant 128 : index
    %118 = vector.load %arg10[%c0_64, %c128_65] : memref<16x320xbf16, #tpu.memory_space<vmem>>, vector<16x64xbf16>
    %c0_66 = arith.constant 0 : index
    %c208 = arith.constant 208 : index
    %119 = vector.load %arg3[%c0_66, %c208] : memref<4x432xbf16, #tpu.memory_space<vmem>>, vector<4x16xbf16>
    %cst_67 = arith.constant dense<0.000000e+00> : vector<4x64xf32>
    %120 = tpu.matmul %119, %118, %cst_67 {dimension_numbers = #tpu.dot_dimension_numbers<[1], [0], [0], [1], [0, 0, 1, 1], [], []>} : vector<4x16xbf16>, vector<16x64xbf16>, vector<4x64xf32> -> vector<4x64xf32>
    %121 = arith.addf %117, %120 : vector<4x64xf32>
    %c0_68 = arith.constant 0 : index
    %c129 = arith.constant 129 : index
    %122 = vector.load %arg10[%c0_68, %c129] : memref<16x320xbf16, #tpu.memory_space<vmem>>, vector<16x64xbf16>
    %cst_69 = arith.constant 0.000000e+00 : bf16
    %123 = vector.broadcast %cst_69 : bf16 to vector<16x64xbf16>
    %124 = vector.shape_cast %11 : vector<1x64xi1> to vector<1x64xi1>
    %125 = vector.broadcast %124 : vector<1x64xi1> to vector<16x64xi1>
    %126 = arith.select %125, %122, %123 : vector<16x64xi1>, vector<16x64xbf16>
    %c0_70 = arith.constant 0 : index
    %c224 = arith.constant 224 : index
    %127 = vector.load %arg3[%c0_70, %c224] : memref<4x432xbf16, #tpu.memory_space<vmem>>, vector<4x16xbf16>
    %cst_71 = arith.constant dense<0.000000e+00> : vector<4x64xf32>
    %128 = tpu.matmul %127, %126, %cst_71 {dimension_numbers = #tpu.dot_dimension_numbers<[1], [0], [0], [1], [0, 0, 1, 1], [], []>} : vector<4x16xbf16>, vector<16x64xbf16>, vector<4x64xf32> -> vector<4x64xf32>
    %129 = arith.addf %121, %128 : vector<4x64xf32>
    %c0_72 = arith.constant 0 : index
    %c131 = arith.constant 131 : index
    %130 = vector.load %arg10[%c0_72, %c131] : memref<16x320xbf16, #tpu.memory_space<vmem>>, vector<16x64xbf16>
    %cst_73 = arith.constant 0.000000e+00 : bf16
    %131 = vector.broadcast %cst_73 : bf16 to vector<16x64xbf16>
    %132 = vector.shape_cast %14 : vector<1x64xi1> to vector<1x64xi1>
    %133 = vector.broadcast %132 : vector<1x64xi1> to vector<16x64xi1>
    %134 = arith.select %133, %130, %131 : vector<16x64xi1>, vector<16x64xbf16>
    %c0_74 = arith.constant 0 : index
    %c240 = arith.constant 240 : index
    %135 = vector.load %arg3[%c0_74, %c240] : memref<4x432xbf16, #tpu.memory_space<vmem>>, vector<4x16xbf16>
    %cst_75 = arith.constant dense<0.000000e+00> : vector<4x64xf32>
    %136 = tpu.matmul %135, %134, %cst_75 {dimension_numbers = #tpu.dot_dimension_numbers<[1], [0], [0], [1], [0, 0, 1, 1], [], []>} : vector<4x16xbf16>, vector<16x64xbf16>, vector<4x64xf32> -> vector<4x64xf32>
    %137 = arith.addf %129, %136 : vector<4x64xf32>
    %c0_76 = arith.constant 0 : index
    %c132 = arith.constant 132 : index
    %138 = vector.load %arg10[%c0_76, %c132] : memref<16x320xbf16, #tpu.memory_space<vmem>>, vector<16x64xbf16>
    %cst_77 = arith.constant 0.000000e+00 : bf16
    %139 = vector.broadcast %cst_77 : bf16 to vector<16x64xbf16>
    %140 = vector.shape_cast %7 : vector<1x64xi1> to vector<1x64xi1>
    %141 = vector.broadcast %140 : vector<1x64xi1> to vector<16x64xi1>
    %142 = arith.select %141, %138, %139 : vector<16x64xi1>, vector<16x64xbf16>
    %c0_78 = arith.constant 0 : index
    %c256 = arith.constant 256 : index
    %143 = vector.load %arg3[%c0_78, %c256] : memref<4x432xbf16, #tpu.memory_space<vmem>>, vector<4x16xbf16>
    %cst_79 = arith.constant dense<0.000000e+00> : vector<4x64xf32>
    %144 = tpu.matmul %143, %142, %cst_79 {dimension_numbers = #tpu.dot_dimension_numbers<[1], [0], [0], [1], [0, 0, 1, 1], [], []>} : vector<4x16xbf16>, vector<16x64xbf16>, vector<4x64xf32> -> vector<4x64xf32>
    %145 = arith.addf %137, %144 : vector<4x64xf32>
    %c0_80 = arith.constant 0 : index
    %c133 = arith.constant 133 : index
    %146 = vector.load %arg10[%c0_80, %c133] : memref<16x320xbf16, #tpu.memory_space<vmem>>, vector<16x64xbf16>
    %cst_81 = arith.constant 0.000000e+00 : bf16
    %147 = vector.broadcast %cst_81 : bf16 to vector<16x64xbf16>
    %148 = vector.shape_cast %15 : vector<1x64xi1> to vector<1x64xi1>
    %149 = vector.broadcast %148 : vector<1x64xi1> to vector<16x64xi1>
    %150 = arith.select %149, %146, %147 : vector<16x64xi1>, vector<16x64xbf16>
    %c0_82 = arith.constant 0 : index
    %c272 = arith.constant 272 : index
    %151 = vector.load %arg3[%c0_82, %c272] : memref<4x432xbf16, #tpu.memory_space<vmem>>, vector<4x16xbf16>
    %cst_83 = arith.constant dense<0.000000e+00> : vector<4x64xf32>
    %152 = tpu.matmul %151, %150, %cst_83 {dimension_numbers = #tpu.dot_dimension_numbers<[1], [0], [0], [1], [0, 0, 1, 1], [], []>} : vector<4x16xbf16>, vector<16x64xbf16>, vector<4x64xf32> -> vector<4x64xf32>
    %153 = arith.addf %145, %152 : vector<4x64xf32>
    %c0_84 = arith.constant 0 : index
    %c139 = arith.constant 139 : index
    %154 = vector.load %arg10[%c0_84, %c139] : memref<16x320xbf16, #tpu.memory_space<vmem>>, vector<16x64xbf16>
    %cst_85 = arith.constant 0.000000e+00 : bf16
    %155 = vector.broadcast %cst_85 : bf16 to vector<16x64xbf16>
    %156 = vector.shape_cast %12 : vector<1x64xi1> to vector<1x64xi1>
    %157 = vector.broadcast %156 : vector<1x64xi1> to vector<16x64xi1>
    %158 = arith.select %157, %154, %155 : vector<16x64xi1>, vector<16x64xbf16>
    %c0_86 = arith.constant 0 : index
    %c288 = arith.constant 288 : index
    %159 = vector.load %arg3[%c0_86, %c288] : memref<4x432xbf16, #tpu.memory_space<vmem>>, vector<4x16xbf16>
    %cst_87 = arith.constant dense<0.000000e+00> : vector<4x64xf32>
    %160 = tpu.matmul %159, %158, %cst_87 {dimension_numbers = #tpu.dot_dimension_numbers<[1], [0], [0], [1], [0, 0, 1, 1], [], []>} : vector<4x16xbf16>, vector<16x64xbf16>, vector<4x64xf32> -> vector<4x64xf32>
    %161 = arith.addf %153, %160 : vector<4x64xf32>
    %c0_88 = arith.constant 0 : index
    %c140 = arith.constant 140 : index
    %162 = vector.load %arg10[%c0_88, %c140] : memref<16x320xbf16, #tpu.memory_space<vmem>>, vector<16x64xbf16>
    %cst_89 = arith.constant 0.000000e+00 : bf16
    %163 = vector.broadcast %cst_89 : bf16 to vector<16x64xbf16>
    %164 = vector.shape_cast %5 : vector<1x64xi1> to vector<1x64xi1>
    %165 = vector.broadcast %164 : vector<1x64xi1> to vector<16x64xi1>
    %166 = arith.select %165, %162, %163 : vector<16x64xi1>, vector<16x64xbf16>
    %c0_90 = arith.constant 0 : index
    %c304 = arith.constant 304 : index
    %167 = vector.load %arg3[%c0_90, %c304] : memref<4x432xbf16, #tpu.memory_space<vmem>>, vector<4x16xbf16>
    %cst_91 = arith.constant dense<0.000000e+00> : vector<4x64xf32>
    %168 = tpu.matmul %167, %166, %cst_91 {dimension_numbers = #tpu.dot_dimension_numbers<[1], [0], [0], [1], [0, 0, 1, 1], [], []>} : vector<4x16xbf16>, vector<16x64xbf16>, vector<4x64xf32> -> vector<4x64xf32>
    %169 = arith.addf %161, %168 : vector<4x64xf32>
    %c0_92 = arith.constant 0 : index
    %c141 = arith.constant 141 : index
    %170 = vector.load %arg10[%c0_92, %c141] : memref<16x320xbf16, #tpu.memory_space<vmem>>, vector<16x64xbf16>
    %cst_93 = arith.constant 0.000000e+00 : bf16
    %171 = vector.broadcast %cst_93 : bf16 to vector<16x64xbf16>
    %172 = vector.shape_cast %13 : vector<1x64xi1> to vector<1x64xi1>
    %173 = vector.broadcast %172 : vector<1x64xi1> to vector<16x64xi1>
    %174 = arith.select %173, %170, %171 : vector<16x64xi1>, vector<16x64xbf16>
    %c0_94 = arith.constant 0 : index
    %c320 = arith.constant 320 : index
    %175 = vector.load %arg3[%c0_94, %c320] : memref<4x432xbf16, #tpu.memory_space<vmem>>, vector<4x16xbf16>
    %cst_95 = arith.constant dense<0.000000e+00> : vector<4x64xf32>
    %176 = tpu.matmul %175, %174, %cst_95 {dimension_numbers = #tpu.dot_dimension_numbers<[1], [0], [0], [1], [0, 0, 1, 1], [], []>} : vector<4x16xbf16>, vector<16x64xbf16>, vector<4x64xf32> -> vector<4x64xf32>
    %177 = arith.addf %169, %176 : vector<4x64xf32>
    %c0_96 = arith.constant 0 : index
    %c143 = arith.constant 143 : index
    %178 = vector.load %arg10[%c0_96, %c143] : memref<16x320xbf16, #tpu.memory_space<vmem>>, vector<16x64xbf16>
    %cst_97 = arith.constant 0.000000e+00 : bf16
    %179 = vector.broadcast %cst_97 : bf16 to vector<16x64xbf16>
    %180 = vector.shape_cast %9 : vector<1x64xi1> to vector<1x64xi1>
    %181 = vector.broadcast %180 : vector<1x64xi1> to vector<16x64xi1>
    %182 = arith.select %181, %178, %179 : vector<16x64xi1>, vector<16x64xbf16>
    %c0_98 = arith.constant 0 : index
    %c336 = arith.constant 336 : index
    %183 = vector.load %arg3[%c0_98, %c336] : memref<4x432xbf16, #tpu.memory_space<vmem>>, vector<4x16xbf16>
    %cst_99 = arith.constant dense<0.000000e+00> : vector<4x64xf32>
    %184 = tpu.matmul %183, %182, %cst_99 {dimension_numbers = #tpu.dot_dimension_numbers<[1], [0], [0], [1], [0, 0, 1, 1], [], []>} : vector<4x16xbf16>, vector<16x64xbf16>, vector<4x64xf32> -> vector<4x64xf32>
    %185 = arith.addf %177, %184 : vector<4x64xf32>
    %c0_100 = arith.constant 0 : index
    %c144_101 = arith.constant 144 : index
    %186 = vector.load %arg10[%c0_100, %c144_101] : memref<16x320xbf16, #tpu.memory_space<vmem>>, vector<16x64xbf16>
    %c0_102 = arith.constant 0 : index
    %c352 = arith.constant 352 : index
    %187 = vector.load %arg3[%c0_102, %c352] : memref<4x432xbf16, #tpu.memory_space<vmem>>, vector<4x16xbf16>
    %cst_103 = arith.constant dense<0.000000e+00> : vector<4x64xf32>
    %188 = tpu.matmul %187, %186, %cst_103 {dimension_numbers = #tpu.dot_dimension_numbers<[1], [0], [0], [1], [0, 0, 1, 1], [], []>} : vector<4x16xbf16>, vector<16x64xbf16>, vector<4x64xf32> -> vector<4x64xf32>
    %189 = arith.addf %185, %188 : vector<4x64xf32>
    %c0_104 = arith.constant 0 : index
    %c145 = arith.constant 145 : index
    %190 = vector.load %arg10[%c0_104, %c145] : memref<16x320xbf16, #tpu.memory_space<vmem>>, vector<16x64xbf16>
    %cst_105 = arith.constant 0.000000e+00 : bf16
    %191 = vector.broadcast %cst_105 : bf16 to vector<16x64xbf16>
    %192 = vector.shape_cast %11 : vector<1x64xi1> to vector<1x64xi1>
    %193 = vector.broadcast %192 : vector<1x64xi1> to vector<16x64xi1>
    %194 = arith.select %193, %190, %191 : vector<16x64xi1>, vector<16x64xbf16>
    %c0_106 = arith.constant 0 : index
    %c368 = arith.constant 368 : index
    %195 = vector.load %arg3[%c0_106, %c368] : memref<4x432xbf16, #tpu.memory_space<vmem>>, vector<4x16xbf16>
    %cst_107 = arith.constant dense<0.000000e+00> : vector<4x64xf32>
    %196 = tpu.matmul %195, %194, %cst_107 {dimension_numbers = #tpu.dot_dimension_numbers<[1], [0], [0], [1], [0, 0, 1, 1], [], []>} : vector<4x16xbf16>, vector<16x64xbf16>, vector<4x64xf32> -> vector<4x64xf32>
    %197 = arith.addf %189, %196 : vector<4x64xf32>
    %c0_108 = arith.constant 0 : index
    %c147 = arith.constant 147 : index
    %198 = vector.load %arg10[%c0_108, %c147] : memref<16x320xbf16, #tpu.memory_space<vmem>>, vector<16x64xbf16>
    %cst_109 = arith.constant 0.000000e+00 : bf16
    %199 = vector.broadcast %cst_109 : bf16 to vector<16x64xbf16>
    %200 = vector.shape_cast %14 : vector<1x64xi1> to vector<1x64xi1>
    %201 = vector.broadcast %200 : vector<1x64xi1> to vector<16x64xi1>
    %202 = arith.select %201, %198, %199 : vector<16x64xi1>, vector<16x64xbf16>
    %c0_110 = arith.constant 0 : index
    %c384 = arith.constant 384 : index
    %203 = vector.load %arg3[%c0_110, %c384] : memref<4x432xbf16, #tpu.memory_space<vmem>>, vector<4x16xbf16>
    %cst_111 = arith.constant dense<0.000000e+00> : vector<4x64xf32>
    %204 = tpu.matmul %203, %202, %cst_111 {dimension_numbers = #tpu.dot_dimension_numbers<[1], [0], [0], [1], [0, 0, 1, 1], [], []>} : vector<4x16xbf16>, vector<16x64xbf16>, vector<4x64xf32> -> vector<4x64xf32>
    %205 = arith.addf %197, %204 : vector<4x64xf32>
    %c0_112 = arith.constant 0 : index
    %c148 = arith.constant 148 : index
    %206 = vector.load %arg10[%c0_112, %c148] : memref<16x320xbf16, #tpu.memory_space<vmem>>, vector<16x64xbf16>
    %cst_113 = arith.constant 0.000000e+00 : bf16
    %207 = vector.broadcast %cst_113 : bf16 to vector<16x64xbf16>
    %208 = vector.shape_cast %7 : vector<1x64xi1> to vector<1x64xi1>
    %209 = vector.broadcast %208 : vector<1x64xi1> to vector<16x64xi1>
    %210 = arith.select %209, %206, %207 : vector<16x64xi1>, vector<16x64xbf16>
    %c0_114 = arith.constant 0 : index
    %c400 = arith.constant 400 : index
    %211 = vector.load %arg3[%c0_114, %c400] : memref<4x432xbf16, #tpu.memory_space<vmem>>, vector<4x16xbf16>
    %cst_115 = arith.constant dense<0.000000e+00> : vector<4x64xf32>
    %212 = tpu.matmul %211, %210, %cst_115 {dimension_numbers = #tpu.dot_dimension_numbers<[1], [0], [0], [1], [0, 0, 1, 1], [], []>} : vector<4x16xbf16>, vector<16x64xbf16>, vector<4x64xf32> -> vector<4x64xf32>
    %213 = arith.addf %205, %212 : vector<4x64xf32>
    %c0_116 = arith.constant 0 : index
    %c149 = arith.constant 149 : index
    %214 = vector.load %arg10[%c0_116, %c149] : memref<16x320xbf16, #tpu.memory_space<vmem>>, vector<16x64xbf16>
    %cst_117 = arith.constant 0.000000e+00 : bf16
    %215 = vector.broadcast %cst_117 : bf16 to vector<16x64xbf16>
    %216 = vector.shape_cast %15 : vector<1x64xi1> to vector<1x64xi1>
    %217 = vector.broadcast %216 : vector<1x64xi1> to vector<16x64xi1>
    %218 = arith.select %217, %214, %215 : vector<16x64xi1>, vector<16x64xbf16>
    %c0_118 = arith.constant 0 : index
    %c416 = arith.constant 416 : index
    %219 = vector.load %arg3[%c0_118, %c416] : memref<4x432xbf16, #tpu.memory_space<vmem>>, vector<4x16xbf16>
    %cst_119 = arith.constant dense<0.000000e+00> : vector<4x64xf32>
    %220 = tpu.matmul %219, %218, %cst_119 {dimension_numbers = #tpu.dot_dimension_numbers<[1], [0], [0], [1], [0, 0, 1, 1], [], []>} : vector<4x16xbf16>, vector<16x64xbf16>, vector<4x64xf32> -> vector<4x64xf32>
    %221 = arith.addf %213, %220 : vector<4x64xf32>
    %222 = vector.shape_cast %221 : vector<4x64xf32> to vector<1x4x64xf32>
    %cst_120 = arith.constant dense<0.000000e+00> : vector<1xf32>
    %223 = vector.multi_reduction <add>, %222, %cst_120 [1, 2] : vector<1x4x64xf32> to vector<1xf32>
    %224 = vector.shape_cast %223 : vector<1xf32> to vector<1x1x1xf32>
    %225 = vector.extract %224[0, 0, 0] : f32 from vector<1x1x1xf32>
    %226 = arith.mulf %221, %221 : vector<4x64xf32>
    %227 = vector.shape_cast %226 : vector<4x64xf32> to vector<1x4x64xf32>
    %cst_121 = arith.constant dense<0.000000e+00> : vector<1xf32>
    %228 = vector.multi_reduction <add>, %227, %cst_121 [1, 2] : vector<1x4x64xf32> to vector<1xf32>
    %229 = vector.shape_cast %228 : vector<1xf32> to vector<1x1x1xf32>
    %230 = vector.extract %229[0, 0, 0] : f32 from vector<1x1x1xf32>
    %cst_122 = arith.constant 2.560000e+02 : f32
    %231 = arith.divf %225, %cst_122 : f32
    %cst_123 = arith.constant 2.560000e+02 : f32
    %232 = arith.divf %230, %cst_123 : f32
    %233 = arith.mulf %231, %231 : f32
    %234 = arith.subf %232, %233 : f32
    %c0_124 = arith.constant 0 : index
    %c0_125 = arith.constant 0 : index
    %235 = vector.load %arg4[%c0_124, %c0_125] : memref<4x1xf32, #tpu.memory_space<vmem>>, vector<4x1xf32>
    %cst_126 = arith.constant 9.99999974E-6 : f32
    %236 = arith.addf %234, %cst_126 : f32
    %237 = math.rsqrt %236 : f32
    %238 = vector.broadcast %237 : f32 to vector<4x1xf32>
    %239 = arith.mulf %235, %238 : vector<4x1xf32>
    %c0_127 = arith.constant 0 : index
    %c0_128 = arith.constant 0 : index
    %240 = vector.load %arg5[%c0_127, %c0_128] : memref<4x1xf32, #tpu.memory_space<vmem>>, vector<4x1xf32>
    %241 = vector.broadcast %231 : f32 to vector<4x1xf32>
    %242 = arith.mulf %241, %239 : vector<4x1xf32>
    %243 = arith.subf %240, %242 : vector<4x1xf32>
    %244 = vector.broadcast %239 : vector<4x1xf32> to vector<4x64xf32>
    %245 = arith.mulf %221, %244 : vector<4x64xf32>
    %246 = vector.broadcast %243 : vector<4x1xf32> to vector<4x64xf32>
    %247 = arith.addf %245, %246 : vector<4x64xf32>
    %cst_129 = arith.constant 0.000000e+00 : f32
    %248 = vector.broadcast %cst_129 : f32 to vector<4x64xf32>
    %249 = arith.maximumf %247, %248 : vector<4x64xf32>
    %250 = arith.truncf %249 : vector<4x64xf32> to vector<4x64xbf16>
    %c0_130 = arith.constant 0 : index
    %c128_131 = arith.constant 128 : index
    %251 = vector.load %arg10[%c0_130, %c128_131] : memref<16x320xbf16, #tpu.memory_space<vmem>>, vector<4x64xbf16>
    tpu.vector_store %arg10[%c0_130, %c128_131], %250 {strides = array<i32>} : memref<16x320xbf16, #tpu.memory_space<vmem>>, vector<4x64xbf16>,
    %c0_132 = arith.constant 0 : index
    %c107_133 = arith.constant 107 : index
    %252 = vector.load %arg10[%c0_132, %c107_133] : memref<16x320xbf16, #tpu.memory_space<vmem>>, vector<16x64xbf16>
    %cst_134 = arith.constant 0.000000e+00 : bf16
    %253 = vector.broadcast %cst_134 : bf16 to vector<16x64xbf16>
    %254 = vector.shape_cast %12 : vector<1x64xi1> to vector<1x64xi1>
    %255 = vector.broadcast %254 : vector<1x64xi1> to vector<16x64xi1>
    %256 = arith.select %255, %252, %253 : vector<16x64xi1>, vector<16x64xbf16>
    %c0_135 = arith.constant 0 : index
    %c0_136 = arith.constant 0 : index
    %257 = vector.load %arg6[%c0_135, %c0_136] : memref<4x432xbf16, #tpu.memory_space<vmem>>, vector<4x16xbf16>
    %cst_137 = arith.constant dense<0.000000e+00> : vector<4x64xf32>
    %258 = tpu.matmul %257, %256, %cst_137 {dimension_numbers = #tpu.dot_dimension_numbers<[1], [0], [0], [1], [0, 0, 1, 1], [], []>} : vector<4x16xbf16>, vector<16x64xbf16>, vector<4x64xf32> -> vector<4x64xf32>
    %c0_138 = arith.constant 0 : index
    %c108_139 = arith.constant 108 : index
    %259 = vector.load %arg10[%c0_138, %c108_139] : memref<16x320xbf16, #tpu.memory_space<vmem>>, vector<16x64xbf16>
    %cst_140 = arith.constant 0.000000e+00 : bf16
    %260 = vector.broadcast %cst_140 : bf16 to vector<16x64xbf16>
    %261 = vector.shape_cast %5 : vector<1x64xi1> to vector<1x64xi1>
    %262 = vector.broadcast %261 : vector<1x64xi1> to vector<16x64xi1>
    %263 = arith.select %262, %259, %260 : vector<16x64xi1>, vector<16x64xbf16>
    %c0_141 = arith.constant 0 : index
    %c16_142 = arith.constant 16 : index
    %264 = vector.load %arg6[%c0_141, %c16_142] : memref<4x432xbf16, #tpu.memory_space<vmem>>, vector<4x16xbf16>
    %cst_143 = arith.constant dense<0.000000e+00> : vector<4x64xf32>
    %265 = tpu.matmul %264, %263, %cst_143 {dimension_numbers = #tpu.dot_dimension_numbers<[1], [0], [0], [1], [0, 0, 1, 1], [], []>} : vector<4x16xbf16>, vector<16x64xbf16>, vector<4x64xf32> -> vector<4x64xf32>
    %266 = arith.addf %258, %265 : vector<4x64xf32>
    %c0_144 = arith.constant 0 : index
    %c109_145 = arith.constant 109 : index
    %267 = vector.load %arg10[%c0_144, %c109_145] : memref<16x320xbf16, #tpu.memory_space<vmem>>, vector<16x64xbf16>
    %cst_146 = arith.constant 0.000000e+00 : bf16
    %268 = vector.broadcast %cst_146 : bf16 to vector<16x64xbf16>
    %269 = vector.shape_cast %13 : vector<1x64xi1> to vector<1x64xi1>
    %270 = vector.broadcast %269 : vector<1x64xi1> to vector<16x64xi1>
    %271 = arith.select %270, %267, %268 : vector<16x64xi1>, vector<16x64xbf16>
    %c0_147 = arith.constant 0 : index
    %c32_148 = arith.constant 32 : index
    %272 = vector.load %arg6[%c0_147, %c32_148] : memref<4x432xbf16, #tpu.memory_space<vmem>>, vector<4x16xbf16>
    %cst_149 = arith.constant dense<0.000000e+00> : vector<4x64xf32>
    %273 = tpu.matmul %272, %271, %cst_149 {dimension_numbers = #tpu.dot_dimension_numbers<[1], [0], [0], [1], [0, 0, 1, 1], [], []>} : vector<4x16xbf16>, vector<16x64xbf16>, vector<4x64xf32> -> vector<4x64xf32>
    %274 = arith.addf %266, %273 : vector<4x64xf32>
    %c0_150 = arith.constant 0 : index
    %c111_151 = arith.constant 111 : index
    %275 = vector.load %arg10[%c0_150, %c111_151] : memref<16x320xbf16, #tpu.memory_space<vmem>>, vector<16x64xbf16>
    %cst_152 = arith.constant 0.000000e+00 : bf16
    %276 = vector.broadcast %cst_152 : bf16 to vector<16x64xbf16>
    %277 = vector.shape_cast %9 : vector<1x64xi1> to vector<1x64xi1>
    %278 = vector.broadcast %277 : vector<1x64xi1> to vector<16x64xi1>
    %279 = arith.select %278, %275, %276 : vector<16x64xi1>, vector<16x64xbf16>
    %c0_153 = arith.constant 0 : index
    %c48_154 = arith.constant 48 : index
    %280 = vector.load %arg6[%c0_153, %c48_154] : memref<4x432xbf16, #tpu.memory_space<vmem>>, vector<4x16xbf16>
    %cst_155 = arith.constant dense<0.000000e+00> : vector<4x64xf32>
    %281 = tpu.matmul %280, %279, %cst_155 {dimension_numbers = #tpu.dot_dimension_numbers<[1], [0], [0], [1], [0, 0, 1, 1], [], []>} : vector<4x16xbf16>, vector<16x64xbf16>, vector<4x64xf32> -> vector<4x64xf32>
    %282 = arith.addf %274, %281 : vector<4x64xf32>
    %c0_156 = arith.constant 0 : index
    %c112_157 = arith.constant 112 : index
    %283 = vector.load %arg10[%c0_156, %c112_157] : memref<16x320xbf16, #tpu.memory_space<vmem>>, vector<16x64xbf16>
    %c0_158 = arith.constant 0 : index
    %c64_159 = arith.constant 64 : index
    %284 = vector.load %arg6[%c0_158, %c64_159] : memref<4x432xbf16, #tpu.memory_space<vmem>>, vector<4x16xbf16>
    %cst_160 = arith.constant dense<0.000000e+00> : vector<4x64xf32>
    %285 = tpu.matmul %284, %283, %cst_160 {dimension_numbers = #tpu.dot_dimension_numbers<[1], [0], [0], [1], [0, 0, 1, 1], [], []>} : vector<4x16xbf16>, vector<16x64xbf16>, vector<4x64xf32> -> vector<4x64xf32>
    %286 = arith.addf %282, %285 : vector<4x64xf32>
    %c0_161 = arith.constant 0 : index
    %c113_162 = arith.constant 113 : index
    %287 = vector.load %arg10[%c0_161, %c113_162] : memref<16x320xbf16, #tpu.memory_space<vmem>>, vector<16x64xbf16>
    %cst_163 = arith.constant 0.000000e+00 : bf16
    %288 = vector.broadcast %cst_163 : bf16 to vector<16x64xbf16>
    %289 = vector.shape_cast %11 : vector<1x64xi1> to vector<1x64xi1>
    %290 = vector.broadcast %289 : vector<1x64xi1> to vector<16x64xi1>
    %291 = arith.select %290, %287, %288 : vector<16x64xi1>, vector<16x64xbf16>
    %c0_164 = arith.constant 0 : index
    %c80_165 = arith.constant 80 : index
    %292 = vector.load %arg6[%c0_164, %c80_165] : memref<4x432xbf16, #tpu.memory_space<vmem>>, vector<4x16xbf16>
    %cst_166 = arith.constant dense<0.000000e+00> : vector<4x64xf32>
    %293 = tpu.matmul %292, %291, %cst_166 {dimension_numbers = #tpu.dot_dimension_numbers<[1], [0], [0], [1], [0, 0, 1, 1], [], []>} : vector<4x16xbf16>, vector<16x64xbf16>, vector<4x64xf32> -> vector<4x64xf32>
    %294 = arith.addf %286, %293 : vector<4x64xf32>
    %c0_167 = arith.constant 0 : index
    %c115_168 = arith.constant 115 : index
    %295 = vector.load %arg10[%c0_167, %c115_168] : memref<16x320xbf16, #tpu.memory_space<vmem>>, vector<16x64xbf16>
    %cst_169 = arith.constant 0.000000e+00 : bf16
    %296 = vector.broadcast %cst_169 : bf16 to vector<16x64xbf16>
    %297 = vector.shape_cast %14 : vector<1x64xi1> to vector<1x64xi1>
    %298 = vector.broadcast %297 : vector<1x64xi1> to vector<16x64xi1>
    %299 = arith.select %298, %295, %296 : vector<16x64xi1>, vector<16x64xbf16>
    %c0_170 = arith.constant 0 : index
    %c96_171 = arith.constant 96 : index
    %300 = vector.load %arg6[%c0_170, %c96_171] : memref<4x432xbf16, #tpu.memory_space<vmem>>, vector<4x16xbf16>
    %cst_172 = arith.constant dense<0.000000e+00> : vector<4x64xf32>
    %301 = tpu.matmul %300, %299, %cst_172 {dimension_numbers = #tpu.dot_dimension_numbers<[1], [0], [0], [1], [0, 0, 1, 1], [], []>} : vector<4x16xbf16>, vector<16x64xbf16>, vector<4x64xf32> -> vector<4x64xf32>
    %302 = arith.addf %294, %301 : vector<4x64xf32>
    %c0_173 = arith.constant 0 : index
    %c116_174 = arith.constant 116 : index
    %303 = vector.load %arg10[%c0_173, %c116_174] : memref<16x320xbf16, #tpu.memory_space<vmem>>, vector<16x64xbf16>
    %cst_175 = arith.constant 0.000000e+00 : bf16
    %304 = vector.broadcast %cst_175 : bf16 to vector<16x64xbf16>
    %305 = vector.shape_cast %7 : vector<1x64xi1> to vector<1x64xi1>
    %306 = vector.broadcast %305 : vector<1x64xi1> to vector<16x64xi1>
    %307 = arith.select %306, %303, %304 : vector<16x64xi1>, vector<16x64xbf16>
    %c0_176 = arith.constant 0 : index
    %c112_177 = arith.constant 112 : index
    %308 = vector.load %arg6[%c0_176, %c112_177] : memref<4x432xbf16, #tpu.memory_space<vmem>>, vector<4x16xbf16>
    %cst_178 = arith.constant dense<0.000000e+00> : vector<4x64xf32>
    %309 = tpu.matmul %308, %307, %cst_178 {dimension_numbers = #tpu.dot_dimension_numbers<[1], [0], [0], [1], [0, 0, 1, 1], [], []>} : vector<4x16xbf16>, vector<16x64xbf16>, vector<4x64xf32> -> vector<4x64xf32>
    %310 = arith.addf %302, %309 : vector<4x64xf32>
    %c0_179 = arith.constant 0 : index
    %c117_180 = arith.constant 117 : index
    %311 = vector.load %arg10[%c0_179, %c117_180] : memref<16x320xbf16, #tpu.memory_space<vmem>>, vector<16x64xbf16>
    %cst_181 = arith.constant 0.000000e+00 : bf16
    %312 = vector.broadcast %cst_181 : bf16 to vector<16x64xbf16>
    %313 = vector.shape_cast %15 : vector<1x64xi1> to vector<1x64xi1>
    %314 = vector.broadcast %313 : vector<1x64xi1> to vector<16x64xi1>
    %315 = arith.select %314, %311, %312 : vector<16x64xi1>, vector<16x64xbf16>
    %c0_182 = arith.constant 0 : index
    %c128_183 = arith.constant 128 : index
    %316 = vector.load %arg6[%c0_182, %c128_183] : memref<4x432xbf16, #tpu.memory_space<vmem>>, vector<4x16xbf16>
    %cst_184 = arith.constant dense<0.000000e+00> : vector<4x64xf32>
    %317 = tpu.matmul %316, %315, %cst_184 {dimension_numbers = #tpu.dot_dimension_numbers<[1], [0], [0], [1], [0, 0, 1, 1], [], []>} : vector<4x16xbf16>, vector<16x64xbf16>, vector<4x64xf32> -> vector<4x64xf32>
    %318 = arith.addf %310, %317 : vector<4x64xf32>
    %c0_185 = arith.constant 0 : index
    %c123_186 = arith.constant 123 : index
    %319 = vector.load %arg10[%c0_185, %c123_186] : memref<16x320xbf16, #tpu.memory_space<vmem>>, vector<16x64xbf16>
    %cst_187 = arith.constant 0.000000e+00 : bf16
    %320 = vector.broadcast %cst_187 : bf16 to vector<16x64xbf16>
    %321 = vector.shape_cast %12 : vector<1x64xi1> to vector<1x64xi1>
    %322 = vector.broadcast %321 : vector<1x64xi1> to vector<16x64xi1>
    %323 = arith.select %322, %319, %320 : vector<16x64xi1>, vector<16x64xbf16>
    %c0_188 = arith.constant 0 : index
    %c144_189 = arith.constant 144 : index
    %324 = vector.load %arg6[%c0_188, %c144_189] : memref<4x432xbf16, #tpu.memory_space<vmem>>, vector<4x16xbf16>
    %cst_190 = arith.constant dense<0.000000e+00> : vector<4x64xf32>
    %325 = tpu.matmul %324, %323, %cst_190 {dimension_numbers = #tpu.dot_dimension_numbers<[1], [0], [0], [1], [0, 0, 1, 1], [], []>} : vector<4x16xbf16>, vector<16x64xbf16>, vector<4x64xf32> -> vector<4x64xf32>
    %326 = arith.addf %318, %325 : vector<4x64xf32>
    %c0_191 = arith.constant 0 : index
    %c124_192 = arith.constant 124 : index
    %327 = vector.load %arg10[%c0_191, %c124_192] : memref<16x320xbf16, #tpu.memory_space<vmem>>, vector<16x64xbf16>
    %cst_193 = arith.constant 0.000000e+00 : bf16
    %328 = vector.broadcast %cst_193 : bf16 to vector<16x64xbf16>
    %329 = vector.shape_cast %5 : vector<1x64xi1> to vector<1x64xi1>
    %330 = vector.broadcast %329 : vector<1x64xi1> to vector<16x64xi1>
    %331 = arith.select %330, %327, %328 : vector<16x64xi1>, vector<16x64xbf16>
    %c0_194 = arith.constant 0 : index
    %c160_195 = arith.constant 160 : index
    %332 = vector.load %arg6[%c0_194, %c160_195] : memref<4x432xbf16, #tpu.memory_space<vmem>>, vector<4x16xbf16>
    %cst_196 = arith.constant dense<0.000000e+00> : vector<4x64xf32>
    %333 = tpu.matmul %332, %331, %cst_196 {dimension_numbers = #tpu.dot_dimension_numbers<[1], [0], [0], [1], [0, 0, 1, 1], [], []>} : vector<4x16xbf16>, vector<16x64xbf16>, vector<4x64xf32> -> vector<4x64xf32>
    %334 = arith.addf %326, %333 : vector<4x64xf32>
    %c0_197 = arith.constant 0 : index
    %c125_198 = arith.constant 125 : index
    %335 = vector.load %arg10[%c0_197, %c125_198] : memref<16x320xbf16, #tpu.memory_space<vmem>>, vector<16x64xbf16>
    %cst_199 = arith.constant 0.000000e+00 : bf16
    %336 = vector.broadcast %cst_199 : bf16 to vector<16x64xbf16>
    %337 = vector.shape_cast %13 : vector<1x64xi1> to vector<1x64xi1>
    %338 = vector.broadcast %337 : vector<1x64xi1> to vector<16x64xi1>
    %339 = arith.select %338, %335, %336 : vector<16x64xi1>, vector<16x64xbf16>
    %c0_200 = arith.constant 0 : index
    %c176_201 = arith.constant 176 : index
    %340 = vector.load %arg6[%c0_200, %c176_201] : memref<4x432xbf16, #tpu.memory_space<vmem>>, vector<4x16xbf16>
    %cst_202 = arith.constant dense<0.000000e+00> : vector<4x64xf32>
    %341 = tpu.matmul %340, %339, %cst_202 {dimension_numbers = #tpu.dot_dimension_numbers<[1], [0], [0], [1], [0, 0, 1, 1], [], []>} : vector<4x16xbf16>, vector<16x64xbf16>, vector<4x64xf32> -> vector<4x64xf32>
    %342 = arith.addf %334, %341 : vector<4x64xf32>
    %c0_203 = arith.constant 0 : index
    %c127_204 = arith.constant 127 : index
    %343 = vector.load %arg10[%c0_203, %c127_204] : memref<16x320xbf16, #tpu.memory_space<vmem>>, vector<16x64xbf16>
    %cst_205 = arith.constant 0.000000e+00 : bf16
    %344 = vector.broadcast %cst_205 : bf16 to vector<16x64xbf16>
    %345 = vector.shape_cast %9 : vector<1x64xi1> to vector<1x64xi1>
    %346 = vector.broadcast %345 : vector<1x64xi1> to vector<16x64xi1>
    %347 = arith.select %346, %343, %344 : vector<16x64xi1>, vector<16x64xbf16>
    %c0_206 = arith.constant 0 : index
    %c192_207 = arith.constant 192 : index
    %348 = vector.load %arg6[%c0_206, %c192_207] : memref<4x432xbf16, #tpu.memory_space<vmem>>, vector<4x16xbf16>
    %cst_208 = arith.constant dense<0.000000e+00> : vector<4x64xf32>
    %349 = tpu.matmul %348, %347, %cst_208 {dimension_numbers = #tpu.dot_dimension_numbers<[1], [0], [0], [1], [0, 0, 1, 1], [], []>} : vector<4x16xbf16>, vector<16x64xbf16>, vector<4x64xf32> -> vector<4x64xf32>
    %350 = arith.addf %342, %349 : vector<4x64xf32>
    %c0_209 = arith.constant 0 : index
    %c128_210 = arith.constant 128 : index
    %351 = vector.load %arg10[%c0_209, %c128_210] : memref<16x320xbf16, #tpu.memory_space<vmem>>, vector<16x64xbf16>
    %c0_211 = arith.constant 0 : index
    %c208_212 = arith.constant 208 : index
    %352 = vector.load %arg6[%c0_211, %c208_212] : memref<4x432xbf16, #tpu.memory_space<vmem>>, vector<4x16xbf16>
    %cst_213 = arith.constant dense<0.000000e+00> : vector<4x64xf32>
    %353 = tpu.matmul %352, %351, %cst_213 {dimension_numbers = #tpu.dot_dimension_numbers<[1], [0], [0], [1], [0, 0, 1, 1], [], []>} : vector<4x16xbf16>, vector<16x64xbf16>, vector<4x64xf32> -> vector<4x64xf32>
    %354 = arith.addf %350, %353 : vector<4x64xf32>
    %c0_214 = arith.constant 0 : index
    %c129_215 = arith.constant 129 : index
    %355 = vector.load %arg10[%c0_214, %c129_215] : memref<16x320xbf16, #tpu.memory_space<vmem>>, vector<16x64xbf16>
    %cst_216 = arith.constant 0.000000e+00 : bf16
    %356 = vector.broadcast %cst_216 : bf16 to vector<16x64xbf16>
    %357 = vector.shape_cast %11 : vector<1x64xi1> to vector<1x64xi1>
    %358 = vector.broadcast %357 : vector<1x64xi1> to vector<16x64xi1>
    %359 = arith.select %358, %355, %356 : vector<16x64xi1>, vector<16x64xbf16>
    %c0_217 = arith.constant 0 : index
    %c224_218 = arith.constant 224 : index
    %360 = vector.load %arg6[%c0_217, %c224_218] : memref<4x432xbf16, #tpu.memory_space<vmem>>, vector<4x16xbf16>
    %cst_219 = arith.constant dense<0.000000e+00> : vector<4x64xf32>
    %361 = tpu.matmul %360, %359, %cst_219 {dimension_numbers = #tpu.dot_dimension_numbers<[1], [0], [0], [1], [0, 0, 1, 1], [], []>} : vector<4x16xbf16>, vector<16x64xbf16>, vector<4x64xf32> -> vector<4x64xf32>
    %362 = arith.addf %354, %361 : vector<4x64xf32>
    %c0_220 = arith.constant 0 : index
    %c131_221 = arith.constant 131 : index
    %363 = vector.load %arg10[%c0_220, %c131_221] : memref<16x320xbf16, #tpu.memory_space<vmem>>, vector<16x64xbf16>
    %cst_222 = arith.constant 0.000000e+00 : bf16
    %364 = vector.broadcast %cst_222 : bf16 to vector<16x64xbf16>
    %365 = vector.shape_cast %14 : vector<1x64xi1> to vector<1x64xi1>
    %366 = vector.broadcast %365 : vector<1x64xi1> to vector<16x64xi1>
    %367 = arith.select %366, %363, %364 : vector<16x64xi1>, vector<16x64xbf16>
    %c0_223 = arith.constant 0 : index
    %c240_224 = arith.constant 240 : index
    %368 = vector.load %arg6[%c0_223, %c240_224] : memref<4x432xbf16, #tpu.memory_space<vmem>>, vector<4x16xbf16>
    %cst_225 = arith.constant dense<0.000000e+00> : vector<4x64xf32>
    %369 = tpu.matmul %368, %367, %cst_225 {dimension_numbers = #tpu.dot_dimension_numbers<[1], [0], [0], [1], [0, 0, 1, 1], [], []>} : vector<4x16xbf16>, vector<16x64xbf16>, vector<4x64xf32> -> vector<4x64xf32>
    %370 = arith.addf %362, %369 : vector<4x64xf32>
    %c0_226 = arith.constant 0 : index
    %c132_227 = arith.constant 132 : index
    %371 = vector.load %arg10[%c0_226, %c132_227] : memref<16x320xbf16, #tpu.memory_space<vmem>>, vector<16x64xbf16>
    %cst_228 = arith.constant 0.000000e+00 : bf16
    %372 = vector.broadcast %cst_228 : bf16 to vector<16x64xbf16>
    %373 = vector.shape_cast %7 : vector<1x64xi1> to vector<1x64xi1>
    %374 = vector.broadcast %373 : vector<1x64xi1> to vector<16x64xi1>
    %375 = arith.select %374, %371, %372 : vector<16x64xi1>, vector<16x64xbf16>
    %c0_229 = arith.constant 0 : index
    %c256_230 = arith.constant 256 : index
    %376 = vector.load %arg6[%c0_229, %c256_230] : memref<4x432xbf16, #tpu.memory_space<vmem>>, vector<4x16xbf16>
    %cst_231 = arith.constant dense<0.000000e+00> : vector<4x64xf32>
    %377 = tpu.matmul %376, %375, %cst_231 {dimension_numbers = #tpu.dot_dimension_numbers<[1], [0], [0], [1], [0, 0, 1, 1], [], []>} : vector<4x16xbf16>, vector<16x64xbf16>, vector<4x64xf32> -> vector<4x64xf32>
    %378 = arith.addf %370, %377 : vector<4x64xf32>
    %c0_232 = arith.constant 0 : index
    %c133_233 = arith.constant 133 : index
    %379 = vector.load %arg10[%c0_232, %c133_233] : memref<16x320xbf16, #tpu.memory_space<vmem>>, vector<16x64xbf16>
    %cst_234 = arith.constant 0.000000e+00 : bf16
    %380 = vector.broadcast %cst_234 : bf16 to vector<16x64xbf16>
    %381 = vector.shape_cast %15 : vector<1x64xi1> to vector<1x64xi1>
    %382 = vector.broadcast %381 : vector<1x64xi1> to vector<16x64xi1>
    %383 = arith.select %382, %379, %380 : vector<16x64xi1>, vector<16x64xbf16>
    %c0_235 = arith.constant 0 : index
    %c272_236 = arith.constant 272 : index
    %384 = vector.load %arg6[%c0_235, %c272_236] : memref<4x432xbf16, #tpu.memory_space<vmem>>, vector<4x16xbf16>
    %cst_237 = arith.constant dense<0.000000e+00> : vector<4x64xf32>
    %385 = tpu.matmul %384, %383, %cst_237 {dimension_numbers = #tpu.dot_dimension_numbers<[1], [0], [0], [1], [0, 0, 1, 1], [], []>} : vector<4x16xbf16>, vector<16x64xbf16>, vector<4x64xf32> -> vector<4x64xf32>
    %386 = arith.addf %378, %385 : vector<4x64xf32>
    %c0_238 = arith.constant 0 : index
    %c139_239 = arith.constant 139 : index
    %387 = vector.load %arg10[%c0_238, %c139_239] : memref<16x320xbf16, #tpu.memory_space<vmem>>, vector<16x64xbf16>
    %cst_240 = arith.constant 0.000000e+00 : bf16
    %388 = vector.broadcast %cst_240 : bf16 to vector<16x64xbf16>
    %389 = vector.shape_cast %12 : vector<1x64xi1> to vector<1x64xi1>
    %390 = vector.broadcast %389 : vector<1x64xi1> to vector<16x64xi1>
    %391 = arith.select %390, %387, %388 : vector<16x64xi1>, vector<16x64xbf16>
    %c0_241 = arith.constant 0 : index
    %c288_242 = arith.constant 288 : index
    %392 = vector.load %arg6[%c0_241, %c288_242] : memref<4x432xbf16, #tpu.memory_space<vmem>>, vector<4x16xbf16>
    %cst_243 = arith.constant dense<0.000000e+00> : vector<4x64xf32>
    %393 = tpu.matmul %392, %391, %cst_243 {dimension_numbers = #tpu.dot_dimension_numbers<[1], [0], [0], [1], [0, 0, 1, 1], [], []>} : vector<4x16xbf16>, vector<16x64xbf16>, vector<4x64xf32> -> vector<4x64xf32>
    %394 = arith.addf %386, %393 : vector<4x64xf32>
    %c0_244 = arith.constant 0 : index
    %c140_245 = arith.constant 140 : index
    %395 = vector.load %arg10[%c0_244, %c140_245] : memref<16x320xbf16, #tpu.memory_space<vmem>>, vector<16x64xbf16>
    %cst_246 = arith.constant 0.000000e+00 : bf16
    %396 = vector.broadcast %cst_246 : bf16 to vector<16x64xbf16>
    %397 = vector.shape_cast %5 : vector<1x64xi1> to vector<1x64xi1>
    %398 = vector.broadcast %397 : vector<1x64xi1> to vector<16x64xi1>
    %399 = arith.select %398, %395, %396 : vector<16x64xi1>, vector<16x64xbf16>
    %c0_247 = arith.constant 0 : index
    %c304_248 = arith.constant 304 : index
    %400 = vector.load %arg6[%c0_247, %c304_248] : memref<4x432xbf16, #tpu.memory_space<vmem>>, vector<4x16xbf16>
    %cst_249 = arith.constant dense<0.000000e+00> : vector<4x64xf32>
    %401 = tpu.matmul %400, %399, %cst_249 {dimension_numbers = #tpu.dot_dimension_numbers<[1], [0], [0], [1], [0, 0, 1, 1], [], []>} : vector<4x16xbf16>, vector<16x64xbf16>, vector<4x64xf32> -> vector<4x64xf32>
    %402 = arith.addf %394, %401 : vector<4x64xf32>
    %c0_250 = arith.constant 0 : index
    %c141_251 = arith.constant 141 : index
    %403 = vector.load %arg10[%c0_250, %c141_251] : memref<16x320xbf16, #tpu.memory_space<vmem>>, vector<16x64xbf16>
    %cst_252 = arith.constant 0.000000e+00 : bf16
    %404 = vector.broadcast %cst_252 : bf16 to vector<16x64xbf16>
    %405 = vector.shape_cast %13 : vector<1x64xi1> to vector<1x64xi1>
    %406 = vector.broadcast %405 : vector<1x64xi1> to vector<16x64xi1>
    %407 = arith.select %406, %403, %404 : vector<16x64xi1>, vector<16x64xbf16>
    %c0_253 = arith.constant 0 : index
    %c320_254 = arith.constant 320 : index
    %408 = vector.load %arg6[%c0_253, %c320_254] : memref<4x432xbf16, #tpu.memory_space<vmem>>, vector<4x16xbf16>
    %cst_255 = arith.constant dense<0.000000e+00> : vector<4x64xf32>
    %409 = tpu.matmul %408, %407, %cst_255 {dimension_numbers = #tpu.dot_dimension_numbers<[1], [0], [0], [1], [0, 0, 1, 1], [], []>} : vector<4x16xbf16>, vector<16x64xbf16>, vector<4x64xf32> -> vector<4x64xf32>
    %410 = arith.addf %402, %409 : vector<4x64xf32>
    %c0_256 = arith.constant 0 : index
    %c143_257 = arith.constant 143 : index
    %411 = vector.load %arg10[%c0_256, %c143_257] : memref<16x320xbf16, #tpu.memory_space<vmem>>, vector<16x64xbf16>
    %cst_258 = arith.constant 0.000000e+00 : bf16
    %412 = vector.broadcast %cst_258 : bf16 to vector<16x64xbf16>
    %413 = vector.shape_cast %9 : vector<1x64xi1> to vector<1x64xi1>
    %414 = vector.broadcast %413 : vector<1x64xi1> to vector<16x64xi1>
    %415 = arith.select %414, %411, %412 : vector<16x64xi1>, vector<16x64xbf16>
    %c0_259 = arith.constant 0 : index
    %c336_260 = arith.constant 336 : index
    %416 = vector.load %arg6[%c0_259, %c336_260] : memref<4x432xbf16, #tpu.memory_space<vmem>>, vector<4x16xbf16>
    %cst_261 = arith.constant dense<0.000000e+00> : vector<4x64xf32>
    %417 = tpu.matmul %416, %415, %cst_261 {dimension_numbers = #tpu.dot_dimension_numbers<[1], [0], [0], [1], [0, 0, 1, 1], [], []>} : vector<4x16xbf16>, vector<16x64xbf16>, vector<4x64xf32> -> vector<4x64xf32>
    %418 = arith.addf %410, %417 : vector<4x64xf32>
    %c0_262 = arith.constant 0 : index
    %c144_263 = arith.constant 144 : index
    %419 = vector.load %arg10[%c0_262, %c144_263] : memref<16x320xbf16, #tpu.memory_space<vmem>>, vector<16x64xbf16>
    %c0_264 = arith.constant 0 : index
    %c352_265 = arith.constant 352 : index
    %420 = vector.load %arg6[%c0_264, %c352_265] : memref<4x432xbf16, #tpu.memory_space<vmem>>, vector<4x16xbf16>
    %cst_266 = arith.constant dense<0.000000e+00> : vector<4x64xf32>
    %421 = tpu.matmul %420, %419, %cst_266 {dimension_numbers = #tpu.dot_dimension_numbers<[1], [0], [0], [1], [0, 0, 1, 1], [], []>} : vector<4x16xbf16>, vector<16x64xbf16>, vector<4x64xf32> -> vector<4x64xf32>
    %422 = arith.addf %418, %421 : vector<4x64xf32>
    %c0_267 = arith.constant 0 : index
    %c145_268 = arith.constant 145 : index
    %423 = vector.load %arg10[%c0_267, %c145_268] : memref<16x320xbf16, #tpu.memory_space<vmem>>, vector<16x64xbf16>
    %cst_269 = arith.constant 0.000000e+00 : bf16
    %424 = vector.broadcast %cst_269 : bf16 to vector<16x64xbf16>
    %425 = vector.shape_cast %11 : vector<1x64xi1> to vector<1x64xi1>
    %426 = vector.broadcast %425 : vector<1x64xi1> to vector<16x64xi1>
    %427 = arith.select %426, %423, %424 : vector<16x64xi1>, vector<16x64xbf16>
    %c0_270 = arith.constant 0 : index
    %c368_271 = arith.constant 368 : index
    %428 = vector.load %arg6[%c0_270, %c368_271] : memref<4x432xbf16, #tpu.memory_space<vmem>>, vector<4x16xbf16>
    %cst_272 = arith.constant dense<0.000000e+00> : vector<4x64xf32>
    %429 = tpu.matmul %428, %427, %cst_272 {dimension_numbers = #tpu.dot_dimension_numbers<[1], [0], [0], [1], [0, 0, 1, 1], [], []>} : vector<4x16xbf16>, vector<16x64xbf16>, vector<4x64xf32> -> vector<4x64xf32>
    %430 = arith.addf %422, %429 : vector<4x64xf32>
    %c0_273 = arith.constant 0 : index
    %c147_274 = arith.constant 147 : index
    %431 = vector.load %arg10[%c0_273, %c147_274] : memref<16x320xbf16, #tpu.memory_space<vmem>>, vector<16x64xbf16>
    %cst_275 = arith.constant 0.000000e+00 : bf16
    %432 = vector.broadcast %cst_275 : bf16 to vector<16x64xbf16>
    %433 = vector.shape_cast %14 : vector<1x64xi1> to vector<1x64xi1>
    %434 = vector.broadcast %433 : vector<1x64xi1> to vector<16x64xi1>
    %435 = arith.select %434, %431, %432 : vector<16x64xi1>, vector<16x64xbf16>
    %c0_276 = arith.constant 0 : index
    %c384_277 = arith.constant 384 : index
    %436 = vector.load %arg6[%c0_276, %c384_277] : memref<4x432xbf16, #tpu.memory_space<vmem>>, vector<4x16xbf16>
    %cst_278 = arith.constant dense<0.000000e+00> : vector<4x64xf32>
    %437 = tpu.matmul %436, %435, %cst_278 {dimension_numbers = #tpu.dot_dimension_numbers<[1], [0], [0], [1], [0, 0, 1, 1], [], []>} : vector<4x16xbf16>, vector<16x64xbf16>, vector<4x64xf32> -> vector<4x64xf32>
    %438 = arith.addf %430, %437 : vector<4x64xf32>
    %c0_279 = arith.constant 0 : index
    %c148_280 = arith.constant 148 : index
    %439 = vector.load %arg10[%c0_279, %c148_280] : memref<16x320xbf16, #tpu.memory_space<vmem>>, vector<16x64xbf16>
    %cst_281 = arith.constant 0.000000e+00 : bf16
    %440 = vector.broadcast %cst_281 : bf16 to vector<16x64xbf16>
    %441 = vector.shape_cast %7 : vector<1x64xi1> to vector<1x64xi1>
    %442 = vector.broadcast %441 : vector<1x64xi1> to vector<16x64xi1>
    %443 = arith.select %442, %439, %440 : vector<16x64xi1>, vector<16x64xbf16>
    %c0_282 = arith.constant 0 : index
    %c400_283 = arith.constant 400 : index
    %444 = vector.load %arg6[%c0_282, %c400_283] : memref<4x432xbf16, #tpu.memory_space<vmem>>, vector<4x16xbf16>
    %cst_284 = arith.constant dense<0.000000e+00> : vector<4x64xf32>
    %445 = tpu.matmul %444, %443, %cst_284 {dimension_numbers = #tpu.dot_dimension_numbers<[1], [0], [0], [1], [0, 0, 1, 1], [], []>} : vector<4x16xbf16>, vector<16x64xbf16>, vector<4x64xf32> -> vector<4x64xf32>
    %446 = arith.addf %438, %445 : vector<4x64xf32>
    %c0_285 = arith.constant 0 : index
    %c149_286 = arith.constant 149 : index
    %447 = vector.load %arg10[%c0_285, %c149_286] : memref<16x320xbf16, #tpu.memory_space<vmem>>, vector<16x64xbf16>
    %cst_287 = arith.constant 0.000000e+00 : bf16
    %448 = vector.broadcast %cst_287 : bf16 to vector<16x64xbf16>
    %449 = vector.shape_cast %15 : vector<1x64xi1> to vector<1x64xi1>
    %450 = vector.broadcast %449 : vector<1x64xi1> to vector<16x64xi1>
    %451 = arith.select %450, %447, %448 : vector<16x64xi1>, vector<16x64xbf16>
    %c0_288 = arith.constant 0 : index
    %c416_289 = arith.constant 416 : index
    %452 = vector.load %arg6[%c0_288, %c416_289] : memref<4x432xbf16, #tpu.memory_space<vmem>>, vector<4x16xbf16>
    %cst_290 = arith.constant dense<0.000000e+00> : vector<4x64xf32>
    %453 = tpu.matmul %452, %451, %cst_290 {dimension_numbers = #tpu.dot_dimension_numbers<[1], [0], [0], [1], [0, 0, 1, 1], [], []>} : vector<4x16xbf16>, vector<16x64xbf16>, vector<4x64xf32> -> vector<4x64xf32>
    %454 = arith.addf %446, %453 : vector<4x64xf32>
    %455 = vector.shape_cast %454 : vector<4x64xf32> to vector<1x4x64xf32>
    %cst_291 = arith.constant dense<0.000000e+00> : vector<1xf32>
    %456 = vector.multi_reduction <add>, %455, %cst_291 [1, 2] : vector<1x4x64xf32> to vector<1xf32>
    %457 = vector.shape_cast %456 : vector<1xf32> to vector<1x1x1xf32>
    %458 = vector.extract %457[0, 0, 0] : f32 from vector<1x1x1xf32>
    %459 = arith.mulf %454, %454 : vector<4x64xf32>
    %460 = vector.shape_cast %459 : vector<4x64xf32> to vector<1x4x64xf32>
    %cst_292 = arith.constant dense<0.000000e+00> : vector<1xf32>
    %461 = vector.multi_reduction <add>, %460, %cst_292 [1, 2] : vector<1x4x64xf32> to vector<1xf32>
    %462 = vector.shape_cast %461 : vector<1xf32> to vector<1x1x1xf32>
    %463 = vector.extract %462[0, 0, 0] : f32 from vector<1x1x1xf32>
    %cst_293 = arith.constant 2.560000e+02 : f32
    %464 = arith.divf %458, %cst_293 : f32
    %cst_294 = arith.constant 2.560000e+02 : f32
    %465 = arith.divf %463, %cst_294 : f32
    %466 = arith.mulf %464, %464 : f32
    %467 = arith.subf %465, %466 : f32
    %c0_295 = arith.constant 0 : index
    %c0_296 = arith.constant 0 : index
    %468 = vector.load %arg7[%c0_295, %c0_296] : memref<4x1xf32, #tpu.memory_space<vmem>>, vector<4x1xf32>
    %cst_297 = arith.constant 9.99999974E-6 : f32
    %469 = arith.addf %467, %cst_297 : f32
    %470 = math.rsqrt %469 : f32
    %471 = vector.broadcast %470 : f32 to vector<4x1xf32>
    %472 = arith.mulf %468, %471 : vector<4x1xf32>
    %c0_298 = arith.constant 0 : index
    %c0_299 = arith.constant 0 : index
    %473 = vector.load %arg8[%c0_298, %c0_299] : memref<4x1xf32, #tpu.memory_space<vmem>>, vector<4x1xf32>
    %474 = vector.broadcast %464 : f32 to vector<4x1xf32>
    %475 = arith.mulf %474, %472 : vector<4x1xf32>
    %476 = arith.subf %473, %475 : vector<4x1xf32>
    %477 = vector.broadcast %472 : vector<4x1xf32> to vector<4x64xf32>
    %478 = arith.mulf %454, %477 : vector<4x64xf32>
    %479 = vector.broadcast %476 : vector<4x1xf32> to vector<4x64xf32>
    %480 = arith.addf %478, %479 : vector<4x64xf32>
    %c0_300 = arith.constant 0 : index
    %c0_301 = arith.constant 0 : index
    %c0_302 = arith.constant 0 : index
    %481 = vector.load %arg1[%c0_300, %c0_301, %c0_302] : memref<1x4x64xbf16, #tpu.memory_space<vmem>>, vector<1x4x64xbf16>
    %482 = vector.shape_cast %481 : vector<1x4x64xbf16> to vector<4x64xbf16>
    %483 = arith.extf %482 : vector<4x64xbf16> to vector<4x64xf32>
    %484 = arith.addf %483, %480 : vector<4x64xf32>
    %cst_303 = arith.constant 5.000000e-01 : f32
    %485 = vector.broadcast %cst_303 : f32 to vector<4x64xf32>
    %486 = arith.mulf %485, %484 : vector<4x64xf32>
    %cst_304 = arith.constant 4.471500e-02 : f32
    %487 = vector.broadcast %cst_304 : f32 to vector<4x64xf32>
    %488 = arith.mulf %487, %484 : vector<4x64xf32>
    %489 = arith.mulf %488, %484 : vector<4x64xf32>
    %490 = arith.mulf %489, %484 : vector<4x64xf32>
    %491 = arith.addf %484, %490 : vector<4x64xf32>
    %cst_305 = arith.constant 0.797884583 : f32
    %492 = vector.broadcast %cst_305 : f32 to vector<4x64xf32>
    %493 = arith.mulf %492, %491 : vector<4x64xf32>
    %494 = math.tanh %493 : vector<4x64xf32>
    %cst_306 = arith.constant 1.000000e+00 : f32
    %495 = vector.broadcast %cst_306 : f32 to vector<4x64xf32>
    %496 = arith.addf %495, %494 : vector<4x64xf32>
    %497 = arith.mulf %486, %496 : vector<4x64xf32>
    %498 = arith.truncf %497 : vector<4x64xf32> to vector<4x64xbf16>
    %c0_307 = arith.constant 0 : index
    %c0_308 = arith.constant 0 : index
    %c0_309 = arith.constant 0 : index
    %499 = vector.load %arg9[%c0_307, %c0_308, %c0_309] : memref<1x4x64xbf16, #tpu.memory_space<vmem>>, vector<1x4x64xbf16>
    %500 = vector.shape_cast %499 : vector<1x4x64xbf16> to vector<4x64xbf16>
    %501 = vector.shape_cast %498 : vector<4x64xbf16> to vector<1x4x64xbf16>
    tpu.vector_store %arg9[%c0_307, %c0_308, %c0_309], %501 {strides = array<i32>} : memref<1x4x64xbf16, #tpu.memory_space<vmem>>, vector<1x4x64xbf16>,
    return
  }
  func.func @transform_0(%arg0: i32) -> (i32, i32, i32) {
    %c0_i32 = arith.constant 0 : i32
    %c0_i32_0 = arith.constant 0 : i32
    %c0_i32_1 = arith.constant 0 : i32
    return %arg0, %c0_i32, %c0_i32_0 : i32, i32, i32
  }
  func.func @transform_1(%arg0: i32) -> (i32, i32) {
    %c0_i32 = arith.constant 0 : i32
    %c0_i32_0 = arith.constant 0 : i32
    %c0_i32_1 = arith.constant 0 : i32
    return %c0_i32, %c0_i32_0 : i32, i32
  }
  func.func @transform_2(%arg0: i32) -> (i32, i32) {
    %c0_i32 = arith.constant 0 : i32
    %c0_i32_0 = arith.constant 0 : i32
    %c0_i32_1 = arith.constant 0 : i32
    return %c0_i32, %c0_i32_0 : i32, i32
  }
  func.func @transform_3(%arg0: i32) -> (i32, i32) {
    %c0_i32 = arith.constant 0 : i32
    %c0_i32_0 = arith.constant 0 : i32
    %c0_i32_1 = arith.constant 0 : i32
    return %c0_i32, %c0_i32_0 : i32, i32
  }
  func.func @transform_4(%arg0: i32) -> (i32, i32) {
    %c0_i32 = arith.constant 0 : i32
    %c0_i32_0 = arith.constant 0 : i32
    %c0_i32_1 = arith.constant 0 : i32
    return %c0_i32, %c0_i32_0 : i32, i32
  }
  func.func @transform_5(%arg0: i32) -> (i32, i32) {
    %c0_i32 = arith.constant 0 : i32
    %c0_i32_0 = arith.constant 0 : i32
    %c0_i32_1 = arith.constant 0 : i32
    return %c0_i32, %c0_i32_0 : i32, i32
  }
  func.func @transform_6(%arg0: i32) -> (i32, i32) {
    %c0_i32 = arith.constant 0 : i32
    %c0_i32_0 = arith.constant 0 : i32
    %c0_i32_1 = arith.constant 0 : i32
    return %c0_i32, %c0_i32_0 : i32, i32
  }
  func.func @transform_7(%arg0: i32) -> (i32, i32) {
    %c0_i32 = arith.constant 0 : i32
    %c0_i32_0 = arith.constant 0 : i32
    %c0_i32_1 = arith.constant 0 : i32
    return %c0_i32, %c0_i32_0 : i32, i32
  }
  func.func @transform_8(%arg0: i32) -> (i32, i32, i32) {
    %c0_i32 = arith.constant 0 : i32
    %c0_i32_0 = arith.constant 0 : i32
    %c0_i32_1 = arith.constant 0 : i32
    return %arg0, %c0_i32, %c0_i32_0 : i32, i32, i32
  }
}

module attributes {stable_mosaic.version = 11 : i64} {
  func.func @_double_adj_conv_kernel(%arg0: i32, %arg1: memref<1x4x64xbf16, #tpu.memory_space<vmem>>, %arg2: memref<2x64xi32, #tpu.memory_space<vmem>>, %arg3: memref<8x432xbf16, #tpu.memory_space<vmem>>, %arg4: memref<8x1xf32, #tpu.memory_space<vmem>>, %arg5: memref<8x1xf32, #tpu.memory_space<vmem>>, %arg6: memref<8x432xbf16, #tpu.memory_space<vmem>>, %arg7: memref<8x1xf32, #tpu.memory_space<vmem>>, %arg8: memref<8x1xf32, #tpu.memory_space<vmem>>, %arg9: memref<1x32x1xf32, #tpu.memory_space<vmem>>, %arg10: memref<8x32xf32, #tpu.memory_space<vmem>>, %arg11: memref<8x1xf32, #tpu.memory_space<vmem>>, %arg12: memref<1x8x64xf32, #tpu.memory_space<vmem>>, %arg13: memref<16x320xbf16, #tpu.memory_space<vmem>>) attributes {dimension_semantics = [#tpu.dimension_semantics<parallel>], iteration_bounds = array<i64: 2>, scalar_prefetch = 0 : i64, scratch_operands = 1 : i64, tpu.core_type = #tpu.core_type<tc>, window_params = [{transform_indices = @transform_0, window_bounds = array<i64: 1, 4, 64>}, {pipeline_mode = #tpu.pipeline_mode<synchronous>, transform_indices = @transform_1, window_bounds = array<i64: 2, 64>}, {pipeline_mode = #tpu.pipeline_mode<synchronous>, transform_indices = @transform_2, window_bounds = array<i64: 8, 432>}, {pipeline_mode = #tpu.pipeline_mode<synchronous>, transform_indices = @transform_3, window_bounds = array<i64: 8, 1>}, {pipeline_mode = #tpu.pipeline_mode<synchronous>, transform_indices = @transform_4, window_bounds = array<i64: 8, 1>}, {pipeline_mode = #tpu.pipeline_mode<synchronous>, transform_indices = @transform_5, window_bounds = array<i64: 8, 432>}, {pipeline_mode = #tpu.pipeline_mode<synchronous>, transform_indices = @transform_6, window_bounds = array<i64: 8, 1>}, {pipeline_mode = #tpu.pipeline_mode<synchronous>, transform_indices = @transform_7, window_bounds = array<i64: 8, 1>}, {transform_indices = @transform_8, window_bounds = array<i64: 1, 32, 1>}, {pipeline_mode = #tpu.pipeline_mode<synchronous>, transform_indices = @transform_9, window_bounds = array<i64: 8, 32>}, {pipeline_mode = #tpu.pipeline_mode<synchronous>, transform_indices = @transform_10, window_bounds = array<i64: 8, 1>}, {transform_indices = @transform_11, window_bounds = array<i64: 1, 8, 64>}]} {
    %cst = arith.constant 0.000000e+00 : bf16
    %0 = vector.broadcast %cst : bf16 to vector<16x320xbf16>
    %c0 = arith.constant 0 : index
    %c0_0 = arith.constant 0 : index
    %1 = vector.load %arg13[%c0, %c0_0] : memref<16x320xbf16, #tpu.memory_space<vmem>>, vector<16x320xbf16>
    tpu.vector_store %arg13[%c0, %c0_0], %0 {strides = array<i32>} : memref<16x320xbf16, #tpu.memory_space<vmem>>, vector<16x320xbf16>,
    %c0_1 = arith.constant 0 : index
    %c0_2 = arith.constant 0 : index
    %2 = vector.load %arg2[%c0_1, %c0_2] : memref<2x64xi32, #tpu.memory_space<vmem>>, vector<1x64xi32>
    %c1 = arith.constant 1 : index
    %c0_3 = arith.constant 0 : index
    %3 = vector.load %arg2[%c1, %c0_3] : memref<2x64xi32, #tpu.memory_space<vmem>>, vector<1x64xi32>
    %c1_i32 = arith.constant 1 : i32
    %4 = vector.broadcast %c1_i32 : i32 to vector<1x64xi32>
    %5 = arith.cmpi sge, %2, %4 : vector<1x64xi32>
    %c2_i32 = arith.constant 2 : i32
    %6 = vector.broadcast %c2_i32 : i32 to vector<1x64xi32>
    %7 = arith.cmpi sle, %2, %6 : vector<1x64xi32>
    %c1_i32_4 = arith.constant 1 : i32
    %8 = vector.broadcast %c1_i32_4 : i32 to vector<1x64xi32>
    %9 = arith.cmpi sge, %3, %8 : vector<1x64xi32>
    %c2_i32_5 = arith.constant 2 : i32
    %10 = vector.broadcast %c2_i32_5 : i32 to vector<1x64xi32>
    %11 = arith.cmpi sle, %3, %10 : vector<1x64xi32>
    %12 = arith.andi %5, %9 : vector<1x64xi1>
    %13 = arith.andi %5, %11 : vector<1x64xi1>
    %14 = arith.andi %7, %9 : vector<1x64xi1>
    %15 = arith.andi %7, %11 : vector<1x64xi1>
    %c0_6 = arith.constant 0 : index
    %c0_7 = arith.constant 0 : index
    %c0_8 = arith.constant 0 : index
    %16 = vector.load %arg1[%c0_6, %c0_7, %c0_8] : memref<1x4x64xbf16, #tpu.memory_space<vmem>>, vector<1x4x64xbf16>
    %17 = vector.shape_cast %16 : vector<1x4x64xbf16> to vector<4x64xbf16>
    %c0_9 = arith.constant 0 : index
    %c128 = arith.constant 128 : index
    %18 = vector.load %arg13[%c0_9, %c128] : memref<16x320xbf16, #tpu.memory_space<vmem>>, vector<4x64xbf16>
    tpu.vector_store %arg13[%c0_9, %c128], %17 {strides = array<i32>} : memref<16x320xbf16, #tpu.memory_space<vmem>>, vector<4x64xbf16>,
    %c0_10 = arith.constant 0 : index
    %c107 = arith.constant 107 : index
    %19 = vector.load %arg13[%c0_10, %c107] : memref<16x320xbf16, #tpu.memory_space<vmem>>, vector<16x64xbf16>
    %cst_11 = arith.constant 0.000000e+00 : bf16
    %20 = vector.broadcast %cst_11 : bf16 to vector<16x64xbf16>
    %21 = vector.shape_cast %12 : vector<1x64xi1> to vector<1x64xi1>
    %22 = vector.broadcast %21 : vector<1x64xi1> to vector<16x64xi1>
    %23 = arith.select %22, %19, %20 : vector<16x64xi1>, vector<16x64xbf16>
    %c0_12 = arith.constant 0 : index
    %c0_13 = arith.constant 0 : index
    %24 = vector.load %arg3[%c0_12, %c0_13] : memref<8x432xbf16, #tpu.memory_space<vmem>>, vector<8x16xbf16>
    %cst_14 = arith.constant dense<0.000000e+00> : vector<8x64xf32>
    %25 = tpu.matmul %24, %23, %cst_14 {dimension_numbers = #tpu.dot_dimension_numbers<[1], [0], [0], [1], [0, 0, 1, 1], [], []>} : vector<8x16xbf16>, vector<16x64xbf16>, vector<8x64xf32> -> vector<8x64xf32>
    %c0_15 = arith.constant 0 : index
    %c108 = arith.constant 108 : index
    %26 = vector.load %arg13[%c0_15, %c108] : memref<16x320xbf16, #tpu.memory_space<vmem>>, vector<16x64xbf16>
    %cst_16 = arith.constant 0.000000e+00 : bf16
    %27 = vector.broadcast %cst_16 : bf16 to vector<16x64xbf16>
    %28 = vector.shape_cast %5 : vector<1x64xi1> to vector<1x64xi1>
    %29 = vector.broadcast %28 : vector<1x64xi1> to vector<16x64xi1>
    %30 = arith.select %29, %26, %27 : vector<16x64xi1>, vector<16x64xbf16>
    %c0_17 = arith.constant 0 : index
    %c16 = arith.constant 16 : index
    %31 = vector.load %arg3[%c0_17, %c16] : memref<8x432xbf16, #tpu.memory_space<vmem>>, vector<8x16xbf16>
    %cst_18 = arith.constant dense<0.000000e+00> : vector<8x64xf32>
    %32 = tpu.matmul %31, %30, %cst_18 {dimension_numbers = #tpu.dot_dimension_numbers<[1], [0], [0], [1], [0, 0, 1, 1], [], []>} : vector<8x16xbf16>, vector<16x64xbf16>, vector<8x64xf32> -> vector<8x64xf32>
    %33 = arith.addf %25, %32 : vector<8x64xf32>
    %c0_19 = arith.constant 0 : index
    %c109 = arith.constant 109 : index
    %34 = vector.load %arg13[%c0_19, %c109] : memref<16x320xbf16, #tpu.memory_space<vmem>>, vector<16x64xbf16>
    %cst_20 = arith.constant 0.000000e+00 : bf16
    %35 = vector.broadcast %cst_20 : bf16 to vector<16x64xbf16>
    %36 = vector.shape_cast %13 : vector<1x64xi1> to vector<1x64xi1>
    %37 = vector.broadcast %36 : vector<1x64xi1> to vector<16x64xi1>
    %38 = arith.select %37, %34, %35 : vector<16x64xi1>, vector<16x64xbf16>
    %c0_21 = arith.constant 0 : index
    %c32 = arith.constant 32 : index
    %39 = vector.load %arg3[%c0_21, %c32] : memref<8x432xbf16, #tpu.memory_space<vmem>>, vector<8x16xbf16>
    %cst_22 = arith.constant dense<0.000000e+00> : vector<8x64xf32>
    %40 = tpu.matmul %39, %38, %cst_22 {dimension_numbers = #tpu.dot_dimension_numbers<[1], [0], [0], [1], [0, 0, 1, 1], [], []>} : vector<8x16xbf16>, vector<16x64xbf16>, vector<8x64xf32> -> vector<8x64xf32>
    %41 = arith.addf %33, %40 : vector<8x64xf32>
    %c0_23 = arith.constant 0 : index
    %c111 = arith.constant 111 : index
    %42 = vector.load %arg13[%c0_23, %c111] : memref<16x320xbf16, #tpu.memory_space<vmem>>, vector<16x64xbf16>
    %cst_24 = arith.constant 0.000000e+00 : bf16
    %43 = vector.broadcast %cst_24 : bf16 to vector<16x64xbf16>
    %44 = vector.shape_cast %9 : vector<1x64xi1> to vector<1x64xi1>
    %45 = vector.broadcast %44 : vector<1x64xi1> to vector<16x64xi1>
    %46 = arith.select %45, %42, %43 : vector<16x64xi1>, vector<16x64xbf16>
    %c0_25 = arith.constant 0 : index
    %c48 = arith.constant 48 : index
    %47 = vector.load %arg3[%c0_25, %c48] : memref<8x432xbf16, #tpu.memory_space<vmem>>, vector<8x16xbf16>
    %cst_26 = arith.constant dense<0.000000e+00> : vector<8x64xf32>
    %48 = tpu.matmul %47, %46, %cst_26 {dimension_numbers = #tpu.dot_dimension_numbers<[1], [0], [0], [1], [0, 0, 1, 1], [], []>} : vector<8x16xbf16>, vector<16x64xbf16>, vector<8x64xf32> -> vector<8x64xf32>
    %49 = arith.addf %41, %48 : vector<8x64xf32>
    %c0_27 = arith.constant 0 : index
    %c112 = arith.constant 112 : index
    %50 = vector.load %arg13[%c0_27, %c112] : memref<16x320xbf16, #tpu.memory_space<vmem>>, vector<16x64xbf16>
    %c0_28 = arith.constant 0 : index
    %c64 = arith.constant 64 : index
    %51 = vector.load %arg3[%c0_28, %c64] : memref<8x432xbf16, #tpu.memory_space<vmem>>, vector<8x16xbf16>
    %cst_29 = arith.constant dense<0.000000e+00> : vector<8x64xf32>
    %52 = tpu.matmul %51, %50, %cst_29 {dimension_numbers = #tpu.dot_dimension_numbers<[1], [0], [0], [1], [0, 0, 1, 1], [], []>} : vector<8x16xbf16>, vector<16x64xbf16>, vector<8x64xf32> -> vector<8x64xf32>
    %53 = arith.addf %49, %52 : vector<8x64xf32>
    %c0_30 = arith.constant 0 : index
    %c113 = arith.constant 113 : index
    %54 = vector.load %arg13[%c0_30, %c113] : memref<16x320xbf16, #tpu.memory_space<vmem>>, vector<16x64xbf16>
    %cst_31 = arith.constant 0.000000e+00 : bf16
    %55 = vector.broadcast %cst_31 : bf16 to vector<16x64xbf16>
    %56 = vector.shape_cast %11 : vector<1x64xi1> to vector<1x64xi1>
    %57 = vector.broadcast %56 : vector<1x64xi1> to vector<16x64xi1>
    %58 = arith.select %57, %54, %55 : vector<16x64xi1>, vector<16x64xbf16>
    %c0_32 = arith.constant 0 : index
    %c80 = arith.constant 80 : index
    %59 = vector.load %arg3[%c0_32, %c80] : memref<8x432xbf16, #tpu.memory_space<vmem>>, vector<8x16xbf16>
    %cst_33 = arith.constant dense<0.000000e+00> : vector<8x64xf32>
    %60 = tpu.matmul %59, %58, %cst_33 {dimension_numbers = #tpu.dot_dimension_numbers<[1], [0], [0], [1], [0, 0, 1, 1], [], []>} : vector<8x16xbf16>, vector<16x64xbf16>, vector<8x64xf32> -> vector<8x64xf32>
    %61 = arith.addf %53, %60 : vector<8x64xf32>
    %c0_34 = arith.constant 0 : index
    %c115 = arith.constant 115 : index
    %62 = vector.load %arg13[%c0_34, %c115] : memref<16x320xbf16, #tpu.memory_space<vmem>>, vector<16x64xbf16>
    %cst_35 = arith.constant 0.000000e+00 : bf16
    %63 = vector.broadcast %cst_35 : bf16 to vector<16x64xbf16>
    %64 = vector.shape_cast %14 : vector<1x64xi1> to vector<1x64xi1>
    %65 = vector.broadcast %64 : vector<1x64xi1> to vector<16x64xi1>
    %66 = arith.select %65, %62, %63 : vector<16x64xi1>, vector<16x64xbf16>
    %c0_36 = arith.constant 0 : index
    %c96 = arith.constant 96 : index
    %67 = vector.load %arg3[%c0_36, %c96] : memref<8x432xbf16, #tpu.memory_space<vmem>>, vector<8x16xbf16>
    %cst_37 = arith.constant dense<0.000000e+00> : vector<8x64xf32>
    %68 = tpu.matmul %67, %66, %cst_37 {dimension_numbers = #tpu.dot_dimension_numbers<[1], [0], [0], [1], [0, 0, 1, 1], [], []>} : vector<8x16xbf16>, vector<16x64xbf16>, vector<8x64xf32> -> vector<8x64xf32>
    %69 = arith.addf %61, %68 : vector<8x64xf32>
    %c0_38 = arith.constant 0 : index
    %c116 = arith.constant 116 : index
    %70 = vector.load %arg13[%c0_38, %c116] : memref<16x320xbf16, #tpu.memory_space<vmem>>, vector<16x64xbf16>
    %cst_39 = arith.constant 0.000000e+00 : bf16
    %71 = vector.broadcast %cst_39 : bf16 to vector<16x64xbf16>
    %72 = vector.shape_cast %7 : vector<1x64xi1> to vector<1x64xi1>
    %73 = vector.broadcast %72 : vector<1x64xi1> to vector<16x64xi1>
    %74 = arith.select %73, %70, %71 : vector<16x64xi1>, vector<16x64xbf16>
    %c0_40 = arith.constant 0 : index
    %c112_41 = arith.constant 112 : index
    %75 = vector.load %arg3[%c0_40, %c112_41] : memref<8x432xbf16, #tpu.memory_space<vmem>>, vector<8x16xbf16>
    %cst_42 = arith.constant dense<0.000000e+00> : vector<8x64xf32>
    %76 = tpu.matmul %75, %74, %cst_42 {dimension_numbers = #tpu.dot_dimension_numbers<[1], [0], [0], [1], [0, 0, 1, 1], [], []>} : vector<8x16xbf16>, vector<16x64xbf16>, vector<8x64xf32> -> vector<8x64xf32>
    %77 = arith.addf %69, %76 : vector<8x64xf32>
    %c0_43 = arith.constant 0 : index
    %c117 = arith.constant 117 : index
    %78 = vector.load %arg13[%c0_43, %c117] : memref<16x320xbf16, #tpu.memory_space<vmem>>, vector<16x64xbf16>
    %cst_44 = arith.constant 0.000000e+00 : bf16
    %79 = vector.broadcast %cst_44 : bf16 to vector<16x64xbf16>
    %80 = vector.shape_cast %15 : vector<1x64xi1> to vector<1x64xi1>
    %81 = vector.broadcast %80 : vector<1x64xi1> to vector<16x64xi1>
    %82 = arith.select %81, %78, %79 : vector<16x64xi1>, vector<16x64xbf16>
    %c0_45 = arith.constant 0 : index
    %c128_46 = arith.constant 128 : index
    %83 = vector.load %arg3[%c0_45, %c128_46] : memref<8x432xbf16, #tpu.memory_space<vmem>>, vector<8x16xbf16>
    %cst_47 = arith.constant dense<0.000000e+00> : vector<8x64xf32>
    %84 = tpu.matmul %83, %82, %cst_47 {dimension_numbers = #tpu.dot_dimension_numbers<[1], [0], [0], [1], [0, 0, 1, 1], [], []>} : vector<8x16xbf16>, vector<16x64xbf16>, vector<8x64xf32> -> vector<8x64xf32>
    %85 = arith.addf %77, %84 : vector<8x64xf32>
    %c0_48 = arith.constant 0 : index
    %c123 = arith.constant 123 : index
    %86 = vector.load %arg13[%c0_48, %c123] : memref<16x320xbf16, #tpu.memory_space<vmem>>, vector<16x64xbf16>
    %cst_49 = arith.constant 0.000000e+00 : bf16
    %87 = vector.broadcast %cst_49 : bf16 to vector<16x64xbf16>
    %88 = vector.shape_cast %12 : vector<1x64xi1> to vector<1x64xi1>
    %89 = vector.broadcast %88 : vector<1x64xi1> to vector<16x64xi1>
    %90 = arith.select %89, %86, %87 : vector<16x64xi1>, vector<16x64xbf16>
    %c0_50 = arith.constant 0 : index
    %c144 = arith.constant 144 : index
    %91 = vector.load %arg3[%c0_50, %c144] : memref<8x432xbf16, #tpu.memory_space<vmem>>, vector<8x16xbf16>
    %cst_51 = arith.constant dense<0.000000e+00> : vector<8x64xf32>
    %92 = tpu.matmul %91, %90, %cst_51 {dimension_numbers = #tpu.dot_dimension_numbers<[1], [0], [0], [1], [0, 0, 1, 1], [], []>} : vector<8x16xbf16>, vector<16x64xbf16>, vector<8x64xf32> -> vector<8x64xf32>
    %93 = arith.addf %85, %92 : vector<8x64xf32>
    %c0_52 = arith.constant 0 : index
    %c124 = arith.constant 124 : index
    %94 = vector.load %arg13[%c0_52, %c124] : memref<16x320xbf16, #tpu.memory_space<vmem>>, vector<16x64xbf16>
    %cst_53 = arith.constant 0.000000e+00 : bf16
    %95 = vector.broadcast %cst_53 : bf16 to vector<16x64xbf16>
    %96 = vector.shape_cast %5 : vector<1x64xi1> to vector<1x64xi1>
    %97 = vector.broadcast %96 : vector<1x64xi1> to vector<16x64xi1>
    %98 = arith.select %97, %94, %95 : vector<16x64xi1>, vector<16x64xbf16>
    %c0_54 = arith.constant 0 : index
    %c160 = arith.constant 160 : index
    %99 = vector.load %arg3[%c0_54, %c160] : memref<8x432xbf16, #tpu.memory_space<vmem>>, vector<8x16xbf16>
    %cst_55 = arith.constant dense<0.000000e+00> : vector<8x64xf32>
    %100 = tpu.matmul %99, %98, %cst_55 {dimension_numbers = #tpu.dot_dimension_numbers<[1], [0], [0], [1], [0, 0, 1, 1], [], []>} : vector<8x16xbf16>, vector<16x64xbf16>, vector<8x64xf32> -> vector<8x64xf32>
    %101 = arith.addf %93, %100 : vector<8x64xf32>
    %c0_56 = arith.constant 0 : index
    %c125 = arith.constant 125 : index
    %102 = vector.load %arg13[%c0_56, %c125] : memref<16x320xbf16, #tpu.memory_space<vmem>>, vector<16x64xbf16>
    %cst_57 = arith.constant 0.000000e+00 : bf16
    %103 = vector.broadcast %cst_57 : bf16 to vector<16x64xbf16>
    %104 = vector.shape_cast %13 : vector<1x64xi1> to vector<1x64xi1>
    %105 = vector.broadcast %104 : vector<1x64xi1> to vector<16x64xi1>
    %106 = arith.select %105, %102, %103 : vector<16x64xi1>, vector<16x64xbf16>
    %c0_58 = arith.constant 0 : index
    %c176 = arith.constant 176 : index
    %107 = vector.load %arg3[%c0_58, %c176] : memref<8x432xbf16, #tpu.memory_space<vmem>>, vector<8x16xbf16>
    %cst_59 = arith.constant dense<0.000000e+00> : vector<8x64xf32>
    %108 = tpu.matmul %107, %106, %cst_59 {dimension_numbers = #tpu.dot_dimension_numbers<[1], [0], [0], [1], [0, 0, 1, 1], [], []>} : vector<8x16xbf16>, vector<16x64xbf16>, vector<8x64xf32> -> vector<8x64xf32>
    %109 = arith.addf %101, %108 : vector<8x64xf32>
    %c0_60 = arith.constant 0 : index
    %c127 = arith.constant 127 : index
    %110 = vector.load %arg13[%c0_60, %c127] : memref<16x320xbf16, #tpu.memory_space<vmem>>, vector<16x64xbf16>
    %cst_61 = arith.constant 0.000000e+00 : bf16
    %111 = vector.broadcast %cst_61 : bf16 to vector<16x64xbf16>
    %112 = vector.shape_cast %9 : vector<1x64xi1> to vector<1x64xi1>
    %113 = vector.broadcast %112 : vector<1x64xi1> to vector<16x64xi1>
    %114 = arith.select %113, %110, %111 : vector<16x64xi1>, vector<16x64xbf16>
    %c0_62 = arith.constant 0 : index
    %c192 = arith.constant 192 : index
    %115 = vector.load %arg3[%c0_62, %c192] : memref<8x432xbf16, #tpu.memory_space<vmem>>, vector<8x16xbf16>
    %cst_63 = arith.constant dense<0.000000e+00> : vector<8x64xf32>
    %116 = tpu.matmul %115, %114, %cst_63 {dimension_numbers = #tpu.dot_dimension_numbers<[1], [0], [0], [1], [0, 0, 1, 1], [], []>} : vector<8x16xbf16>, vector<16x64xbf16>, vector<8x64xf32> -> vector<8x64xf32>
    %117 = arith.addf %109, %116 : vector<8x64xf32>
    %c0_64 = arith.constant 0 : index
    %c128_65 = arith.constant 128 : index
    %118 = vector.load %arg13[%c0_64, %c128_65] : memref<16x320xbf16, #tpu.memory_space<vmem>>, vector<16x64xbf16>
    %c0_66 = arith.constant 0 : index
    %c208 = arith.constant 208 : index
    %119 = vector.load %arg3[%c0_66, %c208] : memref<8x432xbf16, #tpu.memory_space<vmem>>, vector<8x16xbf16>
    %cst_67 = arith.constant dense<0.000000e+00> : vector<8x64xf32>
    %120 = tpu.matmul %119, %118, %cst_67 {dimension_numbers = #tpu.dot_dimension_numbers<[1], [0], [0], [1], [0, 0, 1, 1], [], []>} : vector<8x16xbf16>, vector<16x64xbf16>, vector<8x64xf32> -> vector<8x64xf32>
    %121 = arith.addf %117, %120 : vector<8x64xf32>
    %c0_68 = arith.constant 0 : index
    %c129 = arith.constant 129 : index
    %122 = vector.load %arg13[%c0_68, %c129] : memref<16x320xbf16, #tpu.memory_space<vmem>>, vector<16x64xbf16>
    %cst_69 = arith.constant 0.000000e+00 : bf16
    %123 = vector.broadcast %cst_69 : bf16 to vector<16x64xbf16>
    %124 = vector.shape_cast %11 : vector<1x64xi1> to vector<1x64xi1>
    %125 = vector.broadcast %124 : vector<1x64xi1> to vector<16x64xi1>
    %126 = arith.select %125, %122, %123 : vector<16x64xi1>, vector<16x64xbf16>
    %c0_70 = arith.constant 0 : index
    %c224 = arith.constant 224 : index
    %127 = vector.load %arg3[%c0_70, %c224] : memref<8x432xbf16, #tpu.memory_space<vmem>>, vector<8x16xbf16>
    %cst_71 = arith.constant dense<0.000000e+00> : vector<8x64xf32>
    %128 = tpu.matmul %127, %126, %cst_71 {dimension_numbers = #tpu.dot_dimension_numbers<[1], [0], [0], [1], [0, 0, 1, 1], [], []>} : vector<8x16xbf16>, vector<16x64xbf16>, vector<8x64xf32> -> vector<8x64xf32>
    %129 = arith.addf %121, %128 : vector<8x64xf32>
    %c0_72 = arith.constant 0 : index
    %c131 = arith.constant 131 : index
    %130 = vector.load %arg13[%c0_72, %c131] : memref<16x320xbf16, #tpu.memory_space<vmem>>, vector<16x64xbf16>
    %cst_73 = arith.constant 0.000000e+00 : bf16
    %131 = vector.broadcast %cst_73 : bf16 to vector<16x64xbf16>
    %132 = vector.shape_cast %14 : vector<1x64xi1> to vector<1x64xi1>
    %133 = vector.broadcast %132 : vector<1x64xi1> to vector<16x64xi1>
    %134 = arith.select %133, %130, %131 : vector<16x64xi1>, vector<16x64xbf16>
    %c0_74 = arith.constant 0 : index
    %c240 = arith.constant 240 : index
    %135 = vector.load %arg3[%c0_74, %c240] : memref<8x432xbf16, #tpu.memory_space<vmem>>, vector<8x16xbf16>
    %cst_75 = arith.constant dense<0.000000e+00> : vector<8x64xf32>
    %136 = tpu.matmul %135, %134, %cst_75 {dimension_numbers = #tpu.dot_dimension_numbers<[1], [0], [0], [1], [0, 0, 1, 1], [], []>} : vector<8x16xbf16>, vector<16x64xbf16>, vector<8x64xf32> -> vector<8x64xf32>
    %137 = arith.addf %129, %136 : vector<8x64xf32>
    %c0_76 = arith.constant 0 : index
    %c132 = arith.constant 132 : index
    %138 = vector.load %arg13[%c0_76, %c132] : memref<16x320xbf16, #tpu.memory_space<vmem>>, vector<16x64xbf16>
    %cst_77 = arith.constant 0.000000e+00 : bf16
    %139 = vector.broadcast %cst_77 : bf16 to vector<16x64xbf16>
    %140 = vector.shape_cast %7 : vector<1x64xi1> to vector<1x64xi1>
    %141 = vector.broadcast %140 : vector<1x64xi1> to vector<16x64xi1>
    %142 = arith.select %141, %138, %139 : vector<16x64xi1>, vector<16x64xbf16>
    %c0_78 = arith.constant 0 : index
    %c256 = arith.constant 256 : index
    %143 = vector.load %arg3[%c0_78, %c256] : memref<8x432xbf16, #tpu.memory_space<vmem>>, vector<8x16xbf16>
    %cst_79 = arith.constant dense<0.000000e+00> : vector<8x64xf32>
    %144 = tpu.matmul %143, %142, %cst_79 {dimension_numbers = #tpu.dot_dimension_numbers<[1], [0], [0], [1], [0, 0, 1, 1], [], []>} : vector<8x16xbf16>, vector<16x64xbf16>, vector<8x64xf32> -> vector<8x64xf32>
    %145 = arith.addf %137, %144 : vector<8x64xf32>
    %c0_80 = arith.constant 0 : index
    %c133 = arith.constant 133 : index
    %146 = vector.load %arg13[%c0_80, %c133] : memref<16x320xbf16, #tpu.memory_space<vmem>>, vector<16x64xbf16>
    %cst_81 = arith.constant 0.000000e+00 : bf16
    %147 = vector.broadcast %cst_81 : bf16 to vector<16x64xbf16>
    %148 = vector.shape_cast %15 : vector<1x64xi1> to vector<1x64xi1>
    %149 = vector.broadcast %148 : vector<1x64xi1> to vector<16x64xi1>
    %150 = arith.select %149, %146, %147 : vector<16x64xi1>, vector<16x64xbf16>
    %c0_82 = arith.constant 0 : index
    %c272 = arith.constant 272 : index
    %151 = vector.load %arg3[%c0_82, %c272] : memref<8x432xbf16, #tpu.memory_space<vmem>>, vector<8x16xbf16>
    %cst_83 = arith.constant dense<0.000000e+00> : vector<8x64xf32>
    %152 = tpu.matmul %151, %150, %cst_83 {dimension_numbers = #tpu.dot_dimension_numbers<[1], [0], [0], [1], [0, 0, 1, 1], [], []>} : vector<8x16xbf16>, vector<16x64xbf16>, vector<8x64xf32> -> vector<8x64xf32>
    %153 = arith.addf %145, %152 : vector<8x64xf32>
    %c0_84 = arith.constant 0 : index
    %c139 = arith.constant 139 : index
    %154 = vector.load %arg13[%c0_84, %c139] : memref<16x320xbf16, #tpu.memory_space<vmem>>, vector<16x64xbf16>
    %cst_85 = arith.constant 0.000000e+00 : bf16
    %155 = vector.broadcast %cst_85 : bf16 to vector<16x64xbf16>
    %156 = vector.shape_cast %12 : vector<1x64xi1> to vector<1x64xi1>
    %157 = vector.broadcast %156 : vector<1x64xi1> to vector<16x64xi1>
    %158 = arith.select %157, %154, %155 : vector<16x64xi1>, vector<16x64xbf16>
    %c0_86 = arith.constant 0 : index
    %c288 = arith.constant 288 : index
    %159 = vector.load %arg3[%c0_86, %c288] : memref<8x432xbf16, #tpu.memory_space<vmem>>, vector<8x16xbf16>
    %cst_87 = arith.constant dense<0.000000e+00> : vector<8x64xf32>
    %160 = tpu.matmul %159, %158, %cst_87 {dimension_numbers = #tpu.dot_dimension_numbers<[1], [0], [0], [1], [0, 0, 1, 1], [], []>} : vector<8x16xbf16>, vector<16x64xbf16>, vector<8x64xf32> -> vector<8x64xf32>
    %161 = arith.addf %153, %160 : vector<8x64xf32>
    %c0_88 = arith.constant 0 : index
    %c140 = arith.constant 140 : index
    %162 = vector.load %arg13[%c0_88, %c140] : memref<16x320xbf16, #tpu.memory_space<vmem>>, vector<16x64xbf16>
    %cst_89 = arith.constant 0.000000e+00 : bf16
    %163 = vector.broadcast %cst_89 : bf16 to vector<16x64xbf16>
    %164 = vector.shape_cast %5 : vector<1x64xi1> to vector<1x64xi1>
    %165 = vector.broadcast %164 : vector<1x64xi1> to vector<16x64xi1>
    %166 = arith.select %165, %162, %163 : vector<16x64xi1>, vector<16x64xbf16>
    %c0_90 = arith.constant 0 : index
    %c304 = arith.constant 304 : index
    %167 = vector.load %arg3[%c0_90, %c304] : memref<8x432xbf16, #tpu.memory_space<vmem>>, vector<8x16xbf16>
    %cst_91 = arith.constant dense<0.000000e+00> : vector<8x64xf32>
    %168 = tpu.matmul %167, %166, %cst_91 {dimension_numbers = #tpu.dot_dimension_numbers<[1], [0], [0], [1], [0, 0, 1, 1], [], []>} : vector<8x16xbf16>, vector<16x64xbf16>, vector<8x64xf32> -> vector<8x64xf32>
    %169 = arith.addf %161, %168 : vector<8x64xf32>
    %c0_92 = arith.constant 0 : index
    %c141 = arith.constant 141 : index
    %170 = vector.load %arg13[%c0_92, %c141] : memref<16x320xbf16, #tpu.memory_space<vmem>>, vector<16x64xbf16>
    %cst_93 = arith.constant 0.000000e+00 : bf16
    %171 = vector.broadcast %cst_93 : bf16 to vector<16x64xbf16>
    %172 = vector.shape_cast %13 : vector<1x64xi1> to vector<1x64xi1>
    %173 = vector.broadcast %172 : vector<1x64xi1> to vector<16x64xi1>
    %174 = arith.select %173, %170, %171 : vector<16x64xi1>, vector<16x64xbf16>
    %c0_94 = arith.constant 0 : index
    %c320 = arith.constant 320 : index
    %175 = vector.load %arg3[%c0_94, %c320] : memref<8x432xbf16, #tpu.memory_space<vmem>>, vector<8x16xbf16>
    %cst_95 = arith.constant dense<0.000000e+00> : vector<8x64xf32>
    %176 = tpu.matmul %175, %174, %cst_95 {dimension_numbers = #tpu.dot_dimension_numbers<[1], [0], [0], [1], [0, 0, 1, 1], [], []>} : vector<8x16xbf16>, vector<16x64xbf16>, vector<8x64xf32> -> vector<8x64xf32>
    %177 = arith.addf %169, %176 : vector<8x64xf32>
    %c0_96 = arith.constant 0 : index
    %c143 = arith.constant 143 : index
    %178 = vector.load %arg13[%c0_96, %c143] : memref<16x320xbf16, #tpu.memory_space<vmem>>, vector<16x64xbf16>
    %cst_97 = arith.constant 0.000000e+00 : bf16
    %179 = vector.broadcast %cst_97 : bf16 to vector<16x64xbf16>
    %180 = vector.shape_cast %9 : vector<1x64xi1> to vector<1x64xi1>
    %181 = vector.broadcast %180 : vector<1x64xi1> to vector<16x64xi1>
    %182 = arith.select %181, %178, %179 : vector<16x64xi1>, vector<16x64xbf16>
    %c0_98 = arith.constant 0 : index
    %c336 = arith.constant 336 : index
    %183 = vector.load %arg3[%c0_98, %c336] : memref<8x432xbf16, #tpu.memory_space<vmem>>, vector<8x16xbf16>
    %cst_99 = arith.constant dense<0.000000e+00> : vector<8x64xf32>
    %184 = tpu.matmul %183, %182, %cst_99 {dimension_numbers = #tpu.dot_dimension_numbers<[1], [0], [0], [1], [0, 0, 1, 1], [], []>} : vector<8x16xbf16>, vector<16x64xbf16>, vector<8x64xf32> -> vector<8x64xf32>
    %185 = arith.addf %177, %184 : vector<8x64xf32>
    %c0_100 = arith.constant 0 : index
    %c144_101 = arith.constant 144 : index
    %186 = vector.load %arg13[%c0_100, %c144_101] : memref<16x320xbf16, #tpu.memory_space<vmem>>, vector<16x64xbf16>
    %c0_102 = arith.constant 0 : index
    %c352 = arith.constant 352 : index
    %187 = vector.load %arg3[%c0_102, %c352] : memref<8x432xbf16, #tpu.memory_space<vmem>>, vector<8x16xbf16>
    %cst_103 = arith.constant dense<0.000000e+00> : vector<8x64xf32>
    %188 = tpu.matmul %187, %186, %cst_103 {dimension_numbers = #tpu.dot_dimension_numbers<[1], [0], [0], [1], [0, 0, 1, 1], [], []>} : vector<8x16xbf16>, vector<16x64xbf16>, vector<8x64xf32> -> vector<8x64xf32>
    %189 = arith.addf %185, %188 : vector<8x64xf32>
    %c0_104 = arith.constant 0 : index
    %c145 = arith.constant 145 : index
    %190 = vector.load %arg13[%c0_104, %c145] : memref<16x320xbf16, #tpu.memory_space<vmem>>, vector<16x64xbf16>
    %cst_105 = arith.constant 0.000000e+00 : bf16
    %191 = vector.broadcast %cst_105 : bf16 to vector<16x64xbf16>
    %192 = vector.shape_cast %11 : vector<1x64xi1> to vector<1x64xi1>
    %193 = vector.broadcast %192 : vector<1x64xi1> to vector<16x64xi1>
    %194 = arith.select %193, %190, %191 : vector<16x64xi1>, vector<16x64xbf16>
    %c0_106 = arith.constant 0 : index
    %c368 = arith.constant 368 : index
    %195 = vector.load %arg3[%c0_106, %c368] : memref<8x432xbf16, #tpu.memory_space<vmem>>, vector<8x16xbf16>
    %cst_107 = arith.constant dense<0.000000e+00> : vector<8x64xf32>
    %196 = tpu.matmul %195, %194, %cst_107 {dimension_numbers = #tpu.dot_dimension_numbers<[1], [0], [0], [1], [0, 0, 1, 1], [], []>} : vector<8x16xbf16>, vector<16x64xbf16>, vector<8x64xf32> -> vector<8x64xf32>
    %197 = arith.addf %189, %196 : vector<8x64xf32>
    %c0_108 = arith.constant 0 : index
    %c147 = arith.constant 147 : index
    %198 = vector.load %arg13[%c0_108, %c147] : memref<16x320xbf16, #tpu.memory_space<vmem>>, vector<16x64xbf16>
    %cst_109 = arith.constant 0.000000e+00 : bf16
    %199 = vector.broadcast %cst_109 : bf16 to vector<16x64xbf16>
    %200 = vector.shape_cast %14 : vector<1x64xi1> to vector<1x64xi1>
    %201 = vector.broadcast %200 : vector<1x64xi1> to vector<16x64xi1>
    %202 = arith.select %201, %198, %199 : vector<16x64xi1>, vector<16x64xbf16>
    %c0_110 = arith.constant 0 : index
    %c384 = arith.constant 384 : index
    %203 = vector.load %arg3[%c0_110, %c384] : memref<8x432xbf16, #tpu.memory_space<vmem>>, vector<8x16xbf16>
    %cst_111 = arith.constant dense<0.000000e+00> : vector<8x64xf32>
    %204 = tpu.matmul %203, %202, %cst_111 {dimension_numbers = #tpu.dot_dimension_numbers<[1], [0], [0], [1], [0, 0, 1, 1], [], []>} : vector<8x16xbf16>, vector<16x64xbf16>, vector<8x64xf32> -> vector<8x64xf32>
    %205 = arith.addf %197, %204 : vector<8x64xf32>
    %c0_112 = arith.constant 0 : index
    %c148 = arith.constant 148 : index
    %206 = vector.load %arg13[%c0_112, %c148] : memref<16x320xbf16, #tpu.memory_space<vmem>>, vector<16x64xbf16>
    %cst_113 = arith.constant 0.000000e+00 : bf16
    %207 = vector.broadcast %cst_113 : bf16 to vector<16x64xbf16>
    %208 = vector.shape_cast %7 : vector<1x64xi1> to vector<1x64xi1>
    %209 = vector.broadcast %208 : vector<1x64xi1> to vector<16x64xi1>
    %210 = arith.select %209, %206, %207 : vector<16x64xi1>, vector<16x64xbf16>
    %c0_114 = arith.constant 0 : index
    %c400 = arith.constant 400 : index
    %211 = vector.load %arg3[%c0_114, %c400] : memref<8x432xbf16, #tpu.memory_space<vmem>>, vector<8x16xbf16>
    %cst_115 = arith.constant dense<0.000000e+00> : vector<8x64xf32>
    %212 = tpu.matmul %211, %210, %cst_115 {dimension_numbers = #tpu.dot_dimension_numbers<[1], [0], [0], [1], [0, 0, 1, 1], [], []>} : vector<8x16xbf16>, vector<16x64xbf16>, vector<8x64xf32> -> vector<8x64xf32>
    %213 = arith.addf %205, %212 : vector<8x64xf32>
    %c0_116 = arith.constant 0 : index
    %c149 = arith.constant 149 : index
    %214 = vector.load %arg13[%c0_116, %c149] : memref<16x320xbf16, #tpu.memory_space<vmem>>, vector<16x64xbf16>
    %cst_117 = arith.constant 0.000000e+00 : bf16
    %215 = vector.broadcast %cst_117 : bf16 to vector<16x64xbf16>
    %216 = vector.shape_cast %15 : vector<1x64xi1> to vector<1x64xi1>
    %217 = vector.broadcast %216 : vector<1x64xi1> to vector<16x64xi1>
    %218 = arith.select %217, %214, %215 : vector<16x64xi1>, vector<16x64xbf16>
    %c0_118 = arith.constant 0 : index
    %c416 = arith.constant 416 : index
    %219 = vector.load %arg3[%c0_118, %c416] : memref<8x432xbf16, #tpu.memory_space<vmem>>, vector<8x16xbf16>
    %cst_119 = arith.constant dense<0.000000e+00> : vector<8x64xf32>
    %220 = tpu.matmul %219, %218, %cst_119 {dimension_numbers = #tpu.dot_dimension_numbers<[1], [0], [0], [1], [0, 0, 1, 1], [], []>} : vector<8x16xbf16>, vector<16x64xbf16>, vector<8x64xf32> -> vector<8x64xf32>
    %221 = arith.addf %213, %220 : vector<8x64xf32>
    %222 = vector.shape_cast %221 : vector<8x64xf32> to vector<1x8x64xf32>
    %cst_120 = arith.constant dense<0.000000e+00> : vector<1xf32>
    %223 = vector.multi_reduction <add>, %222, %cst_120 [1, 2] : vector<1x8x64xf32> to vector<1xf32>
    %224 = vector.shape_cast %223 : vector<1xf32> to vector<1x1x1xf32>
    %225 = vector.extract %224[0, 0, 0] : f32 from vector<1x1x1xf32>
    %226 = arith.mulf %221, %221 : vector<8x64xf32>
    %227 = vector.shape_cast %226 : vector<8x64xf32> to vector<1x8x64xf32>
    %cst_121 = arith.constant dense<0.000000e+00> : vector<1xf32>
    %228 = vector.multi_reduction <add>, %227, %cst_121 [1, 2] : vector<1x8x64xf32> to vector<1xf32>
    %229 = vector.shape_cast %228 : vector<1xf32> to vector<1x1x1xf32>
    %230 = vector.extract %229[0, 0, 0] : f32 from vector<1x1x1xf32>
    %cst_122 = arith.constant 5.120000e+02 : f32
    %231 = arith.divf %225, %cst_122 : f32
    %cst_123 = arith.constant 5.120000e+02 : f32
    %232 = arith.divf %230, %cst_123 : f32
    %233 = arith.mulf %231, %231 : f32
    %234 = arith.subf %232, %233 : f32
    %c0_124 = arith.constant 0 : index
    %c0_125 = arith.constant 0 : index
    %235 = vector.load %arg4[%c0_124, %c0_125] : memref<8x1xf32, #tpu.memory_space<vmem>>, vector<8x1xf32>
    %cst_126 = arith.constant 9.99999974E-6 : f32
    %236 = arith.addf %234, %cst_126 : f32
    %237 = math.rsqrt %236 : f32
    %238 = vector.broadcast %237 : f32 to vector<8x1xf32>
    %239 = arith.mulf %235, %238 : vector<8x1xf32>
    %c0_127 = arith.constant 0 : index
    %c0_128 = arith.constant 0 : index
    %240 = vector.load %arg5[%c0_127, %c0_128] : memref<8x1xf32, #tpu.memory_space<vmem>>, vector<8x1xf32>
    %241 = vector.broadcast %231 : f32 to vector<8x1xf32>
    %242 = arith.mulf %241, %239 : vector<8x1xf32>
    %243 = arith.subf %240, %242 : vector<8x1xf32>
    %244 = vector.broadcast %239 : vector<8x1xf32> to vector<8x64xf32>
    %245 = arith.mulf %221, %244 : vector<8x64xf32>
    %246 = vector.broadcast %243 : vector<8x1xf32> to vector<8x64xf32>
    %247 = arith.addf %245, %246 : vector<8x64xf32>
    %cst_129 = arith.constant 0.000000e+00 : f32
    %248 = vector.broadcast %cst_129 : f32 to vector<8x64xf32>
    %249 = arith.maximumf %247, %248 : vector<8x64xf32>
    %250 = arith.truncf %249 : vector<8x64xf32> to vector<8x64xbf16>
    %c0_130 = arith.constant 0 : index
    %c128_131 = arith.constant 128 : index
    %251 = vector.load %arg13[%c0_130, %c128_131] : memref<16x320xbf16, #tpu.memory_space<vmem>>, vector<8x64xbf16>
    tpu.vector_store %arg13[%c0_130, %c128_131], %250 {strides = array<i32>} : memref<16x320xbf16, #tpu.memory_space<vmem>>, vector<8x64xbf16>,
    %c0_132 = arith.constant 0 : index
    %c107_133 = arith.constant 107 : index
    %252 = vector.load %arg13[%c0_132, %c107_133] : memref<16x320xbf16, #tpu.memory_space<vmem>>, vector<16x64xbf16>
    %cst_134 = arith.constant 0.000000e+00 : bf16
    %253 = vector.broadcast %cst_134 : bf16 to vector<16x64xbf16>
    %254 = vector.shape_cast %12 : vector<1x64xi1> to vector<1x64xi1>
    %255 = vector.broadcast %254 : vector<1x64xi1> to vector<16x64xi1>
    %256 = arith.select %255, %252, %253 : vector<16x64xi1>, vector<16x64xbf16>
    %c0_135 = arith.constant 0 : index
    %c0_136 = arith.constant 0 : index
    %257 = vector.load %arg6[%c0_135, %c0_136] : memref<8x432xbf16, #tpu.memory_space<vmem>>, vector<8x16xbf16>
    %cst_137 = arith.constant dense<0.000000e+00> : vector<8x64xf32>
    %258 = tpu.matmul %257, %256, %cst_137 {dimension_numbers = #tpu.dot_dimension_numbers<[1], [0], [0], [1], [0, 0, 1, 1], [], []>} : vector<8x16xbf16>, vector<16x64xbf16>, vector<8x64xf32> -> vector<8x64xf32>
    %c0_138 = arith.constant 0 : index
    %c108_139 = arith.constant 108 : index
    %259 = vector.load %arg13[%c0_138, %c108_139] : memref<16x320xbf16, #tpu.memory_space<vmem>>, vector<16x64xbf16>
    %cst_140 = arith.constant 0.000000e+00 : bf16
    %260 = vector.broadcast %cst_140 : bf16 to vector<16x64xbf16>
    %261 = vector.shape_cast %5 : vector<1x64xi1> to vector<1x64xi1>
    %262 = vector.broadcast %261 : vector<1x64xi1> to vector<16x64xi1>
    %263 = arith.select %262, %259, %260 : vector<16x64xi1>, vector<16x64xbf16>
    %c0_141 = arith.constant 0 : index
    %c16_142 = arith.constant 16 : index
    %264 = vector.load %arg6[%c0_141, %c16_142] : memref<8x432xbf16, #tpu.memory_space<vmem>>, vector<8x16xbf16>
    %cst_143 = arith.constant dense<0.000000e+00> : vector<8x64xf32>
    %265 = tpu.matmul %264, %263, %cst_143 {dimension_numbers = #tpu.dot_dimension_numbers<[1], [0], [0], [1], [0, 0, 1, 1], [], []>} : vector<8x16xbf16>, vector<16x64xbf16>, vector<8x64xf32> -> vector<8x64xf32>
    %266 = arith.addf %258, %265 : vector<8x64xf32>
    %c0_144 = arith.constant 0 : index
    %c109_145 = arith.constant 109 : index
    %267 = vector.load %arg13[%c0_144, %c109_145] : memref<16x320xbf16, #tpu.memory_space<vmem>>, vector<16x64xbf16>
    %cst_146 = arith.constant 0.000000e+00 : bf16
    %268 = vector.broadcast %cst_146 : bf16 to vector<16x64xbf16>
    %269 = vector.shape_cast %13 : vector<1x64xi1> to vector<1x64xi1>
    %270 = vector.broadcast %269 : vector<1x64xi1> to vector<16x64xi1>
    %271 = arith.select %270, %267, %268 : vector<16x64xi1>, vector<16x64xbf16>
    %c0_147 = arith.constant 0 : index
    %c32_148 = arith.constant 32 : index
    %272 = vector.load %arg6[%c0_147, %c32_148] : memref<8x432xbf16, #tpu.memory_space<vmem>>, vector<8x16xbf16>
    %cst_149 = arith.constant dense<0.000000e+00> : vector<8x64xf32>
    %273 = tpu.matmul %272, %271, %cst_149 {dimension_numbers = #tpu.dot_dimension_numbers<[1], [0], [0], [1], [0, 0, 1, 1], [], []>} : vector<8x16xbf16>, vector<16x64xbf16>, vector<8x64xf32> -> vector<8x64xf32>
    %274 = arith.addf %266, %273 : vector<8x64xf32>
    %c0_150 = arith.constant 0 : index
    %c111_151 = arith.constant 111 : index
    %275 = vector.load %arg13[%c0_150, %c111_151] : memref<16x320xbf16, #tpu.memory_space<vmem>>, vector<16x64xbf16>
    %cst_152 = arith.constant 0.000000e+00 : bf16
    %276 = vector.broadcast %cst_152 : bf16 to vector<16x64xbf16>
    %277 = vector.shape_cast %9 : vector<1x64xi1> to vector<1x64xi1>
    %278 = vector.broadcast %277 : vector<1x64xi1> to vector<16x64xi1>
    %279 = arith.select %278, %275, %276 : vector<16x64xi1>, vector<16x64xbf16>
    %c0_153 = arith.constant 0 : index
    %c48_154 = arith.constant 48 : index
    %280 = vector.load %arg6[%c0_153, %c48_154] : memref<8x432xbf16, #tpu.memory_space<vmem>>, vector<8x16xbf16>
    %cst_155 = arith.constant dense<0.000000e+00> : vector<8x64xf32>
    %281 = tpu.matmul %280, %279, %cst_155 {dimension_numbers = #tpu.dot_dimension_numbers<[1], [0], [0], [1], [0, 0, 1, 1], [], []>} : vector<8x16xbf16>, vector<16x64xbf16>, vector<8x64xf32> -> vector<8x64xf32>
    %282 = arith.addf %274, %281 : vector<8x64xf32>
    %c0_156 = arith.constant 0 : index
    %c112_157 = arith.constant 112 : index
    %283 = vector.load %arg13[%c0_156, %c112_157] : memref<16x320xbf16, #tpu.memory_space<vmem>>, vector<16x64xbf16>
    %c0_158 = arith.constant 0 : index
    %c64_159 = arith.constant 64 : index
    %284 = vector.load %arg6[%c0_158, %c64_159] : memref<8x432xbf16, #tpu.memory_space<vmem>>, vector<8x16xbf16>
    %cst_160 = arith.constant dense<0.000000e+00> : vector<8x64xf32>
    %285 = tpu.matmul %284, %283, %cst_160 {dimension_numbers = #tpu.dot_dimension_numbers<[1], [0], [0], [1], [0, 0, 1, 1], [], []>} : vector<8x16xbf16>, vector<16x64xbf16>, vector<8x64xf32> -> vector<8x64xf32>
    %286 = arith.addf %282, %285 : vector<8x64xf32>
    %c0_161 = arith.constant 0 : index
    %c113_162 = arith.constant 113 : index
    %287 = vector.load %arg13[%c0_161, %c113_162] : memref<16x320xbf16, #tpu.memory_space<vmem>>, vector<16x64xbf16>
    %cst_163 = arith.constant 0.000000e+00 : bf16
    %288 = vector.broadcast %cst_163 : bf16 to vector<16x64xbf16>
    %289 = vector.shape_cast %11 : vector<1x64xi1> to vector<1x64xi1>
    %290 = vector.broadcast %289 : vector<1x64xi1> to vector<16x64xi1>
    %291 = arith.select %290, %287, %288 : vector<16x64xi1>, vector<16x64xbf16>
    %c0_164 = arith.constant 0 : index
    %c80_165 = arith.constant 80 : index
    %292 = vector.load %arg6[%c0_164, %c80_165] : memref<8x432xbf16, #tpu.memory_space<vmem>>, vector<8x16xbf16>
    %cst_166 = arith.constant dense<0.000000e+00> : vector<8x64xf32>
    %293 = tpu.matmul %292, %291, %cst_166 {dimension_numbers = #tpu.dot_dimension_numbers<[1], [0], [0], [1], [0, 0, 1, 1], [], []>} : vector<8x16xbf16>, vector<16x64xbf16>, vector<8x64xf32> -> vector<8x64xf32>
    %294 = arith.addf %286, %293 : vector<8x64xf32>
    %c0_167 = arith.constant 0 : index
    %c115_168 = arith.constant 115 : index
    %295 = vector.load %arg13[%c0_167, %c115_168] : memref<16x320xbf16, #tpu.memory_space<vmem>>, vector<16x64xbf16>
    %cst_169 = arith.constant 0.000000e+00 : bf16
    %296 = vector.broadcast %cst_169 : bf16 to vector<16x64xbf16>
    %297 = vector.shape_cast %14 : vector<1x64xi1> to vector<1x64xi1>
    %298 = vector.broadcast %297 : vector<1x64xi1> to vector<16x64xi1>
    %299 = arith.select %298, %295, %296 : vector<16x64xi1>, vector<16x64xbf16>
    %c0_170 = arith.constant 0 : index
    %c96_171 = arith.constant 96 : index
    %300 = vector.load %arg6[%c0_170, %c96_171] : memref<8x432xbf16, #tpu.memory_space<vmem>>, vector<8x16xbf16>
    %cst_172 = arith.constant dense<0.000000e+00> : vector<8x64xf32>
    %301 = tpu.matmul %300, %299, %cst_172 {dimension_numbers = #tpu.dot_dimension_numbers<[1], [0], [0], [1], [0, 0, 1, 1], [], []>} : vector<8x16xbf16>, vector<16x64xbf16>, vector<8x64xf32> -> vector<8x64xf32>
    %302 = arith.addf %294, %301 : vector<8x64xf32>
    %c0_173 = arith.constant 0 : index
    %c116_174 = arith.constant 116 : index
    %303 = vector.load %arg13[%c0_173, %c116_174] : memref<16x320xbf16, #tpu.memory_space<vmem>>, vector<16x64xbf16>
    %cst_175 = arith.constant 0.000000e+00 : bf16
    %304 = vector.broadcast %cst_175 : bf16 to vector<16x64xbf16>
    %305 = vector.shape_cast %7 : vector<1x64xi1> to vector<1x64xi1>
    %306 = vector.broadcast %305 : vector<1x64xi1> to vector<16x64xi1>
    %307 = arith.select %306, %303, %304 : vector<16x64xi1>, vector<16x64xbf16>
    %c0_176 = arith.constant 0 : index
    %c112_177 = arith.constant 112 : index
    %308 = vector.load %arg6[%c0_176, %c112_177] : memref<8x432xbf16, #tpu.memory_space<vmem>>, vector<8x16xbf16>
    %cst_178 = arith.constant dense<0.000000e+00> : vector<8x64xf32>
    %309 = tpu.matmul %308, %307, %cst_178 {dimension_numbers = #tpu.dot_dimension_numbers<[1], [0], [0], [1], [0, 0, 1, 1], [], []>} : vector<8x16xbf16>, vector<16x64xbf16>, vector<8x64xf32> -> vector<8x64xf32>
    %310 = arith.addf %302, %309 : vector<8x64xf32>
    %c0_179 = arith.constant 0 : index
    %c117_180 = arith.constant 117 : index
    %311 = vector.load %arg13[%c0_179, %c117_180] : memref<16x320xbf16, #tpu.memory_space<vmem>>, vector<16x64xbf16>
    %cst_181 = arith.constant 0.000000e+00 : bf16
    %312 = vector.broadcast %cst_181 : bf16 to vector<16x64xbf16>
    %313 = vector.shape_cast %15 : vector<1x64xi1> to vector<1x64xi1>
    %314 = vector.broadcast %313 : vector<1x64xi1> to vector<16x64xi1>
    %315 = arith.select %314, %311, %312 : vector<16x64xi1>, vector<16x64xbf16>
    %c0_182 = arith.constant 0 : index
    %c128_183 = arith.constant 128 : index
    %316 = vector.load %arg6[%c0_182, %c128_183] : memref<8x432xbf16, #tpu.memory_space<vmem>>, vector<8x16xbf16>
    %cst_184 = arith.constant dense<0.000000e+00> : vector<8x64xf32>
    %317 = tpu.matmul %316, %315, %cst_184 {dimension_numbers = #tpu.dot_dimension_numbers<[1], [0], [0], [1], [0, 0, 1, 1], [], []>} : vector<8x16xbf16>, vector<16x64xbf16>, vector<8x64xf32> -> vector<8x64xf32>
    %318 = arith.addf %310, %317 : vector<8x64xf32>
    %c0_185 = arith.constant 0 : index
    %c123_186 = arith.constant 123 : index
    %319 = vector.load %arg13[%c0_185, %c123_186] : memref<16x320xbf16, #tpu.memory_space<vmem>>, vector<16x64xbf16>
    %cst_187 = arith.constant 0.000000e+00 : bf16
    %320 = vector.broadcast %cst_187 : bf16 to vector<16x64xbf16>
    %321 = vector.shape_cast %12 : vector<1x64xi1> to vector<1x64xi1>
    %322 = vector.broadcast %321 : vector<1x64xi1> to vector<16x64xi1>
    %323 = arith.select %322, %319, %320 : vector<16x64xi1>, vector<16x64xbf16>
    %c0_188 = arith.constant 0 : index
    %c144_189 = arith.constant 144 : index
    %324 = vector.load %arg6[%c0_188, %c144_189] : memref<8x432xbf16, #tpu.memory_space<vmem>>, vector<8x16xbf16>
    %cst_190 = arith.constant dense<0.000000e+00> : vector<8x64xf32>
    %325 = tpu.matmul %324, %323, %cst_190 {dimension_numbers = #tpu.dot_dimension_numbers<[1], [0], [0], [1], [0, 0, 1, 1], [], []>} : vector<8x16xbf16>, vector<16x64xbf16>, vector<8x64xf32> -> vector<8x64xf32>
    %326 = arith.addf %318, %325 : vector<8x64xf32>
    %c0_191 = arith.constant 0 : index
    %c124_192 = arith.constant 124 : index
    %327 = vector.load %arg13[%c0_191, %c124_192] : memref<16x320xbf16, #tpu.memory_space<vmem>>, vector<16x64xbf16>
    %cst_193 = arith.constant 0.000000e+00 : bf16
    %328 = vector.broadcast %cst_193 : bf16 to vector<16x64xbf16>
    %329 = vector.shape_cast %5 : vector<1x64xi1> to vector<1x64xi1>
    %330 = vector.broadcast %329 : vector<1x64xi1> to vector<16x64xi1>
    %331 = arith.select %330, %327, %328 : vector<16x64xi1>, vector<16x64xbf16>
    %c0_194 = arith.constant 0 : index
    %c160_195 = arith.constant 160 : index
    %332 = vector.load %arg6[%c0_194, %c160_195] : memref<8x432xbf16, #tpu.memory_space<vmem>>, vector<8x16xbf16>
    %cst_196 = arith.constant dense<0.000000e+00> : vector<8x64xf32>
    %333 = tpu.matmul %332, %331, %cst_196 {dimension_numbers = #tpu.dot_dimension_numbers<[1], [0], [0], [1], [0, 0, 1, 1], [], []>} : vector<8x16xbf16>, vector<16x64xbf16>, vector<8x64xf32> -> vector<8x64xf32>
    %334 = arith.addf %326, %333 : vector<8x64xf32>
    %c0_197 = arith.constant 0 : index
    %c125_198 = arith.constant 125 : index
    %335 = vector.load %arg13[%c0_197, %c125_198] : memref<16x320xbf16, #tpu.memory_space<vmem>>, vector<16x64xbf16>
    %cst_199 = arith.constant 0.000000e+00 : bf16
    %336 = vector.broadcast %cst_199 : bf16 to vector<16x64xbf16>
    %337 = vector.shape_cast %13 : vector<1x64xi1> to vector<1x64xi1>
    %338 = vector.broadcast %337 : vector<1x64xi1> to vector<16x64xi1>
    %339 = arith.select %338, %335, %336 : vector<16x64xi1>, vector<16x64xbf16>
    %c0_200 = arith.constant 0 : index
    %c176_201 = arith.constant 176 : index
    %340 = vector.load %arg6[%c0_200, %c176_201] : memref<8x432xbf16, #tpu.memory_space<vmem>>, vector<8x16xbf16>
    %cst_202 = arith.constant dense<0.000000e+00> : vector<8x64xf32>
    %341 = tpu.matmul %340, %339, %cst_202 {dimension_numbers = #tpu.dot_dimension_numbers<[1], [0], [0], [1], [0, 0, 1, 1], [], []>} : vector<8x16xbf16>, vector<16x64xbf16>, vector<8x64xf32> -> vector<8x64xf32>
    %342 = arith.addf %334, %341 : vector<8x64xf32>
    %c0_203 = arith.constant 0 : index
    %c127_204 = arith.constant 127 : index
    %343 = vector.load %arg13[%c0_203, %c127_204] : memref<16x320xbf16, #tpu.memory_space<vmem>>, vector<16x64xbf16>
    %cst_205 = arith.constant 0.000000e+00 : bf16
    %344 = vector.broadcast %cst_205 : bf16 to vector<16x64xbf16>
    %345 = vector.shape_cast %9 : vector<1x64xi1> to vector<1x64xi1>
    %346 = vector.broadcast %345 : vector<1x64xi1> to vector<16x64xi1>
    %347 = arith.select %346, %343, %344 : vector<16x64xi1>, vector<16x64xbf16>
    %c0_206 = arith.constant 0 : index
    %c192_207 = arith.constant 192 : index
    %348 = vector.load %arg6[%c0_206, %c192_207] : memref<8x432xbf16, #tpu.memory_space<vmem>>, vector<8x16xbf16>
    %cst_208 = arith.constant dense<0.000000e+00> : vector<8x64xf32>
    %349 = tpu.matmul %348, %347, %cst_208 {dimension_numbers = #tpu.dot_dimension_numbers<[1], [0], [0], [1], [0, 0, 1, 1], [], []>} : vector<8x16xbf16>, vector<16x64xbf16>, vector<8x64xf32> -> vector<8x64xf32>
    %350 = arith.addf %342, %349 : vector<8x64xf32>
    %c0_209 = arith.constant 0 : index
    %c128_210 = arith.constant 128 : index
    %351 = vector.load %arg13[%c0_209, %c128_210] : memref<16x320xbf16, #tpu.memory_space<vmem>>, vector<16x64xbf16>
    %c0_211 = arith.constant 0 : index
    %c208_212 = arith.constant 208 : index
    %352 = vector.load %arg6[%c0_211, %c208_212] : memref<8x432xbf16, #tpu.memory_space<vmem>>, vector<8x16xbf16>
    %cst_213 = arith.constant dense<0.000000e+00> : vector<8x64xf32>
    %353 = tpu.matmul %352, %351, %cst_213 {dimension_numbers = #tpu.dot_dimension_numbers<[1], [0], [0], [1], [0, 0, 1, 1], [], []>} : vector<8x16xbf16>, vector<16x64xbf16>, vector<8x64xf32> -> vector<8x64xf32>
    %354 = arith.addf %350, %353 : vector<8x64xf32>
    %c0_214 = arith.constant 0 : index
    %c129_215 = arith.constant 129 : index
    %355 = vector.load %arg13[%c0_214, %c129_215] : memref<16x320xbf16, #tpu.memory_space<vmem>>, vector<16x64xbf16>
    %cst_216 = arith.constant 0.000000e+00 : bf16
    %356 = vector.broadcast %cst_216 : bf16 to vector<16x64xbf16>
    %357 = vector.shape_cast %11 : vector<1x64xi1> to vector<1x64xi1>
    %358 = vector.broadcast %357 : vector<1x64xi1> to vector<16x64xi1>
    %359 = arith.select %358, %355, %356 : vector<16x64xi1>, vector<16x64xbf16>
    %c0_217 = arith.constant 0 : index
    %c224_218 = arith.constant 224 : index
    %360 = vector.load %arg6[%c0_217, %c224_218] : memref<8x432xbf16, #tpu.memory_space<vmem>>, vector<8x16xbf16>
    %cst_219 = arith.constant dense<0.000000e+00> : vector<8x64xf32>
    %361 = tpu.matmul %360, %359, %cst_219 {dimension_numbers = #tpu.dot_dimension_numbers<[1], [0], [0], [1], [0, 0, 1, 1], [], []>} : vector<8x16xbf16>, vector<16x64xbf16>, vector<8x64xf32> -> vector<8x64xf32>
    %362 = arith.addf %354, %361 : vector<8x64xf32>
    %c0_220 = arith.constant 0 : index
    %c131_221 = arith.constant 131 : index
    %363 = vector.load %arg13[%c0_220, %c131_221] : memref<16x320xbf16, #tpu.memory_space<vmem>>, vector<16x64xbf16>
    %cst_222 = arith.constant 0.000000e+00 : bf16
    %364 = vector.broadcast %cst_222 : bf16 to vector<16x64xbf16>
    %365 = vector.shape_cast %14 : vector<1x64xi1> to vector<1x64xi1>
    %366 = vector.broadcast %365 : vector<1x64xi1> to vector<16x64xi1>
    %367 = arith.select %366, %363, %364 : vector<16x64xi1>, vector<16x64xbf16>
    %c0_223 = arith.constant 0 : index
    %c240_224 = arith.constant 240 : index
    %368 = vector.load %arg6[%c0_223, %c240_224] : memref<8x432xbf16, #tpu.memory_space<vmem>>, vector<8x16xbf16>
    %cst_225 = arith.constant dense<0.000000e+00> : vector<8x64xf32>
    %369 = tpu.matmul %368, %367, %cst_225 {dimension_numbers = #tpu.dot_dimension_numbers<[1], [0], [0], [1], [0, 0, 1, 1], [], []>} : vector<8x16xbf16>, vector<16x64xbf16>, vector<8x64xf32> -> vector<8x64xf32>
    %370 = arith.addf %362, %369 : vector<8x64xf32>
    %c0_226 = arith.constant 0 : index
    %c132_227 = arith.constant 132 : index
    %371 = vector.load %arg13[%c0_226, %c132_227] : memref<16x320xbf16, #tpu.memory_space<vmem>>, vector<16x64xbf16>
    %cst_228 = arith.constant 0.000000e+00 : bf16
    %372 = vector.broadcast %cst_228 : bf16 to vector<16x64xbf16>
    %373 = vector.shape_cast %7 : vector<1x64xi1> to vector<1x64xi1>
    %374 = vector.broadcast %373 : vector<1x64xi1> to vector<16x64xi1>
    %375 = arith.select %374, %371, %372 : vector<16x64xi1>, vector<16x64xbf16>
    %c0_229 = arith.constant 0 : index
    %c256_230 = arith.constant 256 : index
    %376 = vector.load %arg6[%c0_229, %c256_230] : memref<8x432xbf16, #tpu.memory_space<vmem>>, vector<8x16xbf16>
    %cst_231 = arith.constant dense<0.000000e+00> : vector<8x64xf32>
    %377 = tpu.matmul %376, %375, %cst_231 {dimension_numbers = #tpu.dot_dimension_numbers<[1], [0], [0], [1], [0, 0, 1, 1], [], []>} : vector<8x16xbf16>, vector<16x64xbf16>, vector<8x64xf32> -> vector<8x64xf32>
    %378 = arith.addf %370, %377 : vector<8x64xf32>
    %c0_232 = arith.constant 0 : index
    %c133_233 = arith.constant 133 : index
    %379 = vector.load %arg13[%c0_232, %c133_233] : memref<16x320xbf16, #tpu.memory_space<vmem>>, vector<16x64xbf16>
    %cst_234 = arith.constant 0.000000e+00 : bf16
    %380 = vector.broadcast %cst_234 : bf16 to vector<16x64xbf16>
    %381 = vector.shape_cast %15 : vector<1x64xi1> to vector<1x64xi1>
    %382 = vector.broadcast %381 : vector<1x64xi1> to vector<16x64xi1>
    %383 = arith.select %382, %379, %380 : vector<16x64xi1>, vector<16x64xbf16>
    %c0_235 = arith.constant 0 : index
    %c272_236 = arith.constant 272 : index
    %384 = vector.load %arg6[%c0_235, %c272_236] : memref<8x432xbf16, #tpu.memory_space<vmem>>, vector<8x16xbf16>
    %cst_237 = arith.constant dense<0.000000e+00> : vector<8x64xf32>
    %385 = tpu.matmul %384, %383, %cst_237 {dimension_numbers = #tpu.dot_dimension_numbers<[1], [0], [0], [1], [0, 0, 1, 1], [], []>} : vector<8x16xbf16>, vector<16x64xbf16>, vector<8x64xf32> -> vector<8x64xf32>
    %386 = arith.addf %378, %385 : vector<8x64xf32>
    %c0_238 = arith.constant 0 : index
    %c139_239 = arith.constant 139 : index
    %387 = vector.load %arg13[%c0_238, %c139_239] : memref<16x320xbf16, #tpu.memory_space<vmem>>, vector<16x64xbf16>
    %cst_240 = arith.constant 0.000000e+00 : bf16
    %388 = vector.broadcast %cst_240 : bf16 to vector<16x64xbf16>
    %389 = vector.shape_cast %12 : vector<1x64xi1> to vector<1x64xi1>
    %390 = vector.broadcast %389 : vector<1x64xi1> to vector<16x64xi1>
    %391 = arith.select %390, %387, %388 : vector<16x64xi1>, vector<16x64xbf16>
    %c0_241 = arith.constant 0 : index
    %c288_242 = arith.constant 288 : index
    %392 = vector.load %arg6[%c0_241, %c288_242] : memref<8x432xbf16, #tpu.memory_space<vmem>>, vector<8x16xbf16>
    %cst_243 = arith.constant dense<0.000000e+00> : vector<8x64xf32>
    %393 = tpu.matmul %392, %391, %cst_243 {dimension_numbers = #tpu.dot_dimension_numbers<[1], [0], [0], [1], [0, 0, 1, 1], [], []>} : vector<8x16xbf16>, vector<16x64xbf16>, vector<8x64xf32> -> vector<8x64xf32>
    %394 = arith.addf %386, %393 : vector<8x64xf32>
    %c0_244 = arith.constant 0 : index
    %c140_245 = arith.constant 140 : index
    %395 = vector.load %arg13[%c0_244, %c140_245] : memref<16x320xbf16, #tpu.memory_space<vmem>>, vector<16x64xbf16>
    %cst_246 = arith.constant 0.000000e+00 : bf16
    %396 = vector.broadcast %cst_246 : bf16 to vector<16x64xbf16>
    %397 = vector.shape_cast %5 : vector<1x64xi1> to vector<1x64xi1>
    %398 = vector.broadcast %397 : vector<1x64xi1> to vector<16x64xi1>
    %399 = arith.select %398, %395, %396 : vector<16x64xi1>, vector<16x64xbf16>
    %c0_247 = arith.constant 0 : index
    %c304_248 = arith.constant 304 : index
    %400 = vector.load %arg6[%c0_247, %c304_248] : memref<8x432xbf16, #tpu.memory_space<vmem>>, vector<8x16xbf16>
    %cst_249 = arith.constant dense<0.000000e+00> : vector<8x64xf32>
    %401 = tpu.matmul %400, %399, %cst_249 {dimension_numbers = #tpu.dot_dimension_numbers<[1], [0], [0], [1], [0, 0, 1, 1], [], []>} : vector<8x16xbf16>, vector<16x64xbf16>, vector<8x64xf32> -> vector<8x64xf32>
    %402 = arith.addf %394, %401 : vector<8x64xf32>
    %c0_250 = arith.constant 0 : index
    %c141_251 = arith.constant 141 : index
    %403 = vector.load %arg13[%c0_250, %c141_251] : memref<16x320xbf16, #tpu.memory_space<vmem>>, vector<16x64xbf16>
    %cst_252 = arith.constant 0.000000e+00 : bf16
    %404 = vector.broadcast %cst_252 : bf16 to vector<16x64xbf16>
    %405 = vector.shape_cast %13 : vector<1x64xi1> to vector<1x64xi1>
    %406 = vector.broadcast %405 : vector<1x64xi1> to vector<16x64xi1>
    %407 = arith.select %406, %403, %404 : vector<16x64xi1>, vector<16x64xbf16>
    %c0_253 = arith.constant 0 : index
    %c320_254 = arith.constant 320 : index
    %408 = vector.load %arg6[%c0_253, %c320_254] : memref<8x432xbf16, #tpu.memory_space<vmem>>, vector<8x16xbf16>
    %cst_255 = arith.constant dense<0.000000e+00> : vector<8x64xf32>
    %409 = tpu.matmul %408, %407, %cst_255 {dimension_numbers = #tpu.dot_dimension_numbers<[1], [0], [0], [1], [0, 0, 1, 1], [], []>} : vector<8x16xbf16>, vector<16x64xbf16>, vector<8x64xf32> -> vector<8x64xf32>
    %410 = arith.addf %402, %409 : vector<8x64xf32>
    %c0_256 = arith.constant 0 : index
    %c143_257 = arith.constant 143 : index
    %411 = vector.load %arg13[%c0_256, %c143_257] : memref<16x320xbf16, #tpu.memory_space<vmem>>, vector<16x64xbf16>
    %cst_258 = arith.constant 0.000000e+00 : bf16
    %412 = vector.broadcast %cst_258 : bf16 to vector<16x64xbf16>
    %413 = vector.shape_cast %9 : vector<1x64xi1> to vector<1x64xi1>
    %414 = vector.broadcast %413 : vector<1x64xi1> to vector<16x64xi1>
    %415 = arith.select %414, %411, %412 : vector<16x64xi1>, vector<16x64xbf16>
    %c0_259 = arith.constant 0 : index
    %c336_260 = arith.constant 336 : index
    %416 = vector.load %arg6[%c0_259, %c336_260] : memref<8x432xbf16, #tpu.memory_space<vmem>>, vector<8x16xbf16>
    %cst_261 = arith.constant dense<0.000000e+00> : vector<8x64xf32>
    %417 = tpu.matmul %416, %415, %cst_261 {dimension_numbers = #tpu.dot_dimension_numbers<[1], [0], [0], [1], [0, 0, 1, 1], [], []>} : vector<8x16xbf16>, vector<16x64xbf16>, vector<8x64xf32> -> vector<8x64xf32>
    %418 = arith.addf %410, %417 : vector<8x64xf32>
    %c0_262 = arith.constant 0 : index
    %c144_263 = arith.constant 144 : index
    %419 = vector.load %arg13[%c0_262, %c144_263] : memref<16x320xbf16, #tpu.memory_space<vmem>>, vector<16x64xbf16>
    %c0_264 = arith.constant 0 : index
    %c352_265 = arith.constant 352 : index
    %420 = vector.load %arg6[%c0_264, %c352_265] : memref<8x432xbf16, #tpu.memory_space<vmem>>, vector<8x16xbf16>
    %cst_266 = arith.constant dense<0.000000e+00> : vector<8x64xf32>
    %421 = tpu.matmul %420, %419, %cst_266 {dimension_numbers = #tpu.dot_dimension_numbers<[1], [0], [0], [1], [0, 0, 1, 1], [], []>} : vector<8x16xbf16>, vector<16x64xbf16>, vector<8x64xf32> -> vector<8x64xf32>
    %422 = arith.addf %418, %421 : vector<8x64xf32>
    %c0_267 = arith.constant 0 : index
    %c145_268 = arith.constant 145 : index
    %423 = vector.load %arg13[%c0_267, %c145_268] : memref<16x320xbf16, #tpu.memory_space<vmem>>, vector<16x64xbf16>
    %cst_269 = arith.constant 0.000000e+00 : bf16
    %424 = vector.broadcast %cst_269 : bf16 to vector<16x64xbf16>
    %425 = vector.shape_cast %11 : vector<1x64xi1> to vector<1x64xi1>
    %426 = vector.broadcast %425 : vector<1x64xi1> to vector<16x64xi1>
    %427 = arith.select %426, %423, %424 : vector<16x64xi1>, vector<16x64xbf16>
    %c0_270 = arith.constant 0 : index
    %c368_271 = arith.constant 368 : index
    %428 = vector.load %arg6[%c0_270, %c368_271] : memref<8x432xbf16, #tpu.memory_space<vmem>>, vector<8x16xbf16>
    %cst_272 = arith.constant dense<0.000000e+00> : vector<8x64xf32>
    %429 = tpu.matmul %428, %427, %cst_272 {dimension_numbers = #tpu.dot_dimension_numbers<[1], [0], [0], [1], [0, 0, 1, 1], [], []>} : vector<8x16xbf16>, vector<16x64xbf16>, vector<8x64xf32> -> vector<8x64xf32>
    %430 = arith.addf %422, %429 : vector<8x64xf32>
    %c0_273 = arith.constant 0 : index
    %c147_274 = arith.constant 147 : index
    %431 = vector.load %arg13[%c0_273, %c147_274] : memref<16x320xbf16, #tpu.memory_space<vmem>>, vector<16x64xbf16>
    %cst_275 = arith.constant 0.000000e+00 : bf16
    %432 = vector.broadcast %cst_275 : bf16 to vector<16x64xbf16>
    %433 = vector.shape_cast %14 : vector<1x64xi1> to vector<1x64xi1>
    %434 = vector.broadcast %433 : vector<1x64xi1> to vector<16x64xi1>
    %435 = arith.select %434, %431, %432 : vector<16x64xi1>, vector<16x64xbf16>
    %c0_276 = arith.constant 0 : index
    %c384_277 = arith.constant 384 : index
    %436 = vector.load %arg6[%c0_276, %c384_277] : memref<8x432xbf16, #tpu.memory_space<vmem>>, vector<8x16xbf16>
    %cst_278 = arith.constant dense<0.000000e+00> : vector<8x64xf32>
    %437 = tpu.matmul %436, %435, %cst_278 {dimension_numbers = #tpu.dot_dimension_numbers<[1], [0], [0], [1], [0, 0, 1, 1], [], []>} : vector<8x16xbf16>, vector<16x64xbf16>, vector<8x64xf32> -> vector<8x64xf32>
    %438 = arith.addf %430, %437 : vector<8x64xf32>
    %c0_279 = arith.constant 0 : index
    %c148_280 = arith.constant 148 : index
    %439 = vector.load %arg13[%c0_279, %c148_280] : memref<16x320xbf16, #tpu.memory_space<vmem>>, vector<16x64xbf16>
    %cst_281 = arith.constant 0.000000e+00 : bf16
    %440 = vector.broadcast %cst_281 : bf16 to vector<16x64xbf16>
    %441 = vector.shape_cast %7 : vector<1x64xi1> to vector<1x64xi1>
    %442 = vector.broadcast %441 : vector<1x64xi1> to vector<16x64xi1>
    %443 = arith.select %442, %439, %440 : vector<16x64xi1>, vector<16x64xbf16>
    %c0_282 = arith.constant 0 : index
    %c400_283 = arith.constant 400 : index
    %444 = vector.load %arg6[%c0_282, %c400_283] : memref<8x432xbf16, #tpu.memory_space<vmem>>, vector<8x16xbf16>
    %cst_284 = arith.constant dense<0.000000e+00> : vector<8x64xf32>
    %445 = tpu.matmul %444, %443, %cst_284 {dimension_numbers = #tpu.dot_dimension_numbers<[1], [0], [0], [1], [0, 0, 1, 1], [], []>} : vector<8x16xbf16>, vector<16x64xbf16>, vector<8x64xf32> -> vector<8x64xf32>
    %446 = arith.addf %438, %445 : vector<8x64xf32>
    %c0_285 = arith.constant 0 : index
    %c149_286 = arith.constant 149 : index
    %447 = vector.load %arg13[%c0_285, %c149_286] : memref<16x320xbf16, #tpu.memory_space<vmem>>, vector<16x64xbf16>
    %cst_287 = arith.constant 0.000000e+00 : bf16
    %448 = vector.broadcast %cst_287 : bf16 to vector<16x64xbf16>
    %449 = vector.shape_cast %15 : vector<1x64xi1> to vector<1x64xi1>
    %450 = vector.broadcast %449 : vector<1x64xi1> to vector<16x64xi1>
    %451 = arith.select %450, %447, %448 : vector<16x64xi1>, vector<16x64xbf16>
    %c0_288 = arith.constant 0 : index
    %c416_289 = arith.constant 416 : index
    %452 = vector.load %arg6[%c0_288, %c416_289] : memref<8x432xbf16, #tpu.memory_space<vmem>>, vector<8x16xbf16>
    %cst_290 = arith.constant dense<0.000000e+00> : vector<8x64xf32>
    %453 = tpu.matmul %452, %451, %cst_290 {dimension_numbers = #tpu.dot_dimension_numbers<[1], [0], [0], [1], [0, 0, 1, 1], [], []>} : vector<8x16xbf16>, vector<16x64xbf16>, vector<8x64xf32> -> vector<8x64xf32>
    %454 = arith.addf %446, %453 : vector<8x64xf32>
    %455 = vector.shape_cast %454 : vector<8x64xf32> to vector<1x8x64xf32>
    %cst_291 = arith.constant dense<0.000000e+00> : vector<1xf32>
    %456 = vector.multi_reduction <add>, %455, %cst_291 [1, 2] : vector<1x8x64xf32> to vector<1xf32>
    %457 = vector.shape_cast %456 : vector<1xf32> to vector<1x1x1xf32>
    %458 = vector.extract %457[0, 0, 0] : f32 from vector<1x1x1xf32>
    %459 = arith.mulf %454, %454 : vector<8x64xf32>
    %460 = vector.shape_cast %459 : vector<8x64xf32> to vector<1x8x64xf32>
    %cst_292 = arith.constant dense<0.000000e+00> : vector<1xf32>
    %461 = vector.multi_reduction <add>, %460, %cst_292 [1, 2] : vector<1x8x64xf32> to vector<1xf32>
    %462 = vector.shape_cast %461 : vector<1xf32> to vector<1x1x1xf32>
    %463 = vector.extract %462[0, 0, 0] : f32 from vector<1x1x1xf32>
    %cst_293 = arith.constant 5.120000e+02 : f32
    %464 = arith.divf %458, %cst_293 : f32
    %cst_294 = arith.constant 5.120000e+02 : f32
    %465 = arith.divf %463, %cst_294 : f32
    %466 = arith.mulf %464, %464 : f32
    %467 = arith.subf %465, %466 : f32
    %c0_295 = arith.constant 0 : index
    %c0_296 = arith.constant 0 : index
    %468 = vector.load %arg7[%c0_295, %c0_296] : memref<8x1xf32, #tpu.memory_space<vmem>>, vector<8x1xf32>
    %cst_297 = arith.constant 9.99999974E-6 : f32
    %469 = arith.addf %467, %cst_297 : f32
    %470 = math.rsqrt %469 : f32
    %471 = vector.broadcast %470 : f32 to vector<8x1xf32>
    %472 = arith.mulf %468, %471 : vector<8x1xf32>
    %c0_298 = arith.constant 0 : index
    %c0_299 = arith.constant 0 : index
    %473 = vector.load %arg8[%c0_298, %c0_299] : memref<8x1xf32, #tpu.memory_space<vmem>>, vector<8x1xf32>
    %474 = vector.broadcast %464 : f32 to vector<8x1xf32>
    %475 = arith.mulf %474, %472 : vector<8x1xf32>
    %476 = arith.subf %473, %475 : vector<8x1xf32>
    %477 = vector.broadcast %472 : vector<8x1xf32> to vector<8x64xf32>
    %478 = arith.mulf %454, %477 : vector<8x64xf32>
    %479 = vector.broadcast %476 : vector<8x1xf32> to vector<8x64xf32>
    %480 = arith.addf %478, %479 : vector<8x64xf32>
    %c0_300 = arith.constant 0 : index
    %c0_301 = arith.constant 0 : index
    %c0_302 = arith.constant 0 : index
    %481 = vector.load %arg9[%c0_300, %c0_301, %c0_302] : memref<1x32x1xf32, #tpu.memory_space<vmem>>, vector<1x32x1xf32>
    %482 = vector.shape_cast %481 : vector<1x32x1xf32> to vector<32x1xf32>
    %483 = arith.negf %482 : vector<32x1xf32>
    %484 = math.exp %483 : vector<32x1xf32>
    %cst_303 = arith.constant 1.000000e+00 : f32
    %485 = vector.broadcast %cst_303 : f32 to vector<32x1xf32>
    %486 = arith.addf %485, %484 : vector<32x1xf32>
    %487 = arith.divf %485, %486 : vector<32x1xf32>
    %488 = arith.mulf %482, %487 : vector<32x1xf32>
    %c0_304 = arith.constant 0 : index
    %c0_305 = arith.constant 0 : index
    %489 = vector.load %arg10[%c0_304, %c0_305] : memref<8x32xf32, #tpu.memory_space<vmem>>, vector<8x32xf32>
    %cst_306 = arith.constant dense<0.000000e+00> : vector<8x1xf32>
    %490 = tpu.matmul %489, %488, %cst_306 {dimension_numbers = #tpu.dot_dimension_numbers<[1], [0], [0], [1], [0, 0, 1, 1], [], []>} : vector<8x32xf32>, vector<32x1xf32>, vector<8x1xf32> -> vector<8x1xf32>
    %c0_307 = arith.constant 0 : index
    %c0_308 = arith.constant 0 : index
    %491 = vector.load %arg11[%c0_307, %c0_308] : memref<8x1xf32, #tpu.memory_space<vmem>>, vector<8x1xf32>
    %492 = arith.addf %490, %491 : vector<8x1xf32>
    %493 = vector.broadcast %492 : vector<8x1xf32> to vector<8x64xf32>
    %494 = arith.addf %480, %493 : vector<8x64xf32>
    %c0_309 = arith.constant 0 : index
    %c0_310 = arith.constant 0 : index
    %c0_311 = arith.constant 0 : index
    %495 = vector.load %arg12[%c0_309, %c0_310, %c0_311] : memref<1x8x64xf32, #tpu.memory_space<vmem>>, vector<1x8x64xf32>
    %496 = vector.shape_cast %495 : vector<1x8x64xf32> to vector<8x64xf32>
    %497 = vector.shape_cast %494 : vector<8x64xf32> to vector<1x8x64xf32>
    tpu.vector_store %arg12[%c0_309, %c0_310, %c0_311], %497 {strides = array<i32>} : memref<1x8x64xf32, #tpu.memory_space<vmem>>, vector<1x8x64xf32>,
    return
  }
  func.func @transform_0(%arg0: i32) -> (i32, i32, i32) {
    %c0_i32 = arith.constant 0 : i32
    %c0_i32_0 = arith.constant 0 : i32
    %c0_i32_1 = arith.constant 0 : i32
    return %arg0, %c0_i32, %c0_i32_0 : i32, i32, i32
  }
  func.func @transform_1(%arg0: i32) -> (i32, i32) {
    %c0_i32 = arith.constant 0 : i32
    %c0_i32_0 = arith.constant 0 : i32
    %c0_i32_1 = arith.constant 0 : i32
    return %c0_i32, %c0_i32_0 : i32, i32
  }
  func.func @transform_2(%arg0: i32) -> (i32, i32) {
    %c0_i32 = arith.constant 0 : i32
    %c0_i32_0 = arith.constant 0 : i32
    %c0_i32_1 = arith.constant 0 : i32
    return %c0_i32, %c0_i32_0 : i32, i32
  }
  func.func @transform_3(%arg0: i32) -> (i32, i32) {
    %c0_i32 = arith.constant 0 : i32
    %c0_i32_0 = arith.constant 0 : i32
    %c0_i32_1 = arith.constant 0 : i32
    return %c0_i32, %c0_i32_0 : i32, i32
  }
  func.func @transform_4(%arg0: i32) -> (i32, i32) {
    %c0_i32 = arith.constant 0 : i32
    %c0_i32_0 = arith.constant 0 : i32
    %c0_i32_1 = arith.constant 0 : i32
    return %c0_i32, %c0_i32_0 : i32, i32
  }
  func.func @transform_5(%arg0: i32) -> (i32, i32) {
    %c0_i32 = arith.constant 0 : i32
    %c0_i32_0 = arith.constant 0 : i32
    %c0_i32_1 = arith.constant 0 : i32
    return %c0_i32, %c0_i32_0 : i32, i32
  }
  func.func @transform_6(%arg0: i32) -> (i32, i32) {
    %c0_i32 = arith.constant 0 : i32
    %c0_i32_0 = arith.constant 0 : i32
    %c0_i32_1 = arith.constant 0 : i32
    return %c0_i32, %c0_i32_0 : i32, i32
  }
  func.func @transform_7(%arg0: i32) -> (i32, i32) {
    %c0_i32 = arith.constant 0 : i32
    %c0_i32_0 = arith.constant 0 : i32
    %c0_i32_1 = arith.constant 0 : i32
    return %c0_i32, %c0_i32_0 : i32, i32
  }
  func.func @transform_8(%arg0: i32) -> (i32, i32, i32) {
    %c0_i32 = arith.constant 0 : i32
    %c0_i32_0 = arith.constant 0 : i32
    %c0_i32_1 = arith.constant 0 : i32
    return %arg0, %c0_i32, %c0_i32_0 : i32, i32, i32
  }
  func.func @transform_9(%arg0: i32) -> (i32, i32) {
    %c0_i32 = arith.constant 0 : i32
    %c0_i32_0 = arith.constant 0 : i32
    %c0_i32_1 = arith.constant 0 : i32
    return %c0_i32, %c0_i32_0 : i32, i32
  }
  func.func @transform_10(%arg0: i32) -> (i32, i32) {
    %c0_i32 = arith.constant 0 : i32
    %c0_i32_0 = arith.constant 0 : i32
    %c0_i32_1 = arith.constant 0 : i32
    return %c0_i32, %c0_i32_0 : i32, i32
  }
  func.func @transform_11(%arg0: i32) -> (i32, i32, i32) {
    %c0_i32 = arith.constant 0 : i32
    %c0_i32_0 = arith.constant 0 : i32
    %c0_i32_1 = arith.constant 0 : i32
    return %arg0, %c0_i32, %c0_i32_0 : i32, i32, i32
  }
}

</mosaic_0001>

<bundles_post_ra>
// kernel: downsample_block.2
= control target key start
LH: loop header
LB: loop body
LE: loop exit
PB: predicated region body
PF: predicated region fallthrough
CT: control target
= control target key end

     0   :  { %s6694_s0 = inlined_call_operand.hbm [shape: bf16[2,4,64], index: 0, kind: input, shape index: {}]   ;;  %s6695_s1 = inlined_call_operand.hbm [shape: s32[2,64], index: 1, kind: input, shape index: {}]   ;;  %s6696_s2 = inlined_call_operand.hbm [shape: bf16[4,432], index: 2, kind: input, shape index: {}]   ;;  %s6697_s3 = inlined_call_operand.hbm [shape: f32[4,1], index: 3, kind: input, shape index: {}]   ;;  %s6698_s4 = inlined_call_operand.hbm [shape: f32[4,1], index: 4, kind: input, shape index: {}]   ;;  %s6699_s5 = inlined_call_operand.hbm [shape: bf16[4,432], index: 5, kind: input, shape index: {}]   ;;  %s6700_s6 = inlined_call_operand.hbm [shape: f32[4,1], index: 6, kind: input, shape index: {}]   ;;  %s6701_s7 = inlined_call_operand.hbm [shape: f32[4,1], index: 7, kind: input, shape index: {}]   ;;  %s6702_s8 = inlined_call_operand.hbm [shape: bf16[2,4,64], index: 8, kind: output, shape index: {}]  }
   0x1   :  { %6806 = sst [smem:[#allocation35_spill]] %s6694_s0 }
   0x2   :  { %6807 = sst [smem:[#allocation36_spill]] %s6695_s1 }
   0x3   :  { %6808 = sst [smem:[#allocation37_spill]] %s6696_s2 }
   0x4   :  { %6809 = sst [smem:[#allocation38_spill]] %s6697_s3 }
   0x5   :  { %6810 = sst [smem:[#allocation39_spill]] %s6698_s4 }
   0x6   :  { %6811 = sst [smem:[#allocation40_spill]] %s6699_s5 }
   0x7   :  { %6812 = sst [smem:[#allocation41_spill]] %s6700_s6 }
   0x8   :  { %6813 = sst [smem:[#allocation42_spill]] %s6701_s7 }
   0x9   :  { %6814 = sst [smem:[#allocation43_spill]] %s6702_s8 }
   0xa   :  { %13 = vsyncpa [#allocation4], 0 }
   0xb   :  { %15 = vsyncpa [#allocation4 + $0x1], 0 }
   0xc   :  { %16 = vsyncpa [#allocation7], 0 }
   0xd   :  { %17 = vsyncpa [#allocation10], 0 }
   0xe   :  { %18 = vsyncpa [#allocation13], 0 }
   0xf   :  { %19 = vsyncpa [#allocation16], 0 }
  0x10   :  { %20 = vsyncpa [#allocation5], 0 }
  0x11   :  { %22 = vsyncpa [#allocation5 + $0x1], 0  ;;  %s5544_s27 = smov 0   ;;  %s5546_s28 = smov 0  }
  0x12   :  { %s5548_s29 = smov 0   ;;  %s5550_s30 = smov 0  }
  0x13 LB: > { %6815 = sst [smem:[#allocation24_spill]] %s5441_s27  ;;  %s5455_s9 = smov [#allocation6]   ;;  %s5453_s30 = sphi %s5550_s30, %s6921_s30   ;;  %s5449_s29 = sphi %s5548_s29, %s6924_s29   ;;  %s5445_s28 = sphi %s5546_s28, %s6923_s28   ;;  %s5441_s27 = sphi %s5544_s27, %s6922_s27  }
  0x14   : > { %6816 = sst [smem:[#allocation25_spill]] %s5445_s28  ;;  %s245_s10 = sshll.u32 %s5455_s9, 4  ;;  %s5570_s10 = int_to_ptr.vmem [resolvable:$true] %s245_s10 }
  0x15   : > { %6817 = sst [smem:[#allocation26_spill]] %s5449_s29  ;;  %s5565_s11 = sadd.s32 4294967295, %s5453_s30  }
  0x16   : > { %6818 = sst [smem:[#allocation27_spill]] %s5453_s30  ;;  %p4215_p0 = scmp.ge.s32.totalorder %s5453_s30, 1 }
  0x17   : > { %6819 = sst [smem:[#allocation28_spill]] %s5565_s11  ;;  %p6703_p1 = scmp.eq.s32.totalorder %s5565_s11, 0 }
  0x18   : > { %p232_p2 = scmp.lt.s32.totalorder %s5453_s30, 3  ;;  %s5456_s13 = smov [#allocation9]  }
  0x19   : > { %s267_s14 = sshll.u32 %s5456_s13, 4  ;;  %s5457_s15 = smov [#allocation12]   ;;  %s5579_s14 = int_to_ptr.vmem [resolvable:$true] %s267_s14 }
  0x1a   : > { %p5572_p3 = pnand %p4215_p0, %p232_p2  ;;  %s289_s16 = sshll.u32 %s5457_s15, 4  ;;  %s5587_s16 = int_to_ptr.vmem [resolvable:$true] %s289_s16 }
  0x1b   : > { %s5458_s18 = smov [#allocation8]   ;;  %s6822_s1 = sld [smem:[#allocation36_spill]] }
  0x1c   : > { %s6820_s12 = scalar_select %p5572_p3, 1, 0 }
  0x1d   : > { %p5016_p5 = pneg %p5572_p3  ;;  %s5589_s19 = sshll.u32 %s5458_s18, 4  ;;  %s257_s19 = int_to_ptr.vmem [resolvable:$true] %s5589_s19 }
  0x1f   : > { %p5583_p6 = pnand %p5016_p5, %p6703_p1 }
  0x21   : > { %s5145_s22 = scalar_lea.hbm %s6822_s1, 32  ;;  %p5599_p8 = pneg %p5583_p6 }
  0x22   : > { %p5146_p7 = scmp.ne.s32.totalorder %s6822_s1, %s5145_s22  ;;  %p5152_p11 = scmp.lt.u32.totalorder %s5145_s22, %s6822_s1 }
  0x24   : > { %p5148_p9 = pnand %p5599_p8, %p5146_p7 }
  0x26   : > { %p5149_p10 = pneg %p5148_p9 }
  0x28   : > { %p5154_p12 = pnand %p5152_p11, %p5149_p10 }
  0x2a   : > { %5157 = shalt.err (!%p5154_p12)
}
  0x2b   : > { %s5158_s13 = scalar_lea.vmem %s5570_s10, 32  ;;  %p5166_p5 = scmp.lt.s32.totalorder %s5570_s10, %s5570_s10 }
  0x2c   : > { %p5159_p13 = scmp.ne.s32.totalorder %s5570_s10, %s5158_s13  ;;  %p5167_p4 = scmp.lt.s32.totalorder %s5158_s13, %s5158_s13 }
  0x2e   : > { %p5161_p0 = pnand %p5159_p13, %p5599_p8  ;;  %p5168_p7 = por %p5167_p4, %p5166_p5 }
  0x30   : > { %p5162_p2 = pneg %p5161_p0 }
  0x32   : > { %p5169_p9 = pnand %p5168_p7, %p5162_p2 }
  0x34   : > { %5172 = shalt.err (!%p5169_p9)
}
  0x35   : > { %5019 = dma.hbm_to_vmem [thread:$0]  (!%p5583_p6), %s6822_s1, 32, %s5570_s10, [#allocation7]  }
  0x36   : > { %s6824_s3 = sld [smem:[#allocation38_spill]] }
  0x3c   : > { %s5173_s22 = scalar_lea.hbm %s6824_s3, 64 }
  0x3d   : > { %p5174_p10 = scmp.ne.s32.totalorder %s6824_s3, %s5173_s22  ;;  %p5180_p12 = scmp.lt.u32.totalorder %s5173_s22, %s6824_s3 }
  0x3f   : > { %p5176_p4 = pnand %p5174_p10, %p5599_p8 }
  0x41   : > { %p5177_p11 = pneg %p5176_p4 }
  0x43   : > { %p5182_p13 = pnand %p5180_p12, %p5177_p11 }
  0x45   : > { %5185 = shalt.err (!%p5182_p13)
}
  0x46   : > { %s5186_s10 = scalar_lea.vmem %s5579_s14, 64  ;;  %p5194_p7 = scmp.lt.s32.totalorder %s5579_s14, %s5579_s14 }
  0x47   : > { %p5187_p0 = scmp.ne.s32.totalorder %s5579_s14, %s5186_s10  ;;  %p5195_p9 = scmp.lt.s32.totalorder %s5186_s10, %s5186_s10 }
  0x49   : > { %p5189_p2 = pnand %p5187_p0, %p5599_p8  ;;  %p5196_p10 = por %p5195_p9, %p5194_p7 }
  0x4b   : > { %p5190_p5 = pneg %p5189_p2 }
  0x4d   : > { %p5197_p4 = pnand %p5196_p10, %p5190_p5 }
  0x4f   : > { %5200 = shalt.err (!%p5197_p4)
}
  0x50   : > { %5025 = dma.hbm_to_vmem [thread:$0]  (!%p5583_p6), %s6824_s3, 64, %s5579_s14, [#allocation10]  }
  0x51   : > { %s6825_s5 = sld [smem:[#allocation40_spill]] }
  0x57   : > { %s5201_s21 = scalar_lea.hbm %s6825_s5, 128 }
  0x58   : > { %p5202_p11 = scmp.ne.s32.totalorder %s6825_s5, %s5201_s21  ;;  %p5208_p0 = scmp.lt.u32.totalorder %s5201_s21, %s6825_s5 }
  0x5a   : > { %p5204_p12 = pnand %p5202_p11, %p5599_p8 }
  0x5c   : > { %p5205_p13 = pneg %p5204_p12 }
  0x5e   : > { %p5210_p2 = pnand %p5208_p0, %p5205_p13 }
  0x60   : > { %5213 = shalt.err (!%p5210_p2)
}
  0x61   : > { %s5214_s14 = scalar_lea.vmem %s5587_s16, 128  ;;  %p5222_p10 = scmp.lt.s32.totalorder %s5587_s16, %s5587_s16 }
  0x62   : > { %p5215_p5 = scmp.ne.s32.totalorder %s5587_s16, %s5214_s14  ;;  %p5223_p4 = scmp.lt.s32.totalorder %s5214_s14, %s5214_s14 }
  0x64   : > { %p5217_p7 = pnand %p5215_p5, %p5599_p8  ;;  %p5224_p11 = por %p5223_p4, %p5222_p10 }
  0x66   : > { %p5218_p9 = pneg %p5217_p7 }
  0x68   : > { %p5225_p12 = pnand %p5224_p11, %p5218_p9 }
  0x6a   : > { %5228 = shalt.err (!%p5225_p12)
}
  0x6b   : > { %5031 = dma.hbm_to_vmem [thread:$0]  (!%p5583_p6), %s6825_s5, 128, %s5587_s16, [#allocation13]  }
  0x6c   : > { %s5459_s13 = smov [#allocation11]   ;;  %s6826_s2 = sld [smem:[#allocation37_spill]] }
  0x6d   : > { %s278_s15 = sshll.u32 %s5459_s13, 4  ;;  %s279_s15 = int_to_ptr.vmem [resolvable:$true] %s278_s15 }
  0x72   : > { %s5229_s21 = scalar_lea.hbm %s6826_s2, 128 }
  0x73   : > { %p5230_p13 = scmp.ne.s32.totalorder %s6826_s2, %s5229_s21  ;;  %p5236_p5 = scmp.lt.u32.totalorder %s5229_s21, %s6826_s2 }
  0x75   : > { %p5232_p0 = pnand %p5230_p13, %p5599_p8 }
  0x77   : > { %p5233_p2 = pneg %p5232_p0 }
  0x79   : > { %p5238_p7 = pnand %p5236_p5, %p5233_p2 }
  0x7b   : > { %5241 = shalt.err (!%p5238_p7)
}
  0x7c   : > { %s5242_s16 = scalar_lea.vmem %s257_s19, 128  ;;  %p5250_p11 = scmp.lt.s32.totalorder %s257_s19, %s257_s19 }
  0x7d   : > { %p5243_p9 = scmp.ne.s32.totalorder %s257_s19, %s5242_s16  ;;  %p5251_p12 = scmp.lt.s32.totalorder %s5242_s16, %s5242_s16 }
  0x7f   : > { %p5245_p10 = pnand %p5243_p9, %p5599_p8  ;;  %p5252_p1 = por %p5251_p12, %p5250_p11 }
  0x81   : > { %p5246_p4 = pneg %p5245_p10 }
  0x83   : > { %p5253_p3 = pnand %p5252_p1, %p5246_p4 }
  0x85   : > { %5256 = shalt.err (!%p5253_p3)
}
  0x86   : > { %5022 = dma.hbm_to_vmem [thread:$0]  (!%p5583_p6), %s6826_s2, 128, %s257_s19, [#allocation7]  }
  0x87   : > { %s6827_s4 = sld [smem:[#allocation39_spill]] }
  0x8d   : > { %s5257_s18 = scalar_lea.hbm %s6827_s4, 64 }
  0x8e   : > { %p5258_p13 = scmp.ne.s32.totalorder %s6827_s4, %s5257_s18  ;;  %p5264_p3 = scmp.lt.u32.totalorder %s5257_s18, %s6827_s4 }
  0x90   : > { %p5260_p0 = pnand %p5258_p13, %p5599_p8 }
  0x92   : > { %p5261_p1 = pneg %p5260_p0 }
  0x94   : > { %p5266_p2 = pnand %p5264_p3, %p5261_p1 }
  0x96   : > { %5269 = shalt.err (!%p5266_p2)
}
  0x97   : > { %s5270_s24 = scalar_lea.vmem %s279_s15, 64  ;;  %p5278_p10 = scmp.lt.s32.totalorder %s279_s15, %s279_s15 }
  0x98   : > { %p5271_p5 = scmp.ne.s32.totalorder %s279_s15, %s5270_s24  ;;  %p5279_p4 = scmp.lt.s32.totalorder %s5270_s24, %s5270_s24 }
  0x9a   : > { %p5273_p7 = pnand %p5271_p5, %p5599_p8  ;;  %p5280_p11 = por %p5279_p4, %p5278_p10 }
  0x9c   : > { %p5274_p9 = pneg %p5273_p7 }
  0x9e   : > { %p5281_p12 = pnand %p5280_p11, %p5274_p9 }
  0xa0   : > { %5284 = shalt.err (!%p5281_p12)
}
  0xa1   : > { %5028 = dma.hbm_to_vmem [thread:$0]  (!%p5583_p6), %s6827_s4, 64, %s279_s15, [#allocation10]  }
  0xa2   : > { %s5460_s16 = smov [#allocation14]   ;;  %s5461_s9 = smov [#allocation15]  }
  0xa3   : > { %s300_s14 = sshll.u32 %s5460_s16, 4  ;;  %s311_s10 = sshll.u32 %s5461_s9, 4  ;;  %s301_s14 = int_to_ptr.vmem [resolvable:$true] %s300_s14  ;;  %s312_s10 = int_to_ptr.vmem [resolvable:$true] %s311_s10 }
  0xa4   : > { %s6828_s6 = sld [smem:[#allocation41_spill]] }
  0xaa   : > { %s5285_s20 = scalar_lea.hbm %s6828_s6, 64 }
  0xab   : > { %p5286_p13 = scmp.ne.s32.totalorder %s6828_s6, %s5285_s20  ;;  %p5292_p3 = scmp.lt.u32.totalorder %s5285_s20, %s6828_s6 }
  0xad   : > { %p5288_p0 = pnand %p5286_p13, %p5599_p8 }
  0xaf   : > { %p5289_p1 = pneg %p5288_p0 }
  0xb1   : > { %p5294_p2 = pnand %p5292_p3, %p5289_p1 }
  0xb3   : > { %5297 = shalt.err (!%p5294_p2)
}
  0xb4   : > { %s5298_s15 = scalar_lea.vmem %s301_s14, 64  ;;  %p5306_p10 = scmp.lt.s32.totalorder %s301_s14, %s301_s14 }
  0xb5   : > { %p5299_p5 = scmp.ne.s32.totalorder %s301_s14, %s5298_s15  ;;  %p5307_p4 = scmp.lt.s32.totalorder %s5298_s15, %s5298_s15 }
  0xb7   : > { %p5301_p7 = pnand %p5299_p5, %p5599_p8  ;;  %p5308_p11 = por %p5307_p4, %p5306_p10 }
  0xb9   : > { %p5302_p9 = pneg %p5301_p7 }
  0xbb   : > { %p5309_p12 = pnand %p5308_p11, %p5302_p9 }
  0xbd   : > { %5312 = shalt.err (!%p5309_p12)
}
  0xbe   : > { %5034 = dma.hbm_to_vmem [thread:$0]  (!%p5583_p6), %s6828_s6, 64, %s301_s14, [#allocation13]  }
  0xbf   : > { %s6829_s7 = sld [smem:[#allocation42_spill]] }
  0xc5   : > { %s5313_s13 = scalar_lea.hbm %s6829_s7, 64 }
  0xc6   : > { %p5314_p13 = scmp.ne.s32.totalorder %s6829_s7, %s5313_s13  ;;  %p5320_p3 = scmp.lt.u32.totalorder %s5313_s13, %s6829_s7 }
  0xc8   : > { %p5316_p0 = pnand %p5314_p13, %p5599_p8 }
  0xca   : > { %p5317_p1 = pneg %p5316_p0 }
  0xcc   : > { %p5322_p2 = pnand %p5320_p3, %p5317_p1 }
  0xce   : > { %5325 = shalt.err (!%p5322_p2)
}
  0xcf   : > { %s5326_s23 = scalar_lea.vmem %s312_s10, 64  ;;  %p5334_p10 = scmp.lt.s32.totalorder %s312_s10, %s312_s10 }
  0xd0   : > { %p5327_p5 = scmp.ne.s32.totalorder %s312_s10, %s5326_s23  ;;  %p5335_p4 = scmp.lt.s32.totalorder %s5326_s23, %s5326_s23 }
  0xd2   : > { %p5329_p7 = pnand %p5327_p5, %p5599_p8  ;;  %p5336_p11 = por %p5335_p4, %p5334_p10 }
  0xd4   : > { %p5330_p9 = pneg %p5329_p7 }
  0xd6   : > { %p5337_p12 = pnand %p5336_p11, %p5330_p9 }
  0xd8   : > { %5340 = shalt.err (!%p5337_p12)
}
  0xd9   : > { %5037 = dma.hbm_to_vmem [thread:$0]  (!%p5583_p6), %s6829_s7, 64, %s312_s10, [#allocation16]  }
  0xda   : > { %s4214_s25 = sadd.s32 4294967294, %s5453_s30   ;;  %s5741_s17 = sadd.s32 1, %s5453_s30  }
  0xdb   : > { %6830 = sst [smem:[#allocation29_spill]] %s5741_s17  ;;  %s35_s15 = sadd.s32 1, %s5449_s29 }
  0xdc   : > { %s32_s19 = ssub.s32 %s5453_s30, %s5741_s17  ;;  %p42_p8 = scmp.ne.s32.totalorder %s5449_s29, %s5445_s28 }
  0xdd   : > { %p33_p13 = scmp.eq.s32.totalorder %s32_s19, 0  ;;  %p43_p0 = scmp.eq.s32.totalorder %s5453_s30, 0 }
  0xde   : > { %p48_p1 = scmp.ne.s32.totalorder %s5445_s28, %s5441_s27  ;;  %p219_p3 = scmp.eq.s32.totalorder %s5565_s11, 1 }
  0xdf   : > { %s5753_s26 = scalar_select %p33_p13, %s5449_s29, %s35_s15  }
  0xe0   : > { %p44_p2 = por %p43_p0, %p42_p8  ;;  %p6832_p5 = scmp.eq.s32.totalorder %s5565_s11, 0 }
  0xe1   : > { %6831 = sst [smem:[#allocation30_spill]] %s5753_s26  ;;  %p5761_p6 = por %p219_p3, %p42_p8 }
  0xe2   : > { %p5757_p7 = por %p6832_p5, %p48_p1  ;;  %p225_p9 = scmp.eq.s32.totalorder %s4214_s25, 1 }
  0xe3   : > { %s6834_s10 = scalar_select %p5761_p6, 1, 0 }
  0xe4   : > { %p5053_p10 = scmp.lt.s32.totalorder %s5453_s30, 2  ;;  %s322_s9 = sand.u32 1, %s5449_s29  }
  0xe5   : > { %6835 = sst [smem:[#allocation31_spill]] %s6834_s10  ;;  %p5767_p4 = por %p225_p9, %p48_p1 }
  0xe6   : > { %s4224_s18 = sshll.u32 %s322_s9, 1  ;;  %s4225_s20 = sshll.u32 %s5453_s30, 5 }
  0xe7   : > { %s6836_s13 = scalar_select %p5767_p4, 1, 0 }
  0xe8   : > { %s6838_s0 = sld [smem:[#allocation35_spill]]  ;;  %s326_s14 = scalar_lea.vmem [#allocation3], %s4224_s18 }
  0xe9   : > { %6837 = sst [smem:[#allocation32_spill]] %s6836_s13  ;;  %s333_s24 = sshll.u32 %s326_s14, 4  ;;  %s5781_s24 = int_to_ptr.vmem [resolvable:$true] %s333_s24 }
  0xea   : > { %p5777_p11 = pnand %p5053_p10, %p44_p2  ;;  %s323_s15 = scalar_lea.sflag [#allocation4], %s322_s9 }
  0xec   : > { %p5343_p8 = pneg %p5777_p11 }
  0xee   : > { %s5775_s23 = scalar_lea.hbm %s6838_s0, %s4225_s20  ;;  %s5346_s21 = scalar_lea.hbm %s6838_s0, 64 }
  0xef   : > { %s5341_s19 = scalar_lea.hbm %s5775_s23, 32  ;;  %p5347_p1 = scmp.lt.u32.totalorder %s5775_s23, %s6838_s0 }
  0xf0   : > { %p5342_p12 = scmp.ne.s32.totalorder %s5775_s23, %s5341_s19  ;;  %p5348_p3 = scmp.lt.u32.totalorder %s5346_s21, %s5341_s19 }
  0xf1   : > { %p5350_p5 = scmp.lt.u32.totalorder %s5341_s19, %s5775_s23 }
  0xf2   : > { %p5344_p13 = pnand %p5343_p8, %p5342_p12  ;;  %p5349_p2 = por %p5348_p3, %p5347_p1 }
  0xf4   : > { %p5345_p0 = pneg %p5344_p13  ;;  %p5351_p9 = por %p5350_p5, %p5349_p2 }
  0xf6   : > { %p5352_p10 = pnand %p5351_p9, %p5345_p0 }
  0xf8   : > { %5355 = shalt.err (!%p5352_p10)
}
  0xf9   : > { %s5356_s9 = scalar_lea.vmem %s5781_s24, 32  ;;  %s5462_s20 = smov [#allocation3]  }
  0xfa   : > { %p5357_p12 = scmp.ne.s32.totalorder %s5781_s24, %s5356_s9  ;;  %s5361_s18 = sshll.u32 %s5462_s20, 4  ;;  %s5362_s18 = int_to_ptr.vmem [resolvable:$false] %s5361_s18 }
  0xfb   : > { %s5363_s22 = scalar_lea.vmem %s5362_s18, 64  ;;  %p5364_p6 = scmp.lt.s32.totalorder %s5781_s24, %s5362_s18 }
  0xfc   : > { %p5359_p13 = pnand %p5357_p12, %p5343_p8  ;;  %p5365_p1 = scmp.lt.s32.totalorder %s5363_s22, %s5356_s9 }
  0xfe   : > { %p5360_p4 = pneg %p5359_p13  ;;  %p5366_p3 = por %p5365_p1, %p5364_p6 }
 0x100   : > { %p5367_p2 = pnand %p5366_p3, %p5360_p4 }
 0x102   : > { %5370 = shalt.err (!%p5367_p2)
}
 0x103   : > { %5041 = dma.hbm_to_vmem [thread:$0]  (!%p5777_p11), %s5775_s23, 32, %s5781_s24, %s323_s15  }
 0x104   : > { %p6840_p0 = scmp.ne.s32.totalorder %s6820_s12, 0 }
 0x106   : > { %342 = sbr.rel (%p6840_p0) target bundleno = 2781 (0xadd), region = 52 }
 0x10d   : > { %s5811_s19 = sand.u32 1, %s5445_s28  }
 0x10e   : > { %6841 = sst [smem:[#allocation33_spill]] %s5811_s19  ;;  %s6706_s21 = sshll.u32 %s5811_s19, 1 }
 0x10f   : > { %s345_s14 = scalar_lea.sflag [#allocation4], %s5811_s19  ;;  %s5817_s9 = scalar_lea.vmem [#allocation3], %s6706_s21 }
 0x110   : > { %6842 = sst [smem:[#allocation34_spill]] %s5817_s9 }
 0x111   : > { %5416 = dma.done.wait (%p5757_p7), %s345_s14, 32  }
 0x112   : > { %5418 = vsyncadd (%p5757_p7), %s345_s14, 4294967264  ;;  %p6843_p6 = scmp.eq.s32.totalorder %s5565_s11, 0 }
 0x114   : > { %5420 = dma.done.wait (%p6843_p6), [#allocation7], 160   ;;  %p6844_p4 = pmov %p6843_p6 }
 0x116   : > { %5422 = vsyncadd (%p6844_p4), [#allocation7], 4294967136  ;;  %p6845_p11 = pmov %p6844_p4 }
 0x117   : > { %p6846_p8 = pmov %p6844_p4 }
 0x118   : > { %5424 = dma.done.wait (%p6845_p11), [#allocation10], 128  }
 0x119   : > { %5426 = vsyncadd (%p6846_p8), [#allocation10], 4294967168  ;;  %p6847_p5 = pmov %p6844_p4 }
 0x11a   : > { %p6848_p9 = pmov %p6844_p4 }
 0x11b   : > { %5428 = dma.done.wait (%p6847_p5), [#allocation13], 192  }
 0x11c   : > { %5430 = vsyncadd (%p6848_p9), [#allocation13], 4294967104  ;;  %p6849_p7 = pmov %p6844_p4 }
 0x11d   : > { %p6850_p10 = pmov %p6844_p4 }
 0x11e   : > { %5432 = dma.done.wait (%p6849_p7), [#allocation16], 64  }
 0x11f   : > { %5434 = vsyncadd (%p6850_p10), [#allocation16], 4294967232  ;;  %v432_v0 = vlaneseq  ;;  %v5463_v1 = vmov 0   ;;  %vm427_vm0 = vcmask 517120   ;;  %v416_v4 = vld [vmem:[#allocation6] sm:$0x1] }
 0x120   : > { %412 = vst [vmem:[#allocation2] sm:$0xff] %v5463_v1  ;;  %413 = vst [vmem:[#allocation2 + $0x8] sm:$0xff] %v5463_v1  ;;  %5136 = vset.pattern.permute.xlu0 %v5463_v1  ;;  %5137 = vset.pattern.permute.xlu1 %v5463_v1  ;;  %v417_v5 = vld [vmem:[#allocation6 + $0x1] sm:$0x1]  ;;  %v426_v6 = vld [vmem:[%s5817_s9] sm:$0x3] }
 0x121   : > { %v5843_v2 = vshrl.u32 %v432_v0, 7  ;;  %vm418_vm1 = vcmp.ge.s32.totalorder %v416_v4, 1  ;;  %vm420_vm2 = vcmp.ge.s32.totalorder %v417_v5, 1  ;;  %vm421_vm3 = vcmp.le.s32.totalorder %v417_v5, 2  ;;  %428 = vst.msk [vmem:[#allocation2 + $0x8] sm:$0x3] %vm427_vm0, %v426_v6 }
 0x122   : > { %v449_v7 = vsel %vm418_vm1, 1, %v5463_v1  ;;  %vm422_vm4 = vmand %vm418_vm1, %vm420_vm2  ;;  %v666_v8 = vsel %vm420_vm2, 1, %v5463_v1  ;;  %v815_v9 = vsel %vm421_vm3, 1, %v5463_v1  ;;  %vm419_vm14 = vcmp.le.s32.totalorder %v416_v4, 2  ;;  %s6709_s12 = smov 108   ;;  %s6711_s16 = smov 109  }
 0x123   : > { %v5846_v3 = vsub.s32 0, %v5843_v2  ;;  %v431_v11 = vsel %vm422_vm4, 1, %v5463_v1  ;;  %vm423_vm5 = vmand %vm418_vm1, %vm421_vm3  ;;  %v981_v26 = vsel %vm419_vm14, 1, %v5463_v1  ;;  %s6707_s23 = smov 107   ;;  %s6713_s24 = smov 111   ;;  %v5468_v40 = vmov 0.0  }
 0x124   : > { %v583_v15 = vsel %vm423_vm5, 1, %v5463_v1  ;;  %vm424_vm4 = vmand %vm419_vm14, %vm420_vm2  ;;  %4440 = vmatprep.subr.bf16.mxu0 %v5468_v40  ;;  %4602 = vmatprep.subr.bf16.mxu1 %v5468_v40  ;;  %v5469_v41 = vmov 1983009808   ;;  %v5931_v47 = vld [vmem:[#allocation8] sm:$0x3]  ;;  %s6721_s25 = smov 20  }
 0x125   : > { %v453_v10 = vrot.slane %v449_v7, %v5846_v3  ;;  %v670_v12 = vrot.slane %v666_v8, %v5846_v3  ;;  %v819_v13 = vrot.slane %v815_v9, %v5846_v3  ;;  %v435_v14 = vrot.slane %v431_v11, %v5846_v3  ;;  %s6715_s15 = smov 113   ;;  %s6746_s20 = smov 112   ;;  %v5974_v55 = vld.sshfl [vmem:[#allocation8] sm:$0x3 pattern:$0x76325410] }
 0x126   : > { %v587_v16 = vrot.slane %v583_v15, %v5846_v3  ;;  %v898_v29 = vsel %vm424_vm4, 1, %v5463_v1  ;;  %v985_v30 = vrot.slane %v981_v26, %v5846_v3  ;;  %v468_v42 = vunpack.c.l.s4 %v5469_v41  ;;  %s6717_s18 = smov 21   ;;  %s6719_s22 = smov 115  }
 0x127   : > { %vm454_vm6 = vcmp.eq.s32.totalorder %v453_v10, 1  ;;  %vm436_vm8 = vcmp.eq.s32.totalorder %v435_v14, 1  ;;  %vm5864_vm9 = vcmp.eq.s32.totalorder %v670_v12, 1  ;;  %vm820_vm12 = vcmp.eq.s32.totalorder %v819_v13, 1  ;;  %s6723_s14 = smov 19   ;;  %s6725_s21 = smov 116  }
 0x128   : > { %vm455_vm7 = vmpackc.low %vm454_vm6, %vm454_vm6  ;;  %vm588_vm11 = vcmp.eq.s32.totalorder %v587_v16, 1  ;;  %v902_v31 = vrot.slane %v898_v29, %v5846_v3  ;;  %vm986_vm2 = vcmp.eq.s32.totalorder %v985_v30, 1  ;;  %v469_v43 = vunpack.c.0.s8 %v468_v42  ;;  %v5924_v44 = vld [vmem:[#allocation2 + $0x8] sm:$0xff]  ;;  %s6863_s0 = smov 116   ;;  %s6864_s1 = smov 19  }
 0x129   : > { %v456_v18 = vsel %vm455_vm7, 65537, %v5463_v1  ;;  %vm437_vm10 = vmpackc.low %vm436_vm8, %vm436_vm8  ;;  %v6100_v41 = vld.sshfl [vmem:[#allocation8 + $0x2] sm:$0x3 pattern:$0x76325410]  ;;  %s6865_s2 = smov 80  }
 0x12a   : > { %v5870_v19 = vrot.slane %v456_v18, %v5846_v3  ;;  %v438_v20 = vsel %vm437_vm10, 65537, %v5463_v1  ;;  %vm589_vm13 = vmpackc.low %vm588_vm11, %vm588_vm11  ;;  %vm903_vm5 = vcmp.eq.s32.totalorder %v902_v31, 1  ;;  %v5927_v45 = vsub.s32 %v469_v43, %v5843_v2  ;;  %s6866_s3 = smov 20   ;;  %s6868_s4 = smov 64  }
 0x12b   : > { %v590_v21 = vsel %vm589_vm13, 65537, %v5463_v1  ;;  %vm672_vm15 = vmpackc.low %vm5864_vm9, %vm5864_vm9  ;;  %v5880_v22 = vrot.slane %v438_v20, %v5846_v3  ;;  %v6064_v20 = vld [vmem:[#allocation8 + $0x2] sm:$0x3]  ;;  %s6869_s5 = smov 21   ;;  %s6870_s6 = smov 113  }
 0x12c   : > { %461 = vrot.lane.b32.xlu0 %v5870_v19, %s6709_s12  ;;  %v5883_v23 = vrot.slane %v590_v21, %v5846_v3  ;;  %v673_v24 = vsel %vm672_vm15, 65537, %v5463_v1  ;;  %vm821_vm1 = vmpackc.low %vm820_vm12, %vm820_vm12  ;;  %v473_v49 = vrot.slane %v5931_v47, %v5927_v45  ;;  %vm5471_vm12 = vmmov 0   ;;  %s6729_s12 = smov 17   ;;  %s6871_s7 = smov 48  }
 0x12d   : > { %v822_v25 = vsel %vm821_vm1, 65537, %v5463_v1  ;;  %v5894_v27 = vrot.slane %v673_v24, %v5846_v3  ;;  %vm987_vm6 = vmpackc.low %vm986_vm2, %vm986_vm2  ;;  %4442 = vmatprep.mubr.msk.bf16.mxu0 %vm5471_vm12, %v5468_v40  ;;  %4604 = vmatprep.mubr.msk.bf16.mxu1 %vm5471_vm12, %v5468_v40  ;;  %vm6752_vm15 = vcmask 162816   ;;  %vm485_vm1 = vcmask 130048   ;;  %s6872_s26 = smov 111   ;;  %s6873_s29 = smov 109  }
 0x12e   : > { %595 = vrot.lane.b32.xlu1 %v5883_v23, %s6711_s16  ;;  %v5897_v28 = vrot.slane %v822_v25, %v5846_v3  ;;  %vm904_vm7 = vmpackc.low %vm903_vm5, %vm903_vm5  ;;  %v988_v32 = vsel %vm987_vm6, 65537, %v5463_v1  ;;  %s6727_s16 = smov 117   ;;  %vm6745_vm2 = vcmask 171008   ;;  %vm6744_vm6 = vcmask 154624   ;;  %s6874_s28 = smov 108  }
 0x12f   : > { %v905_v33 = vsel %vm904_vm7, 65537, %v5463_v1  ;;  %v5909_v34 = vrot.slane %v988_v32, %v5846_v3  ;;  %vm425_vm8 = vmand %vm419_vm14, %vm421_vm3  ;;  %v1147_v24 = vrot.slane %v6064_v20, %v5927_v45  ;;  %s6875_s17 = smov 96   ;;  %s6876_s30 = smov 107  }
 0x130   : > { %443 = vrot.lane.b32.xlu0 %v5880_v22, %s6707_s23  ;;  %v5912_v35 = vrot.slane %v905_v33, %v5846_v3  ;;  %v1064_v36 = vsel %vm425_vm8, 1, %v5463_v1  ;;  %s6784_s23 = smov 96   ;;  %vm6743_vm8 = vcmask 138240  }
 0x131   : > { %v1068_v37 = vrot.slane %v1064_v36, %v5846_v3 }
 0x132   : > { %678 = vrot.lane.b32.xlu1 %v5894_v27, %s6713_s24  ;;  %s6780_s24 = smov 80  }
 0x133   : > { %vm1069_vm9 = vcmp.eq.s32.totalorder %v1068_v37, 1 }
 0x134   : > { %vm1070_vm10 = vmpackc.low %vm1069_vm9, %vm1069_vm9  ;;  %478 = vrot.lane.b32.xlu0 %v5463_v1, %s6721_s25 }
 0x135   : > { %v1071_v38 = vsel %vm1070_vm10, 65537, %v5463_v1 }
 0x136   : > { %v5920_v39 = vrot.slane %v1071_v38, %v5846_v3 }
 0x138   : > { %827 = vrot.lane.b32.xlu0 %v5897_v28, %s6715_s15  ;;  %s6739_s15 = smov 16  }
 0x13c   : > { %531 = vrot.lane.b32.xlu0 %v5463_v1, %s6717_s18 }
 0x140   : > { %910 = vrot.lane.b32.xlu0 %v5912_v35, %s6719_s22  ;;  %s6777_s22 = smov 64  }
 0x19e   : > { %v5929_v46 = vpop.permute.xlu0 %461 }
 0x19f   : > { %vm463_vm3 = vcmp.ne.s16.totalorder %v5929_v46, 0 }
 0x1a0   : > { %v465_v48 = vsel %vm463_vm3, %v5924_v44, 0  ;;  %v5949_v51 = vpop.permute.xlu1 %595 }
 0x1a1   : > { %480 = vrot.lane.b32.xlu1 %v465_v48, %s6721_s25  ;;  %vm597_vm13 = vcmp.ne.s16.totalorder %v5949_v51, 0  ;;  %s6735_s25 = smov 15  }
 0x1a2   : > { %v5942_v50 = vpop.permute.xlu0 %443  ;;  %v599_v54 = vsel %vm597_vm13, %v5924_v44, 0 }
 0x1a3   : > { %vm445_vm11 = vcmp.ne.s16.totalorder %v5942_v50, 0  ;;  %615 = vrot.lane.b32.xlu0 %v599_v54, %s6723_s14 }
 0x1a4   : > { %v447_v52 = vsel %vm445_vm11, %v5924_v44, 0  ;;  %v5961_v53 = vpop.permute.xlu1 %678 }
 0x1a5   : > { %474 = vrot.lane.b32.xlu1 %v473_v49, %s6746_s20  ;;  %vm680_vm14 = vcmp.ne.s16.totalorder %v5961_v53, 0 }
 0x1a6   : > { %v682_v56 = vsel %vm680_vm14, %v5924_v44, 0  ;;  %v479_v58 = vpop.permute.xlu0 %478 }
 0x1a7   : > { %609 = vrot.lane.b32.xlu0 %v5974_v55, %s6784_s23 }
 0x1a9   : > { %533 = vrot.lane.b32.xlu1 %v447_v52, %s6717_s18  ;;  %s6731_s18 = smov 123  }
 0x1aa   : > { %v5998_v60 = vpop.permute.xlu0 %827 }
 0x1ab   : > { %698 = vrot.lane.b32.xlu0 %v682_v56, %s6729_s12  ;;  %vm829_vm4 = vcmp.ne.s16.totalorder %v5998_v60, 0  ;;  %v4298_v60 = vld.sshfl [vmem:[#allocation12 + $0x2] sm:$0x3 pattern:$0x76325410] }
 0x1ac   : > { %v831_v62 = vsel %vm829_vm4, %v5924_v44, 0 }
 0x1ad   : > { %613 = vrot.lane.b32.xlu1 %v5463_v1, %s6723_s14  ;;  %s6733_s14 = smov 124  }
 0x1ae   : > { %v532_v63 = vpop.permute.xlu0 %531 }
 0x1af   : > { %692 = vrot.lane.b32.xlu0 %v5974_v55, %s6780_s24 }
 0x1b1   : > { %993 = vrot.lane.b32.xlu1 %v5909_v34, %s6725_s21  ;;  %s6775_s21 = smov 48  }
 0x1b2   : > { %v6015_v3 = vpop.permute.xlu0 %910 }
 0x1b3   : > { %764 = vrot.lane.b32.xlu0 %v5924_v44, %s6739_s15  ;;  %vm912_vm5 = vcmp.ne.s16.totalorder %v6015_v3, 0 }
 0x1b4   : > { %v914_v5 = vsel %vm912_vm5, %v5924_v44, 0 }
 0x1b5   : > { %696 = vrot.lane.b32.xlu1 %v5463_v1, %s6729_s12  ;;  %s6737_s12 = smov 125  }
 0x1b7   : > { %758 = vrot.lane.b32.xlu0 %v5974_v55, %s6777_s22 }
 0x1b9   : > { %1076 = vrot.lane.b32.xlu1 %v5920_v39, %s6727_s16  ;;  %s6741_s16 = smov 13  }
 0x1bb   : > { %847 = vrot.lane.b32.xlu0 %v831_v62, %s6735_s25 }
 0x1bd   : > { %762 = vrot.lane.b32.xlu1 %v5463_v1, %s6739_s15 }
 0x1bf   : > { %841 = vrot.lane.b32.xlu0 %v5974_v55, %s6775_s21 }
 0x1c1   : > { %1135 = vrot.lane.b32.xlu1 %v5880_v22, %s6731_s18  ;;  %s6748_s18 = smov 32  }
 0x1c3   : > { %930 = vrot.lane.b32.xlu0 %v914_v5, %s6741_s16 }
 0x1c5   : > { %845 = vrot.lane.b32.xlu1 %v5463_v1, %s6735_s25  ;;  %s6763_s25 = smov 127  }
 0x1c7   : > { %924 = vrot.lane.b32.xlu0 %v5974_v55, %s6748_s18  ;;  %s6758_s18 = smov 3  }
 0x1c9   : > { %1205 = vrot.lane.b32.xlu1 %v5870_v19, %s6733_s14  ;;  %s6772_s14 = smov 12  }
 0x1cd   : > { %928 = vrot.lane.b32.xlu1 %v5463_v1, %s6741_s16  ;;  %s6756_s16 = smov 1  }
 0x1d1   : > { %1276 = vrot.lane.b32.xlu1 %v5883_v23, %s6737_s12  ;;  %s6770_s12 = smov 11  }
 0x1d5   : > { %1011 = vrot.lane.b32.xlu1 %v5463_v1, %s6772_s14 }
 0x1d9   : > { %1347 = vrot.lane.b32.xlu1 %v5894_v27, %s6763_s25 }
 0x1dd   : > { %1084 = vrot.lane.b32.xlu1 %v5463_v1, %s6770_s12 }
 0x213   : > { %v481_v57 = vpop.permute.xlu1 %480 }
 0x214   : > { %v483_v59 = vsel %vm6752_vm15, %v479_v58, %v481_v57 }
 0x215   : > { %4441 = vmatpush3.bf16.msra.mxu0 %v483_v59  ;;  %v616_v7 = vpop.permute.xlu0 %615 }
 0x216   : > { %4446 = vmatprep.subr.bf16.mxu0 %v5468_v40 }
 0x217   : > { %v475_v61 = vpop.permute.xlu1 %474 }
 0x218   : > { %4443 = vmatmul.mubr.msk.bf16.vlgmr.msra.gmra.mrb[0].mxu0 %vm485_vm1, %v475_v61 }
 0x219   : > { %4448 = vmatprep.mubr.msk.bf16.mxu0 %vm5471_vm12, %v5468_v40  ;;  %v610_v10 = vpop.permute.xlu0 %609 }
 0x21b   : > { %v534_v0 = vpop.permute.xlu1 %533 }
 0x21c   : > { %v536_v2 = vsel %vm6745_vm2, %v532_v63, %v534_v0  ;;  %vm6751_vm2 = vcmask 105472  }
 0x21d   : > { %4447 = vmatpush3.bf16.msra.mxu0 %v536_v2  ;;  %v699_v12 = vpop.permute.xlu0 %698 }
 0x21e   : > { %4452 = vmatprep.subr.bf16.mxu0 %v5468_v40 }
 0x21f   : > { %v614_v4 = vpop.permute.xlu1 %613 }
 0x220   : > { %v618_v8 = vsel %vm6744_vm6, %v614_v4, %v616_v7 }
 0x221   : > { %v693_v17 = vpop.permute.xlu0 %692 }
 0x223   : > { %v6025_v6 = vpop.permute.xlu1 %993 }
 0x224   : > { %vm995_vm7 = vcmp.ne.s16.totalorder %v6025_v6, 0  ;;  %4449 = vmatmul.mubr.msk.bf16.vlgmr.msra.gmra.mrb[0].mxu0 %vm485_vm1, %v5931_v47 }
 0x225   : > { %4453 = vmatpush3.bf16.msra.mxu0 %v618_v8  ;;  %4454 = vmatprep.mubr.msk.bf16.mxu0 %vm5471_vm12, %v5468_v40  ;;  %v997_v9 = vsel %vm995_vm7, %v5924_v44, 0  ;;  %v765_v25 = vpop.permute.xlu0 %764 }
 0x226   : > { %4458 = vmatprep.subr.bf16.mxu0 %v5468_v40  ;;  %1013 = vrot.lane.b32.xlu0 %v997_v9, %s6772_s14 }
 0x227   : > { %v697_v11 = vpop.permute.xlu1 %696 }
 0x228   : > { %v701_v14 = vsel %vm6743_vm8, %v697_v11, %v699_v12  ;;  %vm6750_vm8 = vcmask 121856  }
 0x229   : > { %v759_v29 = vpop.permute.xlu0 %758 }
 0x22a   : > { %1007 = vrot.lane.b32.xlu0 %v5974_v55, %s6739_s15  ;;  %s6768_s15 = smov 5  }
 0x22b   : > { %v6044_v13 = vpop.permute.xlu1 %1076  ;;  %1152 = vrot.lane.b32.xlu1 %v5463_v1, %s6768_s15 }
 0x22c   : > { %vm1078_vm9 = vcmp.ne.s16.totalorder %v6044_v13, 0 }
 0x22d   : > { %v1080_v15 = vsel %vm1078_vm9, %v5924_v44, 0  ;;  %v848_v31 = vpop.permute.xlu0 %847 }
 0x22e   : > { %1086 = vrot.lane.b32.xlu0 %v1080_v15, %s6770_s12 }
 0x22f   : > { %v763_v16 = vpop.permute.xlu1 %762  ;;  %1473 = vrot.lane.b32.xlu1 %v5897_v28, %s6756_s16 }
 0x230   : > { %4455 = vmatmul.mubr.msk.bf16.vlgmr.msra.gmra.mrb[0].mxu0 %vm485_vm1, %v610_v10  ;;  %v767_v26 = vsel %vm485_vm1, %v763_v16, %v765_v25 }
 0x231   : > { %4459 = vmatpush3.bf16.msra.mxu0 %v701_v14  ;;  %4460 = vmatprep.mubr.msk.bf16.mxu0 %vm5471_vm12, %v5468_v40  ;;  %v842_v36 = vpop.permute.xlu0 %841 }
 0x232   : > { %4464 = vmatprep.subr.bf16.mxu0 %v5468_v40 }
 0x233   : > { %v6062_v18 = vpop.permute.xlu1 %1135 }
 0x234   : > { %vm1137_vm10 = vcmp.ne.s16.totalorder %v6062_v18, 0 }
 0x235   : > { %v1139_v21 = vsel %vm1137_vm10, %v5924_v44, 0  ;;  %v931_v42 = vpop.permute.xlu0 %930 }
 0x236   : > { %1154 = vrot.lane.b32.xlu0 %v1139_v21, %s6768_s15 }
 0x237   : > { %v846_v30 = vpop.permute.xlu1 %845 }
 0x238   : > { %v850_v32 = vsel %vm6750_vm8, %v846_v30, %v848_v31 }
 0x239   : > { %v925_v48 = vpop.permute.xlu0 %924 }
 0x23a   : > { %1148 = vrot.lane.b32.xlu0 %v1147_v24, %s6746_s20  ;;  %s6764_s20 = smov 4  }
 0x23b   : > { %v6088_v33 = vpop.permute.xlu1 %1205  ;;  %1223 = vrot.lane.b32.xlu1 %v5463_v1, %s6764_s20 }
 0x23c   : > { %4461 = vmatmul.mubr.msk.bf16.vlgmr.msra.gmra.mrb[0].mxu0 %vm485_vm1, %v693_v17  ;;  %vm6761_vm6 = vcmp.ne.s16.totalorder %v6088_v33, 0  ;;  %v6188_v17 = vld [vmem:[#allocation8 + $0x4] sm:$0x3] }
 0x23d   : > { %4465 = vmatpush3.bf16.msra.mxu0 %v767_v26  ;;  %4466 = vmatprep.mubr.msk.bf16.mxu0 %vm5471_vm12, %v5468_v40  ;;  %v1209_v37 = vsel %vm6761_vm6, %v5924_v44, 0  ;;  %v1665_v21 = vrot.slane %v6188_v17, %v5927_v45 }
 0x23e   : > { %4470 = vmatprep.subr.bf16.mxu0 %v5468_v40  ;;  %1225 = vrot.lane.b32.xlu0 %v1209_v37, %s6764_s20  ;;  %v4266_v37 = vld.sshfl [vmem:[#allocation8 + $0x4] sm:$0x3 pattern:$0x76325410] }
 0x23f   : > { %v929_v38 = vpop.permute.xlu1 %928  ;;  %1537 = vrot.lane.b32.xlu1 %v5912_v35, %s6758_s18 }
 0x240   : > { %v933_v43 = vsel %vm6751_vm2, %v929_v38, %v931_v42  ;;  %vm6753_vm2 = vcmask 97280  }
 0x242   : > { %1219 = vrot.lane.b32.xlu0 %v6100_v41, %s6784_s23 }
 0x243   : > { %v6107_v47 = vpop.permute.xlu1 %1276  ;;  %1294 = vrot.lane.b32.xlu1 %v5463_v1, %s6758_s18 }
 0x244   : > { %vm1278_vm8 = vcmp.ne.s16.totalorder %v6107_v47, 0 }
 0x245   : > { %v1280_v49 = vsel %vm1278_vm8, %v5924_v44, 0 }
 0x246   : > { %1296 = vrot.lane.b32.xlu0 %v1280_v49, %s6758_s18  ;;  %s6854_s18 = smov 13  }
 0x247   : > { %v1012_v52 = vpop.permute.xlu1 %1011  ;;  %1601 = vrot.lane.b32.xlu1 %v5909_v34, %s6764_s20  ;;  %s6856_s20 = smov 16  }
 0x248   : > { %4467 = vmatmul.mubr.msk.bf16.vlgmr.msra.gmra.mrb[0].mxu0 %vm485_vm1, %v759_v29 }
 0x249   : > { %4472 = vmatprep.mubr.msk.bf16.mxu0 %vm5471_vm12, %v5468_v40  ;;  %4471 = vmatpush3.bf16.msra.mxu0 %v850_v32 }
 0x24a   : > { %4476 = vmatprep.subr.bf16.mxu0 %v5468_v40  ;;  %1290 = vrot.lane.b32.xlu0 %v6100_v41, %s6780_s24  ;;  %s6862_s24 = smov 117  }
 0x24b   : > { %v6125_v56 = vpop.permute.xlu1 %1347  ;;  %1365 = vrot.lane.b32.xlu1 %v5463_v1, %s6756_s16 }
 0x24c   : > { %vm6754_vm15 = vcmp.ne.s16.totalorder %v6125_v56, 0 }
 0x24d   : > { %v1351_v58 = vsel %vm6754_vm15, %v5924_v44, 0 }
 0x24e   : > { %1367 = vrot.lane.b32.xlu0 %v1351_v58, %s6756_s16  ;;  %s6853_s16 = smov 32  }
 0x24f   : > { %v1085_v59 = vpop.permute.xlu1 %1084  ;;  %1654 = vrot.lane.b32.xlu1 %v5920_v39, %s6768_s15  ;;  %s6857_s15 = smov 15  }
 0x252   : > { %1361 = vrot.lane.b32.xlu0 %v6100_v41, %s6777_s22  ;;  %s6861_s22 = smov 17  }
 0x253   : > { %1717 = vrot.lane.b32.xlu1 %v5880_v22, %s6770_s12  ;;  %s6858_s12 = smov 124  }
 0x254   : > { %4473 = vmatmul.mubr.msk.bf16.vlgmr.msra.gmra.mrb[0].mxu0 %vm485_vm1, %v842_v36 }
 0x255   : > { %4478 = vmatprep.mubr.msk.bf16.mxu0 %vm5471_vm12, %v5468_v40  ;;  %4477 = vmatpush3.bf16.msra.mxu0 %v933_v43 }
 0x256   : > { %4482 = vmatprep.subr.bf16.mxu0 %v5468_v40  ;;  %1426 = vrot.lane.b32.xlu0 %v6100_v41, %s6775_s21  ;;  %s6860_s21 = smov 123  }
 0x25a   : > { %1781 = vrot.lane.b32.xlu0 %v5870_v19, %s6772_s14  ;;  %s6859_s14 = smov 112  }
 0x260   : > { %4479 = vmatmul.mubr.msk.bf16.vlgmr.msra.gmra.mrb[0].mxu0 %vm485_vm1, %v925_v48 }
 0x261   : > { %4484 = vmatprep.mubr.msk.bf16.mxu0 %vm5471_vm12, %v5468_v40 }
 0x298   : > { %v1014_v54 = vpop.permute.xlu0 %1013 }
 0x299   : > { %v1016_v55 = vsel %vm6753_vm2, %v1012_v52, %v1014_v54  ;;  %vm6755_vm2 = vcmask 89088  }
 0x29a   : > { %4483 = vmatpush3.bf16.msra.mxu0 %v1016_v55 }
 0x29b   : > { %4488 = vmatprep.subr.bf16.mxu0 %v5468_v40 }
 0x29c   : > { %v1008_v57 = vpop.permute.xlu0 %1007 }
 0x29d   : > { %v1153_v63 = vpop.permute.xlu1 %1152  ;;  %4485 = vmatmul.mubr.msk.bf16.vlgmr.msra.gmra.mrb[0].mxu0 %vm485_vm1, %v1008_v57 }
 0x29e   : > { %4490 = vmatprep.mubr.msk.bf16.mxu0 %vm5471_vm12, %v5468_v40 }
 0x2a0   : > { %v1087_v61 = vpop.permute.xlu0 %1086 }
 0x2a1   : > { %v1089_v62 = vsel %vm6755_vm2, %v1085_v59, %v1087_v61  ;;  %v6148_v0 = vpop.permute.xlu1 %1473  ;;  %vm6760_vm2 = vcmask 39936  }
 0x2a2   : > { %4489 = vmatpush3.bf16.msra.mxu0 %v1089_v62  ;;  %vm6762_vm15 = vcmp.ne.s16.totalorder %v6148_v0, 0 }
 0x2a3   : > { %4494 = vmatprep.subr.bf16.mxu0 %v5468_v40  ;;  %v1476_v2 = vsel %vm6762_vm15, %v5924_v44, 0  ;;  %vm6774_vm15 = vcmask 23552  }
 0x2a4   : > { %1489 = vrot.lane.b32.xlu1 %v1476_v2, %s6763_s25  ;;  %s6855_s25 = smov 125  }
 0x2a8   : > { %v1155_v22 = vpop.permute.xlu0 %1154  ;;  %1486 = vrot.lane.b32.xlu1 %v6100_v41, %s6853_s16 }
 0x2a9   : > { %v1157_v4 = vsel %vm6760_vm2, %v1153_v63, %v1155_v22  ;;  %4491 = vmatmul.mubr.msk.bf16.vlgmr.msra.gmra.mrb[0].mxu0 %vm485_vm1, %v6064_v20  ;;  %vm6766_vm2 = vcmask 31744   ;;  %v2101_v22 = vld [vmem:[#allocation8 + $0x6] sm:$0x3] }
 0x2aa   : > { %4495 = vmatpush3.bf16.msra.mxu0 %v1157_v4  ;;  %4496 = vmatprep.mubr.msk.bf16.mxu0 %vm5471_vm12, %v5468_v40 }
 0x2ab   : > { %4500 = vmatprep.subr.bf16.mxu0 %v5468_v40 }
 0x2ac   : > { %1845 = vrot.lane.b32.xlu1 %v5883_v23, %s6854_s18  ;;  %v1149_v19 = vpop.permute.xlu0 %1148 }
 0x2ad   : > { %v1224_v5 = vpop.permute.xlu1 %1223 }
 0x2b0   : > { %v1226_v7 = vpop.permute.xlu0 %1225 }
 0x2b1   : > { %v1228_v8 = vsel %vm6766_vm2, %v1224_v5, %v1226_v7  ;;  %v6172_v9 = vpop.permute.xlu1 %1537 }
 0x2b2   : > { %vm6767_vm6 = vcmp.ne.s16.totalorder %v6172_v9, 0 }
 0x2b3   : > { %v1540_v23 = vsel %vm6767_vm6, %v5924_v44, 0  ;;  %vm6779_vm6 = vcmask 7168  }
 0x2b4   : > { %v1220_v10 = vpop.permute.xlu0 %1219  ;;  %1553 = vrot.lane.b32.xlu0 %v1540_v23, %s6855_s25  ;;  %v4280_v23 = vld.sshfl [vmem:[#allocation8 + $0x6] sm:$0x3 pattern:$0x76325410] }
 0x2b5   : > { %4497 = vmatmul.mubr.msk.bf16.vlgmr.msra.gmra.mrb[0].mxu0 %vm485_vm1, %v1149_v19  ;;  %v1295_v11 = vpop.permute.xlu1 %1294  ;;  %v2161_v19 = vrot.slane %v2101_v22, %v5927_v45 }
 0x2b6   : > { %4502 = vmatprep.mubr.msk.bf16.mxu0 %vm5471_vm12, %v5468_v40  ;;  %4501 = vmatpush3.bf16.msra.mxu0 %v1228_v8 }
 0x2b7   : > { %4506 = vmatprep.subr.bf16.mxu0 %v5468_v40 }
 0x2b8   : > { %v1297_v12 = vpop.permute.xlu0 %1296  ;;  %1550 = vrot.lane.b32.xlu0 %v6100_v41, %s6856_s20 }
 0x2b9   : > { %v1299_v14 = vsel %vm6774_vm15, %v1295_v11, %v1297_v12  ;;  %v6186_v15 = vpop.permute.xlu1 %1601 }
 0x2ba   : > { %vm1603_vm2 = vcmp.ne.s16.totalorder %v6186_v15, 0 }
 0x2bb   : > { %v1604_v20 = vsel %vm1603_vm2, %v5924_v44, 0 }
 0x2bc   : > { %v1291_v16 = vpop.permute.xlu0 %1290  ;;  %1909 = vrot.lane.b32.xlu0 %v5894_v27, %s6857_s15  ;;  %1607 = vrot.lane.b32.xlu1 %v1604_v20, %s6858_s12 }
 0x2bd   : > { %v1366_v24 = vpop.permute.xlu1 %1365 }
 0x2c0   : > { %v1368_v25 = vpop.permute.xlu0 %1367  ;;  %1666 = vrot.lane.b32.xlu0 %v1665_v21, %s6859_s14 }
 0x2c1   : > { %4503 = vmatmul.mubr.msk.bf16.vlgmr.msra.gmra.mrb[0].mxu0 %vm485_vm1, %v1220_v10  ;;  %v1370_v26 = vsel %vm6779_vm6, %v1366_v24, %v1368_v25  ;;  %v6205_v27 = vpop.permute.xlu1 %1654 }
 0x2c2   : > { %4508 = vmatprep.mubr.msk.bf16.mxu0 %vm5471_vm12, %v5468_v40  ;;  %4507 = vmatpush3.bf16.msra.mxu0 %v1299_v14  ;;  %vm6782_vm15 = vcmp.ne.s16.totalorder %v6205_v27, 0 }
 0x2c3   : > { %4512 = vmatprep.subr.bf16.mxu0 %v5468_v40  ;;  %v1657_v30 = vsel %vm6782_vm15, %v5924_v44, 0 }
 0x2c4   : > { %v1362_v29 = vpop.permute.xlu0 %1361  ;;  %1669 = vrot.lane.b32.xlu1 %v1657_v30, %s6860_s21  ;;  %2033 = vrot.lane.b32.xlu0 %v5897_v28, %s6861_s22 }
 0x2c5   : > { %v6214_v31 = vpop.permute.xlu1 %1717 }
 0x2c6   : > { %vm6783_vm6 = vcmp.ne.s16.totalorder %v6214_v31, 0 }
 0x2c7   : > { %v1720_v36 = vsel %vm6783_vm6, %v5924_v44, 0 }
 0x2c8   : > { %v1427_v32 = vpop.permute.xlu0 %1426  ;;  %1733 = vrot.lane.b32.xlu1 %v1720_v36, %s6862_s24 }
 0x2cc   : > { %v6221_v38 = vpop.permute.xlu0 %1781  ;;  %1730 = vrot.lane.b32.xlu1 %v4266_v37, %s6784_s23  ;;  %s6867_s23 = smov 115  }
 0x2cd   : > { %4509 = vmatmul.mubr.msk.bf16.vlgmr.msra.gmra.mrb[0].mxu0 %vm485_vm1, %v1291_v16  ;;  %vm6787_vm15 = vcmp.ne.s16.totalorder %v6221_v38, 0 }
 0x2ce   : > { %4513 = vmatpush3.bf16.msra.mxu0 %v1370_v26  ;;  %4514 = vmatprep.mubr.msk.bf16.mxu0 %vm5471_vm12, %v5468_v40  ;;  %v1784_v28 = vsel %vm6787_vm15, %v5924_v44, 0 }
 0x2cf   : > { %4518 = vmatprep.subr.bf16.mxu0 %v5468_v40  ;;  %1797 = vrot.lane.b32.xlu0 %v1784_v28, %s6863_s0 }
 0x2d0   : > { %2097 = vrot.lane.b32.xlu1 %v5912_v35, %s6864_s1 }
 0x2d3   : > { %1794 = vrot.lane.b32.xlu0 %v4266_v37, %s6865_s2 }
 0x2d7   : > { %2150 = vrot.lane.b32.xlu0 %v5909_v34, %s6866_s3 }
 0x2d9   : > { %4515 = vmatmul.mubr.msk.bf16.vlgmr.msra.gmra.mrb[0].mxu0 %vm485_vm1, %v1362_v29 }
 0x2da   : > { %4519 = vmatpush3.bf16.msra.mxu0 %v5924_v44  ;;  %4520 = vmatprep.mubr.msk.bf16.mxu0 %vm5471_vm12, %v5468_v40 }
 0x2db   : > { %4524 = vmatprep.subr.bf16.mxu0 %v5468_v40 }
 0x2e5   : > { %4521 = vmatmul.mubr.msk.bf16.vlgmr.msra.gmra.mrb[0].mxu0 %vm485_vm1, %v1427_v32 }
 0x2e6   : > { %4526 = vmatprep.mubr.msk.bf16.mxu0 %vm5471_vm12, %v5468_v40 }
 0x316   : > { %v1490_v41 = vpop.permute.xlu1 %1489 }
 0x317   : > { %4525 = vmatpush3.bf16.msra.mxu0 %v1490_v41 }
 0x318   : > { %4530 = vmatprep.subr.bf16.mxu0 %v5468_v40 }
 0x31a   : > { %v1487_v42 = vpop.permute.xlu1 %1486 }
 0x31b   : > { %4527 = vmatmul.mubr.msk.bf16.vlgmr.msra.gmra.mrb[0].mxu0 %vm485_vm1, %v1487_v42 }
 0x31c   : > { %4532 = vmatprep.mubr.msk.bf16.mxu0 %vm5471_vm12, %v5468_v40 }
 0x31e   : > { %v6237_v43 = vpop.permute.xlu1 %1845 }
 0x31f   : > { %vm6786_vm6 = vcmp.ne.s16.totalorder %v6237_v43, 0 }
 0x320   : > { %v1848_v48 = vsel %vm6786_vm6, %v5924_v44, 0 }
 0x321   : > { %1861 = vrot.lane.b32.xlu1 %v1848_v48, %s6867_s23 }
 0x325   : > { %1858 = vrot.lane.b32.xlu1 %v4266_v37, %s6868_s4 }
 0x326   : > { %v1554_v34 = vpop.permute.xlu0 %1553 }
 0x327   : > { %4531 = vmatpush3.bf16.msra.mxu0 %v1554_v34 }
 0x328   : > { %4536 = vmatprep.subr.bf16.mxu0 %v5468_v40 }
 0x329   : > { %2213 = vrot.lane.b32.xlu1 %v5920_v39, %s6869_s5 }
 0x32a   : > { %v1551_v35 = vpop.permute.xlu0 %1550 }
 0x32b   : > { %4533 = vmatmul.mubr.msk.bf16.vlgmr.msra.gmra.mrb[0].mxu0 %vm485_vm1, %v1551_v35 }
 0x32c   : > { %4538 = vmatprep.mubr.msk.bf16.mxu0 %vm5471_vm12, %v5468_v40 }
 0x32d   : > { %1985 = vrot.lane.b32.xlu1 %v5924_v44, %s6859_s14 }
 0x32e   : > { %v6262_v49 = vpop.permute.xlu0 %1909  ;;  %v1608_v39 = vpop.permute.xlu1 %1607 }
 0x32f   : > { %vm6788_vm6 = vcmp.ne.s16.totalorder %v6262_v49, 0  ;;  %4537 = vmatpush3.bf16.msra.mxu0 %v1608_v39 }
 0x330   : > { %v1912_v52 = vsel %vm6788_vm6, %v5924_v44, 0  ;;  %4542 = vmatprep.subr.bf16.mxu0 %v5468_v40 }
 0x331   : > { %1925 = vrot.lane.b32.xlu0 %v1912_v52, %s6870_s6 }
 0x332   : > { %v1667_v54 = vpop.permute.xlu0 %1666 }
 0x335   : > { %1922 = vrot.lane.b32.xlu0 %v4266_v37, %s6871_s7 }
 0x336   : > { %v1670_v55 = vpop.permute.xlu1 %1669  ;;  %v6271_v57 = vpop.permute.xlu0 %2033 }
 0x337   : > { %4539 = vmatmul.mubr.msk.bf16.vlgmr.msra.gmra.mrb[0].mxu0 %vm485_vm1, %v6188_v17  ;;  %vm6790_vm15 = vcmp.ne.s16.totalorder %v6271_v57, 0 }
 0x338   : > { %4543 = vmatpush3.bf16.msra.mxu0 %v1670_v55  ;;  %4544 = vmatprep.mubr.msk.bf16.mxu0 %vm5471_vm12, %v5468_v40  ;;  %v2036_v58 = vsel %vm6790_vm15, %v5924_v44, 0 }
 0x339   : > { %1982 = vrot.lane.b32.xlu0 %v4266_v37, %s6853_s16  ;;  %2049 = vrot.lane.b32.xlu1 %v2036_v58, %s6872_s26 }
 0x33a   : > { %v1734_v59 = vpop.permute.xlu1 %1733  ;;  %4548 = vmatprep.subr.bf16.mxu0 %v5468_v40 }
 0x33d   : > { %2046 = vrot.lane.b32.xlu0 %v4266_v37, %s6856_s20 }
 0x33e   : > { %v1731_v61 = vpop.permute.xlu1 %1730 }
 0x341   : > { %v1798_v62 = vpop.permute.xlu0 %1797 }
 0x342   : > { %v6285_v63 = vpop.permute.xlu1 %2097 }
 0x343   : > { %4545 = vmatmul.mubr.msk.bf16.vlgmr.msra.gmra.mrb[0].mxu0 %vm485_vm1, %v1667_v54  ;;  %vm6794_vm6 = vcmp.ne.s16.totalorder %v6285_v63, 0 }
 0x344   : > { %4549 = vmatpush3.bf16.msra.mxu0 %v1734_v59  ;;  %4550 = vmatprep.mubr.msk.bf16.mxu0 %vm5471_vm12, %v5468_v40  ;;  %v2100_v4 = vsel %vm6794_vm6, %v5924_v44, 0 }
 0x345   : > { %v1795_v2 = vpop.permute.xlu0 %1794  ;;  %2103 = vrot.lane.b32.xlu1 %v2100_v4, %s6873_s29  ;;  %4554 = vmatprep.subr.bf16.mxu0 %v5468_v40 }
 0x349   : > { %v6297_v5 = vpop.permute.xlu0 %2150  ;;  %2162 = vrot.lane.b32.xlu1 %v2161_v19, %s6859_s14 }
 0x34a   : > { %vm2152_vm15 = vcmp.ne.s16.totalorder %v6297_v5, 0 }
 0x34b   : > { %v2153_v8 = vsel %vm2152_vm15, %v5924_v44, 0 }
 0x34c   : > { %2165 = vrot.lane.b32.xlu0 %v2153_v8, %s6874_s28 }
 0x34d   : > { %2226 = vrot.lane.b32.xlu1 %v4280_v23, %s6875_s17 }
 0x34f   : > { %4551 = vmatmul.mubr.msk.bf16.vlgmr.msra.gmra.mrb[0].mxu0 %vm485_vm1, %v1731_v61 }
 0x350   : > { %4555 = vmatpush3.bf16.msra.mxu0 %v1798_v62  ;;  %4556 = vmatprep.mubr.msk.bf16.mxu0 %vm5471_vm12, %v5468_v40 }
 0x351   : > { %4560 = vmatprep.subr.bf16.mxu0 %v5468_v40 }
 0x35b   : > { %4557 = vmatmul.mubr.msk.bf16.vlgmr.msra.gmra.mrb[0].mxu0 %vm485_vm1, %v1795_v2 }
 0x35c   : > { %4562 = vmatprep.mubr.msk.bf16.mxu0 %vm5471_vm12, %v5468_v40 }
 0x393   : > { %v1862_v7 = vpop.permute.xlu1 %1861 }
 0x394   : > { %4561 = vmatpush3.bf16.msra.mxu0 %v1862_v7 }
 0x395   : > { %4566 = vmatprep.subr.bf16.mxu0 %v5468_v40 }
 0x397   : > { %v1859_v10 = vpop.permute.xlu1 %1858 }
 0x398   : > { %4563 = vmatmul.mubr.msk.bf16.vlgmr.msra.gmra.mrb[0].mxu0 %vm485_vm1, %v1859_v10  ;;  %v2306_v10 = vld [vmem:[#allocation9] sm:$0xf] }
 0x399   : > { %4568 = vmatprep.mubr.msk.bf16.mxu0 %vm5471_vm12, %v5468_v40 }
 0x39b   : > { %v6306_v11 = vpop.permute.xlu1 %2213 }
 0x39c   : > { %vm6796_vm6 = vcmp.ne.s16.totalorder %v6306_v11, 0 }
 0x39d   : > { %v2216_v12 = vsel %vm6796_vm6, %v5924_v44, 0  ;;  %vm2276_vm6 = vcmask 519168  }
 0x39e   : > { %2229 = vrot.lane.b32.xlu0 %v2216_v12, %s6876_s30 }
 0x39f   : > { %v1986_v44 = vpop.permute.xlu1 %1985 }
 0x3a3   : > { %v1926_v14 = vpop.permute.xlu0 %1925 }
 0x3a4   : > { %4567 = vmatpush3.bf16.msra.mxu0 %v1926_v14 }
 0x3a5   : > { %4572 = vmatprep.subr.bf16.mxu0 %v5468_v40 }
 0x3a7   : > { %v1923_v16 = vpop.permute.xlu0 %1922 }
 0x3a8   : > { %4569 = vmatmul.mubr.msk.bf16.vlgmr.msra.gmra.mrb[0].mxu0 %vm485_vm1, %v1923_v16 }
 0x3a9   : > { %4573 = vmatpush3.bf16.msra.mxu0 %v1986_v44  ;;  %4574 = vmatprep.mubr.msk.bf16.mxu0 %vm5471_vm12, %v5468_v40  ;;  %v2313_v44 = vld [vmem:[#allocation11] sm:$0xf] }
 0x3aa   : > { %4578 = vmatprep.subr.bf16.mxu0 %v5468_v40 }
 0x3ab   : > { %v1983_v17 = vpop.permute.xlu0 %1982  ;;  %v2050_v20 = vpop.permute.xlu1 %2049 }
 0x3af   : > { %v2047_v21 = vpop.permute.xlu0 %2046 }
 0x3b4   : > { %4575 = vmatmul.mubr.msk.bf16.vlgmr.msra.gmra.mrb[0].mxu0 %vm485_vm1, %v1983_v17 }
 0x3b5   : > { %4579 = vmatpush3.bf16.msra.mxu0 %v2050_v20  ;;  %4580 = vmatprep.mubr.msk.bf16.mxu0 %vm5471_vm12, %v5468_v40  ;;  %v5144_v20 = vld [vmem:[#allocation2] sm:$0xff] }
 0x3b6   : > { %4584 = vmatprep.subr.bf16.mxu0 %v5468_v40 }
 0x3b7   : > { %v2104_v24 = vpop.permute.xlu1 %2103 }
 0x3bb   : > { %v2163_v26 = vpop.permute.xlu1 %2162 }
 0x3be   : > { %v2166_v25 = vpop.permute.xlu0 %2165 }
 0x3bf   : > { %v2227_v30 = vpop.permute.xlu1 %2226 }
 0x3c0   : > { %4581 = vmatmul.mubr.msk.bf16.vlgmr.msra.gmra.mrb[0].mxu0 %vm485_vm1, %v2047_v21  ;;  %v2337_v21 = vsel %vm463_vm3, %v5144_v20, 0 }
 0x3c1   : > { %4585 = vmatpush3.bf16.msra.mxu0 %v2104_v24  ;;  %4586 = vmatprep.mubr.msk.bf16.mxu0 %vm5471_vm12, %v5468_v40 }
 0x3c2   : > { %4590 = vmatprep.subr.bf16.mxu0 %v5468_v40 }
 0x3cc   : > { %4587 = vmatmul.mubr.msk.bf16.vlgmr.msra.gmra.mrb[0].mxu0 %vm485_vm1, %v2101_v22 }
 0x3cd   : > { %4591 = vmatpush3.bf16.msra.mxu0 %v2166_v25  ;;  %4592 = vmatprep.mubr.msk.bf16.mxu0 %vm5471_vm12, %v5468_v40 }
 0x3ce   : > { %4596 = vmatprep.subr.bf16.mxu0 %v5468_v40 }
 0x3d8   : > { %4593 = vmatmul.mubr.msk.bf16.vlgmr.msra.gmra.mrb[0].mxu0 %vm485_vm1, %v2163_v26 }
 0x3d9   : > { %4598 = vmatprep.mubr.msk.bf16.mxu0 %vm5471_vm12, %v5468_v40 }
 0x410   : > { %v2230_v29 = vpop.permute.xlu0 %2229 }
 0x411   : > { %4597 = vmatpush3.bf16.msra.mxu0 %v2230_v29 }
 0x414   : > { %4599 = vmatmul.mubr.msk.bf16.vlgmr.msra.gmra.mrb[0].mxu0 %vm485_vm1, %v2227_v30 }
 0x4e7   : > { %v2269_v32 = vpop.f32.mrb[0].mxu0 }
 0x4e8   : > { %v4600_v36 = vpop.f32.mrb[1].mxu0  ;;  %v2277_v37 = vsel %vm2276_vm6, %v2269_v32, 0.0  ;;  %v2287_v41 = vmul.f32 %v2269_v32, %v2269_v32 }
 0x4e9   : > { %2278 = vadd.xlane.f32.xlu0 %v2277_v37  ;;  %v2272_v28 = vpop.f32.mrb[2].mxu0  ;;  %v6351_v37 = vld [vmem:[#allocation12] sm:$0x3] }
 0x4ea   : > { %v4601_v42 = vpop.f32.mrb[3].mxu0  ;;  %v2288_v48 = vsel %vm2276_vm6, %v2287_v41, 0.0 }
 0x4eb   : > { %2289 = vadd.xlane.f32.xlu1 %v2288_v48  ;;  %v4286_v48 = vld.sshfl [vmem:[#allocation12] sm:$0x3 pattern:$0x76325410] }
 0x576   : > { %v2279_v34 = vpop.xlane.xlu0 %2278 }
 0x577   : > { %v2280_v35 = vrot.slane %v2279_v34, 4 }
 0x578   : > { %v2290_v39 = vpop.xlane.xlu1 %2289 }
 0x579   : > { %v2281_v52 = vadd.f32 %v2280_v35, %v2279_v34  ;;  %v2291_v54 = vrot.slane %v2290_v39, 4  ;;  %v2334_v34 = vsel %vm445_vm11, %v5144_v20, 0  ;;  %v2453_v35 = vsel %vm597_vm13, %v5144_v20, 0 }
 0x57b   : > { %v2282_v55 = vrot.slane %v2281_v52, 2  ;;  %v2292_v58 = vadd.f32 %v2291_v54, %v2290_v39 }
 0x57d   : > { %v2293_v59 = vrot.slane %v2292_v58, 2  ;;  %v2283_v61 = vadd.f32 %v2282_v55, %v2281_v52  ;;  %v6426_v52 = vld [vmem:[#allocation12 + $0x2] sm:$0x3] }
 0x57e   : > { %v2917_v6 = vrot.slane %v6426_v52, %v5927_v45 }
 0x57f   : > { %v2284_v62 = vrot.slane %v2283_v61, 1  ;;  %v2294_v2 = vadd.f32 %v2293_v59, %v2292_v58  ;;  %v6450_v58 = vld [vmem:[#allocation12 + $0x4] sm:$0x3] }
 0x581   : > { %v2285_v22 = vadd.f32 %v2284_v62, %v2283_v61  ;;  %v2295_v4 = vrot.slane %v2294_v2, 1 }
 0x583   : > { %4972 = vpush %v2285_v22  ;;  %v2296_v19 = vadd.f32 %v2295_v4, %v2294_v2 }
 0x585   : > { %4974 = vpush %v2296_v19 }
 0x5b4   : > { %s4973_s13 = spop %4972 }
 0x5b5   : > { %s2300_s27 = smul.f32 0.00390625, %s4973_s13  ;;  %s6910_s13 = sld [smem:[#allocation28_spill]] }
 0x5b6   : > { %s4975_s8 = spop %4974 }
 0x5b7   : > { %s2304_s10 = smul.f32 %s2300_s27, %s2300_s27  ;;  %v2314_v14 = vstv %s2300_s27  ;;  %s6881_s27 = smov 3  }
 0x5b8   : > { %s2303_s19 = smul.f32 0.00390625, %s4975_s8  ;;  %s6880_s8 = smov 4  }
 0x5ba   : > { %s2305_s11 = ssub.f32 %s2303_s19, %s2304_s10  ;;  %s6911_s19 = sld [smem:[#allocation33_spill]] }
 0x5bc   : > { %s2307_s9 = sadd.f32 1e-05, %s2305_s11  ;;  %s6885_s11 = smov 127  }
 0x5be   : > { %v2308_v7 = vstv %s2307_s9  ;;  %s4329_s9 = sshll.u32 %s6910_s13, 5 }
 0x5bf   : > { %5138 = vrsqrt.f32 %v2308_v7 }
 0x5c9   : > { %v5139_v8 = vpop.eup %5138 }
 0x5ca   : > { %4976 = vpush %v5139_v8 }
 0x5fb   : > { %s4977_s29 = spop %4976 }
 0x5fc   : > { %v2311_v23 = vstv %s4977_s29  ;;  %s6882_s29 = smov 1  }
 0x5fd   : > { %v2312_v12 = vmul.f32 %v2311_v23, %v2306_v10 }
 0x5ff   : > { %v2315_v16 = vmul.f32 %v2314_v14, %v2312_v12  ;;  %2319 = vperm.xlu0 %5136, %v2312_v12  }
 0x601   : > { %v2316_v17 = vsub.f32 %v2313_v44, %v2315_v16 }
 0x603   : > { %2325 = vperm.xlu1 %5137, %v2316_v17  }
 0x607   : > { %2351 = vrot.lane.b32.xlu1 %v2337_v21, %s6866_s3 }
 0x67e   : > { %v2320_v24 = vpop.permute.xlu0 %2319 }
 0x67f   : > { %v2322_v25 = vmul.f32 %v2320_v24, %v2269_v32  ;;  %v2346_v32 = vrot.slane %v6351_v37, %v5927_v45 }
 0x682   : > { %v2326_v26 = vpop.permute.xlu1 %2325 }
 0x683   : > { %v2328_v29 = vadd.f32 %v2326_v26, %v2322_v25 }
 0x685   : > { %v2329_v30 = vmax.f32 %v2328_v29, 0.0  ;;  %v6539_v29 = vld [vmem:[#allocation12 + $0x6] sm:$0x3] }
 0x686   : > { %v2352_v5 = vpop.permute.xlu1 %2351 }
 0x687   : > { %v2330_v36 = vpack.c.bf16 %v2329_v30, %v2329_v30  ;;  %v3885_v30 = vrot.slane %v6539_v29, %v5927_v45 }
 0x689   : > { %2331 = vst.msk [vmem:[#allocation2 + $0x8] sm:$0x3] %vm427_vm0, %v2330_v36 }
 0x690   : > { %v6353_v41 = vld [vmem:[#allocation2 + $0x8] sm:$0xff] }
 0x691   : > { %v2454_v28 = vsel %vm597_vm13, %v6353_v41, 0  ;;  %v2338_v42 = vsel %vm463_vm3, %v6353_v41, 0  ;;  %v2335_v46 = vsel %vm445_vm11, %v6353_v41, 0  ;;  %v2720_v50 = vsel %vm912_vm5, %v6353_v41, 0 }
 0x692   : > { %2470 = vrot.lane.b32.xlu0 %v2454_v28, %s6864_s1  ;;  %2353 = vrot.lane.b32.xlu1 %v2338_v42, %s6866_s3  ;;  %v2521_v39 = vsel %vm680_vm14, %v6353_v41, 0  ;;  %s6877_s3 = smov 12   ;;  %v2854_v51 = vsel %vm1078_vm9, %v6353_v41, 0  ;;  %v2653_v53 = vsel %vm829_vm4, %v6353_v41, 0  ;;  %v2909_v3 = vsel %vm1137_vm10, %v6353_v41, 0 }
 0x693   : > { %v2787_v13 = vsel %vm995_vm7, %v6353_v41, 0  ;;  %v3042_v18 = vsel %vm1278_vm8, %v6353_v41, 0  ;;  %vm6883_vm3 = vcmp.ne.s16.totalorder %v6148_v0, 0  ;;  %vm6884_vm11 = vcmp.ne.s16.totalorder %v6088_v33, 0 }
 0x694   : > { %v3230_v47 = vsel %vm6883_vm3, %v6353_v41, 0  ;;  %v2975_v54 = vsel %vm6884_vm11, %v6353_v41, 0  ;;  %vm6886_vm13 = vcmp.ne.s16.totalorder %v6172_v9, 0  ;;  %v3352_v33 = vsel %vm1603_vm2, %v6353_v41, 0 }
 0x695   : > { %v3291_v55 = vsel %vm6886_vm13, %v6353_v41, 0  ;;  %v3410_v0 = vrot.slane %v6450_v58, %v5927_v45  ;;  %vm6887_vm14 = vcmp.ne.s16.totalorder %v6125_v56, 0  ;;  %vm6888_vm4 = vcmp.ne.s16.totalorder %v6205_v27, 0 }
 0x696   : > { %2535 = vrot.lane.b32.xlu0 %v5463_v1, %s6861_s22  ;;  %2347 = vrot.lane.b32.xlu1 %v2346_v32, %s6859_s14  ;;  %v3109_v9 = vsel %vm6887_vm14, %v6353_v41, 0  ;;  %v3402_v56 = vsel %vm6888_vm4, %v6353_v41, 0  ;;  %vm6889_vm2 = vcmp.ne.s16.totalorder %v6214_v31, 0  ;;  %vm6890_vm5 = vcmp.ne.s16.totalorder %v6221_v38, 0 }
 0x697   : > { %v3462_v15 = vsel %vm6889_vm2, %v6353_v41, 0  ;;  %v3523_v59 = vsel %vm6890_vm5, %v6353_v41, 0  ;;  %v3877_v27 = vsel %vm2152_vm15, %v6353_v41, 0  ;;  %vm6891_vm7 = vcmp.ne.s16.totalorder %v6237_v43, 0 }
 0x698   : > { %v3584_v31 = vsel %vm6891_vm7, %v6353_v41, 0  ;;  %vm6892_vm8 = vcmp.ne.s16.totalorder %v6306_v11, 0  ;;  %vm6893_vm9 = vcmp.ne.s16.totalorder %v6262_v49, 0  ;;  %vm6894_vm15 = vcmp.ne.s16.totalorder %v6271_v57, 0 }
 0x699   : > { %v3937_v38 = vsel %vm6892_vm8, %v6353_v41, 0  ;;  %v3645_v61 = vsel %vm6893_vm9, %v6353_v41, 0  ;;  %v3766_v62 = vsel %vm6894_vm15, %v6353_v41, 0  ;;  %vm6895_vm10 = vcmask 162816  }
 0x69a   : > { %2531 = vrot.lane.b32.xlu0 %v4286_v48, %s6865_s2  ;;  %2402 = vrot.lane.b32.xlu1 %v2334_v34, %s6869_s5  ;;  %vm6896_vm3 = vcmp.ne.s16.totalorder %v6285_v63, 0  ;;  %vm6898_vm11 = vcmask 171008   ;;  %vm6899_vm13 = vcmask 154624   ;;  %vm6900_vm14 = vcmask 138240  }
 0x69b   : > { %v3827_v2 = vsel %vm6896_vm3, %v6353_v41, 0  ;;  %vm6901_vm4 = vcmask 121856   ;;  %vm6902_vm2 = vcmask 105472   ;;  %vm6903_vm5 = vcmask 97280  }
 0x69c   : > { %v4326_v32 = vld.sshfl [vmem:[#allocation12 + $0x6] sm:$0x3 pattern:$0x76325410]  ;;  %vm6904_vm7 = vcmask 89088   ;;  %vm6905_vm8 = vcmask 39936  }
 0x69d   : > { %vm6906_vm9 = vcmask 31744   ;;  %vm6907_vm15 = vcmask 23552  }
 0x69e   : > { %2602 = vrot.lane.b32.xlu0 %v6353_v41, %s6856_s20  ;;  %2404 = vrot.lane.b32.xlu1 %v2335_v46, %s6869_s5  ;;  %s6879_s5 = smov 5  }
 0x6a2   : > { %2667 = vrot.lane.b32.xlu0 %v5463_v1, %s6857_s15  ;;  %2468 = vrot.lane.b32.xlu1 %v2453_v35, %s6864_s1  ;;  %s6878_s1 = smov 11  }
 0x6a6   : > { %2663 = vrot.lane.b32.xlu0 %v4286_v48, %s6871_s7  ;;  %2464 = vrot.lane.b32.xlu1 %v4286_v48, %s6875_s17 }
 0x6aa   : > { %2736 = vrot.lane.b32.xlu0 %v2720_v50, %s6854_s18  ;;  %2537 = vrot.lane.b32.xlu1 %v2521_v39, %s6861_s22 }
 0x6ae   : > { %2801 = vrot.lane.b32.xlu0 %v5463_v1, %s6877_s3  ;;  %2600 = vrot.lane.b32.xlu1 %v5144_v20, %s6856_s20 }
 0x6b2   : > { %2797 = vrot.lane.b32.xlu0 %v4286_v48, %s6856_s20  ;;  %2596 = vrot.lane.b32.xlu1 %v4286_v48, %s6868_s4 }
 0x6b6   : > { %2860 = vrot.lane.b32.xlu0 %v2854_v51, %s6878_s1  ;;  %2669 = vrot.lane.b32.xlu1 %v2653_v53, %s6857_s15  ;;  %s6914_s15 = sld [smem:[#allocation43_spill]] }
 0x6ba   : > { %2924 = vrot.lane.b32.xlu0 %v2909_v3, %s6879_s5  ;;  %2734 = vrot.lane.b32.xlu1 %v5463_v1, %s6854_s18  ;;  %s4064_s18 = scalar_lea.sflag [#allocation5], %s6911_s19 }
 0x6be   : > { %2989 = vrot.lane.b32.xlu0 %v5463_v1, %s6880_s8  ;;  %2730 = vrot.lane.b32.xlu1 %v4286_v48, %s6853_s16 }
 0x6c2   : > { %2985 = vrot.lane.b32.xlu0 %v4298_v60, %s6875_s17  ;;  %2803 = vrot.lane.b32.xlu1 %v2787_v13, %s6877_s3 }
 0x6c6   : > { %3058 = vrot.lane.b32.xlu0 %v3042_v18, %s6881_s27  ;;  %2858 = vrot.lane.b32.xlu1 %v5463_v1, %s6878_s1 }
 0x6ca   : > { %3123 = vrot.lane.b32.xlu0 %v5463_v1, %s6882_s29  ;;  %2922 = vrot.lane.b32.xlu1 %v5463_v1, %s6879_s5 }
 0x6ce   : > { %3119 = vrot.lane.b32.xlu0 %v4298_v60, %s6868_s4  ;;  %2918 = vrot.lane.b32.xlu1 %v2917_v6, %s6859_s14 }
 0x6d2   : > { %3243 = vrot.lane.b32.xlu0 %v3230_v47, %s6885_s11  ;;  %2991 = vrot.lane.b32.xlu1 %v2975_v54, %s6880_s8 }
 0x6d6   : > { %3304 = vrot.lane.b32.xlu0 %v3291_v55, %s6855_s25  ;;  %3056 = vrot.lane.b32.xlu1 %v5463_v1, %s6881_s27  ;;  %v4312_v1 = vld.sshfl [vmem:[#allocation12 + $0x4] sm:$0x3 pattern:$0x76325410] }
 0x6da   : > { %3355 = vrot.lane.b32.xlu0 %v3352_v33, %s6858_s12  ;;  %3052 = vrot.lane.b32.xlu1 %v4298_v60, %s6865_s2  ;;  %s6913_s12 = sshll.u32 %s6911_s19, 1 }
 0x6de   : > { %3411 = vrot.lane.b32.xlu0 %v3410_v0, %s6859_s14  ;;  %3125 = vrot.lane.b32.xlu1 %v3109_v9, %s6882_s29 }
 0x6e2   : > { %3472 = vrot.lane.b32.xlu0 %v4312_v1, %s6875_s17  ;;  %3183 = vrot.lane.b32.xlu1 %v4298_v60, %s6871_s7 }
 0x6e6   : > { %3533 = vrot.lane.b32.xlu0 %v4312_v1, %s6865_s2  ;;  %3240 = vrot.lane.b32.xlu1 %v4298_v60, %s6853_s16 }
 0x6ea   : > { %3594 = vrot.lane.b32.xlu0 %v4312_v1, %s6868_s4  ;;  %3301 = vrot.lane.b32.xlu1 %v4298_v60, %s6856_s20 }
 0x6ee   : > { %3655 = vrot.lane.b32.xlu0 %v4312_v1, %s6871_s7  ;;  %3414 = vrot.lane.b32.xlu1 %v3402_v56, %s6860_s21  ;;  %s6912_s21 = sld [smem:[#allocation31_spill]] }
 0x6f2   : > { %3715 = vrot.lane.b32.xlu0 %v4312_v1, %s6853_s16  ;;  %3475 = vrot.lane.b32.xlu1 %v3462_v15, %s6862_s24  ;;  %s408_s16 = scalar_lea.vmem [#allocation17], %s6913_s12 }
 0x6f4   : > { %p6915_p13 = scmp.ne.s32.totalorder %s6912_s21, 0 }
 0x6f6   : > { %3776 = vrot.lane.b32.xlu0 %v4312_v1, %s6856_s20  ;;  %3536 = vrot.lane.b32.xlu1 %v3523_v59, %s6863_s0  ;;  %s6897_s0 = smov 109   ;;  %s6649_s20 = scalar_lea.hbm %s6914_s15, %s4329_s9 }
 0x6fa   : > { %3889 = vrot.lane.b32.xlu0 %v3877_v27, %s6874_s28  ;;  %3597 = vrot.lane.b32.xlu1 %v3584_v31, %s6867_s23  ;;  %s4077_s23 = sshll.u32 %s408_s16, 4  ;;  %s6651_s23 = int_to_ptr.vmem [resolvable:$true] %s4077_s23 }
 0x6fb   : > { %s5371_s22 = scalar_lea.vmem %s6651_s23, 32 }
 0x6fc   : > { %p5372_p12 = scmp.ne.s32.totalorder %s6651_s23, %s5371_s22 }
 0x6fe   : > { %3950 = vrot.lane.b32.xlu0 %v3937_v38, %s6876_s30  ;;  %3658 = vrot.lane.b32.xlu1 %v3645_v61, %s6870_s6  ;;  %p5373_p1 = pnand %p5372_p12, %p6915_p13 }
 0x700   : > { %p5374_p3 = pneg %p5373_p1 }
 0x702   : > { %3718 = vrot.lane.b32.xlu1 %v6353_v41, %s6859_s14 }
 0x704   : > { %v2354_v43 = vpop.permute.xlu1 %2353  ;;  %v2471_v19 = vpop.permute.xlu0 %2470 }
 0x705   : > { %v2355_v11 = vsel %vm6895_vm10, %v2352_v5, %v2354_v43  ;;  %vm6908_vm10 = vcmask 7168  }
 0x706   : > { %3779 = vrot.lane.b32.xlu1 %v3766_v62, %s6872_s26  ;;  %4603 = vmatpush3.bf16.msra.mxu1 %v2355_v11  ;;  %s6909_s26 = sld [smem:[#allocation34_spill]] }
 0x707   : > { %4608 = vmatprep.subr.bf16.mxu1 %v5468_v40 }
 0x708   : > { %v2348_v49 = vpop.permute.xlu1 %2347  ;;  %v2536_v23 = vpop.permute.xlu0 %2535 }
 0x709   : > { %4605 = vmatmul.mubr.msk.bf16.vlgmr.msra.gmra.mrb[0].mxu1 %vm485_vm1, %v2348_v49 }
 0x70a   : > { %3830 = vrot.lane.b32.xlu1 %v3827_v2, %s6897_s0  ;;  %4610 = vmatprep.mubr.msk.bf16.mxu1 %vm5471_vm12, %v5468_v40 }
 0x70c   : > { %v2403_v57 = vpop.permute.xlu1 %2402  ;;  %v2532_v14 = vpop.permute.xlu0 %2531 }
 0x70e   : > { %3886 = vrot.lane.b32.xlu1 %v3885_v30, %s6859_s14  ;;  %s5498_s14 = smov [#allocation17]  }
 0x70f   : > { %s5375_s3 = sshll.u32 %s5498_s14, 4  ;;  %s5376_s3 = int_to_ptr.vmem [resolvable:$false] %s5375_s3 }
 0x710   : > { %v2405_v22 = vpop.permute.xlu1 %2404  ;;  %v2603_v16 = vpop.permute.xlu0 %2602  ;;  %s5377_s1 = scalar_lea.vmem %s5376_s3, 64  ;;  %p5378_p2 = scmp.lt.s32.totalorder %s6651_s23, %s5376_s3 }
 0x711   : > { %v2406_v4 = vsel %vm6898_vm11, %v2403_v57, %v2405_v22  ;;  %p5379_p0 = scmp.lt.s32.totalorder %s5377_s1, %s5371_s22 }
 0x712   : > { %4609 = vmatpush3.bf16.msra.mxu1 %v2406_v4  ;;  %3947 = vrot.lane.b32.xlu1 %v4326_v32, %s6875_s17 }
 0x713   : > { %4614 = vmatprep.subr.bf16.mxu1 %v5468_v40  ;;  %p5380_p6 = por %p5379_p0, %p5378_p2 }
 0x714   : > { %v2469_v7 = vpop.permute.xlu1 %2468  ;;  %v2668_v24 = vpop.permute.xlu0 %2667 }
 0x715   : > { %v2472_v8 = vsel %vm6899_vm13, %v2469_v7, %v2471_v19  ;;  %4611 = vmatmul.mubr.msk.bf16.vlgmr.msra.gmra.mrb[0].mxu1 %vm485_vm1, %v6351_v37  ;;  %p5381_p4 = pnand %p5380_p6, %p5374_p3 }
 0x716   : > { %4615 = vmatpush3.bf16.msra.mxu1 %v2472_v8  ;;  %4616 = vmatprep.mubr.msk.bf16.mxu1 %vm5471_vm12, %v5468_v40 }
 0x717   : > { %4620 = vmatprep.subr.bf16.mxu1 %v5468_v40 }
 0x718   : > { %v2465_v63 = vpop.permute.xlu1 %2464  ;;  %v2664_v26 = vpop.permute.xlu0 %2663 }
 0x71c   : > { %v2538_v10 = vpop.permute.xlu1 %2537  ;;  %v2737_v37 = vpop.permute.xlu0 %2736 }
 0x71d   : > { %v2539_v12 = vsel %vm6900_vm14, %v2536_v23, %v2538_v10 }
 0x720   : > { %v2601_v44 = vpop.permute.xlu1 %2600  ;;  %v2802_v45 = vpop.permute.xlu0 %2801 }
 0x721   : > { %4617 = vmatmul.mubr.msk.bf16.vlgmr.msra.gmra.mrb[0].mxu1 %vm485_vm1, %v2465_v63  ;;  %v2604_v17 = vsel %vm485_vm1, %v2601_v44, %v2603_v16 }
 0x722   : > { %4621 = vmatpush3.bf16.msra.mxu1 %v2539_v12  ;;  %4622 = vmatprep.mubr.msk.bf16.mxu1 %vm5471_vm12, %v5468_v40 }
 0x723   : > { %4626 = vmatprep.subr.bf16.mxu1 %v5468_v40 }
 0x724   : > { %v2597_v20 = vpop.permute.xlu1 %2596  ;;  %v2798_v46 = vpop.permute.xlu0 %2797 }
 0x728   : > { %v2670_v21 = vpop.permute.xlu1 %2669  ;;  %v2861_v50 = vpop.permute.xlu0 %2860 }
 0x729   : > { %v2671_v25 = vsel %vm6901_vm4, %v2668_v24, %v2670_v21 }
 0x72c   : > { %v2735_v36 = vpop.permute.xlu1 %2734  ;;  %v2925_v53 = vpop.permute.xlu0 %2924 }
 0x72d   : > { %4623 = vmatmul.mubr.msk.bf16.vlgmr.msra.gmra.mrb[0].mxu1 %vm485_vm1, %v2532_v14  ;;  %v2738_v28 = vsel %vm6902_vm2, %v2735_v36, %v2737_v37 }
 0x72e   : > { %4627 = vmatpush3.bf16.msra.mxu1 %v2604_v17  ;;  %4628 = vmatprep.mubr.msk.bf16.mxu1 %vm5471_vm12, %v5468_v40 }
 0x72f   : > { %4632 = vmatprep.subr.bf16.mxu1 %v5468_v40 }
 0x730   : > { %v2731_v42 = vpop.permute.xlu1 %2730  ;;  %v2990_v18 = vpop.permute.xlu0 %2989 }
 0x734   : > { %v2804_v48 = vpop.permute.xlu1 %2803 }
 0x735   : > { %v2805_v34 = vsel %vm6903_vm5, %v2802_v45, %v2804_v48 }
 0x738   : > { %v2859_v35 = vpop.permute.xlu1 %2858 }
 0x739   : > { %4629 = vmatmul.mubr.msk.bf16.vlgmr.msra.gmra.mrb[0].mxu1 %vm485_vm1, %v2597_v20  ;;  %v2862_v39 = vsel %vm6904_vm7, %v2859_v35, %v2861_v50 }
 0x73a   : > { %4633 = vmatpush3.bf16.msra.mxu1 %v2671_v25  ;;  %4634 = vmatprep.mubr.msk.bf16.mxu1 %vm5471_vm12, %v5468_v40 }
 0x73b   : > { %4638 = vmatprep.subr.bf16.mxu1 %v5468_v40 }
 0x73c   : > { %v2923_v51 = vpop.permute.xlu1 %2922 }
 0x73d   : > { %v2926_v3 = vsel %vm6905_vm8, %v2923_v51, %v2925_v53  ;;  %v4026_v51 = vld [vmem:[#allocation14] sm:$0xf] }
 0x740   : > { %v2919_v60 = vpop.permute.xlu1 %2918 }
 0x744   : > { %v2992_v13 = vpop.permute.xlu1 %2991 }
 0x745   : > { %4635 = vmatmul.mubr.msk.bf16.vlgmr.msra.gmra.mrb[0].mxu1 %vm485_vm1, %v2664_v26  ;;  %v2993_v6 = vsel %vm6906_vm9, %v2990_v18, %v2992_v13  ;;  %v4033_v13 = vld [vmem:[#allocation15] sm:$0xf] }
 0x746   : > { %4639 = vmatpush3.bf16.msra.mxu1 %v2738_v28  ;;  %4640 = vmatprep.mubr.msk.bf16.mxu1 %vm5471_vm12, %v5468_v40 }
 0x747   : > { %4644 = vmatprep.subr.bf16.mxu1 %v5468_v40 }
 0x748   : > { %v3057_v47 = vpop.permute.xlu1 %3056 }
 0x74c   : > { %v3053_v33 = vpop.permute.xlu1 %3052 }
 0x750   : > { %v3126_v0 = vpop.permute.xlu1 %3125 }
 0x751   : > { %4641 = vmatmul.mubr.msk.bf16.vlgmr.msra.gmra.mrb[0].mxu1 %vm485_vm1, %v2731_v42 }
 0x752   : > { %4645 = vmatpush3.bf16.msra.mxu1 %v2805_v34  ;;  %4646 = vmatprep.mubr.msk.bf16.mxu1 %vm5471_vm12, %v5468_v40 }
 0x753   : > { %4650 = vmatprep.subr.bf16.mxu1 %v5468_v40 }
 0x754   : > { %v3184_v15 = vpop.permute.xlu1 %3183 }
 0x758   : > { %v3241_v27 = vpop.permute.xlu1 %3240 }
 0x75d   : > { %4647 = vmatmul.mubr.msk.bf16.vlgmr.msra.gmra.mrb[0].mxu1 %vm485_vm1, %v2798_v46 }
 0x75e   : > { %4651 = vmatpush3.bf16.msra.mxu1 %v2862_v39  ;;  %4652 = vmatprep.mubr.msk.bf16.mxu1 %vm5471_vm12, %v5468_v40 }
 0x75f   : > { %4656 = vmatprep.subr.bf16.mxu1 %v5468_v40 }
 0x769   : > { %4653 = vmatmul.mubr.msk.bf16.vlgmr.msra.gmra.mrb[0].mxu1 %vm485_vm1, %v6426_v52  ;;  %v2986_v52 = vpop.permute.xlu0 %2985 }
 0x76a   : > { %4657 = vmatpush3.bf16.msra.mxu1 %v2926_v3  ;;  %4658 = vmatprep.mubr.msk.bf16.mxu1 %vm5471_vm12, %v5468_v40 }
 0x76b   : > { %4662 = vmatprep.subr.bf16.mxu1 %v5468_v40 }
 0x76d   : > { %v3059_v54 = vpop.permute.xlu0 %3058 }
 0x76e   : > { %v3060_v55 = vsel %vm6907_vm15, %v3057_v47, %v3059_v54  ;;  %v4049_v47 = vld [vmem:[%s6909_s26] sm:$0x3] }
 0x771   : > { %v3124_v9 = vpop.permute.xlu0 %3123 }
 0x772   : > { %v3127_v1 = vsel %vm6908_vm10, %v3124_v9, %v3126_v0 }
 0x775   : > { %4659 = vmatmul.mubr.msk.bf16.vlgmr.msra.gmra.mrb[0].mxu1 %vm485_vm1, %v2919_v60  ;;  %v3120_v56 = vpop.permute.xlu0 %3119 }
 0x776   : > { %4663 = vmatpush3.bf16.msra.mxu1 %v2993_v6  ;;  %4664 = vmatprep.mubr.msk.bf16.mxu1 %vm5471_vm12, %v5468_v40 }
 0x777   : > { %4668 = vmatprep.subr.bf16.mxu1 %v5468_v40 }
 0x779   : > { %v3244_v59 = vpop.permute.xlu0 %3243 }
 0x77d   : > { %v3305_v31 = vpop.permute.xlu0 %3304 }
 0x781   : > { %4665 = vmatmul.mubr.msk.bf16.vlgmr.msra.gmra.mrb[0].mxu1 %vm485_vm1, %v2986_v52  ;;  %v3356_v38 = vpop.permute.xlu0 %3355 }
 0x782   : > { %4669 = vmatpush3.bf16.msra.mxu1 %v3060_v55  ;;  %4670 = vmatprep.mubr.msk.bf16.mxu1 %vm5471_vm12, %v5468_v40  ;;  %v4050_v55 = vunpack.c.l.bf16 %v4049_v47 }
 0x783   : > { %4674 = vmatprep.subr.bf16.mxu1 %v5468_v40 }
 0x785   : > { %v3412_v5 = vpop.permute.xlu0 %3411 }
 0x789   : > { %v3473_v62 = vpop.permute.xlu0 %3472 }
 0x78d   : > { %4671 = vmatmul.mubr.msk.bf16.vlgmr.msra.gmra.mrb[0].mxu1 %vm485_vm1, %v3053_v33 }
 0x78e   : > { %4675 = vmatpush3.bf16.msra.mxu1 %v3127_v1  ;;  %4676 = vmatprep.mubr.msk.bf16.mxu1 %vm5471_vm12, %v5468_v40 }
 0x78f   : > { %4680 = vmatprep.subr.bf16.mxu1 %v5468_v40 }
 0x799   : > { %4677 = vmatmul.mubr.msk.bf16.vlgmr.msra.gmra.mrb[0].mxu1 %vm485_vm1, %v3120_v56 }
 0x79a   : > { %4681 = vmatpush3.bf16.msra.mxu1 %v6353_v41  ;;  %4682 = vmatprep.mubr.msk.bf16.mxu1 %vm5471_vm12, %v5468_v40  ;;  %v3302_v41 = vpop.permute.xlu1 %3301 }
 0x79b   : > { %4686 = vmatprep.subr.bf16.mxu1 %v5468_v40 }
 0x79e   : > { %v3415_v61 = vpop.permute.xlu1 %3414 }
 0x7a2   : > { %v3476_v43 = vpop.permute.xlu1 %3475 }
 0x7a5   : > { %4683 = vmatmul.mubr.msk.bf16.vlgmr.msra.gmra.mrb[0].mxu1 %vm485_vm1, %v3184_v15 }
 0x7a6   : > { %4687 = vmatpush3.bf16.msra.mxu1 %v3244_v59  ;;  %4688 = vmatprep.mubr.msk.bf16.mxu1 %vm5471_vm12, %v5468_v40  ;;  %v3537_v11 = vpop.permute.xlu1 %3536 }
 0x7a7   : > { %4692 = vmatprep.subr.bf16.mxu1 %v5468_v40 }
 0x7aa   : > { %v3598_v49 = vpop.permute.xlu1 %3597 }
 0x7ae   : > { %v3659_v57 = vpop.permute.xlu1 %3658 }
 0x7b1   : > { %4689 = vmatmul.mubr.msk.bf16.vlgmr.msra.gmra.mrb[0].mxu1 %vm485_vm1, %v3241_v27 }
 0x7b2   : > { %4693 = vmatpush3.bf16.msra.mxu1 %v3305_v31  ;;  %4694 = vmatprep.mubr.msk.bf16.mxu1 %vm5471_vm12, %v5468_v40  ;;  %v3719_v4 = vpop.permute.xlu1 %3718 }
 0x7b3   : > { %4698 = vmatprep.subr.bf16.mxu1 %v5468_v40 }
 0x7b6   : > { %v3780_v7 = vpop.permute.xlu1 %3779 }
 0x7ba   : > { %v3831_v63 = vpop.permute.xlu1 %3830 }
 0x7bd   : > { %4695 = vmatmul.mubr.msk.bf16.vlgmr.msra.gmra.mrb[0].mxu1 %vm485_vm1, %v3302_v41 }
 0x7be   : > { %4699 = vmatpush3.bf16.msra.mxu1 %v3356_v38  ;;  %4700 = vmatprep.mubr.msk.bf16.mxu1 %vm5471_vm12, %v5468_v40  ;;  %v3887_v23 = vpop.permute.xlu1 %3886 }
 0x7bf   : > { %4704 = vmatprep.subr.bf16.mxu1 %v5468_v40 }
 0x7c2   : > { %v3948_v14 = vpop.permute.xlu1 %3947 }
 0x7c9   : > { %4701 = vmatmul.mubr.msk.bf16.vlgmr.msra.gmra.mrb[0].mxu1 %vm485_vm1, %v6450_v58  ;;  %v3534_v58 = vpop.permute.xlu0 %3533 }
 0x7ca   : > { %4705 = vmatpush3.bf16.msra.mxu1 %v3415_v61  ;;  %4706 = vmatprep.mubr.msk.bf16.mxu1 %vm5471_vm12, %v5468_v40 }
 0x7cb   : > { %4710 = vmatprep.subr.bf16.mxu1 %v5468_v40 }
 0x7cd   : > { %v3595_v2 = vpop.permute.xlu0 %3594 }
 0x7d1   : > { %v3656_v22 = vpop.permute.xlu0 %3655 }
 0x7d5   : > { %4707 = vmatmul.mubr.msk.bf16.vlgmr.msra.gmra.mrb[0].mxu1 %vm485_vm1, %v3412_v5  ;;  %v3716_v19 = vpop.permute.xlu0 %3715 }
 0x7d6   : > { %4711 = vmatpush3.bf16.msra.mxu1 %v3476_v43  ;;  %4712 = vmatprep.mubr.msk.bf16.mxu1 %vm5471_vm12, %v5468_v40 }
 0x7d7   : > { %4716 = vmatprep.subr.bf16.mxu1 %v5468_v40 }
 0x7d9   : > { %v3777_v8 = vpop.permute.xlu0 %3776 }
 0x7dd   : > { %v3890_v10 = vpop.permute.xlu0 %3889 }
 0x7e1   : > { %4713 = vmatmul.mubr.msk.bf16.vlgmr.msra.gmra.mrb[0].mxu1 %vm485_vm1, %v3473_v62  ;;  %v3951_v12 = vpop.permute.xlu0 %3950 }
 0x7e2   : > { %4717 = vmatpush3.bf16.msra.mxu1 %v3537_v11  ;;  %4718 = vmatprep.mubr.msk.bf16.mxu1 %vm5471_vm12, %v5468_v40 }
 0x7e3   : > { %4722 = vmatprep.subr.bf16.mxu1 %v5468_v40 }
 0x7ed   : > { %4719 = vmatmul.mubr.msk.bf16.vlgmr.msra.gmra.mrb[0].mxu1 %vm485_vm1, %v3534_v58 }
 0x7ee   : > { %4723 = vmatpush3.bf16.msra.mxu1 %v3598_v49  ;;  %4724 = vmatprep.mubr.msk.bf16.mxu1 %vm5471_vm12, %v5468_v40 }
 0x7ef   : > { %4728 = vmatprep.subr.bf16.mxu1 %v5468_v40 }
 0x7f9   : > { %4725 = vmatmul.mubr.msk.bf16.vlgmr.msra.gmra.mrb[0].mxu1 %vm485_vm1, %v3595_v2 }
 0x7fa   : > { %4729 = vmatpush3.bf16.msra.mxu1 %v3659_v57  ;;  %4730 = vmatprep.mubr.msk.bf16.mxu1 %vm5471_vm12, %v5468_v40 }
 0x7fb   : > { %4734 = vmatprep.subr.bf16.mxu1 %v5468_v40 }
 0x805   : > { %4731 = vmatmul.mubr.msk.bf16.vlgmr.msra.gmra.mrb[0].mxu1 %vm485_vm1, %v3656_v22 }
 0x806   : > { %4735 = vmatpush3.bf16.msra.mxu1 %v3719_v4  ;;  %4736 = vmatprep.mubr.msk.bf16.mxu1 %vm5471_vm12, %v5468_v40 }
 0x807   : > { %4740 = vmatprep.subr.bf16.mxu1 %v5468_v40 }
 0x811   : > { %4737 = vmatmul.mubr.msk.bf16.vlgmr.msra.gmra.mrb[0].mxu1 %vm485_vm1, %v3716_v19 }
 0x812   : > { %4741 = vmatpush3.bf16.msra.mxu1 %v3780_v7  ;;  %4742 = vmatprep.mubr.msk.bf16.mxu1 %vm5471_vm12, %v5468_v40 }
 0x813   : > { %4746 = vmatprep.subr.bf16.mxu1 %v5468_v40 }
 0x81d   : > { %4743 = vmatmul.mubr.msk.bf16.vlgmr.msra.gmra.mrb[0].mxu1 %vm485_vm1, %v3777_v8 }
 0x81e   : > { %4747 = vmatpush3.bf16.msra.mxu1 %v3831_v63  ;;  %4748 = vmatprep.mubr.msk.bf16.mxu1 %vm5471_vm12, %v5468_v40 }
 0x81f   : > { %4752 = vmatprep.subr.bf16.mxu1 %v5468_v40 }
 0x829   : > { %4749 = vmatmul.mubr.msk.bf16.vlgmr.msra.gmra.mrb[0].mxu1 %vm485_vm1, %v6539_v29 }
 0x82a   : > { %4753 = vmatpush3.bf16.msra.mxu1 %v3890_v10  ;;  %4754 = vmatprep.mubr.msk.bf16.mxu1 %vm5471_vm12, %v5468_v40 }
 0x82b   : > { %4758 = vmatprep.subr.bf16.mxu1 %v5468_v40 }
 0x835   : > { %4755 = vmatmul.mubr.msk.bf16.vlgmr.msra.gmra.mrb[0].mxu1 %vm485_vm1, %v3887_v23 }
 0x836   : > { %4759 = vmatpush3.bf16.msra.mxu1 %v3951_v12  ;;  %4760 = vmatprep.mubr.msk.bf16.mxu1 %vm5471_vm12, %v5468_v40 }
 0x841   : > { %4761 = vmatmul.mubr.msk.bf16.vlgmr.msra.gmra.mrb[0].mxu1 %vm485_vm1, %v3948_v14 }
 0x914   : > { %v3990_v44 = vpop.f32.mrb[0].mxu1 }
 0x915   : > { %v4007_v16 = vmul.f32 %v3990_v44, %v3990_v44  ;;  %v4762_v17 = vpop.f32.mrb[1].mxu1  ;;  %v3997_v20 = vsel %vm2276_vm6, %v3990_v44, 0.0 }
 0x916   : > { %3998 = vadd.xlane.f32.xlu0 %v3997_v20  ;;  %v3993_v21 = vpop.f32.mrb[2].mxu1 }
 0x917   : > { %v4763_v24 = vpop.f32.mrb[3].mxu1  ;;  %v4008_v25 = vsel %vm2276_vm6, %v4007_v16, 0.0 }
 0x918   : > { %4009 = vadd.xlane.f32.xlu1 %v4008_v25 }
 0x9a3   : > { %v3999_v26 = vpop.xlane.xlu0 %3998 }
 0x9a4   : > { %v4000_v29 = vrot.slane %v3999_v26, 4 }
 0x9a5   : > { %v4010_v30 = vpop.xlane.xlu1 %4009 }
 0x9a6   : > { %v4001_v36 = vadd.f32 %v4000_v29, %v3999_v26  ;;  %v4011_v37 = vrot.slane %v4010_v30, 4 }
 0x9a8   : > { %v4002_v40 = vrot.slane %v4001_v36, 2  ;;  %v4012_v28 = vadd.f32 %v4011_v37, %v4010_v30 }
 0x9aa   : > { %v4013_v42 = vrot.slane %v4012_v28, 2  ;;  %v4003_v32 = vadd.f32 %v4002_v40, %v4001_v36 }
 0x9ac   : > { %v4004_v48 = vrot.slane %v4003_v32, 1  ;;  %v4014_v45 = vadd.f32 %v4013_v42, %v4012_v28 }
 0x9ae   : > { %v4005_v34 = vadd.f32 %v4004_v48, %v4003_v32  ;;  %v4015_v46 = vrot.slane %v4014_v45, 1 }
 0x9b0   : > { %4978 = vpush %v4005_v34  ;;  %v4016_v35 = vadd.f32 %v4015_v46, %v4014_v45 }
 0x9b2   : > { %4980 = vpush %v4016_v35 }
 0x9e1   : > { %s4979_s2 = spop %4978 }
 0x9e2   : > { %s4020_s4 = smul.f32 0.00390625, %s4979_s2 }
 0x9e3   : > { %s4981_s6 = spop %4980 }
 0x9e4   : > { %s4024_s7 = smul.f32 %s4020_s4, %s4020_s4  ;;  %v4034_v60 = vstv %s4020_s4 }
 0x9e5   : > { %s4023_s28 = smul.f32 0.00390625, %s4981_s6 }
 0x9e7   : > { %s4025_s30 = ssub.f32 %s4023_s28, %s4024_s7 }
 0x9e9   : > { %s4027_s17 = sadd.f32 1e-05, %s4025_s30 }
 0x9eb   : > { %v4028_v50 = vstv %s4027_s17 }
 0x9ec   : > { %5140 = vrsqrt.f32 %v4028_v50 }
 0x9f6   : > { %v5141_v39 = vpop.eup %5140 }
 0x9f7   : > { %4982 = vpush %v5141_v39 }
 0xa28   : > { %s4983_s10 = spop %4982 }
 0xa29   : > { %v4031_v53 = vstv %s4983_s10 }
 0xa2a   : > { %v4032_v3 = vmul.f32 %v4031_v53, %v4026_v51 }
 0xa2c   : > { %v4035_v18 = vmul.f32 %v4034_v60, %v4032_v3  ;;  %4039 = vperm.xlu0 %5136, %v4032_v3  }
 0xa2e   : > { %v4036_v6 = vsub.f32 %v4033_v13, %v4035_v18 }
 0xa30   : > { %4045 = vperm.xlu1 %5137, %v4036_v6  }
 0xaab   : > { %v4040_v52 = vpop.permute.xlu0 %4039 }
 0xaac   : > { %v4042_v54 = vmul.f32 %v4040_v52, %v3990_v44 }
 0xaaf   : > { %v4046_v33 = vpop.permute.xlu1 %4045 }
 0xab0   : > { %v4048_v0 = vadd.f32 %v4046_v33, %v4042_v54 }
 0xab2   : > { %v4051_v9 = vadd.f32 %v4050_v55, %v4048_v0 }
 0xab4   : > { %v4053_v1 = vmul.f32 0.044715, %v4051_v9  ;;  %v4052_v41 = vmul.f32 0.5, %v4051_v9 }
 0xab6   : > { %v4054_v56 = vmul.f32 %v4053_v1, %v4051_v9 }
 0xab8   : > { %v4055_v15 = vmul.f32 %v4054_v56, %v4051_v9 }
 0xaba   : > { %v4056_v59 = vadd.f32 %v4055_v15, %v4051_v9 }
 0xabc   : > { %v4057_v27 = vmul.f32 0.7978846, %v4056_v59 }
 0xabe   : > { %5142 = vtanh.f32 %v4057_v27 }
 0xac8   : > { %v5143_v31 = vpop.eup %5142 }
 0xac9   : > { %v4059_v38 = vadd.f32 1.0, %v5143_v31 }
 0xacb   : > { %v4060_v61 = vmul.f32 %v4059_v38, %v4052_v41 }
 0xacd   : > { %v4061_v5 = vpack.c.bf16 %v4060_v61, %v4060_v61 }
 0xacf   : > { %4062 = vst.msk [vmem:[%s408_s16] sm:$0x3] %vm427_vm0, %v4061_v5 }
 0xad0   : > { %5384 = shalt.err (!%p5381_p4)
}
 0xad1   : > { %s5385_s5 = scalar_lea.hbm %s6649_s20, 32  ;;  %s5389_s29 = scalar_lea.hbm %s6914_s15, 64 }
 0xad2   : > { %p5386_p11 = scmp.ne.s32.totalorder %s6649_s20, %s5385_s5  ;;  %p5390_p9 = scmp.lt.u32.totalorder %s6649_s20, %s6914_s15 }
 0xad3   : > { %p5391_p7 = scmp.lt.u32.totalorder %s5389_s29, %s5385_s5  ;;  %p5393_p12 = scmp.lt.u32.totalorder %s5385_s5, %s6649_s20 }
 0xad4   : > { %p5387_p8 = pnand %p5386_p11, %p6915_p13 }
 0xad5   : > { %p5392_p10 = por %p5391_p7, %p5390_p9 }
 0xad6   : > { %p5388_p5 = pneg %p5387_p8 }
 0xad7   : > { %p5394_p1 = por %p5393_p12, %p5392_p10 }
 0xad9   : > { %p5395_p3 = pnand %p5394_p1, %p5388_p5 }
 0xadb   : > { %5398 = shalt.err (!%p5395_p3)
}
 0xadc   : > { %5014 = dma.vmem_to_hbm [thread:$0]  (%p6915_p13), %s6651_s23, 32, %s6649_s20, %s4064_s18  }
 0xadd PF: > { %s6916_s2 = sld [smem:[#allocation24_spill]]  ;;  %s6917_s4 = sld [smem:[#allocation32_spill]] }
 0xade   : > { %s6918_s6 = sld [smem:[#allocation27_spill]] }
 0xae3   : > { %s4089_s7 = sand.u32 1, %s6916_s2   ;;  %p6919_p2 = scmp.ne.s32.totalorder %s6917_s4, 0 }
 0xae4   : > { %p6920_p0 = scmp.ge.s32.totalorder %s6918_s6, 2  ;;  %s4090_s28 = scalar_lea.sflag [#allocation5], %s4089_s7 }
 0xae6   : > { %p5043_p6 = pnand %p6920_p0, %p6919_p2 }
 0xae8   : > { %5436 = dma.done.wait (!%p5043_p6), %s4090_s28, 32  }
 0xae9   : > { %5438 = vsyncadd (!%p5043_p6), %s4090_s28, 4294967264  ;;  %s6921_s30 = sld [smem:[#allocation29_spill]]  ;;  %s6922_s27 = sld [smem:[#allocation25_spill]] }
 0xaea   : > { %s6923_s28 = sld [smem:[#allocation26_spill]]  ;;  %s6924_s29 = sld [smem:[#allocation30_spill]] }
 0xaef   : > { %p25_p4 = scmp.ge.s32.totalorder %s6921_s30, 4  }
 0xaf1   :  { %27 = sbr.rel (!%p25_p4) target bundleno = 19 (0x13), region = 125 }
 0xaf8   :  { %4095 = vsyncpa [#allocation4], 1 }
 0xaf9   :  { %4097 = vsyncpa [#allocation4 + $0x1], 1 }
 0xafa   :  { %4098 = vsyncpa [#allocation7], 1 }
 0xafb   :  { %4099 = vsyncpa [#allocation10], 1 }
 0xafc   :  { %4100 = vsyncpa [#allocation13], 1 }
 0xafd   :  { %4101 = vsyncpa [#allocation16], 1 }
 0xafe   :  { %4102 = vsyncpa [#allocation5], 1 }
 0xaff   :  { %4104 = vsyncpa [#allocation5 + $0x1], 1 }

// kernel: downsample_block.3
= control target key start
LH: loop header
LB: loop body
LE: loop exit
PB: predicated region body
PF: predicated region fallthrough
CT: control target
= control target key end

     0   :  { %s6795_s0 = inlined_call_operand.hbm [shape: bf16[2,4,64], index: 0, kind: input, shape index: {}]   ;;  %s6796_s1 = inlined_call_operand.hbm [shape: s32[2,64], index: 1, kind: input, shape index: {}]   ;;  %s6797_s2 = inlined_call_operand.hbm [shape: bf16[8,432], index: 2, kind: input, shape index: {}]   ;;  %s6798_s3 = inlined_call_operand.hbm [shape: f32[8,1], index: 3, kind: input, shape index: {}]   ;;  %s6799_s4 = inlined_call_operand.hbm [shape: f32[8,1], index: 4, kind: input, shape index: {}]   ;;  %s6800_s5 = inlined_call_operand.hbm [shape: bf16[8,432], index: 5, kind: input, shape index: {}]   ;;  %s6801_s6 = inlined_call_operand.hbm [shape: f32[8,1], index: 6, kind: input, shape index: {}]   ;;  %s6802_s7 = inlined_call_operand.hbm [shape: f32[8,1], index: 7, kind: input, shape index: {}]   ;;  %s6803_s8 = inlined_call_operand.hbm [shape: f32[2,32,1], index: 8, kind: input, shape index: {}]   ;;  %s6804_s9 = inlined_call_operand.hbm [shape: f32[8,32], index: 9, kind: input, shape index: {}]   ;;  %s6805_s10 = inlined_call_operand.hbm [shape: f32[8,1], index: 10, kind: input, shape index: {}]   ;;  %s6806_s11 = inlined_call_operand.hbm [shape: f32[2,8,64], index: 11, kind: output, shape index: {}]  }
   0x1   :  { %6902 = sst [smem:[#allocation33_spill]] %s6795_s0 }
   0x2   :  { %6903 = sst [smem:[#allocation34_spill]] %s6796_s1 }
   0x3   :  { %6904 = sst [smem:[#allocation35_spill]] %s6797_s2 }
   0x4   :  { %6905 = sst [smem:[#allocation36_spill]] %s6798_s3 }
   0x5   :  { %6906 = sst [smem:[#allocation37_spill]] %s6799_s4 }
   0x6   :  { %6907 = sst [smem:[#allocation38_spill]] %s6800_s5 }
   0x7   :  { %6908 = sst [smem:[#allocation39_spill]] %s6801_s6 }
   0x8   :  { %6909 = sst [smem:[#allocation40_spill]] %s6802_s7 }
   0x9   :  { %6910 = sst [smem:[#allocation41_spill]] %s6803_s8 }
   0xa   :  { %6911 = sst [smem:[#allocation42_spill]] %s6804_s9 }
   0xb   :  { %6912 = sst [smem:[#allocation43_spill]] %s6805_s10 }
   0xc   :  { %6913 = sst [smem:[#allocation44_spill]] %s6806_s11 }
   0xd   :  { %16 = vsyncpa [#allocation4], 0 }
   0xe   :  { %18 = vsyncpa [#allocation4 + $0x1], 0 }
   0xf   :  { %19 = vsyncpa [#allocation7], 0 }
  0x10   :  { %20 = vsyncpa [#allocation10], 0 }
  0x11   :  { %21 = vsyncpa [#allocation13], 0 }
  0x12   :  { %22 = vsyncpa [#allocation16], 0 }
  0x13   :  { %23 = vsyncpa [#allocation5], 0 }
  0x14   :  { %25 = vsyncpa [#allocation5 + $0x1], 0  ;;  %s5550_s17 = smov 0   ;;  %s5552_s18 = smov 0  }
  0x15   :  { %s5554_s19 = smov 0   ;;  %s5556_s20 = smov 0  }
  0x16 LB: > { %6914 = sst [smem:[#allocation30_spill]] %s5435_s19  ;;  %s5441_s21 = smov [#allocation6]   ;;  %s5439_s20 = sphi %s5556_s20, %s7022_s20   ;;  %s5435_s19 = sphi %s5554_s19, %s7019_s19   ;;  %s5431_s18 = sphi %s5552_s18, %s7021_s18   ;;  %s5427_s17 = sphi %s5550_s17, %s7020_s17  }
  0x17   : > { %s316_s22 = sshll.u32 %s5441_s21, 4  ;;  %s5571_s23 = sadd.s32 4294967295, %s5439_s20   ;;  %s5576_s22 = int_to_ptr.vmem [resolvable:$true] %s316_s22 }
  0x18   : > { %p4048_p0 = scmp.ge.s32.totalorder %s5439_s20, 1  ;;  %p6809_p1 = scmp.eq.s32.totalorder %s5571_s23, 0 }
  0x19   : > { %p303_p2 = scmp.lt.s32.totalorder %s5439_s20, 3  ;;  %s5442_s25 = smov [#allocation9]  }
  0x1a   : > { %s338_s26 = sshll.u32 %s5442_s25, 4  ;;  %s5443_s27 = smov [#allocation8]   ;;  %s5585_s26 = int_to_ptr.vmem [resolvable:$true] %s338_s26 }
  0x1b   : > { %p5578_p3 = pnand %p4048_p0, %p303_p2  ;;  %s327_s28 = sshll.u32 %s5443_s27, 4  ;;  %s5593_s28 = int_to_ptr.vmem [resolvable:$true] %s327_s28 }
  0x1c   : > { %s5444_s30 = smov [#allocation11]   ;;  %s6918_s1 = sld [smem:[#allocation34_spill]] }
  0x1d   : > { %s6915_s24 = scalar_select %p5578_p3, 1, 0 }
  0x1e   : > { %p4865_p5 = pneg %p5578_p3  ;;  %s5595_s12 = sshll.u32 %s5444_s30, 4  ;;  %s350_s12 = int_to_ptr.vmem [resolvable:$true] %s5595_s12 }
  0x1f   : > { %6916 = sst [smem:[#allocation31_spill]] %s6915_s24 }
  0x20   : > { %p5589_p6 = pnand %p4865_p5, %p6809_p1 }
  0x22   : > { %s6917_s29 = scalar_select %p5589_p6, 1, 0 }
  0x23   : > { %s5033_s15 = scalar_lea.hbm %s6918_s1, 32  ;;  %p5605_p8 = pneg %p5589_p6 }
  0x24   : > { %p5034_p7 = scmp.ne.s32.totalorder %s6918_s1, %s5033_s15  ;;  %p5040_p11 = scmp.lt.u32.totalorder %s5033_s15, %s6918_s1 }
  0x26   : > { %p5036_p9 = pnand %p5605_p8, %p5034_p7 }
  0x28   : > { %p5037_p10 = pneg %p5036_p9 }
  0x2a   : > { %p5042_p12 = pnand %p5040_p11, %p5037_p10 }
  0x2c   : > { %5045 = shalt.err (!%p5042_p12)
}
  0x2d   : > { %s5046_s13 = scalar_lea.vmem %s5576_s22, 32  ;;  %p5054_p5 = scmp.lt.s32.totalorder %s5576_s22, %s5576_s22 }
  0x2e   : > { %p5047_p13 = scmp.ne.s32.totalorder %s5576_s22, %s5046_s13  ;;  %p5055_p4 = scmp.lt.s32.totalorder %s5046_s13, %s5046_s13 }
  0x30   : > { %p5049_p0 = pnand %p5047_p13, %p5605_p8  ;;  %p5056_p7 = por %p5055_p4, %p5054_p5 }
  0x32   : > { %p5050_p2 = pneg %p5049_p0 }
  0x34   : > { %p5057_p9 = pnand %p5056_p7, %p5050_p2 }
  0x36   : > { %5060 = shalt.err (!%p5057_p9)
}
  0x37   : > { %4868 = dma.hbm_to_vmem [thread:$0]  (!%p5589_p6), %s6918_s1, 32, %s5576_s22, [#allocation7]  }
  0x38   : > { %s6920_s3 = sld [smem:[#allocation36_spill]] }
  0x3e   : > { %s5061_s27 = scalar_lea.hbm %s6920_s3, 128 }
  0x3f   : > { %p5062_p10 = scmp.ne.s32.totalorder %s6920_s3, %s5061_s27  ;;  %p5068_p12 = scmp.lt.u32.totalorder %s5061_s27, %s6920_s3 }
  0x41   : > { %p5064_p4 = pnand %p5062_p10, %p5605_p8 }
  0x43   : > { %p5065_p11 = pneg %p5064_p4 }
  0x45   : > { %p5070_p13 = pnand %p5068_p12, %p5065_p11 }
  0x47   : > { %5073 = shalt.err (!%p5070_p13)
}
  0x48   : > { %s5074_s22 = scalar_lea.vmem %s5585_s26, 128  ;;  %p5082_p7 = scmp.lt.s32.totalorder %s5585_s26, %s5585_s26 }
  0x49   : > { %p5075_p0 = scmp.ne.s32.totalorder %s5585_s26, %s5074_s22  ;;  %p5083_p9 = scmp.lt.s32.totalorder %s5074_s22, %s5074_s22 }
  0x4b   : > { %p5077_p2 = pnand %p5075_p0, %p5605_p8  ;;  %p5084_p10 = por %p5083_p9, %p5082_p7 }
  0x4d   : > { %p5078_p5 = pneg %p5077_p2 }
  0x4f   : > { %p5085_p4 = pnand %p5084_p10, %p5078_p5 }
  0x51   : > { %5088 = shalt.err (!%p5085_p4)
}
  0x52   : > { %4874 = dma.hbm_to_vmem [thread:$0]  (!%p5589_p6), %s6920_s3, 128, %s5585_s26, [#allocation10]  }
  0x53   : > { %s6921_s2 = sld [smem:[#allocation35_spill]] }
  0x59   : > { %s5089_s16 = scalar_lea.hbm %s6921_s2, 256 }
  0x5a   : > { %p5090_p11 = scmp.ne.s32.totalorder %s6921_s2, %s5089_s16  ;;  %p5096_p0 = scmp.lt.u32.totalorder %s5089_s16, %s6921_s2 }
  0x5c   : > { %p5092_p12 = pnand %p5090_p11, %p5605_p8 }
  0x5e   : > { %p5093_p13 = pneg %p5092_p12 }
  0x60   : > { %p5098_p2 = pnand %p5096_p0, %p5093_p13 }
  0x62   : > { %5101 = shalt.err (!%p5098_p2)
}
  0x63   : > { %s5102_s26 = scalar_lea.vmem %s5593_s28, 256  ;;  %p5110_p10 = scmp.lt.s32.totalorder %s5593_s28, %s5593_s28 }
  0x64   : > { %p5103_p5 = scmp.ne.s32.totalorder %s5593_s28, %s5102_s26  ;;  %p5111_p4 = scmp.lt.s32.totalorder %s5102_s26, %s5102_s26 }
  0x66   : > { %p5105_p7 = pnand %p5103_p5, %p5605_p8  ;;  %p5112_p11 = por %p5111_p4, %p5110_p10 }
  0x68   : > { %p5106_p9 = pneg %p5105_p7 }
  0x6a   : > { %p5113_p12 = pnand %p5112_p11, %p5106_p9 }
  0x6c   : > { %5116 = shalt.err (!%p5113_p12)
}
  0x6d   : > { %4871 = dma.hbm_to_vmem [thread:$0]  (!%p5589_p6), %s6921_s2, 256, %s5593_s28, [#allocation7]  }
  0x6e   : > { %s5445_s24 = smov [#allocation12]   ;;  %s6922_s4 = sld [smem:[#allocation37_spill]] }
  0x6f   : > { %s360_s14 = sshll.u32 %s5445_s24, 4  ;;  %s361_s14 = int_to_ptr.vmem [resolvable:$true] %s360_s14 }
  0x74   : > { %s5117_s21 = scalar_lea.hbm %s6922_s4, 128 }
  0x75   : > { %p5118_p13 = scmp.ne.s32.totalorder %s6922_s4, %s5117_s21  ;;  %p5124_p5 = scmp.lt.u32.totalorder %s5117_s21, %s6922_s4 }
  0x77   : > { %p5120_p0 = pnand %p5118_p13, %p5605_p8 }
  0x79   : > { %p5121_p2 = pneg %p5120_p0 }
  0x7b   : > { %p5126_p7 = pnand %p5124_p5, %p5121_p2 }
  0x7d   : > { %5129 = shalt.err (!%p5126_p7)
}
  0x7e   : > { %s5130_s28 = scalar_lea.vmem %s350_s12, 128  ;;  %p5138_p11 = scmp.lt.s32.totalorder %s350_s12, %s350_s12 }
  0x7f   : > { %p5131_p9 = scmp.ne.s32.totalorder %s350_s12, %s5130_s28  ;;  %p5139_p12 = scmp.lt.s32.totalorder %s5130_s28, %s5130_s28 }
  0x81   : > { %p5133_p10 = pnand %p5131_p9, %p5605_p8  ;;  %p5140_p1 = por %p5139_p12, %p5138_p11 }
  0x83   : > { %p5134_p4 = pneg %p5133_p10 }
  0x85   : > { %p5141_p3 = pnand %p5140_p1, %p5134_p4 }
  0x87   : > { %5144 = shalt.err (!%p5141_p3)
}
  0x88   : > { %4877 = dma.hbm_to_vmem [thread:$0]  (!%p5589_p6), %s6922_s4, 128, %s350_s12, [#allocation10]  }
  0x89   : > { %s6923_s5 = sld [smem:[#allocation38_spill]] }
  0x8f   : > { %s5145_s16 = scalar_lea.hbm %s6923_s5, 256 }
  0x90   : > { %p5146_p13 = scmp.ne.s32.totalorder %s6923_s5, %s5145_s16  ;;  %p5152_p3 = scmp.lt.u32.totalorder %s5145_s16, %s6923_s5 }
  0x92   : > { %p5148_p0 = pnand %p5146_p13, %p5605_p8 }
  0x94   : > { %p5149_p1 = pneg %p5148_p0 }
  0x96   : > { %p5154_p2 = pnand %p5152_p3, %p5149_p1 }
  0x98   : > { %5157 = shalt.err (!%p5154_p2)
}
  0x99   : > { %s5158_s26 = scalar_lea.vmem %s361_s14, 256  ;;  %p5166_p10 = scmp.lt.s32.totalorder %s361_s14, %s361_s14 }
  0x9a   : > { %p5159_p5 = scmp.ne.s32.totalorder %s361_s14, %s5158_s26  ;;  %p5167_p4 = scmp.lt.s32.totalorder %s5158_s26, %s5158_s26 }
  0x9c   : > { %p5161_p7 = pnand %p5159_p5, %p5605_p8  ;;  %p5168_p11 = por %p5167_p4, %p5166_p10 }
  0x9e   : > { %p5162_p9 = pneg %p5161_p7 }
  0xa0   : > { %p5169_p12 = pnand %p5168_p11, %p5162_p9 }
  0xa2   : > { %5172 = shalt.err (!%p5169_p12)
}
  0xa3   : > { %4880 = dma.hbm_to_vmem [thread:$0]  (!%p5589_p6), %s6923_s5, 256, %s361_s14, [#allocation13]  }
  0xa4   : > { %s4047_s22 = sadd.s32 4294967294, %s5439_s20   ;;  %s5711_s11 = sadd.s32 1, %s5439_s20  }
  0xa5   : > { %s38_s24 = sadd.s32 1, %s5435_s19  ;;  %s35_s15 = ssub.s32 %s5439_s20, %s5711_s11 }
  0xa6   : > { %p45_p13 = scmp.ne.s32.totalorder %s5435_s19, %s5431_s18  ;;  %p36_p0 = scmp.eq.s32.totalorder %s35_s15, 0 }
  0xa7   : > { %p46_p1 = scmp.eq.s32.totalorder %s5439_s20, 0  ;;  %p51_p3 = scmp.ne.s32.totalorder %s5431_s18, %s5427_s17 }
  0xa8   : > { %p290_p2 = scmp.eq.s32.totalorder %s5571_s23, 1  ;;  %p6925_p7 = scmp.eq.s32.totalorder %s5571_s23, 0 }
  0xa9   : > { %s5723_s16 = scalar_select %p36_p0, %s5435_s19, %s38_s24  }
  0xaa   : > { %p47_p5 = por %p46_p1, %p45_p13  ;;  %p5727_p9 = por %p6925_p7, %p51_p3 }
  0xab   : > { %6924 = sst [smem:[#allocation32_spill]] %s5723_s16  ;;  %p5731_p10 = por %p290_p2, %p45_p13 }
  0xac   : > { %s6926_s14 = scalar_select %p5727_p9, 1, 0 }
  0xad   : > { %s6927_s21 = scalar_select %p5731_p10, 1, 0 }
  0xae   : > { %p296_p4 = scmp.eq.s32.totalorder %s4047_s22, 1  ;;  %p4913_p11 = scmp.lt.s32.totalorder %s5439_s20, 2 }
  0xaf   : > { %s415_s27 = sand.u32 1, %s5439_s20   ;;  %s417_s13 = sand.u32 1, %s5435_s19  }
  0xb0   : > { %p5737_p12 = por %p296_p4, %p51_p3  ;;  %s4060_s26 = sshll.u32 %s5439_s20, 5 }
  0xb1   : > { %s4059_s12 = sshll.u32 %s417_s13, 1  ;;  %s6929_s0 = sld [smem:[#allocation33_spill]] }
  0xb2   : > { %s6928_s30 = scalar_select %p5737_p12, 1, 0 }
  0xb3   : > { %p5748_p13 = pnand %p4913_p11, %p47_p5  ;;  %s419_s1 = scalar_lea.vmem [#allocation3], %s4059_s12 }
  0xb4   : > { %s426_s2 = sshll.u32 %s419_s1, 4  ;;  %s5752_s3 = sshll.u32 %s417_s13, 5  ;;  %s5754_s2 = int_to_ptr.vmem [resolvable:$true] %s426_s2 }
  0xb5   : > { %s6930_s22 = scalar_select %p5748_p13, 1, 0 }
  0xb6   : > { %s5756_s4 = scalar_lea.sflag [#allocation4], %s415_s27  ;;  %p6815_p1 = pneg %p5748_p13 }
  0xb7   : > { %s5746_s15 = scalar_lea.hbm %s6929_s0, %s4060_s26  ;;  %s5178_s5 = scalar_lea.hbm %s6929_s0, 64 }
  0xb8   : > { %s5173_s26 = scalar_lea.hbm %s5746_s15, 32  ;;  %p5179_p5 = scmp.lt.u32.totalorder %s5746_s15, %s6929_s0 }
  0xb9   : > { %p5174_p0 = scmp.ne.s32.totalorder %s5746_s15, %s5173_s26  ;;  %p5180_p7 = scmp.lt.u32.totalorder %s5178_s5, %s5173_s26 }
  0xba   : > { %p5182_p11 = scmp.lt.u32.totalorder %s5173_s26, %s5746_s15 }
  0xbb   : > { %p5176_p3 = pnand %p6815_p1, %p5174_p0  ;;  %p5181_p4 = por %p5180_p7, %p5179_p5 }
  0xbd   : > { %p5177_p2 = pneg %p5176_p3  ;;  %p5183_p12 = por %p5182_p11, %p5181_p4 }
  0xbf   : > { %p5184_p10 = pnand %p5183_p12, %p5177_p2 }
  0xc1   : > { %5187 = shalt.err (!%p5184_p10)
}
  0xc2   : > { %s5188_s27 = scalar_lea.vmem %s5754_s2, 32  ;;  %s5446_s13 = smov [#allocation3]  }
  0xc3   : > { %p5189_p0 = scmp.ne.s32.totalorder %s5754_s2, %s5188_s27  ;;  %s5193_s28 = sshll.u32 %s5446_s13, 4  ;;  %s5194_s28 = int_to_ptr.vmem [resolvable:$false] %s5193_s28 }
  0xc4   : > { %s5195_s24 = scalar_lea.vmem %s5194_s28, 64  ;;  %p5196_p6 = scmp.lt.s32.totalorder %s5754_s2, %s5194_s28 }
  0xc5   : > { %p5191_p3 = pnand %p5189_p0, %p6815_p1  ;;  %p5197_p5 = scmp.lt.s32.totalorder %s5195_s24, %s5188_s27 }
  0xc7   : > { %p5192_p9 = pneg %p5191_p3  ;;  %p5198_p7 = por %p5197_p5, %p5196_p6 }
  0xc9   : > { %p5199_p4 = pnand %p5198_p7, %p5192_p9 }
  0xcb   : > { %5202 = shalt.err (!%p5199_p4)
}
  0xcc   : > { %4896 = dma.hbm_to_vmem [thread:$0]  (!%p5748_p13), %s5746_s15, 32, %s5754_s2, %s5756_s4  }
  0xcd   : > { %s437_s5 = scalar_lea.vmem [#allocation17], %s5752_s3  ;;  %s5447_s12 = smov [#allocation14]  }
  0xce   : > { %s444_s26 = sshll.u32 %s437_s5, 4  ;;  %s371_s1 = sshll.u32 %s5447_s12, 4  ;;  %s5785_s26 = int_to_ptr.vmem [resolvable:$true] %s444_s26  ;;  %s372_s1 = int_to_ptr.vmem [resolvable:$true] %s371_s1 }
  0xcf   : > { %s6931_s6 = sld [smem:[#allocation39_spill]] }
  0xd5   : > { %s5203_s28 = scalar_lea.hbm %s6931_s6, 128 }
  0xd6   : > { %p5204_p6 = scmp.ne.s32.totalorder %s6931_s6, %s5203_s28  ;;  %p5210_p12 = scmp.lt.u32.totalorder %s5203_s28, %s6931_s6 }
  0xd8   : > { %p5206_p9 = pnand %p5204_p6, %p5605_p8 }
  0xda   : > { %p5207_p10 = pneg %p5206_p9 }
  0xdc   : > { %p5212_p2 = pnand %p5210_p12, %p5207_p10 }
  0xde   : > { %5215 = shalt.err (!%p5212_p2)
}
  0xdf   : > { %s5216_s3 = scalar_lea.vmem %s372_s1, 128  ;;  %p5224_p5 = scmp.lt.s32.totalorder %s372_s1, %s372_s1 }
  0xe0   : > { %p5217_p11 = scmp.ne.s32.totalorder %s372_s1, %s5216_s3  ;;  %p5225_p7 = scmp.lt.s32.totalorder %s5216_s3, %s5216_s3 }
  0xe2   : > { %p5219_p0 = pnand %p5217_p11, %p5605_p8  ;;  %p5226_p4 = por %p5225_p7, %p5224_p5 }
  0xe4   : > { %p5220_p3 = pneg %p5219_p0 }
  0xe6   : > { %p5227_p1 = pnand %p5226_p4, %p5220_p3 }
  0xe8   : > { %5230 = shalt.err (!%p5227_p1)
}
  0xe9   : > { %p6932_p6 = scmp.ne.s32.totalorder %s6917_s29, 0  ;;  %s5448_s16 = smov [#allocation15]  }
  0xea   : > { %s382_s5 = sshll.u32 %s5448_s16, 4  ;;  %s5449_s12 = smov [#allocation18]   ;;  %s383_s5 = int_to_ptr.vmem [resolvable:$true] %s382_s5 }
  0xeb   : > { %4883 = dma.hbm_to_vmem [thread:$0]  (!%p6932_p6), %s6931_s6, 128, %s372_s1, [#allocation13]  }
  0xec   : > { %s393_s13 = sshll.u32 %s5449_s12, 4  ;;  %s6933_s7 = sld [smem:[#allocation40_spill]]  ;;  %s5805_s13 = int_to_ptr.vmem [resolvable:$true] %s393_s13 }
  0xf2   : > { %s5231_s24 = scalar_lea.hbm %s6933_s7, 128 }
  0xf3   : > { %p5232_p1 = scmp.ne.s32.totalorder %s6933_s7, %s5231_s24  ;;  %p5238_p12 = scmp.lt.u32.totalorder %s5231_s24, %s6933_s7 }
  0xf5   : > { %p5234_p9 = pnand %p5232_p1, %p5605_p8 }
  0xf7   : > { %p5235_p10 = pneg %p5234_p9 }
  0xf9   : > { %p5240_p2 = pnand %p5238_p12, %p5235_p10 }
  0xfb   : > { %5243 = shalt.err (!%p5240_p2)
}
  0xfc   : > { %s5244_s15 = scalar_lea.vmem %s383_s5, 128  ;;  %p5252_p5 = scmp.lt.s32.totalorder %s383_s5, %s383_s5 }
  0xfd   : > { %p5245_p11 = scmp.ne.s32.totalorder %s383_s5, %s5244_s15  ;;  %p5253_p7 = scmp.lt.s32.totalorder %s5244_s15, %s5244_s15 }
  0xff   : > { %p5247_p0 = pnand %p5245_p11, %p5605_p8  ;;  %p5254_p4 = por %p5253_p7, %p5252_p5 }
 0x101   : > { %p5248_p3 = pneg %p5247_p0 }
 0x103   : > { %p5255_p13 = pnand %p5254_p4, %p5248_p3 }
 0x105   : > { %5258 = shalt.err (!%p5255_p13)
}
 0x106   : > { %4886 = dma.hbm_to_vmem [thread:$0]  (!%p6932_p6), %s6933_s7, 128, %s383_s5, [#allocation16]  }
 0x107   : > { %s6934_s9 = sld [smem:[#allocation42_spill]] }
 0x10d   : > { %s5259_s24 = scalar_lea.hbm %s6934_s9, 128 }
 0x10e   : > { %p5260_p1 = scmp.ne.s32.totalorder %s6934_s9, %s5259_s24  ;;  %p5266_p13 = scmp.lt.u32.totalorder %s5259_s24, %s6934_s9 }
 0x110   : > { %p5262_p9 = pnand %p5260_p1, %p5605_p8 }
 0x112   : > { %p5263_p10 = pneg %p5262_p9 }
 0x114   : > { %p5268_p12 = pnand %p5266_p13, %p5263_p10 }
 0x116   : > { %5271 = shalt.err (!%p5268_p12)
}
 0x117   : > { %s5272_s5 = scalar_lea.vmem %s5805_s13, 128  ;;  %p5280_p3 = scmp.lt.s32.totalorder %s5805_s13, %s5805_s13 }
 0x118   : > { %p5273_p2 = scmp.ne.s32.totalorder %s5805_s13, %s5272_s5  ;;  %p5281_p5 = scmp.lt.s32.totalorder %s5272_s5, %s5272_s5 }
 0x11a   : > { %p5275_p11 = pnand %p5273_p2, %p5605_p8  ;;  %p5282_p7 = por %p5281_p5, %p5280_p3 }
 0x11c   : > { %p5276_p0 = pneg %p5275_p11 }
 0x11e   : > { %p5283_p4 = pnand %p5282_p7, %p5276_p0 }
 0x120   : > { %5286 = shalt.err (!%p5283_p4)
}
 0x121   : > { %4889 = dma.hbm_to_vmem [thread:$0]  (!%p6932_p6), %s6934_s9, 128, %s5805_s13, [#allocation7]  }
 0x122   : > { %s4148_s12 = sshll.u32 %s5439_s20, 9  ;;  %s5450_s27 = smov [#allocation19]  }
 0x123   : > { %s404_s28 = sshll.u32 %s5450_s27, 4  ;;  %s6935_s8 = sld [smem:[#allocation41_spill]]  ;;  %s405_s28 = int_to_ptr.vmem [resolvable:$true] %s404_s28 }
 0x124   : > { %s6936_s10 = sld [smem:[#allocation43_spill]] }
 0x129   : > { %s5852_s3 = scalar_lea.hbm %s6935_s8, %s4148_s12 }
 0x12a   : > { %s5287_s5 = scalar_lea.hbm %s6936_s10, 128 }
 0x12b   : > { %p5288_p1 = scmp.ne.s32.totalorder %s6936_s10, %s5287_s5  ;;  %p5294_p13 = scmp.lt.u32.totalorder %s5287_s5, %s6936_s10 }
 0x12d   : > { %p5290_p9 = pnand %p5288_p1, %p5605_p8 }
 0x12f   : > { %p5291_p10 = pneg %p5290_p9 }
 0x131   : > { %p5296_p12 = pnand %p5294_p13, %p5291_p10 }
 0x133   : > { %5299 = shalt.err (!%p5296_p12)
}
 0x134   : > { %s5300_s16 = scalar_lea.vmem %s405_s28, 128  ;;  %p5308_p3 = scmp.lt.s32.totalorder %s405_s28, %s405_s28 }
 0x135   : > { %p5301_p2 = scmp.ne.s32.totalorder %s405_s28, %s5300_s16  ;;  %p5309_p5 = scmp.lt.s32.totalorder %s5300_s16, %s5300_s16 }
 0x137   : > { %p5303_p11 = pnand %p5301_p2, %p5605_p8  ;;  %p5310_p7 = por %p5309_p5, %p5308_p3 }
 0x139   : > { %p5304_p0 = pneg %p5303_p11 }
 0x13b   : > { %p5311_p4 = pnand %p5310_p7, %p5304_p0 }
 0x13d   : > { %5314 = shalt.err (!%p5311_p4)
}
 0x13e   : > { %4892 = dma.hbm_to_vmem [thread:$0]  (!%p6932_p6), %s6936_s10, 128, %s405_s28, [#allocation10]  }
 0x13f   : > { %s5315_s12 = scalar_lea.hbm %s5852_s3, 512  ;;  %p6937_p8 = scmp.ne.s32.totalorder %s6930_s22, 0 }
 0x140   : > { %p5316_p1 = scmp.ne.s32.totalorder %s5852_s3, %s5315_s12  ;;  %s5320_s24 = scalar_lea.hbm %s6935_s8, 1024 }
 0x141   : > { %p6938_p9 = pneg %p6937_p8  ;;  %p5321_p12 = scmp.lt.u32.totalorder %s5852_s3, %s6935_s8 }
 0x142   : > { %p5322_p2 = scmp.lt.u32.totalorder %s5320_s24, %s5315_s12  ;;  %p5324_p0 = scmp.lt.u32.totalorder %s5315_s12, %s5852_s3 }
 0x143   : > { %p5318_p10 = pnand %p5316_p1, %p6938_p9 }
 0x144   : > { %p5323_p11 = por %p5322_p2, %p5321_p12 }
 0x145   : > { %p5319_p13 = pneg %p5318_p10 }
 0x146   : > { %p5325_p3 = por %p5324_p0, %p5323_p11 }
 0x148   : > { %p5326_p5 = pnand %p5325_p3, %p5319_p13 }
 0x14a   : > { %5329 = shalt.err (!%p5326_p5)
}
 0x14b   : > { %s5330_s28 = scalar_lea.vmem %s5785_s26, 512  ;;  %p6939_p7 = pmov %p6938_p9 }
 0x14c   : > { %p5331_p6 = scmp.ne.s32.totalorder %s5785_s26, %s5330_s28  ;;  %s5451_s0 = smov [#allocation17]  }
 0x14d   : > { %s5335_s1 = sshll.u32 %s5451_s0, 4  ;;  %s5336_s1 = int_to_ptr.vmem [resolvable:$false] %s5335_s1 }
 0x14e   : > { %p5333_p4 = pnand %p5331_p6, %p6939_p7  ;;  %s5337_s5 = scalar_lea.vmem %s5336_s1, 1024 }
 0x14f   : > { %p5338_p9 = scmp.lt.s32.totalorder %s5785_s26, %s5336_s1  ;;  %p5339_p10 = scmp.lt.s32.totalorder %s5337_s5, %s5330_s28 }
 0x150   : > { %p5334_p1 = pneg %p5333_p4 }
 0x151   : > { %p5340_p12 = por %p5339_p10, %p5338_p9 }
 0x153   : > { %p5341_p2 = pnand %p5340_p12, %p5334_p1 }
 0x155   : > { %5344 = shalt.err (!%p5341_p2)
}
 0x156   : > { %s5452_s13 = smov 128   ;;  %s5453_s15 = smov 8  }
 0x157   : > { %4899 = dma.hbm_to_vmem [thread:$0]  (!%p6937_p8), %s5852_s3, 512, %s5785_s26, %s5756_s4, %s5452_s13, %s5452_s13, %s5453_s15  }
 0x158   : > { %s6940_s16 = sld [smem:[#allocation31_spill]] }
 0x15e   : > { %p6941_p13 = scmp.ne.s32.totalorder %s6940_s16, 0 }
 0x15f   : > { %s458_s6 = sand.u32 (!%p6941_p13), 1, %s5571_s23   ;;  %s5900_s7 = sand.u32 (!%p6941_p13), 1, %s5431_s18  }
 0x160   : > { %456 = sbr.rel (%p6941_p13) target bundleno = 2779 (0xadb), region = 64  ;;  %s4065_s12 = sshll.u32 (!%p6941_p13), %s5900_s7, 1 }
 0x161   : > { %s459_s25 = scalar_lea.sflag (!%p6941_p13), [#allocation4], %s458_s6  ;;  %s462_s27 = scalar_lea.vmem (!%p6941_p13), [#allocation3], %s4065_s12 }
 0x162   : > { %p6942_p11 = scmp.ne.s32.totalorder (!%p6941_p13), %s6926_s14, 0 }
 0x167   : > { %5390 = dma.done.wait (%p6942_p11), %s459_s25, 32  }
 0x168   : > { %5392 = vsyncadd (%p6942_p11), %s459_s25, 4294967264  ;;  %p6943_p8 = scmp.eq.s32.totalorder %s5571_s23, 0 }
 0x16a   : > { %5394 = dma.done.wait (%p6943_p8), [#allocation7], 288   ;;  %p6944_p0 = pmov %p6943_p8 }
 0x16c   : > { %5396 = vsyncadd (%p6944_p0), [#allocation7], 4294967008  ;;  %p6945_p3 = pmov %p6944_p0 }
 0x16d   : > { %p6946_p5 = pmov %p6944_p0 }
 0x16e   : > { %5398 = dma.done.wait (%p6945_p3), [#allocation10], 256  }
 0x16f   : > { %5400 = vsyncadd (%p6946_p5), [#allocation10], 4294967040  ;;  %p6947_p6 = pmov %p6944_p0 }
 0x170   : > { %p6948_p7 = pmov %p6944_p0 }
 0x171   : > { %5402 = dma.done.wait (%p6947_p6), [#allocation13], 384  }
 0x172   : > { %5404 = vsyncadd (%p6948_p7), [#allocation13], 4294966912  ;;  %p6949_p4 = pmov %p6944_p0 }
 0x173   : > { %p6950_p1 = pmov %p6944_p0 }
 0x174   : > { %5406 = dma.done.wait (%p6949_p4), [#allocation16], 128  }
 0x175   : > { %5408 = vsyncadd (%p6950_p1), [#allocation16], 4294967168  ;;  %s4073_s4 = sshll.u32 %s5900_s7, 5 }
 0x176   : > { %s5924_s22 = scalar_lea.vmem [#allocation17], %s4073_s4 }
 0x177   : > { %5410 = dma.done.wait (%p6942_p11), %s459_s25, 512  }
 0x178   : > { %5412 = vsyncadd (%p6942_p11), %s459_s25, 4294966784  ;;  %p6951_p9 = pmov %p6944_p0 }
 0x179   : > { %p6952_p10 = pmov %p6944_p0 }
 0x17a   : > { %5414 = dma.done.wait (%p6951_p9), [#allocation7], 128  }
 0x17b   : > { %5416 = vsyncadd (%p6952_p10), [#allocation7], 4294967168  ;;  %p6953_p12 = pmov %p6944_p0 }
 0x17c   : > { %p6954_p2 = pmov %p6944_p0 }
 0x17d   : > { %5418 = dma.done.wait (%p6953_p12), [#allocation10], 128  }
 0x17e   : > { %5420 = vsyncadd (%p6954_p2), [#allocation10], 4294967168  ;;  %v574_v0 = vlaneseq  ;;  %v5454_v1 = vmov 0   ;;  %vm569_vm0 = vcmask 517120   ;;  %v558_v4 = vld [vmem:[#allocation6] sm:$0x1] }
 0x17f   : > { %555 = vst [vmem:[#allocation2 + $0x8] sm:$0xff] %v5454_v1  ;;  %554 = vst [vmem:[#allocation2] sm:$0xff] %v5454_v1  ;;  %5002 = vset.pattern.permute.xlu0 %v5454_v1  ;;  %5003 = vset.pattern.permute.xlu1 %v5454_v1  ;;  %v568_v5 = vld [vmem:[%s462_s27] sm:$0x3]  ;;  %v559_v6 = vld [vmem:[#allocation6 + $0x1] sm:$0x1] }
 0x180   : > { %v575_v2 = vshrl.u32 %v574_v0, 7  ;;  %vm560_vm1 = vcmp.ge.s32.totalorder %v558_v4, 1  ;;  %570 = vst.msk [vmem:[#allocation2 + $0x8] sm:$0x3] %vm569_vm0, %v568_v5  ;;  %vm562_vm2 = vcmp.ge.s32.totalorder %v559_v6, 1  ;;  %vm563_vm3 = vcmp.le.s32.totalorder %v559_v6, 2 }
 0x181   : > { %v591_v7 = vsel %vm560_vm1, 1, %v5454_v1  ;;  %vm564_vm4 = vmand %vm560_vm1, %vm562_vm2  ;;  %v790_v8 = vsel %vm562_vm2, 1, %v5454_v1  ;;  %v917_v9 = vsel %vm563_vm3, 1, %v5454_v1  ;;  %vm561_vm14 = vcmp.le.s32.totalorder %v558_v4, 2  ;;  %s6820_s14 = smov 108   ;;  %s6822_s26 = smov 109  }
 0x182   : > { %v5942_v3 = vsub.s32 0, %v575_v2  ;;  %v573_v11 = vsel %vm564_vm4, 1, %v5454_v1  ;;  %vm565_vm5 = vmand %vm560_vm1, %vm563_vm3  ;;  %v1061_v26 = vsel %vm561_vm14, 1, %v5454_v1  ;;  %s6818_s3 = smov 107   ;;  %s6824_s24 = smov 111   ;;  %v5459_v40 = vmov 0.0  }
 0x183   : > { %v718_v15 = vsel %vm565_vm5, 1, %v5454_v1  ;;  %vm566_vm1 = vmand %vm561_vm14, %vm562_vm2  ;;  %4262 = vmatprep.subr.bf16.mxu0 %v5459_v40  ;;  %4424 = vmatprep.subr.bf16.mxu1 %v5459_v40  ;;  %v6022_v43 = vld [vmem:[#allocation8] sm:$0xf]  ;;  %s6832_s29 = smov 20   ;;  %s6826_s2 = smov 113  }
 0x184   : > { %v595_v10 = vrot.slane %v591_v7, %v5942_v3  ;;  %v794_v12 = vrot.slane %v790_v8, %v5942_v3  ;;  %v921_v13 = vrot.slane %v917_v9, %v5942_v3  ;;  %v577_v14 = vrot.slane %v573_v11, %v5942_v3  ;;  %s6898_s28 = smov 112   ;;  %s6828_s0 = smov 21  }
 0x185   : > { %v722_v16 = vrot.slane %v718_v15, %v5942_v3  ;;  %v989_v29 = vsel %vm566_vm1, 1, %v5454_v1  ;;  %v1065_v30 = vrot.slane %v1061_v26, %v5942_v3  ;;  %v6033_v45 = vcombine.low %v6022_v43, %v6022_v43  ;;  %s6830_s1 = smov 115   ;;  %s6834_s5 = smov 19  }
 0x186   : > { %vm596_vm6 = vcmp.eq.s32.totalorder %v595_v10, 1  ;;  %vm578_vm8 = vcmp.eq.s32.totalorder %v577_v14, 1  ;;  %vm5958_vm9 = vcmp.eq.s32.totalorder %v794_v12, 1  ;;  %vm922_vm12 = vcmp.eq.s32.totalorder %v921_v13, 1  ;;  %s6836_s13 = smov 116   ;;  %s6890_s15 = smov 96  }
 0x187   : > { %vm597_vm7 = vmpackc.low %vm596_vm6, %vm596_vm6  ;;  %vm723_vm11 = vcmp.eq.s32.totalorder %v722_v16, 1  ;;  %v993_v31 = vrot.slane %v989_v29, %v5942_v3  ;;  %vm1066_vm2 = vcmp.eq.s32.totalorder %v1065_v30, 1  ;;  %v6018_v41 = vld [vmem:[#allocation2 + $0x8] sm:$0xff]  ;;  %s6842_s16 = smov 17   ;;  %s6838_s6 = smov 117   ;;  %vm6848_vm1 = vcmask 171008  }
 0x188   : > { %v598_v18 = vsel %vm597_vm7, 65537, %v5454_v1  ;;  %vm579_vm10 = vmpackc.low %vm578_vm8, %vm578_vm8  ;;  %s6896_s12 = smov 80   ;;  %s6894_s25 = smov 16   ;;  %v6156_v14 = vld [vmem:[#allocation8 + $0x4] sm:$0xf] }
 0x189   : > { %v5964_v19 = vrot.slane %v598_v18, %v5942_v3  ;;  %v580_v20 = vsel %vm579_vm10, 65537, %v5454_v1  ;;  %vm724_vm13 = vmpackc.low %vm723_vm11, %vm723_vm11  ;;  %vm994_vm4 = vcmp.eq.s32.totalorder %v993_v31, 1  ;;  %vm5461_vm11 = vmmov 0   ;;  %s6844_s27 = smov 123   ;;  %s6875_s4 = smov 64  }
 0x18a   : > { %v725_v21 = vsel %vm724_vm13, 65537, %v5454_v1  ;;  %vm796_vm15 = vmpackc.low %vm5958_vm9, %vm5958_vm9  ;;  %v5974_v22 = vrot.slane %v580_v20, %v5942_v3  ;;  %4264 = vmatprep.mubr.msk.bf16.mxu0 %vm5461_vm11, %v5459_v40  ;;  %4426 = vmatprep.mubr.msk.bf16.mxu1 %vm5461_vm11, %v5459_v40  ;;  %v6167_v16 = vcombine.low %v6156_v14, %v6156_v14  ;;  %s6982_s19 = smov 32   ;;  %p7015_p11 = scmp.ne.s32.totalorder %s6927_s21, 0 }
 0x18b   : > { %603 = vrot.lane.b32.xlu0 %v5964_v19, %s6820_s14  ;;  %v5977_v23 = vrot.slane %v725_v21, %v5942_v3  ;;  %v797_v24 = vsel %vm796_vm15, 65537, %v5454_v1  ;;  %vm923_vm0 = vmpackc.low %vm922_vm12, %vm922_vm12  ;;  %vm622_vm15 = vcmask 130048   ;;  %s6858_s14 = smov 124  }
 0x18c   : > { %v924_v25 = vsel %vm923_vm0, 65537, %v5454_v1  ;;  %v5988_v27 = vrot.slane %v797_v24, %v5942_v3  ;;  %vm1067_vm5 = vmpackc.low %vm1066_vm2, %vm1066_vm2 }
 0x18d   : > { %730 = vrot.lane.b32.xlu1 %v5977_v23, %s6822_s26  ;;  %v5991_v28 = vrot.slane %v924_v25, %v5942_v3  ;;  %vm995_vm6 = vmpackc.low %vm994_vm4, %vm994_vm4  ;;  %v1068_v32 = vsel %vm1067_vm5, 65537, %v5454_v1  ;;  %s6887_s26 = smov 48   ;;  %vm6841_vm4 = vcmask 154624  }
 0x18e   : > { %v996_v33 = vsel %vm995_vm6, 65537, %v5454_v1  ;;  %v6003_v34 = vrot.slane %v1068_v32, %v5942_v3  ;;  %vm567_vm7 = vmand %vm561_vm14, %vm563_vm3  ;;  %vm6850_vm14 = vcmask 162816   ;;  %vm6840_vm6 = vcmask 138240  }
 0x18f   : > { %585 = vrot.lane.b32.xlu0 %v5974_v22, %s6818_s3  ;;  %v6006_v35 = vrot.slane %v996_v33, %v5942_v3  ;;  %v1133_v36 = vsel %vm567_vm7, 1, %v5454_v1  ;;  %s6892_s3 = smov 15  }
 0x190   : > { %v1137_v37 = vrot.slane %v1133_v36, %v5942_v3 }
 0x191   : > { %802 = vrot.lane.b32.xlu1 %v5988_v27, %s6824_s24  ;;  %s6884_s24 = smov 13  }
 0x192   : > { %vm1138_vm8 = vcmp.eq.s32.totalorder %v1137_v37, 1 }
 0x193   : > { %vm1139_vm9 = vmpackc.low %vm1138_vm8, %vm1138_vm8  ;;  %615 = vrot.lane.b32.xlu0 %v5454_v1, %s6832_s29 }
 0x194   : > { %v1140_v38 = vsel %vm1139_vm9, 65537, %v5454_v1  ;;  %vm6846_vm9 = vcmask 121856  }
 0x195   : > { %v6014_v39 = vrot.slane %v1140_v38, %v5942_v3 }
 0x197   : > { %929 = vrot.lane.b32.xlu0 %v5991_v28, %s6826_s2  ;;  %s6859_s2 = smov 125  }
 0x19b   : > { %668 = vrot.lane.b32.xlu0 %v5454_v1, %s6828_s0 }
 0x19f   : > { %1001 = vrot.lane.b32.xlu0 %v6006_v35, %s6830_s1  ;;  %s6878_s1 = smov 12  }
 0x1fd   : > { %v6020_v42 = vpop.permute.xlu0 %603 }
 0x1fe   : > { %vm605_vm3 = vcmp.ne.s16.totalorder %v6020_v42, 0 }
 0x1ff   : > { %v607_v44 = vsel %vm605_vm3, %v6018_v41, 0  ;;  %v6042_v47 = vpop.permute.xlu1 %730 }
 0x200   : > { %617 = vrot.lane.b32.xlu1 %v607_v44, %s6832_s29  ;;  %vm732_vm12 = vcmp.ne.s16.totalorder %v6042_v47, 0  ;;  %s6861_s29 = smov 127  }
 0x201   : > { %v6035_v46 = vpop.permute.xlu0 %585  ;;  %v734_v50 = vsel %vm732_vm12, %v6018_v41, 0 }
 0x202   : > { %vm587_vm10 = vcmp.ne.s16.totalorder %v6035_v46, 0  ;;  %741 = vrot.lane.b32.xlu0 %v734_v50, %s6834_s5 }
 0x203   : > { %v589_v48 = vsel %vm587_vm10, %v6018_v41, 0  ;;  %v6055_v49 = vpop.permute.xlu1 %802 }
 0x204   : > { %611 = vrot.lane.b32.xlu1 %v6033_v45, %s6898_s28  ;;  %vm804_vm13 = vcmp.ne.s16.totalorder %v6055_v49, 0 }
 0x205   : > { %v806_v51 = vsel %vm804_vm13, %v6018_v41, 0  ;;  %v616_v53 = vpop.permute.xlu0 %615 }
 0x206   : > { %735 = vrot.lane.b32.xlu0 %v6033_v45, %s6890_s15 }
 0x208   : > { %670 = vrot.lane.b32.xlu1 %v589_v48, %s6828_s0  ;;  %s6881_s0 = smov 32  }
 0x209   : > { %v6090_v55 = vpop.permute.xlu0 %929 }
 0x20a   : > { %813 = vrot.lane.b32.xlu0 %v806_v51, %s6842_s16  ;;  %vm931_vm0 = vcmp.ne.s16.totalorder %v6090_v55, 0 }
 0x20b   : > { %v933_v57 = vsel %vm931_vm0, %v6018_v41, 0 }
 0x20c   : > { %739 = vrot.lane.b32.xlu1 %v5454_v1, %s6834_s5  ;;  %s6872_s5 = smov 11  }
 0x20d   : > { %v669_v58 = vpop.permute.xlu0 %668 }
 0x20e   : > { %807 = vrot.lane.b32.xlu0 %v6033_v45, %s6896_s12 }
 0x210   : > { %1073 = vrot.lane.b32.xlu1 %v6003_v34, %s6836_s13  ;;  %s6870_s13 = smov 5  }
 0x211   : > { %v6107_v61 = vpop.permute.xlu0 %1001 }
 0x212   : > { %868 = vrot.lane.b32.xlu0 %v6018_v41, %s6894_s25  ;;  %vm1003_vm2 = vcmp.ne.s16.totalorder %v6107_v61, 0 }
 0x213   : > { %v1005_v63 = vsel %vm1003_vm2, %v6018_v41, 0 }
 0x214   : > { %811 = vrot.lane.b32.xlu1 %v5454_v1, %s6842_s16  ;;  %s6868_s16 = smov 4  }
 0x216   : > { %862 = vrot.lane.b32.xlu0 %v6033_v45, %s6875_s4 }
 0x218   : > { %1145 = vrot.lane.b32.xlu1 %v6014_v39, %s6838_s6  ;;  %s6863_s6 = smov 1  }
 0x21a   : > { %940 = vrot.lane.b32.xlu0 %v933_v57, %s6892_s3 }
 0x21c   : > { %866 = vrot.lane.b32.xlu1 %v5454_v1, %s6894_s25 }
 0x21e   : > { %934 = vrot.lane.b32.xlu0 %v6033_v45, %s6887_s26 }
 0x220   : > { %1204 = vrot.lane.b32.xlu1 %v5974_v22, %s6844_s27  ;;  %s6865_s27 = smov 3  }
 0x222   : > { %1012 = vrot.lane.b32.xlu0 %v1005_v63, %s6884_s24 }
 0x224   : > { %938 = vrot.lane.b32.xlu1 %v5454_v1, %s6892_s3 }
 0x226   : > { %1006 = vrot.lane.b32.xlu0 %v6033_v45, %s6881_s0 }
 0x228   : > { %1267 = vrot.lane.b32.xlu1 %v5964_v19, %s6858_s14 }
 0x22c   : > { %1010 = vrot.lane.b32.xlu1 %v5454_v1, %s6884_s24 }
 0x230   : > { %1327 = vrot.lane.b32.xlu1 %v5977_v23, %s6859_s2 }
 0x234   : > { %1082 = vrot.lane.b32.xlu1 %v5454_v1, %s6878_s1 }
 0x238   : > { %1387 = vrot.lane.b32.xlu1 %v5988_v27, %s6861_s29 }
 0x23c   : > { %1153 = vrot.lane.b32.xlu1 %v5454_v1, %s6872_s5 }
 0x240   : > { %1216 = vrot.lane.b32.xlu1 %v5454_v1, %s6870_s13 }
 0x244   : > { %1493 = vrot.lane.b32.xlu1 %v5991_v28, %s6863_s6 }
 0x248   : > { %1276 = vrot.lane.b32.xlu1 %v5454_v1, %s6868_s16 }
 0x24c   : > { %1547 = vrot.lane.b32.xlu1 %v6006_v35, %s6865_s27 }
 0x250   : > { %1336 = vrot.lane.b32.xlu1 %v5454_v1, %s6865_s27 }
 0x254   : > { %1601 = vrot.lane.b32.xlu1 %v6003_v34, %s6868_s16 }
 0x258   : > { %1396 = vrot.lane.b32.xlu1 %v5454_v1, %s6863_s6 }
 0x25c   : > { %1654 = vrot.lane.b32.xlu1 %v6014_v39, %s6870_s13 }
 0x260   : > { %1711 = vrot.lane.b32.xlu1 %v5974_v22, %s6872_s5 }
 0x272   : > { %v618_v52 = vpop.permute.xlu1 %617 }
 0x273   : > { %v620_v54 = vsel %vm6850_vm14, %v616_v53, %v618_v52 }
 0x274   : > { %4263 = vmatpush3.bf16.msra.mxu0 %v620_v54  ;;  %v742_v2 = vpop.permute.xlu0 %741 }
 0x275   : > { %4268 = vmatprep.subr.bf16.mxu0 %v5459_v40 }
 0x276   : > { %v612_v56 = vpop.permute.xlu1 %611 }
 0x277   : > { %4265 = vmatmul.mubr.msk.bf16.vlgmr.msra.gmra.mrb[0].mxu0 %vm622_vm15, %v612_v56 }
 0x278   : > { %4270 = vmatprep.mubr.msk.bf16.mxu0 %vm5461_vm11, %v5459_v40  ;;  %v736_v5 = vpop.permute.xlu0 %735 }
 0x27a   : > { %v671_v59 = vpop.permute.xlu1 %670 }
 0x27b   : > { %v673_v60 = vsel %vm6848_vm1, %v669_v58, %v671_v59 }
 0x27c   : > { %4269 = vmatpush3.bf16.msra.mxu0 %v673_v60  ;;  %v814_v7 = vpop.permute.xlu0 %813 }
 0x27d   : > { %4274 = vmatprep.subr.bf16.mxu0 %v5459_v40 }
 0x27e   : > { %v740_v62 = vpop.permute.xlu1 %739 }
 0x27f   : > { %v744_v3 = vsel %vm6841_vm4, %v740_v62, %v742_v2  ;;  %vm6847_vm4 = vcmask 105472  }
 0x280   : > { %v808_v12 = vpop.permute.xlu0 %807 }
 0x282   : > { %v6117_v0 = vpop.permute.xlu1 %1073 }
 0x283   : > { %vm1075_vm5 = vcmp.ne.s16.totalorder %v6117_v0, 0  ;;  %4271 = vmatmul.mubr.msk.bf16.vlgmr.msra.gmra.mrb[0].mxu0 %vm622_vm15, %v6022_v43 }
 0x284   : > { %4275 = vmatpush3.bf16.msra.mxu0 %v744_v3  ;;  %4276 = vmatprep.mubr.msk.bf16.mxu0 %vm5461_vm11, %v5459_v40  ;;  %v1077_v4 = vsel %vm1075_vm5, %v6018_v41, 0  ;;  %v869_v17 = vpop.permute.xlu0 %868 }
 0x285   : > { %4280 = vmatprep.subr.bf16.mxu0 %v5459_v40  ;;  %1084 = vrot.lane.b32.xlu0 %v1077_v4, %s6878_s1 }
 0x286   : > { %v812_v6 = vpop.permute.xlu1 %811 }
 0x287   : > { %v816_v9 = vsel %vm6840_vm6, %v812_v6, %v814_v7 }
 0x288   : > { %v863_v20 = vpop.permute.xlu0 %862 }
 0x289   : > { %1078 = vrot.lane.b32.xlu0 %v6033_v45, %s6894_s25 }
 0x28a   : > { %v6136_v8 = vpop.permute.xlu1 %1145 }
 0x28b   : > { %vm1147_vm7 = vcmp.ne.s16.totalorder %v6136_v8, 0 }
 0x28c   : > { %v1149_v10 = vsel %vm1147_vm7, %v6018_v41, 0  ;;  %v941_v24 = vpop.permute.xlu0 %940 }
 0x28d   : > { %1155 = vrot.lane.b32.xlu0 %v1149_v10, %s6872_s5  ;;  %v6281_v10 = vld [vmem:[#allocation8 + $0x8] sm:$0xf]  ;;  %s6964_s5 = smov 21  }
 0x28e   : > { %v867_v11 = vpop.permute.xlu1 %866 }
 0x28f   : > { %4277 = vmatmul.mubr.msk.bf16.vlgmr.msra.gmra.mrb[0].mxu0 %vm622_vm15, %v736_v5  ;;  %v871_v18 = vsel %vm622_vm15, %v867_v11, %v869_v17 }
 0x290   : > { %4281 = vmatpush3.bf16.msra.mxu0 %v816_v9  ;;  %4282 = vmatprep.mubr.msk.bf16.mxu0 %vm5461_vm11, %v5459_v40  ;;  %v935_v29 = vpop.permute.xlu0 %934 }
 0x291   : > { %4286 = vmatprep.subr.bf16.mxu0 %v5459_v40 }
 0x292   : > { %v6154_v13 = vpop.permute.xlu1 %1204 }
 0x293   : > { %vm1206_vm8 = vcmp.ne.s16.totalorder %v6154_v13, 0 }
 0x294   : > { %v1208_v15 = vsel %vm1206_vm8, %v6018_v41, 0  ;;  %v1013_v32 = vpop.permute.xlu0 %1012 }
 0x295   : > { %1218 = vrot.lane.b32.xlu0 %v1208_v15, %s6870_s13  ;;  %s6963_s13 = smov 115  }
 0x296   : > { %v939_v21 = vpop.permute.xlu1 %938 }
 0x297   : > { %v943_v25 = vsel %vm6846_vm9, %v939_v21, %v941_v24 }
 0x298   : > { %v1007_v37 = vpop.permute.xlu0 %1006 }
 0x299   : > { %1212 = vrot.lane.b32.xlu0 %v6167_v16, %s6898_s28 }
 0x29a   : > { %v6183_v26 = vpop.permute.xlu1 %1267 }
 0x29b   : > { %4283 = vmatmul.mubr.msk.bf16.vlgmr.msra.gmra.mrb[0].mxu0 %vm622_vm15, %v808_v12  ;;  %vm6854_vm6 = vcmp.ne.s16.totalorder %v6183_v26, 0  ;;  %v6292_v12 = vcombine.low %v6281_v10, %v6281_v10 }
 0x29c   : > { %4287 = vmatpush3.bf16.msra.mxu0 %v871_v18  ;;  %4288 = vmatprep.mubr.msk.bf16.mxu0 %vm5461_vm11, %v5459_v40  ;;  %v1271_v30 = vsel %vm6854_vm6, %v6018_v41, 0  ;;  %vm6857_vm6 = vcmask 23552  }
 0x29d   : > { %4292 = vmatprep.subr.bf16.mxu0 %v5459_v40  ;;  %1278 = vrot.lane.b32.xlu0 %v1271_v30, %s6868_s16  ;;  %s6962_s16 = smov 20  }
 0x29e   : > { %v1011_v31 = vpop.permute.xlu1 %1010 }
 0x29f   : > { %v1015_v33 = vsel %vm6847_vm4, %v1011_v31, %v1013_v32  ;;  %vm6849_vm4 = vcmask 97280  }
 0x2a1   : > { %1272 = vrot.lane.b32.xlu0 %v6167_v16, %s6890_s15 }
 0x2a2   : > { %v6200_v36 = vpop.permute.xlu1 %1327 }
 0x2a3   : > { %vm1329_vm9 = vcmp.ne.s16.totalorder %v6200_v36, 0 }
 0x2a4   : > { %v1331_v38 = vsel %vm1329_vm9, %v6018_v41, 0 }
 0x2a5   : > { %1338 = vrot.lane.b32.xlu0 %v1331_v38, %s6865_s27  ;;  %s6961_s27 = smov 19  }
 0x2a6   : > { %v1083_v43 = vpop.permute.xlu1 %1082 }
 0x2a7   : > { %4289 = vmatmul.mubr.msk.bf16.vlgmr.msra.gmra.mrb[0].mxu0 %vm622_vm15, %v863_v20 }
 0x2a8   : > { %4294 = vmatprep.mubr.msk.bf16.mxu0 %vm5461_vm11, %v5459_v40  ;;  %4293 = vmatpush3.bf16.msra.mxu0 %v943_v25 }
 0x2a9   : > { %4298 = vmatprep.subr.bf16.mxu0 %v5459_v40  ;;  %1332 = vrot.lane.b32.xlu0 %v6167_v16, %s6896_s12 }
 0x2aa   : > { %v6218_v48 = vpop.permute.xlu1 %1387 }
 0x2ab   : > { %vm6853_vm1 = vcmp.ne.s16.totalorder %v6218_v48, 0 }
 0x2ac   : > { %v1391_v51 = vsel %vm6853_vm1, %v6018_v41, 0 }
 0x2ad   : > { %1398 = vrot.lane.b32.xlu0 %v1391_v51, %s6863_s6  ;;  %s6960_s6 = smov 116  }
 0x2ae   : > { %v1154_v52 = vpop.permute.xlu1 %1153 }
 0x2b1   : > { %1392 = vrot.lane.b32.xlu0 %v6167_v16, %s6875_s4 }
 0x2b2   : > { %v1217_v56 = vpop.permute.xlu1 %1216 }
 0x2b3   : > { %4295 = vmatmul.mubr.msk.bf16.vlgmr.msra.gmra.mrb[0].mxu0 %vm622_vm15, %v935_v29 }
 0x2b4   : > { %4300 = vmatprep.mubr.msk.bf16.mxu0 %vm5461_vm11, %v5459_v40  ;;  %4299 = vmatpush3.bf16.msra.mxu0 %v1015_v33 }
 0x2b5   : > { %4304 = vmatprep.subr.bf16.mxu0 %v5459_v40  ;;  %1447 = vrot.lane.b32.xlu0 %v6167_v16, %s6887_s26 }
 0x2b6   : > { %v6241_v57 = vpop.permute.xlu1 %1493 }
 0x2b7   : > { %vm1495_vm14 = vcmp.ne.s16.totalorder %v6241_v57, 0 }
 0x2b8   : > { %v1496_v58 = vsel %vm1495_vm14, %v6018_v41, 0 }
 0x2b9   : > { %1765 = vrot.lane.b32.xlu0 %v5964_v19, %s6878_s1  ;;  %1500 = vrot.lane.b32.xlu1 %v1496_v58, %s6861_s29  ;;  %s6959_s29 = smov 117   ;;  %s6966_s1 = smov 111  }
 0x2ba   : > { %v1277_v60 = vpop.permute.xlu1 %1276 }
 0x2bd   : > { %1497 = vrot.lane.b32.xlu1 %v6167_v16, %s6881_s0 }
 0x2be   : > { %v6265_v2 = vpop.permute.xlu1 %1547 }
 0x2bf   : > { %4301 = vmatmul.mubr.msk.bf16.vlgmr.msra.gmra.mrb[0].mxu0 %vm622_vm15, %v1007_v37  ;;  %vm6856_vm1 = vcmp.ne.s16.totalorder %v6265_v2, 0 }
 0x2c0   : > { %4306 = vmatprep.mubr.msk.bf16.mxu0 %vm5461_vm11, %v5459_v40 }
 0x2c1   : > { %1819 = vrot.lane.b32.xlu1 %v5977_v23, %s6884_s24  ;;  %v1550_v23 = vsel %vm6856_vm1, %v6018_v41, 0  ;;  %vm6860_vm1 = vcmask 7168   ;;  %s6968_s24 = smov 108  }
 0x2c2   : > { %1554 = vrot.lane.b32.xlu0 %v1550_v23, %s6859_s2  ;;  %v1337_v4 = vpop.permute.xlu1 %1336  ;;  %s6958_s2 = smov 17  }
 0x2c6   : > { %1551 = vrot.lane.b32.xlu0 %v6167_v16, %s6894_s25  ;;  %v6279_v7 = vpop.permute.xlu1 %1601 }
 0x2ca   : > { %1873 = vrot.lane.b32.xlu0 %v5988_v27, %s6892_s3 }
 0x2ce   : > { %1661 = vrot.lane.b32.xlu0 %v6292_v12, %s6898_s28 }
 0x2d2   : > { %1976 = vrot.lane.b32.xlu0 %v5991_v28, %s6958_s2 }
 0x2f7   : > { %v1085_v44 = vpop.permute.xlu0 %1084 }
 0x2f8   : > { %v1087_v45 = vsel %vm6849_vm4, %v1083_v43, %v1085_v44  ;;  %vm6851_vm4 = vcmask 89088  }
 0x2f9   : > { %4305 = vmatpush3.bf16.msra.mxu0 %v1087_v45 }
 0x2fa   : > { %4310 = vmatprep.subr.bf16.mxu0 %v5459_v40 }
 0x2fb   : > { %v1079_v50 = vpop.permute.xlu0 %1078 }
 0x2fc   : > { %4307 = vmatmul.mubr.msk.bf16.vlgmr.msra.gmra.mrb[0].mxu0 %vm622_vm15, %v1079_v50 }
 0x2fd   : > { %4312 = vmatprep.mubr.msk.bf16.mxu0 %vm5461_vm11, %v5459_v40 }
 0x2ff   : > { %v1156_v53 = vpop.permute.xlu0 %1155 }
 0x300   : > { %v1158_v54 = vsel %vm6851_vm4, %v1154_v52, %v1156_v53  ;;  %vm6852_vm4 = vcmask 39936  }
 0x301   : > { %4311 = vmatpush3.bf16.msra.mxu0 %v1158_v54 }
 0x302   : > { %4316 = vmatprep.subr.bf16.mxu0 %v5459_v40 }
 0x307   : > { %v1219_v22 = vpop.permute.xlu0 %1218 }
 0x308   : > { %v1221_v59 = vsel %vm6852_vm4, %v1217_v56, %v1219_v22  ;;  %4313 = vmatmul.mubr.msk.bf16.vlgmr.msra.gmra.mrb[0].mxu0 %vm622_vm15, %v6156_v14  ;;  %vm6855_vm4 = vcmask 31744   ;;  %v1397_v14 = vpop.permute.xlu1 %1396  ;;  %v2034_v56 = vld [vmem:[#allocation8 + $0xc] sm:$0xf] }
 0x309   : > { %4317 = vmatpush3.bf16.msra.mxu0 %v1221_v59  ;;  %4318 = vmatprep.mubr.msk.bf16.mxu0 %vm5461_vm11, %v5459_v40  ;;  %v4105_v22 = vcombine.low %v2034_v56, %v2034_v56 }
 0x30a   : > { %4322 = vmatprep.subr.bf16.mxu0 %v5459_v40 }
 0x30b   : > { %v1213_v19 = vpop.permute.xlu0 %1212 }
 0x30c   : > { %v6301_v27 = vpop.permute.xlu1 %1654 }
 0x30f   : > { %v1279_v62 = vpop.permute.xlu0 %1278 }
 0x310   : > { %v1281_v63 = vsel %vm6855_vm4, %v1277_v60, %v1279_v62  ;;  %vm1603_vm4 = vcmp.ne.s16.totalorder %v6279_v7, 0  ;;  %v6310_v20 = vpop.permute.xlu1 %1711 }
 0x311   : > { %v1604_v11 = vsel %vm1603_vm4, %v6018_v41, 0 }
 0x312   : > { %1607 = vrot.lane.b32.xlu1 %v1604_v11, %s6858_s14  ;;  %s6957_s14 = smov 123  }
 0x313   : > { %v1273_v3 = vpop.permute.xlu0 %1272 }
 0x314   : > { %4319 = vmatmul.mubr.msk.bf16.vlgmr.msra.gmra.mrb[0].mxu0 %vm622_vm15, %v1213_v19 }
 0x315   : > { %4324 = vmatprep.mubr.msk.bf16.mxu0 %vm5461_vm11, %v5459_v40  ;;  %4323 = vmatpush3.bf16.msra.mxu0 %v1281_v63 }
 0x316   : > { %4328 = vmatprep.subr.bf16.mxu0 %v5459_v40 }
 0x317   : > { %v1339_v5 = vpop.permute.xlu0 %1338 }
 0x318   : > { %v1341_v6 = vsel %vm6857_vm6, %v1337_v4, %v1339_v5  ;;  %vm6862_vm6 = vcmp.ne.s16.totalorder %v6301_v27, 0 }
 0x319   : > { %v1657_v18 = vsel %vm6862_vm6, %v6018_v41, 0 }
 0x31a   : > { %1664 = vrot.lane.b32.xlu1 %v1657_v18, %s6957_s14 }
 0x31b   : > { %v1333_v9 = vpop.permute.xlu0 %1332 }
 0x31f   : > { %v1399_v15 = vpop.permute.xlu0 %1398 }
 0x320   : > { %4325 = vmatmul.mubr.msk.bf16.vlgmr.msra.gmra.mrb[0].mxu0 %vm622_vm15, %v1273_v3  ;;  %v1401_v16 = vsel %vm6860_vm1, %v1397_v14, %v1399_v15  ;;  %vm6867_vm1 = vcmp.ne.s16.totalorder %v6310_v20, 0 }
 0x321   : > { %4330 = vmatprep.mubr.msk.bf16.mxu0 %vm5461_vm11, %v5459_v40  ;;  %4329 = vmatpush3.bf16.msra.mxu0 %v1341_v6  ;;  %v1714_v24 = vsel %vm6867_vm1, %v6018_v41, 0 }
 0x322   : > { %4334 = vmatprep.subr.bf16.mxu0 %v5459_v40  ;;  %1718 = vrot.lane.b32.xlu1 %v1714_v24, %s6959_s29 }
 0x323   : > { %v1393_v17 = vpop.permute.xlu0 %1392 }
 0x326   : > { %1715 = vrot.lane.b32.xlu1 %v6292_v12, %s6890_s15 }
 0x327   : > { %v1448_v21 = vpop.permute.xlu0 %1447 }
 0x32a   : > { %2030 = vrot.lane.b32.xlu1 %v6006_v35, %s6961_s27 }
 0x32b   : > { %v6317_v25 = vpop.permute.xlu0 %1765  ;;  %v1501_v29 = vpop.permute.xlu1 %1500 }
 0x32c   : > { %4331 = vmatmul.mubr.msk.bf16.vlgmr.msra.gmra.mrb[0].mxu0 %vm622_vm15, %v1333_v9  ;;  %vm6877_vm6 = vcmp.ne.s16.totalorder %v6317_v25, 0 }
 0x32d   : > { %4335 = vmatpush3.bf16.msra.mxu0 %v1401_v16  ;;  %4336 = vmatprep.mubr.msk.bf16.mxu0 %vm5461_vm11, %v5459_v40  ;;  %v1768_v28 = vsel %vm6877_vm6, %v6018_v41, 0 }
 0x32e   : > { %4340 = vmatprep.subr.bf16.mxu0 %v5459_v40  ;;  %1772 = vrot.lane.b32.xlu0 %v1768_v28, %s6960_s6 }
 0x32f   : > { %v1498_v30 = vpop.permute.xlu1 %1497 }
 0x332   : > { %1769 = vrot.lane.b32.xlu0 %v6292_v12, %s6896_s12 }
 0x333   : > { %v6335_v31 = vpop.permute.xlu1 %1819 }
 0x334   : > { %vm6874_vm1 = vcmp.ne.s16.totalorder %v6335_v31, 0 }
 0x335   : > { %v1822_v32 = vsel %vm6874_vm1, %v6018_v41, 0 }
 0x336   : > { %2083 = vrot.lane.b32.xlu0 %v6003_v34, %s6962_s16  ;;  %1826 = vrot.lane.b32.xlu1 %v1822_v32, %s6963_s13  ;;  %v1555_v34 = vpop.permute.xlu0 %1554 }
 0x338   : > { %4337 = vmatmul.mubr.msk.bf16.vlgmr.msra.gmra.mrb[0].mxu0 %vm622_vm15, %v1393_v17 }
 0x339   : > { %4341 = vmatpush3.bf16.msra.mxu0 %v6018_v41  ;;  %4342 = vmatprep.mubr.msk.bf16.mxu0 %vm5461_vm11, %v5459_v40 }
 0x33a   : > { %4346 = vmatprep.subr.bf16.mxu0 %v5459_v40  ;;  %1823 = vrot.lane.b32.xlu1 %v6292_v12, %s6875_s4  ;;  %v1552_v35 = vpop.permute.xlu0 %1551  ;;  %s6965_s4 = smov 113  }
 0x33e   : > { %2140 = vrot.lane.b32.xlu1 %v6014_v39, %s6964_s5  ;;  %v6361_v33 = vpop.permute.xlu0 %1873 }
 0x33f   : > { %vm6883_vm1 = vcmp.ne.s16.totalorder %v6361_v33, 0 }
 0x340   : > { %v1876_v37 = vsel %vm6883_vm1, %v6018_v41, 0 }
 0x341   : > { %1880 = vrot.lane.b32.xlu0 %v1876_v37, %s6965_s4 }
 0x342   : > { %1929 = vrot.lane.b32.xlu1 %v6018_v41, %s6898_s28  ;;  %v1662_v38 = vpop.permute.xlu0 %1661 }
 0x344   : > { %4343 = vmatmul.mubr.msk.bf16.vlgmr.msra.gmra.mrb[0].mxu0 %vm622_vm15, %v1448_v21 }
 0x345   : > { %4347 = vmatpush3.bf16.msra.mxu0 %v1501_v29  ;;  %4348 = vmatprep.mubr.msk.bf16.mxu0 %vm5461_vm11, %v5459_v40 }
 0x346   : > { %4352 = vmatprep.subr.bf16.mxu0 %v5459_v40  ;;  %1877 = vrot.lane.b32.xlu0 %v6292_v12, %s6887_s26  ;;  %v6371_v44 = vpop.permute.xlu0 %1976  ;;  %s6969_s26 = smov 107  }
 0x347   : > { %vm6880_vm6 = vcmp.ne.s16.totalorder %v6371_v44, 0 }
 0x348   : > { %v1979_v45 = vsel %vm6880_vm6, %v6018_v41, 0 }
 0x349   : > { %1983 = vrot.lane.b32.xlu1 %v1979_v45, %s6966_s1 }
 0x34a   : > { %1927 = vrot.lane.b32.xlu0 %v6292_v12, %s6881_s0  ;;  %s6967_s0 = smov 109  }
 0x34e   : > { %1980 = vrot.lane.b32.xlu0 %v6292_v12, %s6894_s25 }
 0x350   : > { %4349 = vmatmul.mubr.msk.bf16.vlgmr.msra.gmra.mrb[0].mxu0 %vm622_vm15, %v1498_v30 }
 0x351   : > { %4354 = vmatprep.mubr.msk.bf16.mxu0 %vm5461_vm11, %v5459_v40  ;;  %4353 = vmatpush3.bf16.msra.mxu0 %v1555_v34 }
 0x352   : > { %4358 = vmatprep.subr.bf16.mxu0 %v5459_v40 }
 0x35c   : > { %4355 = vmatmul.mubr.msk.bf16.vlgmr.msra.gmra.mrb[0].mxu0 %vm622_vm15, %v1552_v35 }
 0x35d   : > { %4360 = vmatprep.mubr.msk.bf16.mxu0 %vm5461_vm11, %v5459_v40 }
 0x384   : > { %v1608_v39 = vpop.permute.xlu1 %1607 }
 0x385   : > { %4359 = vmatpush3.bf16.msra.mxu0 %v1608_v39 }
 0x386   : > { %4364 = vmatprep.subr.bf16.mxu0 %v5459_v40 }
 0x388   : > { %4361 = vmatmul.mubr.msk.bf16.vlgmr.msra.gmra.mrb[0].mxu0 %vm622_vm15, %v6281_v10 }
 0x389   : > { %4366 = vmatprep.mubr.msk.bf16.mxu0 %vm5461_vm11, %v5459_v40 }
 0x38c   : > { %v1665_v43 = vpop.permute.xlu1 %1664 }
 0x38d   : > { %4365 = vmatpush3.bf16.msra.mxu0 %v1665_v43 }
 0x38e   : > { %4370 = vmatprep.subr.bf16.mxu0 %v5459_v40 }
 0x394   : > { %v1719_v50 = vpop.permute.xlu1 %1718  ;;  %4367 = vmatmul.mubr.msk.bf16.vlgmr.msra.gmra.mrb[0].mxu0 %vm622_vm15, %v1662_v38 }
 0x395   : > { %4371 = vmatpush3.bf16.msra.mxu0 %v1719_v50  ;;  %4372 = vmatprep.mubr.msk.bf16.mxu0 %vm5461_vm11, %v5459_v40 }
 0x396   : > { %4376 = vmatprep.subr.bf16.mxu0 %v5459_v40 }
 0x398   : > { %v1716_v51 = vpop.permute.xlu1 %1715 }
 0x39c   : > { %v6387_v53 = vpop.permute.xlu1 %2030 }
 0x39d   : > { %vm6886_vm6 = vcmp.ne.s16.totalorder %v6387_v53, 0 }
 0x39e   : > { %v2033_v58 = vsel %vm6886_vm6, %v6018_v41, 0 }
 0x39f   : > { %2036 = vrot.lane.b32.xlu1 %v2033_v58, %s6967_s0 }
 0x3a0   : > { %v1773_v52 = vpop.permute.xlu0 %1772  ;;  %4373 = vmatmul.mubr.msk.bf16.vlgmr.msra.gmra.mrb[0].mxu0 %vm622_vm15, %v1716_v51 }
 0x3a1   : > { %4377 = vmatpush3.bf16.msra.mxu0 %v1773_v52  ;;  %4378 = vmatprep.mubr.msk.bf16.mxu0 %vm5461_vm11, %v5459_v40 }
 0x3a2   : > { %4382 = vmatprep.subr.bf16.mxu0 %v5459_v40 }
 0x3a3   : > { %2090 = vrot.lane.b32.xlu1 %v4105_v22, %s6898_s28 }
 0x3a4   : > { %v1770_v54 = vpop.permute.xlu0 %1769 }
 0x3a7   : > { %2144 = vrot.lane.b32.xlu1 %v4105_v22, %s6890_s15 }
 0x3a8   : > { %v6398_v59 = vpop.permute.xlu0 %2083  ;;  %v1827_v19 = vpop.permute.xlu1 %1826 }
 0x3a9   : > { %vm2085_vm1 = vcmp.ne.s16.totalorder %v6398_v59, 0 }
 0x3aa   : > { %v2086_v60 = vsel %vm2085_vm1, %v6018_v41, 0 }
 0x3ab   : > { %2093 = vrot.lane.b32.xlu0 %v2086_v60, %s6968_s24 }
 0x3ac   : > { %v1824_v62 = vpop.permute.xlu1 %1823  ;;  %4379 = vmatmul.mubr.msk.bf16.vlgmr.msra.gmra.mrb[0].mxu0 %vm622_vm15, %v1770_v54 }
 0x3ad   : > { %4383 = vmatpush3.bf16.msra.mxu0 %v1827_v19  ;;  %4384 = vmatprep.mubr.msk.bf16.mxu0 %vm5461_vm11, %v5459_v40  ;;  %v2223_v19 = vld [vmem:[#allocation9] sm:$0xff] }
 0x3ae   : > { %4388 = vmatprep.subr.bf16.mxu0 %v5459_v40 }
 0x3b0   : > { %v6407_v63 = vpop.permute.xlu1 %2140 }
 0x3b1   : > { %vm6889_vm6 = vcmp.ne.s16.totalorder %v6407_v63, 0 }
 0x3b2   : > { %v2143_v3 = vsel %vm6889_vm6, %v6018_v41, 0  ;;  %vm6900_vm6 = vcmask 523264  }
 0x3b3   : > { %2147 = vrot.lane.b32.xlu0 %v2143_v3, %s6969_s26  ;;  %v1881_v23 = vpop.permute.xlu0 %1880 }
 0x3b4   : > { %v1930_v41 = vpop.permute.xlu1 %1929 }
 0x3b8   : > { %4385 = vmatmul.mubr.msk.bf16.vlgmr.msra.gmra.mrb[0].mxu0 %vm622_vm15, %v1824_v62  ;;  %v1878_v4 = vpop.permute.xlu0 %1877 }
 0x3b9   : > { %4390 = vmatprep.mubr.msk.bf16.mxu0 %vm5461_vm11, %v5459_v40  ;;  %4389 = vmatpush3.bf16.msra.mxu0 %v1881_v23  ;;  %v2230_v23 = vld [vmem:[#allocation11] sm:$0xff] }
 0x3ba   : > { %4394 = vmatprep.subr.bf16.mxu0 %v5459_v40 }
 0x3bb   : > { %v1984_v6 = vpop.permute.xlu1 %1983 }
 0x3bc   : > { %v1928_v5 = vpop.permute.xlu0 %1927 }
 0x3c0   : > { %v1981_v9 = vpop.permute.xlu0 %1980 }
 0x3c4   : > { %4391 = vmatmul.mubr.msk.bf16.vlgmr.msra.gmra.mrb[0].mxu0 %vm622_vm15, %v1878_v4 }
 0x3c5   : > { %4395 = vmatpush3.bf16.msra.mxu0 %v1930_v41  ;;  %4396 = vmatprep.mubr.msk.bf16.mxu0 %vm5461_vm11, %v5459_v40 }
 0x3c6   : > { %4400 = vmatprep.subr.bf16.mxu0 %v5459_v40 }
 0x3d0   : > { %4397 = vmatmul.mubr.msk.bf16.vlgmr.msra.gmra.mrb[0].mxu0 %vm622_vm15, %v1928_v5 }
 0x3d1   : > { %4401 = vmatpush3.bf16.msra.mxu0 %v1984_v6  ;;  %4402 = vmatprep.mubr.msk.bf16.mxu0 %vm5461_vm11, %v5459_v40 }
 0x3d2   : > { %4406 = vmatprep.subr.bf16.mxu0 %v5459_v40 }
 0x3dc   : > { %4403 = vmatmul.mubr.msk.bf16.vlgmr.msra.gmra.mrb[0].mxu0 %vm622_vm15, %v1981_v9 }
 0x3dd   : > { %4408 = vmatprep.mubr.msk.bf16.mxu0 %vm5461_vm11, %v5459_v40 }
 0x411   : > { %v2037_v10 = vpop.permute.xlu1 %2036 }
 0x412   : > { %4407 = vmatpush3.bf16.msra.mxu0 %v2037_v10 }
 0x413   : > { %4412 = vmatprep.subr.bf16.mxu0 %v5459_v40 }
 0x415   : > { %4409 = vmatmul.mubr.msk.bf16.vlgmr.msra.gmra.mrb[0].mxu0 %vm622_vm15, %v2034_v56  ;;  %v2091_v12 = vpop.permute.xlu1 %2090 }
 0x416   : > { %4414 = vmatprep.mubr.msk.bf16.mxu0 %vm5461_vm11, %v5459_v40 }
 0x419   : > { %v2145_v15 = vpop.permute.xlu1 %2144 }
 0x41d   : > { %v2094_v11 = vpop.permute.xlu0 %2093 }
 0x41e   : > { %4413 = vmatpush3.bf16.msra.mxu0 %v2094_v11 }
 0x41f   : > { %4418 = vmatprep.subr.bf16.mxu0 %v5459_v40 }
 0x421   : > { %4415 = vmatmul.mubr.msk.bf16.vlgmr.msra.gmra.mrb[0].mxu0 %vm622_vm15, %v2091_v12 }
 0x422   : > { %4420 = vmatprep.mubr.msk.bf16.mxu0 %vm5461_vm11, %v5459_v40 }
 0x425   : > { %v2148_v14 = vpop.permute.xlu0 %2147 }
 0x426   : > { %4419 = vmatpush3.bf16.msra.mxu0 %v2148_v14  ;;  %v6452_v14 = vld [vmem:[#allocation12] sm:$0xf] }
 0x42d   : > { %4421 = vmatmul.mubr.msk.bf16.vlgmr.msra.gmra.mrb[0].mxu0 %vm622_vm15, %v2145_v15 }
 0x42e   : > { %4594 = vmatprep.mubr.msk.f32.mxu0 %vm5461_vm11, %v5459_v40 }
 0x500   : > { %v2187_v16 = vpop.f32.mrb[0].mxu0 }
 0x501   : > { %v4422_v17 = vpop.f32.mrb[1].mxu0  ;;  %v2194_v18 = vsel %vm6900_vm6, %v2187_v16, 0.0  ;;  %v2204_v21 = vmul.f32 %v2187_v16, %v2187_v16 }
 0x502   : > { %2195 = vadd.xlane.f32.xlu0 %v2194_v18  ;;  %v2190_v24 = vpop.f32.mrb[2].mxu0 }
 0x503   : > { %v4423_v29 = vpop.f32.mrb[3].mxu0  ;;  %v2205_v28 = vsel %vm6900_vm6, %v2204_v21, 0.0  ;;  %vm2248_vm6 = vcmask 519168   ;;  %v5032_v21 = vld [vmem:[#allocation2] sm:$0xff] }
 0x504   : > { %2206 = vadd.xlane.f32.xlu1 %v2205_v28  ;;  %v6511_v29 = vld [vmem:[#allocation12 + $0x4] sm:$0xf] }
 0x505   : > { %v4118_v55 = vcombine.low %v6511_v29, %v6511_v29 }
 0x58f   : > { %v2196_v30 = vpop.xlane.xlu0 %2195 }
 0x590   : > { %v2197_v32 = vrot.slane %v2196_v30, 4 }
 0x591   : > { %v2207_v34 = vpop.xlane.xlu1 %2206 }
 0x592   : > { %v2198_v35 = vadd.f32 %v2197_v32, %v2196_v30  ;;  %v2208_v39 = vrot.slane %v2207_v34, 4  ;;  %v6549_v30 = vld [vmem:[#allocation12 + $0x8] sm:$0xf] }
 0x593   : > { %v4127_v57 = vcombine.low %v6549_v30, %v6549_v30 }
 0x594   : > { %v2199_v37 = vrot.slane %v2198_v35, 2  ;;  %v2209_v38 = vadd.f32 %v2208_v39, %v2207_v34 }
 0x596   : > { %v2210_v43 = vrot.slane %v2209_v38, 2  ;;  %v2200_v45 = vadd.f32 %v2199_v37, %v2198_v35 }
 0x598   : > { %v2201_v50 = vrot.slane %v2200_v45, 1  ;;  %v2211_v51 = vadd.f32 %v2210_v43, %v2209_v38 }
 0x59a   : > { %v2202_v52 = vadd.f32 %v2201_v50, %v2200_v45  ;;  %v2212_v54 = vrot.slane %v2211_v51, 1 }
 0x59c   : > { %4811 = vpush %v2202_v52  ;;  %v2213_v56 = vadd.f32 %v2212_v54, %v2211_v51 }
 0x59e   : > { %4813 = vpush %v2213_v56 }
 0x5cd   : > { %s4812_s15 = spop %4811 }
 0x5ce   : > { %s2217_s3 = smul.f32 0.001953125, %s4812_s15  ;;  %s6975_s15 = smov 96  }
 0x5cf   : > { %s4814_s25 = spop %4813 }
 0x5d0   : > { %s2221_s12 = smul.f32 %s2217_s3, %s2217_s3  ;;  %v2231_v3 = vstv %s2217_s3  ;;  %s6973_s3 = smov 15  }
 0x5d1   : > { %s2220_s28 = smul.f32 0.001953125, %s4814_s25  ;;  %s6979_s25 = smov 11  }
 0x5d3   : > { %s2222_s8 = ssub.f32 %s2220_s28, %s2221_s12  ;;  %s6974_s28 = smov 48  }
 0x5d4   : > { %s6978_s12 = smov 64  }
 0x5d5   : > { %s2224_s9 = sadd.f32 1e-05, %s2222_s8  ;;  %s6970_s8 = smov 112  }
 0x5d7   : > { %v2225_v58 = vstv %s2224_s9  ;;  %s6971_s9 = smov 80  }
 0x5d8   : > { %5012 = vrsqrt.f32 %v2225_v58 }
 0x5e2   : > { %v5013_v22 = vpop.eup %5012 }
 0x5e3   : > { %4815 = vpush %v5013_v22 }
 0x614   : > { %s4816_s10 = spop %4815 }
 0x615   : > { %v2228_v60 = vstv %s4816_s10  ;;  %s6972_s10 = smov 16  }
 0x616   : > { %v2229_v62 = vmul.f32 %v2228_v60, %v2223_v19 }
 0x618   : > { %v2232_v41 = vmul.f32 %v2231_v3, %v2229_v62  ;;  %2236 = vperm.xlu0 %5002, %v2229_v62  }
 0x61a   : > { %v2233_v4 = vsub.f32 %v2230_v23, %v2232_v41  ;;  %v6638_v41 = vld [vmem:[#allocation12 + $0xc] sm:$0xf] }
 0x61c   : > { %2242 = vperm.xlu1 %5003, %v2233_v4   ;;  %v4136_v4 = vcombine.low %v6638_v41, %v6638_v41 }
 0x620   : > { %2264 = vrot.lane.b32.xlu1 %v5454_v1, %s6962_s16 }
 0x697   : > { %v2237_v5 = vpop.permute.xlu0 %2236 }
 0x698   : > { %v2239_v6 = vmul.f32 %v2237_v5, %v2187_v16  ;;  %v4108_v16 = vcombine.low %v6452_v14, %v6452_v14 }
 0x69b   : > { %v2243_v9 = vpop.permute.xlu1 %2242 }
 0x69c   : > { %v2245_v10 = vadd.f32 %v2243_v9, %v2239_v6 }
 0x69e   : > { %v2246_v11 = vmax.f32 %v2245_v10, 0.0 }
 0x69f   : > { %v2265_v59 = vpop.permute.xlu1 %2264 }
 0x6a0   : > { %v2247_v12 = vpack.c.bf16 %v2246_v11, %v2246_v11 }
 0x6a2   : > { %2249 = vst.msk [vmem:[#allocation2 + $0x8] sm:$0xf] %vm2248_vm6, %v2247_v12  ;;  %vm6998_vm6 = vcmask 162816  }
 0x6a9   : > { %v6454_v15 = vld [vmem:[#allocation2 + $0x8] sm:$0xff] }
 0x6aa   : > { %v2365_v17 = vsel %vm732_vm12, %v6454_v15, 0  ;;  %v2256_v18 = vsel %vm605_vm3, %v6454_v15, 0  ;;  %v2253_v42 = vsel %vm587_vm10, %v6454_v15, 0  ;;  %v2587_v46 = vsel %vm1003_vm2, %v6454_v15, 0 }
 0x6ab   : > { %2372 = vrot.lane.b32.xlu0 %v2365_v17, %s6961_s27  ;;  %2266 = vrot.lane.b32.xlu1 %v2256_v18, %s6962_s16  ;;  %v2421_v47 = vsel %vm804_vm13, %v6454_v15, 0  ;;  %s6976_s16 = smov 13   ;;  %v2699_v61 = vsel %vm1147_vm7, %v6454_v15, 0  ;;  %v2531_v49 = vsel %vm931_vm0, %v6454_v15, 0  ;;  %v2754_v24 = vsel %vm1206_vm8, %v6454_v15, 0 }
 0x6ac   : > { %v2643_v8 = vsel %vm1075_vm5, %v6454_v15, 0  ;;  %v2869_v13 = vsel %vm1329_vm9, %v6454_v15, 0  ;;  %v3026_v0 = vsel %vm1495_vm14, %v6454_v15, 0  ;;  %vm6985_vm3 = vcmp.ne.s16.totalorder %v6183_v26, 0 }
 0x6ad   : > { %v2813_v36 = vsel %vm6985_vm3, %v6454_v15, 0  ;;  %vm6987_vm10 = vcmp.ne.s16.totalorder %v6265_v2, 0  ;;  %v3128_v26 = vsel %vm1603_vm4, %v6454_v15, 0  ;;  %vm6990_vm12 = vcmp.ne.s16.totalorder %v6218_v48, 0 }
 0x6ae   : > { %v3077_v28 = vsel %vm6987_vm10, %v6454_v15, 0  ;;  %v2925_v2 = vsel %vm6990_vm12, %v6454_v15, 0  ;;  %vm6991_vm13 = vcmp.ne.s16.totalorder %v6301_v27, 0  ;;  %vm6992_vm14 = vcmp.ne.s16.totalorder %v6310_v20, 0 }
 0x6af   : > { %2426 = vrot.lane.b32.xlu0 %v5454_v1, %s6958_s2  ;;  %2260 = vrot.lane.b32.xlu1 %v4108_v16, %s6970_s8  ;;  %v3232_v48 = vsel %vm6992_vm14, %v6454_v15, 0  ;;  %vm6993_vm0 = vcmp.ne.s16.totalorder %v6317_v25, 0  ;;  %v3586_v27 = vsel %vm2085_vm1, %v6454_v15, 0  ;;  %vm6994_vm2 = vcmp.ne.s16.totalorder %v6335_v31, 0 }
 0x6b0   : > { %v3283_v7 = vsel %vm6993_vm0, %v6454_v15, 0  ;;  %v3334_v20 = vsel %vm6994_vm2, %v6454_v15, 0  ;;  %vm6995_vm4 = vcmp.ne.s16.totalorder %v6407_v63, 0  ;;  %vm6996_vm5 = vcmp.ne.s16.totalorder %v6361_v33, 0 }
 0x6b1   : > { %v3640_v25 = vsel %vm6995_vm4, %v6454_v15, 0  ;;  %v3385_v32 = vsel %vm6996_vm5, %v6454_v15, 0  ;;  %vm6997_vm1 = vcmp.ne.s16.totalorder %v6371_v44, 0  ;;  %vm6999_vm7 = vcmp.ne.s16.totalorder %v6387_v53, 0 }
 0x6b2   : > { %v3485_v34 = vsel %vm6997_vm1, %v6454_v15, 0  ;;  %v3536_v35 = vsel %vm6999_vm7, %v6454_v15, 0  ;;  %vm7000_vm8 = vcmask 171008   ;;  %vm7001_vm9 = vcmask 154624  }
 0x6b3   : > { %2422 = vrot.lane.b32.xlu0 %v4108_v16, %s6971_s9  ;;  %2315 = vrot.lane.b32.xlu1 %v5454_v1, %s6964_s5  ;;  %vm7002_vm3 = vcmask 138240   ;;  %vm7003_vm10 = vcmask 121856   ;;  %vm7004_vm12 = vcmask 105472   ;;  %vm7006_vm14 = vcmask 89088  }
 0x6b4   : > { %vm7007_vm0 = vcmask 39936   ;;  %vm7008_vm2 = vcmask 31744   ;;  %vm7009_vm4 = vcmask 23552   ;;  %vm7010_vm5 = vcmask 7168  }
 0x6b7   : > { %2482 = vrot.lane.b32.xlu0 %v6454_v15, %s6972_s10  ;;  %2317 = vrot.lane.b32.xlu1 %v2253_v42, %s6964_s5  ;;  %s6977_s5 = smov 12  }
 0x6bb   : > { %2536 = vrot.lane.b32.xlu0 %v5454_v1, %s6973_s3  ;;  %2370 = vrot.lane.b32.xlu1 %v5454_v1, %s6961_s27  ;;  %s6981_s27 = smov 4  }
 0x6bf   : > { %2532 = vrot.lane.b32.xlu0 %v4108_v16, %s6974_s28  ;;  %2366 = vrot.lane.b32.xlu1 %v4108_v16, %s6975_s15 }
 0x6c3   : > { %2594 = vrot.lane.b32.xlu0 %v2587_v46, %s6976_s16  ;;  %2428 = vrot.lane.b32.xlu1 %v2421_v47, %s6958_s2  ;;  %s6980_s2 = smov 5  }
 0x6c7   : > { %2648 = vrot.lane.b32.xlu0 %v5454_v1, %s6977_s5  ;;  %2480 = vrot.lane.b32.xlu1 %v5032_v21, %s6972_s10 }
 0x6cb   : > { %2644 = vrot.lane.b32.xlu0 %v4108_v16, %s6972_s10  ;;  %2476 = vrot.lane.b32.xlu1 %v4108_v16, %s6978_s12 }
 0x6cf   : > { %2705 = vrot.lane.b32.xlu0 %v2699_v61, %s6979_s25  ;;  %2538 = vrot.lane.b32.xlu1 %v2531_v49, %s6973_s3  ;;  %s6983_s3 = smov 3  }
 0x6d3   : > { %2764 = vrot.lane.b32.xlu0 %v2754_v24, %s6980_s2  ;;  %2592 = vrot.lane.b32.xlu1 %v5454_v1, %s6976_s16  ;;  %s6984_s16 = smov 1  }
 0x6d7   : > { %2818 = vrot.lane.b32.xlu0 %v5454_v1, %s6981_s27  ;;  %2588 = vrot.lane.b32.xlu1 %v4108_v16, %s6982_s19 }
 0x6db   : > { %2814 = vrot.lane.b32.xlu0 %v4118_v55, %s6975_s15  ;;  %2650 = vrot.lane.b32.xlu1 %v2643_v8, %s6977_s5  ;;  %s6986_s5 = smov 127  }
 0x6df   : > { %2876 = vrot.lane.b32.xlu0 %v2869_v13, %s6983_s3  ;;  %2703 = vrot.lane.b32.xlu1 %v5454_v1, %s6979_s25  ;;  %s6988_s25 = smov 125  }
 0x6e3   : > { %2930 = vrot.lane.b32.xlu0 %v5454_v1, %s6984_s16  ;;  %2762 = vrot.lane.b32.xlu1 %v5454_v1, %s6980_s2  ;;  %s6989_s2 = smov 124  }
 0x6e7   : > { %2926 = vrot.lane.b32.xlu0 %v4118_v55, %s6978_s12  ;;  %2758 = vrot.lane.b32.xlu1 %v4118_v55, %s6970_s8 }
 0x6eb   : > { %3030 = vrot.lane.b32.xlu0 %v3026_v0, %s6986_s5  ;;  %2820 = vrot.lane.b32.xlu1 %v2813_v36, %s6981_s27 }
 0x6ef   : > { %3081 = vrot.lane.b32.xlu0 %v3077_v28, %s6988_s25  ;;  %2874 = vrot.lane.b32.xlu1 %v5454_v1, %s6983_s3  ;;  %v3178_v1 = vsel %vm6991_vm13, %v6454_v15, 0  ;;  %vm7005_vm13 = vcmask 97280  }
 0x6f3   : > { %3131 = vrot.lane.b32.xlu0 %v3128_v26, %s6989_s2  ;;  %2870 = vrot.lane.b32.xlu1 %v4118_v55, %s6971_s9 }
 0x6f7   : > { %3182 = vrot.lane.b32.xlu0 %v4127_v57, %s6970_s8  ;;  %2932 = vrot.lane.b32.xlu1 %v2925_v2, %s6984_s16 }
 0x6fb   : > { %3233 = vrot.lane.b32.xlu0 %v4127_v57, %s6975_s15  ;;  %2980 = vrot.lane.b32.xlu1 %v4118_v55, %s6974_s28 }
 0x6ff   : > { %3284 = vrot.lane.b32.xlu0 %v4127_v57, %s6971_s9  ;;  %3027 = vrot.lane.b32.xlu1 %v4118_v55, %s6982_s19 }
 0x703   : > { %3335 = vrot.lane.b32.xlu0 %v4127_v57, %s6978_s12  ;;  %3078 = vrot.lane.b32.xlu1 %v4118_v55, %s6972_s10  ;;  %s3859_s12 = scalar_lea.sflag [#allocation5], %s5900_s7 }
 0x707   : > { %3386 = vrot.lane.b32.xlu0 %v4127_v57, %s6974_s28  ;;  %3185 = vrot.lane.b32.xlu1 %v3178_v1, %s6957_s14  ;;  %s7013_s28 = sld [smem:[#allocation44_spill]] }
 0x70b   : > { %3436 = vrot.lane.b32.xlu0 %v4127_v57, %s6982_s19  ;;  %3236 = vrot.lane.b32.xlu1 %v3232_v48, %s6959_s29 }
 0x70f   : > { %3486 = vrot.lane.b32.xlu0 %v4127_v57, %s6972_s10  ;;  %3287 = vrot.lane.b32.xlu1 %v3283_v7, %s6960_s6  ;;  %s4145_s6 = sshll.u32 %s5571_s23, 7  ;;  %s5489_s23 = smov [#allocation20]  }
 0x710   : > { %s5349_s3 = sshll.u32 %s5489_s23, 4  ;;  %s5350_s3 = int_to_ptr.vmem [resolvable:$false] %s5349_s3 }
 0x711   : > { %s5351_s16 = scalar_lea.vmem %s5350_s3, 256 }
 0x713   : > { %3593 = vrot.lane.b32.xlu0 %v3586_v27, %s6968_s24  ;;  %3338 = vrot.lane.b32.xlu1 %v3334_v20, %s6963_s13  ;;  %s4076_s13 = sshll.u32 %s5900_s7, 3 }
 0x717   : > { %3644 = vrot.lane.b32.xlu0 %v3640_v25, %s6969_s26  ;;  %3389 = vrot.lane.b32.xlu1 %v3385_v32, %s6965_s4  ;;  %s550_s4 = scalar_lea.vmem [#allocation20], %s4076_s13 }
 0x71b   : > { %3438 = vrot.lane.b32.xlu1 %v6454_v15, %s6970_s8 }
 0x71d   : > { %v2267_v31 = vpop.permute.xlu1 %2266  ;;  %v2373_v38 = vpop.permute.xlu0 %2372 }
 0x71e   : > { %v2268_v63 = vsel %vm6998_vm6, %v2265_v59, %v2267_v31 }
 0x71f   : > { %3489 = vrot.lane.b32.xlu1 %v3485_v34, %s6966_s1  ;;  %4425 = vmatpush3.bf16.msra.mxu1 %v2268_v63 }
 0x720   : > { %4430 = vmatprep.subr.bf16.mxu1 %v5459_v40 }
 0x721   : > { %v2261_v33 = vpop.permute.xlu1 %2260  ;;  %v2427_v51 = vpop.permute.xlu0 %2426 }
 0x722   : > { %4427 = vmatmul.mubr.msk.bf16.vlgmr.msra.gmra.mrb[0].mxu1 %vm622_vm15, %v2261_v33 }
 0x723   : > { %3539 = vrot.lane.b32.xlu1 %v3536_v35, %s6967_s0  ;;  %4432 = vmatprep.mubr.msk.bf16.mxu1 %vm5461_vm11, %v5459_v40 }
 0x725   : > { %v2316_v44 = vpop.permute.xlu1 %2315  ;;  %v2423_v54 = vpop.permute.xlu0 %2422 }
 0x727   : > { %3590 = vrot.lane.b32.xlu1 %v4136_v4, %s6970_s8  ;;  %s3872_s8 = sshll.u32 %s550_s4, 4  ;;  %s6752_s8 = int_to_ptr.vmem [resolvable:$true] %s3872_s8 }
 0x728   : > { %s5345_s27 = scalar_lea.vmem %s6752_s8, 128  ;;  %p5352_p3 = scmp.lt.s32.totalorder %s6752_s8, %s5350_s3 }
 0x729   : > { %v2318_v39 = vpop.permute.xlu1 %2317  ;;  %v2483_v58 = vpop.permute.xlu0 %2482  ;;  %p5346_p13 = scmp.ne.s32.totalorder %s6752_s8, %s5345_s27  ;;  %p5353_p5 = scmp.lt.s32.totalorder %s5351_s16, %s5345_s27 }
 0x72a   : > { %v2319_v37 = vsel %vm7000_vm8, %v2316_v44, %v2318_v39 }
 0x72b   : > { %4431 = vmatpush3.bf16.msra.mxu1 %v2319_v37  ;;  %3641 = vrot.lane.b32.xlu1 %v4136_v4, %s6975_s15  ;;  %s6750_s15 = scalar_lea.hbm %s7013_s28, %s4145_s6  ;;  %p5347_p8 = pnand %p5346_p13, %p7015_p11 }
 0x72c   : > { %4436 = vmatprep.subr.bf16.mxu1 %v5459_v40  ;;  %p5354_p6 = por %p5353_p5, %p5352_p3 }
 0x72d   : > { %v2371_v43 = vpop.permute.xlu1 %2370  ;;  %v2537_v62 = vpop.permute.xlu0 %2536  ;;  %p5348_p0 = pneg %p5347_p8 }
 0x72e   : > { %v2374_v45 = vsel %vm7001_vm9, %v2371_v43, %v2373_v38  ;;  %4433 = vmatmul.mubr.msk.bf16.vlgmr.msra.gmra.mrb[0].mxu1 %vm622_vm15, %v6452_v14 }
 0x72f   : > { %4437 = vmatpush3.bf16.msra.mxu1 %v2374_v45  ;;  %4438 = vmatprep.mubr.msk.bf16.mxu1 %vm5461_vm11, %v5459_v40  ;;  %p5355_p7 = pnand %p5354_p6, %p5348_p0 }
 0x730   : > { %4442 = vmatprep.subr.bf16.mxu1 %v5459_v40 }
 0x731   : > { %v2367_v53 = vpop.permute.xlu1 %2366  ;;  %v2533_v23 = vpop.permute.xlu0 %2532 }
 0x735   : > { %v2429_v50 = vpop.permute.xlu1 %2428  ;;  %v2595_v6 = vpop.permute.xlu0 %2594 }
 0x736   : > { %v2430_v52 = vsel %vm7002_vm3, %v2427_v51, %v2429_v50 }
 0x739   : > { %v2481_v56 = vpop.permute.xlu1 %2480  ;;  %v2649_v12 = vpop.permute.xlu0 %2648 }
 0x73a   : > { %4439 = vmatmul.mubr.msk.bf16.vlgmr.msra.gmra.mrb[0].mxu1 %vm622_vm15, %v2367_v53  ;;  %v2484_v22 = vsel %vm622_vm15, %v2481_v56, %v2483_v58  ;;  %v3744_v56 = vld [vmem:[%s5924_s22 + $0x8] sm:$0xff]  ;;  %v3745_v58 = vld [vmem:[%s5924_s22 + $0x10] sm:$0xff] }
 0x73b   : > { %4443 = vmatpush3.bf16.msra.mxu1 %v2430_v52  ;;  %4444 = vmatprep.mubr.msk.bf16.mxu1 %vm5461_vm11, %v5459_v40 }
 0x73c   : > { %4448 = vmatprep.subr.bf16.mxu1 %v5459_v40 }
 0x73d   : > { %v2477_v19 = vpop.permute.xlu1 %2476  ;;  %v2645_v17 = vpop.permute.xlu0 %2644 }
 0x741   : > { %v2539_v60 = vpop.permute.xlu1 %2538  ;;  %v2706_v16 = vpop.permute.xlu0 %2705 }
 0x742   : > { %v2540_v3 = vsel %vm7003_vm10, %v2537_v62, %v2539_v60  ;;  %v4140_v60 = vmul.f32 -1.442695, %v3744_v56  ;;  %v3746_v62 = vld [vmem:[%s5924_s22 + $0x18] sm:$0xff] }
 0x745   : > { %v2593_v5 = vpop.permute.xlu1 %2592  ;;  %v2765_v47 = vpop.permute.xlu0 %2764 }
 0x746   : > { %4445 = vmatmul.mubr.msk.bf16.vlgmr.msra.gmra.mrb[0].mxu1 %vm622_vm15, %v2423_v54  ;;  %v2596_v9 = vsel %vm7004_vm12, %v2593_v5, %v2595_v6  ;;  %v3743_v54 = vld [vmem:[%s5924_s22] sm:$0xff] }
 0x747   : > { %4449 = vmatpush3.bf16.msra.mxu1 %v2484_v22  ;;  %4450 = vmatprep.mubr.msk.bf16.mxu1 %vm5461_vm11, %v5459_v40  ;;  %v5488_v22 = vmov 0.0|0.0  }
 0x748   : > { %4454 = vmatprep.subr.bf16.mxu1 %v5459_v40  ;;  %4597 = vmatprep.subr.bf16.mxu0 %v5488_v22 }
 0x749   : > { %v2589_v10 = vpop.permute.xlu1 %2588  ;;  %v2819_v24 = vpop.permute.xlu0 %2818 }
 0x74d   : > { %v2651_v11 = vpop.permute.xlu1 %2650 }
 0x74e   : > { %v2652_v14 = vsel %vm7005_vm13, %v2649_v12, %v2651_v11 }
 0x751   : > { %v2704_v18 = vpop.permute.xlu1 %2703 }
 0x752   : > { %4451 = vmatmul.mubr.msk.bf16.vlgmr.msra.gmra.mrb[0].mxu1 %vm622_vm15, %v2477_v19  ;;  %v2707_v42 = vsel %vm7006_vm14, %v2704_v18, %v2706_v16  ;;  %v4139_v19 = vmul.f32 -1.442695, %v3743_v54 }
 0x753   : > { %4455 = vmatpush3.bf16.msra.mxu1 %v2540_v3  ;;  %4456 = vmatprep.mubr.msk.bf16.mxu1 %vm5461_vm11, %v5459_v40  ;;  %v4141_v3 = vmul.f32 -1.442695, %v3745_v58 }
 0x754   : > { %4460 = vmatprep.subr.bf16.mxu1 %v5459_v40  ;;  %5014 = vpow2.f32 %v4139_v19 }
 0x755   : > { %v2763_v46 = vpop.permute.xlu1 %2762  ;;  %5016 = vpow2.f32 %v4140_v60 }
 0x756   : > { %v2766_v21 = vsel %vm7007_vm0, %v2763_v46, %v2765_v47  ;;  %5018 = vpow2.f32 %v4141_v3 }
 0x759   : > { %v2759_v61 = vpop.permute.xlu1 %2758 }
 0x75d   : > { %v2821_v49 = vpop.permute.xlu1 %2820 }
 0x75e   : > { %4457 = vmatmul.mubr.msk.bf16.vlgmr.msra.gmra.mrb[0].mxu1 %vm622_vm15, %v2533_v23  ;;  %v2822_v55 = vsel %vm7008_vm2, %v2819_v24, %v2821_v49  ;;  %v4142_v23 = vmul.f32 -1.442695, %v3746_v62  ;;  %v3775_v49 = vld [vmem:[#allocation18] sm:$0xff] }
 0x75f   : > { %4461 = vmatpush3.bf16.msra.mxu1 %v2596_v9  ;;  %4462 = vmatprep.mubr.msk.bf16.mxu1 %vm5461_vm11, %v5459_v40 }
 0x760   : > { %4466 = vmatprep.subr.bf16.mxu1 %v5459_v40  ;;  %5020 = vpow2.f32 %v4142_v23 }
 0x761   : > { %v2875_v8 = vpop.permute.xlu1 %2874 }
 0x765   : > { %v2871_v36 = vpop.permute.xlu1 %2870 }
 0x769   : > { %v2933_v28 = vpop.permute.xlu1 %2932 }
 0x76a   : > { %4463 = vmatmul.mubr.msk.bf16.vlgmr.msra.gmra.mrb[0].mxu1 %vm622_vm15, %v2589_v10 }
 0x76b   : > { %4467 = vmatpush3.bf16.msra.mxu1 %v2652_v14  ;;  %4468 = vmatprep.mubr.msk.bf16.mxu1 %vm5461_vm11, %v5459_v40 }
 0x76c   : > { %4472 = vmatprep.subr.bf16.mxu1 %v5459_v40 }
 0x76d   : > { %v2981_v1 = vpop.permute.xlu1 %2980 }
 0x771   : > { %v3028_v7 = vpop.permute.xlu1 %3027 }
 0x776   : > { %4469 = vmatmul.mubr.msk.bf16.vlgmr.msra.gmra.mrb[0].mxu1 %vm622_vm15, %v2645_v17 }
 0x777   : > { %4473 = vmatpush3.bf16.msra.mxu1 %v2707_v42  ;;  %4474 = vmatprep.mubr.msk.bf16.mxu1 %vm5461_vm11, %v5459_v40 }
 0x778   : > { %4478 = vmatprep.subr.bf16.mxu1 %v5459_v40 }
 0x782   : > { %4475 = vmatmul.mubr.msk.bf16.vlgmr.msra.gmra.mrb[0].mxu1 %vm622_vm15, %v6511_v29  ;;  %v2815_v29 = vpop.permute.xlu0 %2814 }
 0x783   : > { %4479 = vmatpush3.bf16.msra.mxu1 %v2766_v21  ;;  %4480 = vmatprep.mubr.msk.bf16.mxu1 %vm5461_vm11, %v5459_v40 }
 0x784   : > { %4484 = vmatprep.subr.bf16.mxu1 %v5459_v40 }
 0x786   : > { %v2877_v13 = vpop.permute.xlu0 %2876 }
 0x787   : > { %v2878_v0 = vsel %vm7009_vm4, %v2875_v8, %v2877_v13 }
 0x78a   : > { %v2931_v26 = vpop.permute.xlu0 %2930 }
 0x78b   : > { %v2934_v57 = vsel %vm7010_vm5, %v2931_v26, %v2933_v28 }
 0x78e   : > { %4481 = vmatmul.mubr.msk.bf16.vlgmr.msra.gmra.mrb[0].mxu1 %vm622_vm15, %v2759_v61  ;;  %v2927_v2 = vpop.permute.xlu0 %2926 }
 0x78f   : > { %4485 = vmatpush3.bf16.msra.mxu1 %v2822_v55  ;;  %4486 = vmatprep.mubr.msk.bf16.mxu1 %vm5461_vm11, %v5459_v40 }
 0x790   : > { %4490 = vmatprep.subr.bf16.mxu1 %v5459_v40 }
 0x792   : > { %v3031_v48 = vpop.permute.xlu0 %3030 }
 0x796   : > { %v3082_v27 = vpop.permute.xlu0 %3081 }
 0x79a   : > { %4487 = vmatmul.mubr.msk.bf16.vlgmr.msra.gmra.mrb[0].mxu1 %vm622_vm15, %v2815_v29  ;;  %v3132_v20 = vpop.permute.xlu0 %3131 }
 0x79b   : > { %4491 = vmatpush3.bf16.msra.mxu1 %v2878_v0  ;;  %4492 = vmatprep.mubr.msk.bf16.mxu1 %vm5461_vm11, %v5459_v40 }
 0x79c   : > { %4496 = vmatprep.subr.bf16.mxu1 %v5459_v40 }
 0x79e   : > { %v3183_v32 = vpop.permute.xlu0 %3182 }
 0x7a2   : > { %v3234_v31 = vpop.permute.xlu0 %3233 }
 0x7a6   : > { %4493 = vmatmul.mubr.msk.bf16.vlgmr.msra.gmra.mrb[0].mxu1 %vm622_vm15, %v2871_v36 }
 0x7a7   : > { %4497 = vmatpush3.bf16.msra.mxu1 %v2934_v57  ;;  %4498 = vmatprep.mubr.msk.bf16.mxu1 %vm5461_vm11, %v5459_v40 }
 0x7a8   : > { %4502 = vmatprep.subr.bf16.mxu1 %v5459_v40 }
 0x7b2   : > { %4499 = vmatmul.mubr.msk.bf16.vlgmr.msra.gmra.mrb[0].mxu1 %vm622_vm15, %v2927_v2 }
 0x7b3   : > { %4503 = vmatpush3.bf16.msra.mxu1 %v6454_v15  ;;  %4504 = vmatprep.mubr.msk.bf16.mxu1 %vm5461_vm11, %v5459_v40  ;;  %v3079_v15 = vpop.permute.xlu1 %3078 }
 0x7b4   : > { %4508 = vmatprep.subr.bf16.mxu1 %v5459_v40 }
 0x7b7   : > { %v3186_v25 = vpop.permute.xlu1 %3185 }
 0x7bb   : > { %v3237_v59 = vpop.permute.xlu1 %3236 }
 0x7be   : > { %4505 = vmatmul.mubr.msk.bf16.vlgmr.msra.gmra.mrb[0].mxu1 %vm622_vm15, %v2981_v1 }
 0x7bf   : > { %4509 = vmatpush3.bf16.msra.mxu1 %v3031_v48  ;;  %4510 = vmatprep.mubr.msk.bf16.mxu1 %vm5461_vm11, %v5459_v40  ;;  %v3288_v34 = vpop.permute.xlu1 %3287 }
 0x7c0   : > { %4514 = vmatprep.subr.bf16.mxu1 %v5459_v40 }
 0x7c3   : > { %v3339_v63 = vpop.permute.xlu1 %3338 }
 0x7c7   : > { %v3390_v35 = vpop.permute.xlu1 %3389 }
 0x7ca   : > { %4511 = vmatmul.mubr.msk.bf16.vlgmr.msra.gmra.mrb[0].mxu1 %vm622_vm15, %v3028_v7 }
 0x7cb   : > { %4515 = vmatpush3.bf16.msra.mxu1 %v3082_v27  ;;  %4516 = vmatprep.mubr.msk.bf16.mxu1 %vm5461_vm11, %v5459_v40  ;;  %v3439_v39 = vpop.permute.xlu1 %3438 }
 0x7cc   : > { %4520 = vmatprep.subr.bf16.mxu1 %v5459_v40 }
 0x7cf   : > { %v3490_v38 = vpop.permute.xlu1 %3489 }
 0x7d3   : > { %v3540_v45 = vpop.permute.xlu1 %3539 }
 0x7d6   : > { %4517 = vmatmul.mubr.msk.bf16.vlgmr.msra.gmra.mrb[0].mxu1 %vm622_vm15, %v3079_v15 }
 0x7d7   : > { %4521 = vmatpush3.bf16.msra.mxu1 %v3132_v20  ;;  %4522 = vmatprep.mubr.msk.bf16.mxu1 %vm5461_vm11, %v5459_v40  ;;  %v3591_v50 = vpop.permute.xlu1 %3590 }
 0x7d8   : > { %4526 = vmatprep.subr.bf16.mxu1 %v5459_v40 }
 0x7db   : > { %v3642_v52 = vpop.permute.xlu1 %3641 }
 0x7e2   : > { %4523 = vmatmul.mubr.msk.bf16.vlgmr.msra.gmra.mrb[0].mxu1 %vm622_vm15, %v6549_v30  ;;  %v3285_v30 = vpop.permute.xlu0 %3284 }
 0x7e3   : > { %4527 = vmatpush3.bf16.msra.mxu1 %v3186_v25  ;;  %4528 = vmatprep.mubr.msk.bf16.mxu1 %vm5461_vm11, %v5459_v40 }
 0x7e4   : > { %4532 = vmatprep.subr.bf16.mxu1 %v5459_v40 }
 0x7e6   : > { %v3336_v33 = vpop.permute.xlu0 %3335 }
 0x7ea   : > { %v3387_v44 = vpop.permute.xlu0 %3386 }
 0x7ee   : > { %4529 = vmatmul.mubr.msk.bf16.vlgmr.msra.gmra.mrb[0].mxu1 %vm622_vm15, %v3183_v32  ;;  %v3437_v37 = vpop.permute.xlu0 %3436 }
 0x7ef   : > { %4533 = vmatpush3.bf16.msra.mxu1 %v3237_v59  ;;  %4534 = vmatprep.mubr.msk.bf16.mxu1 %vm5461_vm11, %v5459_v40 }
 0x7f0   : > { %4538 = vmatprep.subr.bf16.mxu1 %v5459_v40 }
 0x7f2   : > { %v3487_v43 = vpop.permute.xlu0 %3486 }
 0x7f6   : > { %v3594_v53 = vpop.permute.xlu0 %3593 }
 0x7fa   : > { %4535 = vmatmul.mubr.msk.bf16.vlgmr.msra.gmra.mrb[0].mxu1 %vm622_vm15, %v3234_v31  ;;  %v3645_v51 = vpop.permute.xlu0 %3644 }
 0x7fb   : > { %4539 = vmatpush3.bf16.msra.mxu1 %v3288_v34  ;;  %4540 = vmatprep.mubr.msk.bf16.mxu1 %vm5461_vm11, %v5459_v40 }
 0x7fc   : > { %4544 = vmatprep.subr.bf16.mxu1 %v5459_v40 }
 0x806   : > { %4541 = vmatmul.mubr.msk.bf16.vlgmr.msra.gmra.mrb[0].mxu1 %vm622_vm15, %v3285_v30 }
 0x807   : > { %4545 = vmatpush3.bf16.msra.mxu1 %v3339_v63  ;;  %4546 = vmatprep.mubr.msk.bf16.mxu1 %vm5461_vm11, %v5459_v40 }
 0x808   : > { %4550 = vmatprep.subr.bf16.mxu1 %v5459_v40 }
 0x812   : > { %4547 = vmatmul.mubr.msk.bf16.vlgmr.msra.gmra.mrb[0].mxu1 %vm622_vm15, %v3336_v33 }
 0x813   : > { %4551 = vmatpush3.bf16.msra.mxu1 %v3390_v35  ;;  %4552 = vmatprep.mubr.msk.bf16.mxu1 %vm5461_vm11, %v5459_v40  ;;  %v3720_v35 = vld [vmem:[#allocation14] sm:$0xff] }
 0x814   : > { %4556 = vmatprep.subr.bf16.mxu1 %v5459_v40 }
 0x81e   : > { %4553 = vmatmul.mubr.msk.bf16.vlgmr.msra.gmra.mrb[0].mxu1 %vm622_vm15, %v3387_v44 }
 0x81f   : > { %4557 = vmatpush3.bf16.msra.mxu1 %v3439_v39  ;;  %4558 = vmatprep.mubr.msk.bf16.mxu1 %vm5461_vm11, %v5459_v40  ;;  %v3776_v39 = vld [vmem:[#allocation19] sm:$0xff] }
 0x820   : > { %4562 = vmatprep.subr.bf16.mxu1 %v5459_v40 }
 0x82a   : > { %4559 = vmatmul.mubr.msk.bf16.vlgmr.msra.gmra.mrb[0].mxu1 %vm622_vm15, %v3437_v37 }
 0x82b   : > { %4563 = vmatpush3.bf16.msra.mxu1 %v3490_v38  ;;  %4564 = vmatprep.mubr.msk.bf16.mxu1 %vm5461_vm11, %v5459_v40 }
 0x82c   : > { %4568 = vmatprep.subr.bf16.mxu1 %v5459_v40 }
 0x836   : > { %4565 = vmatmul.mubr.msk.bf16.vlgmr.msra.gmra.mrb[0].mxu1 %vm622_vm15, %v3487_v43  ;;  %v3727_v43 = vld [vmem:[#allocation15] sm:$0xff] }
 0x837   : > { %4569 = vmatpush3.bf16.msra.mxu1 %v3540_v45  ;;  %4570 = vmatprep.mubr.msk.bf16.mxu1 %vm5461_vm11, %v5459_v40 }
 0x838   : > { %4574 = vmatprep.subr.bf16.mxu1 %v5459_v40 }
 0x842   : > { %4571 = vmatmul.mubr.msk.bf16.vlgmr.msra.gmra.mrb[0].mxu1 %vm622_vm15, %v6638_v41  ;;  %v5015_v41 = vpop.eup %5014 }
 0x843   : > { %4575 = vmatpush3.bf16.msra.mxu1 %v3594_v53  ;;  %4576 = vmatprep.mubr.msk.bf16.mxu1 %vm5461_vm11, %v5459_v40  ;;  %v5017_v4 = vpop.eup %5016 }
 0x844   : > { %4580 = vmatprep.subr.bf16.mxu1 %v5459_v40  ;;  %v5019_v5 = vpop.eup %5018  ;;  %v3760_v6 = vadd.f32 1.0, %v5017_v4 }
 0x845   : > { %v5021_v9 = vpop.eup %5020  ;;  %v3761_v10 = vadd.f32 1.0, %v5019_v5 }
 0x846   : > { %v3762_v11 = vadd.f32 1.0, %v5021_v9 }
 0x84e   : > { %4577 = vmatmul.mubr.msk.bf16.vlgmr.msra.gmra.mrb[0].mxu1 %vm622_vm15, %v3591_v50 }
 0x84f   : > { %4581 = vmatpush3.bf16.msra.mxu1 %v3645_v51  ;;  %4582 = vmatprep.mubr.msk.bf16.mxu1 %vm5461_vm11, %v5459_v40  ;;  %v3759_v40 = vadd.f32 1.0, %v5015_v41  ;;  %vm3777_vm11 = vcmask 261120  }
 0x851   : > { %5022 = vrcp.f32 %v3759_v40 }
 0x852   : > { %5024 = vrcp.f32 %v3760_v6 }
 0x853   : > { %5026 = vrcp.f32 %v3761_v10 }
 0x854   : > { %5028 = vrcp.f32 %v3762_v11 }
 0x85a   : > { %4583 = vmatmul.mubr.msk.bf16.vlgmr.msra.gmra.mrb[0].mxu1 %vm622_vm15, %v3642_v52  ;;  %vm7011_vm15 = vcmask 523264  }
 0x85b   : > { %v5023_v12 = vpop.eup %5022  ;;  %vm7012_vm1 = vmmov %vm7011_vm15 }
 0x85c   : > { %v5025_v14 = vpop.eup %5024  ;;  %v3771_v17 = vmul.f32 %v5023_v12, %v3743_v54  ;;  %vm7014_vm6 = vmmov %vm7012_vm1 }
 0x85d   : > { %v5027_v18 = vpop.eup %5026  ;;  %v3772_v16 = vmul.f32 %v5025_v14, %v3744_v56 }
 0x85e   : > { %v5029_v42 = vpop.eup %5028  ;;  %v3773_v46 = vmul.f32 %v5027_v18, %v3745_v58 }
 0x85f   : > { %v4598_v47 = vpack.c.bf16 %v3772_v16, %v3771_v17  ;;  %v3774_v21 = vmul.f32 %v5029_v42, %v3746_v62 }
 0x861   : > { %4599 = vmatpush3.bf16.msra.mxu0 %v4598_v47  ;;  %v4601_v61 = vpack.c.bf16 %v3774_v21, %v3773_v46 }
 0x862   : > { %4600 = vmatprep.subr.bf16.mxu0 %v5488_v22 }
 0x865   : > { %4602 = vmatpush3.bf16.msra.mxu0 %v4601_v61 }
 0x868   : > { %4595 = vmatmul.mubr.msk.f32.vlgmr.msra.gmra.mrb[4].mxu0 %vm3777_vm11, %v3775_v49 }
 0x92d   : > { %v3684_v24 = vpop.f32.mrb[0].mxu1 }
 0x92e   : > { %v3701_v55 = vmul.f32 %v3684_v24, %v3684_v24  ;;  %v4584_v29 = vpop.f32.mrb[1].mxu1  ;;  %v3691_v8 = vsel %vm7011_vm15, %v3684_v24, 0.0 }
 0x92f   : > { %3692 = vadd.xlane.f32.xlu0 %v3691_v8  ;;  %v3687_v13 = vpop.f32.mrb[2].mxu1 }
 0x930   : > { %v4585_v0 = vpop.f32.mrb[3].mxu1  ;;  %v3702_v36 = vsel %vm7012_vm1, %v3701_v55, 0.0 }
 0x931   : > { %3703 = vadd.xlane.f32.xlu1 %v3702_v36 }
 0x93b   : > { %v3847_v31 = vpop.f32.mrb[4].mxu0 }
 0x93c   : > { %v4596_v34 = vpop.f32.mrb[5].mxu0  ;;  %v3848_v53 = vadd.f32 %v3847_v31, %v3776_v39 }
 0x9bc   : > { %v3693_v28 = vpop.xlane.xlu0 %3692 }
 0x9bd   : > { %v3694_v26 = vrot.slane %v3693_v28, 4 }
 0x9be   : > { %v3704_v57 = vpop.xlane.xlu1 %3703 }
 0x9bf   : > { %v3695_v2 = vadd.f32 %v3694_v26, %v3693_v28  ;;  %v3705_v1 = vrot.slane %v3704_v57, 4 }
 0x9c1   : > { %v3696_v48 = vrot.slane %v3695_v2, 2  ;;  %v3706_v7 = vadd.f32 %v3705_v1, %v3704_v57 }
 0x9c3   : > { %v3707_v27 = vrot.slane %v3706_v7, 2  ;;  %v3697_v15 = vadd.f32 %v3696_v48, %v3695_v2 }
 0x9c5   : > { %v3698_v20 = vrot.slane %v3697_v15, 1  ;;  %v3708_v25 = vadd.f32 %v3707_v27, %v3706_v7 }
 0x9c7   : > { %v3699_v32 = vadd.f32 %v3698_v20, %v3697_v15  ;;  %v3709_v59 = vrot.slane %v3708_v25, 1 }
 0x9c9   : > { %4817 = vpush %v3699_v32  ;;  %v3710_v30 = vadd.f32 %v3709_v59, %v3708_v25 }
 0x9cb   : > { %4819 = vpush %v3710_v30 }
 0x9fa   : > { %s4818_s19 = spop %4817 }
 0x9fb   : > { %s3714_s22 = smul.f32 0.001953125, %s4818_s19 }
 0x9fc   : > { %s4820_s14 = spop %4819 }
 0x9fd   : > { %s3718_s26 = smul.f32 %s3714_s22, %s3714_s22  ;;  %v3728_v38 = vstv %s3714_s22 }
 0x9fe   : > { %s3717_s24 = smul.f32 0.001953125, %s4820_s14 }
 0xa00   : > { %s3719_s29 = ssub.f32 %s3717_s24, %s3718_s26 }
 0xa02   : > { %s3721_s0 = sadd.f32 1e-05, %s3719_s29 }
 0xa04   : > { %v3722_v63 = vstv %s3721_s0 }
 0xa05   : > { %5030 = vrsqrt.f32 %v3722_v63 }
 0xa0f   : > { %v5031_v33 = vpop.eup %5030 }
 0xa10   : > { %4821 = vpush %v5031_v33 }
 0xa41   : > { %s4822_s1 = spop %4821 }
 0xa42   : > { %v3725_v44 = vstv %s4822_s1 }
 0xa43   : > { %v3726_v37 = vmul.f32 %v3725_v44, %v3720_v35 }
 0xa45   : > { %v3729_v45 = vmul.f32 %v3728_v38, %v3726_v37  ;;  %3733 = vperm.xlu0 %5002, %v3726_v37  }
 0xa47   : > { %v3730_v50 = vsub.f32 %v3727_v43, %v3729_v45 }
 0xa49   : > { %3739 = vperm.xlu1 %5003, %v3730_v50   ;;  %3853 = vperm.xlu0 %5002, %v3848_v53  }
 0xac4   : > { %v3734_v51 = vpop.permute.xlu0 %3733 }
 0xac5   : > { %v3736_v52 = vmul.f32 %v3734_v51, %v3684_v24 }
 0xac8   : > { %v3740_v54 = vpop.permute.xlu1 %3739  ;;  %v3854_v58 = vpop.permute.xlu0 %3853 }
 0xac9   : > { %v3742_v56 = vadd.f32 %v3740_v54, %v3736_v52 }
 0xacb   : > { %v3856_v22 = vadd.f32 %v3854_v58, %v3742_v56 }
 0xacd   : > { %3857 = vst.msk [vmem:[%s550_s4] sm:$0xff] %vm7014_vm6, %v3856_v22 }
 0xace   : > { %5358 = shalt.err (!%p5355_p7)
}
 0xacf   : > { %s5359_s7 = scalar_lea.hbm %s6750_s15, 128  ;;  %s5363_s2 = scalar_lea.hbm %s7013_s28, 256 }
 0xad0   : > { %p5360_p4 = scmp.ne.s32.totalorder %s6750_s15, %s5359_s7  ;;  %p5364_p10 = scmp.lt.u32.totalorder %s6750_s15, %s7013_s28 }
 0xad1   : > { %p5365_p12 = scmp.lt.u32.totalorder %s5363_s2, %s5359_s7  ;;  %p5367_p13 = scmp.lt.u32.totalorder %s5359_s7, %s6750_s15 }
 0xad2   : > { %p5361_p1 = pnand %p5360_p4, %p7015_p11 }
 0xad3   : > { %p5366_p2 = por %p5365_p12, %p5364_p10 }
 0xad4   : > { %p5362_p9 = pneg %p5361_p1 }
 0xad5   : > { %p5368_p8 = por %p5367_p13, %p5366_p2 }
 0xad7   : > { %p5369_p0 = pnand %p5368_p8, %p5362_p9 }
 0xad9   : > { %5372 = shalt.err (!%p5369_p0)
}
 0xada   : > { %4863 = dma.vmem_to_hbm [thread:$0]  (%p7015_p11), %s6752_s8, 128, %s6750_s15, %s3859_s12  }
 0xadb PF: > { %s3884_s14 = sand.u32 1, %s5427_s17   ;;  %p7016_p3 = scmp.ne.s32.totalorder %s6928_s30, 0 }
 0xadc   : > { %p7017_p5 = scmp.ge.s32.totalorder %s5439_s20, 2  ;;  %s3885_s26 = scalar_lea.sflag [#allocation5], %s3884_s14 }
 0xade   : > { %p4901_p6 = pnand %p7017_p5, %p7016_p3 }
 0xae0   : > { %5422 = dma.done.wait (!%p4901_p6), %s3885_s26, 128  }
 0xae1   : > { %5424 = vsyncadd (!%p4901_p6), %s3885_s26, 4294967168  ;;  %s7018_s24 = sld [smem:[#allocation30_spill]]  ;;  %s7019_s19 = sld [smem:[#allocation32_spill]] }
 0xae2   : > { %p28_p7 = scmp.ge.s32.totalorder %s5711_s11, 4   ;;  %s7020_s17 = smov %s5431_s18 }
 0xae3   : > { %s7022_s20 = smov %s5711_s11 }
 0xae4   :  { %30 = sbr.rel (!%p28_p7) target bundleno = 22 (0x16), region = 156 }
 0xae7   : > { %s7021_s18 = smov %s7018_s24 }
 0xaeb   :  { %3890 = vsyncpa [#allocation4], 1 }
 0xaec   :  { %3892 = vsyncpa [#allocation4 + $0x1], 1 }
 0xaed   :  { %3893 = vsyncpa [#allocation7], 1 }
 0xaee   :  { %3894 = vsyncpa [#allocation10], 1 }
 0xaef   :  { %3895 = vsyncpa [#allocation13], 1 }
 0xaf0   :  { %3896 = vsyncpa [#allocation16], 1 }
 0xaf1   :  { %3897 = vsyncpa [#allocation5], 1 }
 0xaf2   :  { %3899 = vsyncpa [#allocation5 + $0x1], 1 }

</bundles_post_ra>
